<compile_context>
chip_gen: v6e
topology: v6e:2x2x1
jax: 0.10.0
libtpu: 0.0.40
codegen_flags: <defaults>
</compile_context>

<pallas_src>
import jax
import jax.numpy as jnp
from jax.experimental import pallas as pl
from jax.experimental.pallas import tpu as pltpu

D_IN = 768
D_HID = 3072
N_CHUNK = 4                 # hidden dim processed in 4 chunks of 768
CH = D_HID // N_CHUNK


def _gelu_exact(x):
    # nn.GELU() default = exact erf formulation, kept in f32.
    return 0.5 * x * (1.0 + jax.lax.erf(x * 0.7071067811865476))


def mlp_kernel(x_ref, w1_ref, b1_ref, w2_ref, b2_ref, o_ref):
    # x_ref:  (TM, 768)  bf16     w1_ref: (768, 3072) bf16   b1_ref: (1, 3072) f32
    # w2_ref: (3072, 768) bf16    b2_ref: (1, 768)    f32    o_ref:  (TM, 768)
    tm = x_ref.shape[0]
    x = x_ref[...]

    # Hoisted b2 broadcast: accumulator starts at the output bias (once/step).
    acc = jnp.broadcast_to(b2_ref[...], (tm, D_IN)).astype(jnp.float32)

    # Hidden dim in statically-unrolled chunks: chunk c's GELU (VALU) overlaps
    # chunk c+/-1's matmuls (MXU).  Chunk boundaries are multiples of 768, so
    # the ref slices stay (8,128)-aligned (no hidden VMEM copies).
    # Padded rows of a partial last M-tile flow through erf on uninitialized
    # data; harmless: rows are independent and those rows are never stored.
    for c in range(N_CHUNK):
        lo, hi = c * CH, (c + 1) * CH
        h = jnp.dot(x, w1_ref[:, lo:hi], preferred_element_type=jnp.float32)
        h = _gelu_exact(h + b1_ref[:, lo:hi])                 # f32 exact erf GELU
        acc = acc + jnp.dot(h.astype(jnp.bfloat16), w2_ref[lo:hi, :],
                            preferred_element_type=jnp.float32)

    o_ref[...] = acc.astype(o_ref.dtype)


def _round_up(x, m):
    return ((x + m - 1) // m) * m


def _vmem_capacity_bytes():
    try:
        return int(pltpu.get_tpu_info().vmem_capacity_bytes)
    except Exception:
        return 64 * 1024 * 1024            # conservative: v7x per-TC VMEM


def _pick_tiling(M):
    """Token-tile TM and scoped-VMEM limit, per TPU generation."""
    vmem_cap = _vmem_capacity_bytes()
    if vmem_cap >= 100 * 1024 * 1024:      # v5e / v6e: 128 MiB VMEM
        tm_max, vmem_limit = 1024, 96 * 1024 * 1024
    else:                                  # v7x (64 MiB / TC) or unknown
        tm_max, vmem_limit = 512, 48 * 1024 * 1024

    if M <= tm_max:
        # Single tile: round up to bf16 sublane packing (16 rows per vreg).
        tm = max(16, _round_up(M, 16))
    elif M < 2 * tm_max:
        # Two roughly even tiles so the v7x megacore gets balanced work;
        # keep MXU-row alignment (multiple of 256).
        tm = max(256, _round_up(pl.cdiv(M, 2), 256))
    else:
        tm = tm_max
    return tm, vmem_limit


def mlp_forward(x, w1, b1, w2, b2):
    """x: (B, S, 768). w1: (3072, 768), b1: (3072,), w2: (768, 3072), b2: (768,)
    (PyTorch nn.Linear parameter layout)."""
    B, S, _ = x.shape
    M = B * S

    # bf16 matmul operands, f32 accumulation / bias / GELU.
    x2d = x.reshape(M, D_IN).astype(jnp.bfloat16)
    w1_t = w1.T.astype(jnp.bfloat16)          # (768, 3072)
    w2_t = w2.T.astype(jnp.bfloat16)          # (3072, 768)
    b1_2d = b1.reshape(1, D_HID).astype(jnp.float32)
    b2_2d = b2.reshape(1, D_IN).astype(jnp.float32)

    TM, vmem_limit = _pick_tiling(M)
    grid = (pl.cdiv(M, TM),)

    # Resident operands (constant index map): single-buffered so the pipeline
    # does not allocate a useless second copy (~9 MiB of bf16 weights saved).
    def _resident(shape):
        return pl.BlockSpec(shape, lambda i: (0,) * len(shape),
                            pipeline_mode=pl.Buffered(1))

    out_itemsize = jnp.dtype(x.dtype).itemsize
    cost = pl.CostEstimate(
        flops=2 * 2 * M * D_IN * D_HID,                    # two matmuls
        transcendentals=M * D_HID,                         # erf on hidden acts
        bytes_accessed=(w1_t.size * 2 + w2_t.size * 2      # bf16 weights
                        + b1_2d.size * 4 + b2_2d.size * 4  # f32 biases
                        + x2d.size * 2                     # bf16 activations in
                        + M * D_IN * out_itemsize),        # output
    )

    out = pl.pallas_call(
        mlp_kernel,
        out_shape=jax.ShapeDtypeStruct((M, D_IN), x.dtype),
        grid_spec=pltpu.PrefetchScalarGridSpec(
            num_scalar_prefetch=0,
            grid=grid,
            in_specs=[
                pl.BlockSpec((TM, D_IN), lambda i: (i, 0)),   # x tile (2-buffered)
                _resident((D_IN, D_HID)),                     # w1 (resident)
                _resident((1, D_HID)),                        # b1 (resident)
                _resident((D_HID, D_IN)),                     # w2 (resident)
                _resident((1, D_IN)),                         # b2 (resident)
            ],
            out_specs=pl.BlockSpec((TM, D_IN), lambda i: (i, 0)),
        ),
        compiler_params=pltpu.CompilerParams(
            dimension_semantics=("parallel",),
            vmem_limit_bytes=vmem_limit,
        ),
        cost_estimate=cost,
    )(x2d, w1_t, b1_2d, w2_t, b2_2d)

    return out.reshape(B, S, D_IN)


if __name__ == "__main__":
    key = jax.random.PRNGKey(0)
    k_x, k_w1, k_b1, k_w2, k_b2 = jax.random.split(key, 5)

    B, S = 2, 8  # small token count; hidden dims fixed by module (768 -> 3072 -> 768)
    x = jax.random.normal(k_x, (B, S, D_IN), dtype=jnp.float32)

    # Deterministic synthetic parameters (PyTorch nn.Linear layout: (out, in)).
    w1 = jax.random.normal(k_w1, (D_HID, D_IN), dtype=jnp.float32) * 0.02
    b1 = jax.random.normal(k_b1, (D_HID,), dtype=jnp.float32) * 0.02
    w2 = jax.random.normal(k_w2, (D_IN, D_HID), dtype=jnp.float32) * 0.02
    b2 = jax.random.normal(k_b2, (D_IN,), dtype=jnp.float32) * 0.02

    out = mlp_forward(x, w1, b1, w2, b2)
    out = jax.block_until_ready(out)
    assert out.shape == (B, S, D_IN)

    # Reference 1: plain-JAX with the same bf16 matmul operands / f32 accumulate
    # (eval-mode dropout = identity) -> tight tolerance.
    xb = x.reshape(-1, D_IN).astype(jnp.bfloat16)
    h_ref = jnp.dot(xb, w1.T.astype(jnp.bfloat16),
                    preferred_element_type=jnp.float32) + b1
    h_ref = 0.5 * h_ref * (1.0 + jax.lax.erf(h_ref / jnp.sqrt(2.0)))
    y_ref = jnp.dot(h_ref.astype(jnp.bfloat16), w2.T.astype(jnp.bfloat16),
                    preferred_element_type=jnp.float32) + b2
    ref_bf16 = y_ref.reshape(B, S, D_IN)
    assert jnp.allclose(out, ref_bf16, atol=2e-3, rtol=2e-3)

    # Reference 2: full f32 reference -> loose tolerance (bf16 operand error).
    ref = jnp.einsum("bsd,hd->bsh", x, w1) + b1
    ref = 0.5 * ref * (1.0 + jax.lax.erf(ref / jnp.sqrt(2.0)))
    ref = jnp.einsum("bsh,dh->bsd", ref, w2) + b2
    assert jnp.allclose(out, ref, atol=5e-2, rtol=5e-2)

    print("KERNEL_OK")
</pallas_src>

<mosaic_0001>
module attributes {stable_mosaic.version = 11 : i64} {
  func.func @mlp_kernel(%arg0: i32, %arg1: memref<16x768xbf16, #tpu.memory_space<vmem>>, %arg2: memref<768x3072xbf16, #tpu.memory_space<vmem>>, %arg3: memref<1x3072xf32, #tpu.memory_space<vmem>>, %arg4: memref<3072x768xbf16, #tpu.memory_space<vmem>>, %arg5: memref<1x768xf32, #tpu.memory_space<vmem>>, %arg6: memref<16x768xf32, #tpu.memory_space<vmem>>) attributes {dimension_semantics = [#tpu.dimension_semantics<parallel>], iteration_bounds = array<i64: 1>, scalar_prefetch = 0 : i64, scratch_operands = 0 : i64, tpu.core_type = #tpu.core_type<tc>, window_params = [{transform_indices = @transform_0, window_bounds = array<i64: 16, 768>}, {pipeline_mode = #tpu.pipeline_mode<synchronous>, transform_indices = @transform_1, window_bounds = array<i64: 768, 3072>}, {pipeline_mode = #tpu.pipeline_mode<synchronous>, transform_indices = @transform_2, window_bounds = array<i64: 1, 3072>}, {pipeline_mode = #tpu.pipeline_mode<synchronous>, transform_indices = @transform_3, window_bounds = array<i64: 3072, 768>}, {pipeline_mode = #tpu.pipeline_mode<synchronous>, transform_indices = @transform_4, window_bounds = array<i64: 1, 768>}, {transform_indices = @transform_5, window_bounds = array<i64: 16, 768>}]} {
    %c0 = arith.constant 0 : index
    %c0_0 = arith.constant 0 : index
    %0 = vector.load %arg1[%c0, %c0_0] : memref<16x768xbf16, #tpu.memory_space<vmem>>, vector<16x768xbf16>
    %c0_1 = arith.constant 0 : index
    %c0_2 = arith.constant 0 : index
    %1 = vector.load %arg5[%c0_1, %c0_2] : memref<1x768xf32, #tpu.memory_space<vmem>>, vector<1x768xf32>
    %2 = vector.shape_cast %1 : vector<1x768xf32> to vector<1x768xf32>
    %3 = vector.broadcast %2 : vector<1x768xf32> to vector<16x768xf32>
    %c0_3 = arith.constant 0 : index
    %c0_4 = arith.constant 0 : index
    %4 = vector.load %arg2[%c0_3, %c0_4] : memref<768x3072xbf16, #tpu.memory_space<vmem>>, vector<768x768xbf16>
    %cst = arith.constant dense<0.000000e+00> : vector<16x768xf32>
    %5 = tpu.matmul %0, %4, %cst {dimension_numbers = #tpu.dot_dimension_numbers<[1], [0], [0], [1], [0, 0, 1, 1], [], []>} : vector<16x768xbf16>, vector<768x768xbf16>, vector<16x768xf32> -> vector<16x768xf32>
    %c0_5 = arith.constant 0 : index
    %c0_6 = arith.constant 0 : index
    %6 = vector.load %arg3[%c0_5, %c0_6] : memref<1x3072xf32, #tpu.memory_space<vmem>>, vector<1x768xf32>
    %7 = vector.broadcast %6 : vector<1x768xf32> to vector<16x768xf32>
    %8 = arith.addf %5, %7 : vector<16x768xf32>
    %cst_7 = arith.constant 5.000000e-01 : f32
    %9 = vector.broadcast %cst_7 : f32 to vector<16x768xf32>
    %10 = arith.mulf %9, %8 : vector<16x768xf32>
    %cst_8 = arith.constant 0.707106769 : f32
    %11 = vector.broadcast %cst_8 : f32 to vector<16x768xf32>
    %12 = arith.mulf %8, %11 : vector<16x768xf32>
    %13 = math.erf %12 : vector<16x768xf32>
    %cst_9 = arith.constant 1.000000e+00 : f32
    %14 = vector.broadcast %cst_9 : f32 to vector<16x768xf32>
    %15 = arith.addf %14, %13 : vector<16x768xf32>
    %16 = arith.mulf %10, %15 : vector<16x768xf32>
    %17 = arith.truncf %16 : vector<16x768xf32> to vector<16x768xbf16>
    %c0_10 = arith.constant 0 : index
    %c0_11 = arith.constant 0 : index
    %18 = vector.load %arg4[%c0_10, %c0_11] : memref<3072x768xbf16, #tpu.memory_space<vmem>>, vector<768x768xbf16>
    %cst_12 = arith.constant dense<0.000000e+00> : vector<16x768xf32>
    %19 = tpu.matmul %17, %18, %cst_12 {dimension_numbers = #tpu.dot_dimension_numbers<[1], [0], [0], [1], [0, 0, 1, 1], [], []>} : vector<16x768xbf16>, vector<768x768xbf16>, vector<16x768xf32> -> vector<16x768xf32>
    %20 = arith.addf %3, %19 : vector<16x768xf32>
    %c0_13 = arith.constant 0 : index
    %c768 = arith.constant 768 : index
    %21 = vector.load %arg2[%c0_13, %c768] : memref<768x3072xbf16, #tpu.memory_space<vmem>>, vector<768x768xbf16>
    %cst_14 = arith.constant dense<0.000000e+00> : vector<16x768xf32>
    %22 = tpu.matmul %0, %21, %cst_14 {dimension_numbers = #tpu.dot_dimension_numbers<[1], [0], [0], [1], [0, 0, 1, 1], [], []>} : vector<16x768xbf16>, vector<768x768xbf16>, vector<16x768xf32> -> vector<16x768xf32>
    %c0_15 = arith.constant 0 : index
    %c768_16 = arith.constant 768 : index
    %23 = vector.load %arg3[%c0_15, %c768_16] : memref<1x3072xf32, #tpu.memory_space<vmem>>, vector<1x768xf32>
    %24 = vector.broadcast %23 : vector<1x768xf32> to vector<16x768xf32>
    %25 = arith.addf %22, %24 : vector<16x768xf32>
    %cst_17 = arith.constant 5.000000e-01 : f32
    %26 = vector.broadcast %cst_17 : f32 to vector<16x768xf32>
    %27 = arith.mulf %26, %25 : vector<16x768xf32>
    %cst_18 = arith.constant 0.707106769 : f32
    %28 = vector.broadcast %cst_18 : f32 to vector<16x768xf32>
    %29 = arith.mulf %25, %28 : vector<16x768xf32>
    %30 = math.erf %29 : vector<16x768xf32>
    %cst_19 = arith.constant 1.000000e+00 : f32
    %31 = vector.broadcast %cst_19 : f32 to vector<16x768xf32>
    %32 = arith.addf %31, %30 : vector<16x768xf32>
    %33 = arith.mulf %27, %32 : vector<16x768xf32>
    %34 = arith.truncf %33 : vector<16x768xf32> to vector<16x768xbf16>
    %c768_20 = arith.constant 768 : index
    %c0_21 = arith.constant 0 : index
    %35 = vector.load %arg4[%c768_20, %c0_21] : memref<3072x768xbf16, #tpu.memory_space<vmem>>, vector<768x768xbf16>
    %cst_22 = arith.constant dense<0.000000e+00> : vector<16x768xf32>
    %36 = tpu.matmul %34, %35, %cst_22 {dimension_numbers = #tpu.dot_dimension_numbers<[1], [0], [0], [1], [0, 0, 1, 1], [], []>} : vector<16x768xbf16>, vector<768x768xbf16>, vector<16x768xf32> -> vector<16x768xf32>
    %37 = arith.addf %20, %36 : vector<16x768xf32>
    %c0_23 = arith.constant 0 : index
    %c1536 = arith.constant 1536 : index
    %38 = vector.load %arg2[%c0_23, %c1536] : memref<768x3072xbf16, #tpu.memory_space<vmem>>, vector<768x768xbf16>
    %cst_24 = arith.constant dense<0.000000e+00> : vector<16x768xf32>
    %39 = tpu.matmul %0, %38, %cst_24 {dimension_numbers = #tpu.dot_dimension_numbers<[1], [0], [0], [1], [0, 0, 1, 1], [], []>} : vector<16x768xbf16>, vector<768x768xbf16>, vector<16x768xf32> -> vector<16x768xf32>
    %c0_25 = arith.constant 0 : index
    %c1536_26 = arith.constant 1536 : index
    %40 = vector.load %arg3[%c0_25, %c1536_26] : memref<1x3072xf32, #tpu.memory_space<vmem>>, vector<1x768xf32>
    %41 = vector.broadcast %40 : vector<1x768xf32> to vector<16x768xf32>
    %42 = arith.addf %39, %41 : vector<16x768xf32>
    %cst_27 = arith.constant 5.000000e-01 : f32
    %43 = vector.broadcast %cst_27 : f32 to vector<16x768xf32>
    %44 = arith.mulf %43, %42 : vector<16x768xf32>
    %cst_28 = arith.constant 0.707106769 : f32
    %45 = vector.broadcast %cst_28 : f32 to vector<16x768xf32>
    %46 = arith.mulf %42, %45 : vector<16x768xf32>
    %47 = math.erf %46 : vector<16x768xf32>
    %cst_29 = arith.constant 1.000000e+00 : f32
    %48 = vector.broadcast %cst_29 : f32 to vector<16x768xf32>
    %49 = arith.addf %48, %47 : vector<16x768xf32>
    %50 = arith.mulf %44, %49 : vector<16x768xf32>
    %51 = arith.truncf %50 : vector<16x768xf32> to vector<16x768xbf16>
    %c1536_30 = arith.constant 1536 : index
    %c0_31 = arith.constant 0 : index
    %52 = vector.load %arg4[%c1536_30, %c0_31] : memref<3072x768xbf16, #tpu.memory_space<vmem>>, vector<768x768xbf16>
    %cst_32 = arith.constant dense<0.000000e+00> : vector<16x768xf32>
    %53 = tpu.matmul %51, %52, %cst_32 {dimension_numbers = #tpu.dot_dimension_numbers<[1], [0], [0], [1], [0, 0, 1, 1], [], []>} : vector<16x768xbf16>, vector<768x768xbf16>, vector<16x768xf32> -> vector<16x768xf32>
    %54 = arith.addf %37, %53 : vector<16x768xf32>
    %c0_33 = arith.constant 0 : index
    %c2304 = arith.constant 2304 : index
    %55 = vector.load %arg2[%c0_33, %c2304] : memref<768x3072xbf16, #tpu.memory_space<vmem>>, vector<768x768xbf16>
    %cst_34 = arith.constant dense<0.000000e+00> : vector<16x768xf32>
    %56 = tpu.matmul %0, %55, %cst_34 {dimension_numbers = #tpu.dot_dimension_numbers<[1], [0], [0], [1], [0, 0, 1, 1], [], []>} : vector<16x768xbf16>, vector<768x768xbf16>, vector<16x768xf32> -> vector<16x768xf32>
    %c0_35 = arith.constant 0 : index
    %c2304_36 = arith.constant 2304 : index
    %57 = vector.load %arg3[%c0_35, %c2304_36] : memref<1x3072xf32, #tpu.memory_space<vmem>>, vector<1x768xf32>
    %58 = vector.broadcast %57 : vector<1x768xf32> to vector<16x768xf32>
    %59 = arith.addf %56, %58 : vector<16x768xf32>
    %cst_37 = arith.constant 5.000000e-01 : f32
    %60 = vector.broadcast %cst_37 : f32 to vector<16x768xf32>
    %61 = arith.mulf %60, %59 : vector<16x768xf32>
    %cst_38 = arith.constant 0.707106769 : f32
    %62 = vector.broadcast %cst_38 : f32 to vector<16x768xf32>
    %63 = arith.mulf %59, %62 : vector<16x768xf32>
    %64 = math.erf %63 : vector<16x768xf32>
    %cst_39 = arith.constant 1.000000e+00 : f32
    %65 = vector.broadcast %cst_39 : f32 to vector<16x768xf32>
    %66 = arith.addf %65, %64 : vector<16x768xf32>
    %67 = arith.mulf %61, %66 : vector<16x768xf32>
    %68 = arith.truncf %67 : vector<16x768xf32> to vector<16x768xbf16>
    %c2304_40 = arith.constant 2304 : index
    %c0_41 = arith.constant 0 : index
    %69 = vector.load %arg4[%c2304_40, %c0_41] : memref<3072x768xbf16, #tpu.memory_space<vmem>>, vector<768x768xbf16>
    %cst_42 = arith.constant dense<0.000000e+00> : vector<16x768xf32>
    %70 = tpu.matmul %68, %69, %cst_42 {dimension_numbers = #tpu.dot_dimension_numbers<[1], [0], [0], [1], [0, 0, 1, 1], [], []>} : vector<16x768xbf16>, vector<768x768xbf16>, vector<16x768xf32> -> vector<16x768xf32>
    %71 = arith.addf %54, %70 : vector<16x768xf32>
    %c0_43 = arith.constant 0 : index
    %c0_44 = arith.constant 0 : index
    %72 = vector.load %arg6[%c0_43, %c0_44] : memref<16x768xf32, #tpu.memory_space<vmem>>, vector<16x768xf32>
    tpu.vector_store %arg6[%c0_43, %c0_44], %71 {strides = array<i32>} : memref<16x768xf32, #tpu.memory_space<vmem>>, vector<16x768xf32>,
    return
  }
  func.func @transform_0(%arg0: i32) -> (i32, i32) {
    %c0_i32 = arith.constant 0 : i32
    %c0_i32_0 = arith.constant 0 : i32
    return %arg0, %c0_i32 : i32, i32
  }
  func.func @transform_1(%arg0: i32) -> (i32, i32) {
    %c0_i32 = arith.constant 0 : i32
    %c0_i32_0 = arith.constant 0 : i32
    %c0_i32_1 = arith.constant 0 : i32
    return %c0_i32, %c0_i32_0 : i32, i32
  }
  func.func @transform_2(%arg0: i32) -> (i32, i32) {
    %c0_i32 = arith.constant 0 : i32
    %c0_i32_0 = arith.constant 0 : i32
    %c0_i32_1 = arith.constant 0 : i32
    return %c0_i32, %c0_i32_0 : i32, i32
  }
  func.func @transform_3(%arg0: i32) -> (i32, i32) {
    %c0_i32 = arith.constant 0 : i32
    %c0_i32_0 = arith.constant 0 : i32
    %c0_i32_1 = arith.constant 0 : i32
    return %c0_i32, %c0_i32_0 : i32, i32
  }
  func.func @transform_4(%arg0: i32) -> (i32, i32) {
    %c0_i32 = arith.constant 0 : i32
    %c0_i32_0 = arith.constant 0 : i32
    %c0_i32_1 = arith.constant 0 : i32
    return %c0_i32, %c0_i32_0 : i32, i32
  }
  func.func @transform_5(%arg0: i32) -> (i32, i32) {
    %c0_i32 = arith.constant 0 : i32
    %c0_i32_0 = arith.constant 0 : i32
    return %arg0, %c0_i32 : i32, i32
  }
}

</mosaic_0001>

<bundles_post_ra>
// kernel: tpu_custom_call.1
= control target key start
LH: loop header
LB: loop body
LE: loop exit
PB: predicated region body
PF: predicated region fallthrough
CT: control target
= control target key end

     0   :  { %10 = vsyncpa [#allocation3], 0  ;;  %s22498_s0 = inlined_call_operand.hbm [shape: bf16[16,768], index: 0, kind: input, shape index: {}]   ;;  %s22499_s1 = inlined_call_operand.hbm [shape: bf16[768,3072], index: 1, kind: input, shape index: {}]   ;;  %s22500_s2 = inlined_call_operand.hbm [shape: f32[1,3072], index: 2, kind: input, shape index: {}]   ;;  %s22501_s3 = inlined_call_operand.hbm [shape: bf16[3072,768], index: 3, kind: input, shape index: {}]   ;;  %s22502_s4 = inlined_call_operand.hbm [shape: f32[1,768], index: 4, kind: input, shape index: {}]   ;;  %s22503_s5 = inlined_call_operand.hbm [shape: f32[16,768], index: 5, kind: output, shape index: {}]  }
   0x1   :  { %11 = vsyncpa [#allocation6], 0 }
   0x2   :  { %12 = vsyncpa [#allocation9], 0 }
   0x3   :  { %13 = vsyncpa [#allocation4], 0  ;;  %s21871_s18 = smov [#allocation5]  }
   0x4   :  { %s31_s19 = sshll.u32 %s21871_s18, 4  ;;  %s32_s19 = int_to_ptr.vmem [resolvable:$true] %s31_s19 }
   0x5   :  { %s21751_s20 = scalar_lea.vmem %s32_s19, 147456  ;;  %p21756_p1 = scmp.lt.s32.totalorder %s32_s19, %s32_s19 }
   0x6   :  { %p21752_p0 = scmp.ne.s32.totalorder %s32_s19, %s21751_s20  ;;  %p21757_p2 = scmp.lt.s32.totalorder %s21751_s20, %s21751_s20 }
   0x8   :  { %p21758_p3 = por %p21757_p2, %p21756_p1 }
   0xa   :  { %p21759_p4 = pnand %p21758_p3, %p21752_p0 }
   0xc   :  { %21762 = shalt.err (!%p21759_p4)
}
   0xd   :  { %s21872_s21 = smov 1536   ;;  %s21873_s22 = smov 96  }
   0xe   :  { %37 = dma.hbm_to_vmem [thread:$0]  %s22499_s1, 147456, %s32_s19, [#allocation6], %s21872_s21, %s21872_s21, %s21873_s22  }
   0xf   :  { %s21874_s25 = smov [#allocation8]   ;;  %s21875_s27 = smov [#allocation2]  }
  0x10   :  { %s53_s26 = sshll.u32 %s21874_s25, 4  ;;  %s19_s28 = sshll.u32 %s21875_s27, 4  ;;  %s54_s26 = int_to_ptr.vmem [resolvable:$true] %s53_s26  ;;  %s20_s28 = int_to_ptr.vmem [resolvable:$true] %s19_s28 }
  0x11   :  { %s21771_s29 = scalar_lea.vmem %s54_s26, 147456  ;;  %p21776_p6 = scmp.lt.s32.totalorder %s54_s26, %s54_s26 }
  0x12   :  { %p21772_p5 = scmp.ne.s32.totalorder %s54_s26, %s21771_s29  ;;  %p21777_p7 = scmp.lt.s32.totalorder %s21771_s29, %s21771_s29 }
  0x14   :  { %p21778_p8 = por %p21777_p7, %p21776_p6 }
  0x16   :  { %p21779_p9 = pnand %p21778_p8, %p21772_p5 }
  0x18   :  { %21782 = shalt.err (!%p21779_p9)
}
  0x19   :  { %s21876_s30 = smov 384   ;;  %s21877_s6 = smov 24  }
  0x1a   :  { %59 = dma.hbm_to_vmem [thread:$0]  %s22501_s3, 147456, %s54_s26, [#allocation9], %s21876_s30, %s21876_s30, %s21877_s6  }
  0x1b   :  { %s21791_s1 = scalar_lea.vmem %s20_s28, 768  ;;  %p21796_p11 = scmp.lt.s32.totalorder %s20_s28, %s20_s28 }
  0x1c   :  { %p21792_p10 = scmp.ne.s32.totalorder %s20_s28, %s21791_s1  ;;  %p21797_p12 = scmp.lt.s32.totalorder %s21791_s1, %s21791_s1 }
  0x1e   :  { %p21798_p13 = por %p21797_p12, %p21796_p11 }
  0x20   :  { %p21799_p0 = pnand %p21798_p13, %p21792_p10 }
  0x22   :  { %21802 = shalt.err (!%p21799_p0)
}
  0x23   :  { %25 = dma.hbm_to_vmem [thread:$0]  %s22498_s0, 768, %s20_s28, [#allocation3], %s21876_s30, %s21876_s30, %s21877_s6  }
  0x24   :  { %s21878_s11 = smov [#allocation7]   ;;  %s21879_s13 = smov [#allocation10]  }
  0x25   :  { %s44_s12 = sshll.u32 %s21878_s11, 4  ;;  %s66_s14 = sshll.u32 %s21879_s13, 4  ;;  %s45_s12 = int_to_ptr.vmem [resolvable:$true] %s44_s12  ;;  %s67_s14 = int_to_ptr.vmem [resolvable:$true] %s66_s14 }
  0x26   :  { %s21811_s15 = scalar_lea.vmem %s45_s12, 384  ;;  %p21816_p2 = scmp.lt.s32.totalorder %s45_s12, %s45_s12 }
  0x27   :  { %p21812_p1 = scmp.ne.s32.totalorder %s45_s12, %s21811_s15  ;;  %p21817_p3 = scmp.lt.s32.totalorder %s21811_s15, %s21811_s15 }
  0x29   :  { %p21818_p4 = por %p21817_p3, %p21816_p2 }
  0x2b   :  { %p21819_p5 = pnand %p21818_p4, %p21812_p1 }
  0x2d   :  { %21822 = shalt.err (!%p21819_p5)
}
  0x2e   :  { %47 = dma.hbm_to_vmem [thread:$0]  %s22500_s2, 384, %s45_s12, [#allocation6]  }
  0x2f   :  { %s21831_s17 = scalar_lea.vmem %s67_s14, 96  ;;  %p21836_p7 = scmp.lt.s32.totalorder %s67_s14, %s67_s14 }
  0x30   :  { %p21832_p6 = scmp.ne.s32.totalorder %s67_s14, %s21831_s17  ;;  %p21837_p8 = scmp.lt.s32.totalorder %s21831_s17, %s21831_s17 }
  0x32   :  { %p21838_p9 = por %p21837_p8, %p21836_p7 }
  0x34   :  { %p21839_p10 = pnand %p21838_p9, %p21832_p6 }
  0x36   :  { %21842 = shalt.err (!%p21839_p10)
}
  0x37   :  { %69 = dma.hbm_to_vmem [thread:$0]  %s22502_s4, 96, %s67_s14, [#allocation9]  }
  0x38   :  { %21863 = dma.done.wait [#allocation3], 768  }
  0x39   :  { %21864 = vsyncadd [#allocation3], 4294966528 }
  0x3a   :  { %21865 = dma.done.wait [#allocation6], 147840  }
  0x3b   :  { %21866 = vsyncadd [#allocation6], 4294819456 }
  0x3c   :  { %21867 = dma.done.wait [#allocation9], 147552  }
  0x3d   :  { %21868 = vsyncadd [#allocation9], 4294819744  ;;  %v165_v0 = vld [vmem:[#allocation5 + $0x540] sm:$0xff]  ;;  %v21928_v57 = vld [vmem:[#allocation2 + $0x4] ss:$24 sps:$4 sm:$0xff]   ;;  %s21880_s2 = smov [#allocation11]  }
  0x3e   :  { %v168_v1 = vld [vmem:[#allocation5 + $0x5a0] sm:$0xff]  ;;  %1945 = vmatprep.mubr.bf16.mxu0 %v21928_v57  ;;  %v21931_v60 = vld [vmem:[#allocation2 + $0xc] ss:$24 sps:$4 sm:$0xff]   ;;  %s17530_s4 = sshll.u32 %s21880_s2, 4  ;;  %s17531_s4 = int_to_ptr.vmem [resolvable:$true] %s17530_s4 }
  0x3f   :  { %v261_v2 = vld [vmem:[#allocation5 + $0x1140] sm:$0xff]  ;;  %v17593_v3 = vcombine.high %v165_v0, %v168_v1  ;;  %v17592_v4 = vcombine.low %v165_v0, %v168_v1  ;;  %1988 = vmatprep.mubr.bf16.mxu1 %v21931_v60  ;;  %s21843_s19 = scalar_lea.vmem %s17531_s4, 1536  ;;  %p21848_p12 = scmp.lt.s32.totalorder %s17531_s4, %s17531_s4 }
  0x40   :  { %v264_v5 = vld [vmem:[#allocation5 + $0x11a0] sm:$0xff]  ;;  %p21844_p11 = scmp.ne.s32.totalorder %s17531_s4, %s21843_s19  ;;  %p21849_p13 = scmp.lt.s32.totalorder %s21843_s19, %s21843_s19 }
  0x41   :  { %v159_v6 = vld [vmem:[#allocation5 + $0x480] sm:$0xff]  ;;  %v17689_v8 = vcombine.high %v261_v2, %v264_v5  ;;  %v17688_v9 = vcombine.low %v261_v2, %v264_v5  ;;  %1913 = vmatprep.subr.bf16.mxu0 %v17593_v3 }
  0x42   :  { %v162_v7 = vld [vmem:[#allocation5 + $0x4e0] sm:$0xff]  ;;  %1914 = vmatpush1.bf16.msra.mxu0 %v17592_v4  ;;  %p21850_p0 = por %p21849_p13, %p21848_p12 }
  0x43   :  { %v17587_v10 = vcombine.high %v159_v6, %v162_v7  ;;  %v255_v11 = vld [vmem:[#allocation5 + $0x1080] sm:$0xff]  ;;  %1956 = vmatprep.subr.bf16.mxu1 %v17689_v8  ;;  %v17586_v18 = vcombine.low %v159_v6, %v162_v7 }
  0x44   :  { %v258_v12 = vld [vmem:[#allocation5 + $0x10e0] sm:$0xff]  ;;  %1957 = vmatpush1.bf16.msra.mxu1 %v17688_v9  ;;  %p21851_p1 = pnand %p21850_p0, %p21844_p11 }
  0x45   :  { %v153_v13 = vld [vmem:[#allocation5 + $0x3c0] sm:$0xff]  ;;  %v17683_v14 = vcombine.high %v255_v11, %v258_v12  ;;  %1915 = vmatprep.subr.bf16.mxu0 %v17587_v10  ;;  %v17682_v19 = vcombine.low %v255_v11, %v258_v12 }
  0x46   :  { %v156_v15 = vld [vmem:[#allocation5 + $0x420] sm:$0xff]  ;;  %1916 = vmatpush1.bf16.msra.mxu0 %v17586_v18 }
  0x47   :  { %v249_v16 = vld [vmem:[#allocation5 + $0xfc0] sm:$0xff]  ;;  %v17581_v20 = vcombine.high %v153_v13, %v156_v15  ;;  %1958 = vmatprep.subr.bf16.mxu1 %v17683_v14  ;;  %v17580_v26 = vcombine.low %v153_v13, %v156_v15 }
  0x48   :  { %v252_v17 = vld [vmem:[#allocation5 + $0x1020] sm:$0xff]  ;;  %1959 = vmatpush1.bf16.msra.mxu1 %v17682_v19 }
  0x49   :  { %v17677_v21 = vcombine.high %v249_v16, %v252_v17  ;;  %v147_v22 = vld [vmem:[#allocation5 + $0x300] sm:$0xff]  ;;  %1917 = vmatprep.subr.bf16.mxu0 %v17581_v20  ;;  %v17676_v27 = vcombine.low %v249_v16, %v252_v17 }
  0x4a   :  { %v150_v23 = vld [vmem:[#allocation5 + $0x360] sm:$0xff]  ;;  %1918 = vmatpush1.bf16.msra.mxu0 %v17580_v26 }
  0x4b   :  { %v243_v24 = vld [vmem:[#allocation5 + $0xf00] sm:$0xff]  ;;  %v17575_v28 = vcombine.high %v147_v22, %v150_v23  ;;  %1960 = vmatprep.subr.bf16.mxu1 %v17677_v21  ;;  %v17574_v34 = vcombine.low %v147_v22, %v150_v23 }
  0x4c   :  { %v246_v25 = vld [vmem:[#allocation5 + $0xf60] sm:$0xff]  ;;  %1961 = vmatpush1.bf16.msra.mxu1 %v17676_v27 }
  0x4d   :  { %v17671_v29 = vcombine.high %v243_v24, %v246_v25  ;;  %v141_v30 = vld [vmem:[#allocation5 + $0x240] sm:$0xff]  ;;  %1919 = vmatprep.subr.bf16.mxu0 %v17575_v28  ;;  %v17670_v35 = vcombine.low %v243_v24, %v246_v25 }
  0x4e   :  { %v144_v31 = vld [vmem:[#allocation5 + $0x2a0] sm:$0xff]  ;;  %1920 = vmatpush1.bf16.msra.mxu0 %v17574_v34 }
  0x4f   :  { %v237_v32 = vld [vmem:[#allocation5 + $0xe40] sm:$0xff]  ;;  %v17569_v36 = vcombine.high %v141_v30, %v144_v31  ;;  %1962 = vmatprep.subr.bf16.mxu1 %v17671_v29  ;;  %v17568_v42 = vcombine.low %v141_v30, %v144_v31 }
  0x50   :  { %v240_v33 = vld [vmem:[#allocation5 + $0xea0] sm:$0xff]  ;;  %1963 = vmatpush1.bf16.msra.mxu1 %v17670_v35 }
  0x51   :  { %v17665_v37 = vcombine.high %v237_v32, %v240_v33  ;;  %v135_v38 = vld [vmem:[#allocation5 + $0x180] sm:$0xff]  ;;  %1921 = vmatprep.subr.bf16.mxu0 %v17569_v36  ;;  %v17664_v43 = vcombine.low %v237_v32, %v240_v33 }
  0x52   :  { %v138_v39 = vld [vmem:[#allocation5 + $0x1e0] sm:$0xff]  ;;  %1922 = vmatpush1.bf16.msra.mxu0 %v17568_v42 }
  0x53   :  { %v231_v40 = vld [vmem:[#allocation5 + $0xd80] sm:$0xff]  ;;  %v17563_v44 = vcombine.high %v135_v38, %v138_v39  ;;  %1964 = vmatprep.subr.bf16.mxu1 %v17665_v37  ;;  %v17562_v50 = vcombine.low %v135_v38, %v138_v39 }
  0x54   :  { %v234_v41 = vld [vmem:[#allocation5 + $0xde0] sm:$0xff]  ;;  %1965 = vmatpush1.bf16.msra.mxu1 %v17664_v43 }
  0x55   :  { %v17659_v45 = vcombine.high %v231_v40, %v234_v41  ;;  %v129_v46 = vld [vmem:[#allocation5 + $0xc0] sm:$0xff]  ;;  %1923 = vmatprep.subr.bf16.mxu0 %v17563_v44  ;;  %v17658_v51 = vcombine.low %v231_v40, %v234_v41 }
  0x56   :  { %v132_v47 = vld [vmem:[#allocation5 + $0x120] sm:$0xff]  ;;  %1924 = vmatpush1.bf16.msra.mxu0 %v17562_v50 }
  0x57   :  { %v225_v48 = vld [vmem:[#allocation5 + $0xcc0] sm:$0xff]  ;;  %v17557_v52 = vcombine.high %v129_v46, %v132_v47  ;;  %1966 = vmatprep.subr.bf16.mxu1 %v17659_v45  ;;  %v17556_v59 = vcombine.low %v129_v46, %v132_v47 }
  0x58   :  { %v228_v49 = vld [vmem:[#allocation5 + $0xd20] sm:$0xff]  ;;  %1967 = vmatpush1.bf16.msra.mxu1 %v17658_v51 }
  0x59   :  { %v123_v53 = vld [vmem:[#allocation5] sm:$0xff]  ;;  %v17653_v54 = vcombine.high %v225_v48, %v228_v49  ;;  %1925 = vmatprep.subr.bf16.mxu0 %v17557_v52  ;;  %v17652_v61 = vcombine.low %v225_v48, %v228_v49 }
  0x5a   :  { %v126_v55 = vld [vmem:[#allocation5 + $0x60] sm:$0xff]  ;;  %1926 = vmatpush1.bf16.msra.mxu0 %v17556_v59 }
  0x5b   :  { %v219_v56 = vld [vmem:[#allocation5 + $0xc00] sm:$0xff]  ;;  %v17551_v62 = vcombine.high %v123_v53, %v126_v55  ;;  %1968 = vmatprep.subr.bf16.mxu1 %v17653_v54  ;;  %v17550_v4 = vcombine.low %v123_v53, %v126_v55 }
  0x5c   :  { %v222_v58 = vld [vmem:[#allocation5 + $0xc60] sm:$0xff]  ;;  %1969 = vmatpush1.bf16.msra.mxu1 %v17652_v61 }
  0x5d   :  { %v17647_v63 = vcombine.high %v219_v56, %v222_v58  ;;  %v213_v0 = vld [vmem:[#allocation5 + $0xb40] sm:$0xff]  ;;  %1927 = vmatprep.subr.bf16.mxu0 %v17551_v62  ;;  %v17646_v5 = vcombine.low %v219_v56, %v222_v58 }
  0x5e   :  { %v216_v1 = vld [vmem:[#allocation5 + $0xba0] sm:$0xff]  ;;  %1928 = vmatpush1.bf16.msra.mxu0 %v17550_v4  ;;  %v166_v4 = vld [vmem:[#allocation5 + $0x548] sm:$0xff] }
  0x5f   :  { %v309_v2 = vld [vmem:[#allocation5 + $0x1740] sm:$0xff]  ;;  %v17641_v6 = vcombine.high %v213_v0, %v216_v1  ;;  %1970 = vmatprep.subr.bf16.mxu1 %v17647_v63  ;;  %v17640_v12 = vcombine.low %v213_v0, %v216_v1 }
  0x60   :  { %v312_v3 = vld [vmem:[#allocation5 + $0x17a0] sm:$0xff]  ;;  %1971 = vmatpush1.bf16.msra.mxu1 %v17646_v5  ;;  %v169_v5 = vld [vmem:[#allocation5 + $0x5a8] sm:$0xff] }
  0x61   :  { %v17737_v7 = vcombine.high %v309_v2, %v312_v3  ;;  %v207_v8 = vld [vmem:[#allocation5 + $0xa80] sm:$0xff]  ;;  %1929 = vmatprep.subr.bf16.mxu0 %v17641_v6  ;;  %v17736_v13 = vcombine.low %v309_v2, %v312_v3 }
  0x62   :  { %v210_v9 = vld [vmem:[#allocation5 + $0xae0] sm:$0xff]  ;;  %1930 = vmatpush2.bf16.msra.mxu0 %v17640_v12  ;;  %v21934_v12 = vld [vmem:[#allocation2] ss:$24 sps:$4 sm:$0xff]  }
  0x63   :  { %v303_v10 = vld [vmem:[#allocation5 + $0x1680] sm:$0xff]  ;;  %v17635_v14 = vcombine.high %v207_v8, %v210_v9  ;;  %1972 = vmatprep.subr.bf16.mxu1 %v17737_v7  ;;  %v17634_v20 = vcombine.low %v207_v8, %v210_v9  ;;  %v17595_v9 = vcombine.high %v166_v4, %v169_v5 }
  0x64   :  { %v306_v11 = vld [vmem:[#allocation5 + $0x16e0] sm:$0xff]  ;;  %1973 = vmatpush2.bf16.msra.mxu1 %v17736_v13  ;;  %v160_v13 = vld [vmem:[#allocation5 + $0x488] sm:$0xff] }
  0x65   :  { %v17731_v15 = vcombine.high %v303_v10, %v306_v11  ;;  %v201_v16 = vld [vmem:[#allocation5 + $0x9c0] sm:$0xff]  ;;  %1931 = vmatprep.subr.bf16.mxu0 %v17635_v14  ;;  %v17730_v21 = vcombine.low %v303_v10, %v306_v11  ;;  %v163_v14 = vld [vmem:[#allocation5 + $0x4e8] sm:$0xff] }
  0x66   :  { %v204_v17 = vld [vmem:[#allocation5 + $0xa20] sm:$0xff]  ;;  %1932 = vmatpush2.bf16.msra.mxu0 %v17634_v20 }
  0x67   :  { %v297_v18 = vld [vmem:[#allocation5 + $0x15c0] sm:$0xff]  ;;  %v17629_v22 = vcombine.high %v201_v16, %v204_v17  ;;  %1974 = vmatprep.subr.bf16.mxu1 %v17731_v15  ;;  %v17628_v28 = vcombine.low %v201_v16, %v204_v17  ;;  %v19871_v16 = vld [vmem:[#allocation2 + $0x8] ss:$24 sps:$4 sm:$0xff]   ;;  %v17594_v17 = vcombine.low %v166_v4, %v169_v5 }
  0x68   :  { %v300_v19 = vld [vmem:[#allocation5 + $0x1620] sm:$0xff]  ;;  %1975 = vmatpush2.bf16.msra.mxu1 %v17730_v21 }
  0x69   :  { %v17725_v23 = vcombine.high %v297_v18, %v300_v19  ;;  %v195_v24 = vld [vmem:[#allocation5 + $0x900] sm:$0xff]  ;;  %1933 = vmatprep.subr.bf16.mxu0 %v17629_v22  ;;  %v17724_v29 = vcombine.low %v297_v18, %v300_v19  ;;  %v17589_v19 = vcombine.high %v160_v13, %v163_v14 }
  0x6a   :  { %v198_v25 = vld [vmem:[#allocation5 + $0x960] sm:$0xff]  ;;  %1934 = vmatpush2.bf16.msra.mxu0 %v17628_v28 }
  0x6b   :  { %v291_v26 = vld [vmem:[#allocation5 + $0x1500] sm:$0xff]  ;;  %v17623_v30 = vcombine.high %v195_v24, %v198_v25  ;;  %1976 = vmatprep.subr.bf16.mxu1 %v17725_v23  ;;  %v17622_v36 = vcombine.low %v195_v24, %v198_v25  ;;  %v154_v23 = vld [vmem:[#allocation5 + $0x3c8] sm:$0xff] }
  0x6c   :  { %v294_v27 = vld [vmem:[#allocation5 + $0x1560] sm:$0xff]  ;;  %1977 = vmatpush2.bf16.msra.mxu1 %v17724_v29  ;;  %v157_v24 = vld [vmem:[#allocation5 + $0x428] sm:$0xff] }
  0x6d   :  { %v17719_v31 = vcombine.high %v291_v26, %v294_v27  ;;  %v189_v32 = vld [vmem:[#allocation5 + $0x840] sm:$0xff]  ;;  %1935 = vmatprep.subr.bf16.mxu0 %v17623_v30  ;;  %v17718_v37 = vcombine.low %v291_v26, %v294_v27  ;;  %v17588_v26 = vcombine.low %v160_v13, %v163_v14  ;;  %v17583_v30 = vcombine.high %v154_v23, %v157_v24 }
  0x6e   :  { %v192_v33 = vld [vmem:[#allocation5 + $0x8a0] sm:$0xff]  ;;  %1936 = vmatpush2.bf16.msra.mxu0 %v17622_v36  ;;  %v17582_v36 = vcombine.low %v154_v23, %v157_v24 }
  0x6f   :  { %v285_v34 = vld [vmem:[#allocation5 + $0x1440] sm:$0xff]  ;;  %v17617_v38 = vcombine.high %v189_v32, %v192_v33  ;;  %1978 = vmatprep.subr.bf16.mxu1 %v17719_v31  ;;  %v17616_v44 = vcombine.low %v189_v32, %v192_v33  ;;  %v148_v31 = vld [vmem:[#allocation5 + $0x308] sm:$0xff] }
  0x70   :  { %v288_v35 = vld [vmem:[#allocation5 + $0x14a0] sm:$0xff]  ;;  %1979 = vmatpush2.bf16.msra.mxu1 %v17718_v37  ;;  %v151_v32 = vld [vmem:[#allocation5 + $0x368] sm:$0xff] }
  0x71   :  { %v17713_v39 = vcombine.high %v285_v34, %v288_v35  ;;  %v183_v40 = vld [vmem:[#allocation5 + $0x780] sm:$0xff]  ;;  %1937 = vmatprep.subr.bf16.mxu0 %v17617_v38  ;;  %v17712_v45 = vcombine.low %v285_v34, %v288_v35  ;;  %v17577_v38 = vcombine.high %v148_v31, %v151_v32 }
  0x72   :  { %v186_v41 = vld [vmem:[#allocation5 + $0x7e0] sm:$0xff]  ;;  %1938 = vmatpush2.bf16.msra.mxu0 %v17616_v44  ;;  %v17576_v44 = vcombine.low %v148_v31, %v151_v32 }
  0x73   :  { %v279_v42 = vld [vmem:[#allocation5 + $0x1380] sm:$0xff]  ;;  %v17611_v46 = vcombine.high %v183_v40, %v186_v41  ;;  %1980 = vmatprep.subr.bf16.mxu1 %v17713_v39  ;;  %v17610_v52 = vcombine.low %v183_v40, %v186_v41  ;;  %v142_v39 = vld [vmem:[#allocation5 + $0x248] sm:$0xff] }
  0x74   :  { %v282_v43 = vld [vmem:[#allocation5 + $0x13e0] sm:$0xff]  ;;  %1981 = vmatpush2.bf16.msra.mxu1 %v17712_v45  ;;  %v145_v40 = vld [vmem:[#allocation5 + $0x2a8] sm:$0xff] }
  0x75   :  { %v17707_v47 = vcombine.high %v279_v42, %v282_v43  ;;  %v177_v48 = vld [vmem:[#allocation5 + $0x6c0] sm:$0xff]  ;;  %1939 = vmatprep.subr.bf16.mxu0 %v17611_v46  ;;  %v17706_v53 = vcombine.low %v279_v42, %v282_v43  ;;  %v17571_v45 = vcombine.high %v142_v39, %v145_v40  ;;  %v136_v46 = vld [vmem:[#allocation5 + $0x188] sm:$0xff] }
  0x76   :  { %v180_v49 = vld [vmem:[#allocation5 + $0x720] sm:$0xff]  ;;  %1940 = vmatpush2.bf16.msra.mxu0 %v17610_v52 }
  0x77   :  { %v273_v50 = vld [vmem:[#allocation5 + $0x12c0] sm:$0xff]  ;;  %v17605_v54 = vcombine.high %v177_v48, %v180_v49  ;;  %1982 = vmatprep.subr.bf16.mxu1 %v17707_v47  ;;  %v17604_v62 = vcombine.low %v177_v48, %v180_v49  ;;  %v139_v47 = vld [vmem:[#allocation5 + $0x1e8] sm:$0xff] }
  0x78   :  { %v276_v51 = vld [vmem:[#allocation5 + $0x1320] sm:$0xff]  ;;  %1983 = vmatpush2.bf16.msra.mxu1 %v17706_v53  ;;  %v17565_v53 = vcombine.high %v136_v46, %v139_v47 }
  0x79   :  { %v17701_v55 = vcombine.high %v273_v50, %v276_v51  ;;  %v171_v56 = vld [vmem:[#allocation5 + $0x600] sm:$0xff]  ;;  %1941 = vmatprep.subr.bf16.mxu0 %v17605_v54  ;;  %v17700_v63 = vcombine.low %v273_v50, %v276_v51  ;;  %v17570_v51 = vcombine.low %v142_v39, %v145_v40  ;;  %v130_v54 = vld [vmem:[#allocation5 + $0xc8] sm:$0xff] }
  0x7a   :  { %v174_v58 = vld [vmem:[#allocation5 + $0x660] sm:$0xff]  ;;  %1942 = vmatpush2.bf16.msra.mxu0 %v17604_v62 }
  0x7b   :  { %v267_v59 = vld [vmem:[#allocation5 + $0x1200] sm:$0xff]  ;;  %v17599_v0 = vcombine.high %v171_v56, %v174_v58  ;;  %1984 = vmatprep.subr.bf16.mxu1 %v17701_v55  ;;  %v17598_v6 = vcombine.low %v171_v56, %v174_v58  ;;  %v133_v55 = vld [vmem:[#allocation5 + $0x128] sm:$0xff] }
  0x7c   :  { %v270_v61 = vld [vmem:[#allocation5 + $0x1260] sm:$0xff]  ;;  %1985 = vmatpush2.bf16.msra.mxu1 %v17700_v63  ;;  %v17559_v63 = vcombine.high %v130_v54, %v133_v55  ;;  %v17558_v5 = vcombine.low %v130_v54, %v133_v55 }
  0x7d   :  { %v17695_v1 = vcombine.high %v267_v59, %v270_v61  ;;  %v357_v2 = vld [vmem:[#allocation5 + $0x1d40] sm:$0xff]  ;;  %1943 = vmatprep.subr.bf16.mxu0 %v17599_v0  ;;  %v17694_v7 = vcombine.low %v267_v59, %v270_v61  ;;  %v17564_v61 = vcombine.low %v136_v46, %v139_v47  ;;  %v124_v0 = vld [vmem:[#allocation5 + $0x8] sm:$0xff] }
  0x7e   :  { %v360_v3 = vld [vmem:[#allocation5 + $0x1da0] sm:$0xff]  ;;  %1944 = vmatpush2.bf16.msra.mxu0 %v17598_v6 }
  0x7f   :  { %v17785_v8 = vcombine.high %v357_v2, %v360_v3  ;;  %1986 = vmatprep.subr.bf16.mxu1 %v17695_v1  ;;  %v351_v10 = vld [vmem:[#allocation5 + $0x1c80] sm:$0xff]  ;;  %v17784_v15 = vcombine.low %v357_v2, %v360_v3  ;;  %v127_v1 = vld [vmem:[#allocation5 + $0x68] sm:$0xff] }
  0x80   :  { %v354_v11 = vld [vmem:[#allocation5 + $0x1ce0] sm:$0xff]  ;;  %1987 = vmatpush2.bf16.msra.mxu1 %v17694_v7  ;;  %v17553_v7 = vcombine.high %v124_v0, %v127_v1  ;;  %v17552_v14 = vcombine.low %v124_v0, %v127_v1 }
  0x81   :  { %1999 = vmatprep.subr.bf16.mxu0 %v17785_v8  ;;  %v17779_v18 = vcombine.high %v351_v10, %v354_v11  ;;  %2042 = vmatprep.subr.bf16.mxu1 %v17595_v9  ;;  %v345_v20 = vld [vmem:[#allocation5 + $0x1bc0] sm:$0xff]  ;;  %v17778_v25 = vcombine.low %v351_v10, %v354_v11  ;;  %v214_v8 = vld [vmem:[#allocation5 + $0xb48] sm:$0xff] }
  0x82   :  { %v348_v21 = vld [vmem:[#allocation5 + $0x1c20] sm:$0xff]  ;;  %1946 = vmatmul.mubr.bf16.vlgmr.msra.gmra.mxu0 %v21934_v12  ;;  %v217_v9 = vld [vmem:[#allocation5 + $0xba8] sm:$0xff] }
  0x83   :  { %v21936_v22 = vld [vmem:[#allocation2 + $0x14] ss:$24 sps:$4 sm:$0xff]   ;;  %2000 = vmatpush1.bf16.msra.mxu0 %v17784_v15  ;;  %1989 = vmatmul.mubr.bf16.vlgmr.msra.gmra.mxu1 %v19871_v16  ;;  %v17773_v27 = vcombine.high %v345_v20, %v348_v21  ;;  %v17772_v33 = vcombine.low %v345_v20, %v348_v21  ;;  %v17643_v16 = vcombine.high %v214_v8, %v217_v9 }
  0x84   :  { %2043 = vmatpush1.bf16.msra.mxu1 %v17594_v17  ;;  %2001 = vmatprep.subr.bf16.mxu0 %v17779_v18  ;;  %v339_v28 = vld [vmem:[#allocation5 + $0x1b00] sm:$0xff]  ;;  %v208_v17 = vld [vmem:[#allocation5 + $0xa88] sm:$0xff]  ;;  %v17642_v23 = vcombine.low %v214_v8, %v217_v9 }
  0x85   :  { %v342_v29 = vld [vmem:[#allocation5 + $0x1b60] sm:$0xff]  ;;  %2044 = vmatprep.subr.bf16.mxu1 %v17589_v19  ;;  %2031 = vmatprep.mubr.bf16.mxu0 %v21936_v22  ;;  %v211_v18 = vld [vmem:[#allocation5 + $0xae8] sm:$0xff] }
  0x86   :  { %2074 = vmatprep.mubr.bf16.mxu1 %v21928_v57  ;;  %v333_v34 = vld [vmem:[#allocation5 + $0x1a40] sm:$0xff]  ;;  %v17767_v37 = vcombine.high %v339_v28, %v342_v29  ;;  %v17766_v41 = vcombine.low %v339_v28, %v342_v29  ;;  %v17636_v31 = vcombine.low %v208_v17, %v211_v18 }
  0x87   :  { %2002 = vmatpush1.bf16.msra.mxu0 %v17778_v25  ;;  %v336_v35 = vld [vmem:[#allocation5 + $0x1aa0] sm:$0xff]  ;;  %v17637_v25 = vcombine.high %v208_v17, %v211_v18 }
  0x88   :  { %2045 = vmatpush1.bf16.msra.mxu1 %v17588_v26  ;;  %2003 = vmatprep.subr.bf16.mxu0 %v17773_v27  ;;  %v327_v42 = vld [vmem:[#allocation5 + $0x1980] sm:$0xff]  ;;  %v17761_v57 = vcombine.high %v333_v34, %v336_v35  ;;  %v17760_v48 = vcombine.low %v333_v34, %v336_v35  ;;  %v202_v26 = vld [vmem:[#allocation5 + $0x9c8] sm:$0xff] }
  0x89   :  { %2046 = vmatprep.subr.bf16.mxu1 %v17583_v30  ;;  %v330_v43 = vld [vmem:[#allocation5 + $0x19e0] sm:$0xff]  ;;  %v205_v27 = vld [vmem:[#allocation5 + $0xa28] sm:$0xff] }
  0x8a   :  { %v321_v49 = vld [vmem:[#allocation5 + $0x18c0] sm:$0xff]  ;;  %v17755_v52 = vcombine.high %v327_v42, %v330_v43  ;;  %v17754_v56 = vcombine.low %v327_v42, %v330_v43  ;;  %v196_v34 = vld [vmem:[#allocation5 + $0x908] sm:$0xff]  ;;  %v17630_v39 = vcombine.low %v202_v26, %v205_v27 }
  0x8b   :  { %2004 = vmatpush1.bf16.msra.mxu0 %v17772_v33  ;;  %v324_v50 = vld [vmem:[#allocation5 + $0x1920] sm:$0xff]  ;;  %v17631_v33 = vcombine.high %v202_v26, %v205_v27  ;;  %v199_v35 = vld [vmem:[#allocation5 + $0x968] sm:$0xff] }
  0x8c   :  { %2047 = vmatpush1.bf16.msra.mxu1 %v17582_v36  ;;  %2005 = vmatprep.subr.bf16.mxu0 %v17767_v37  ;;  %v315_v58 = vld [vmem:[#allocation5 + $0x1800] sm:$0xff]  ;;  %v17749_v62 = vcombine.high %v321_v49, %v324_v50  ;;  %v17748_v2 = vcombine.low %v321_v49, %v324_v50  ;;  %v190_v42 = vld [vmem:[#allocation5 + $0x848] sm:$0xff]  ;;  %v17624_v46 = vcombine.low %v196_v34, %v199_v35 }
  0x8d   :  { %2048 = vmatprep.subr.bf16.mxu1 %v17577_v38  ;;  %v318_v59 = vld [vmem:[#allocation5 + $0x1860] sm:$0xff]  ;;  %v193_v43 = vld [vmem:[#allocation5 + $0x8a8] sm:$0xff] }
  0x8e   :  { %v405_v3 = vld [vmem:[#allocation5 + $0x2340] sm:$0xff]  ;;  %v17743_v6 = vcombine.high %v315_v58, %v318_v59  ;;  %v17742_v10 = vcombine.low %v315_v58, %v318_v59  ;;  %v184_v49 = vld [vmem:[#allocation5 + $0x788] sm:$0xff]  ;;  %v17618_v54 = vcombine.low %v190_v42, %v193_v43 }
  0x8f   :  { %2006 = vmatpush1.bf16.msra.mxu0 %v17766_v41  ;;  %v408_v4 = vld [vmem:[#allocation5 + $0x23a0] sm:$0xff]  ;;  %v17625_v41 = vcombine.high %v196_v34, %v199_v35  ;;  %v187_v50 = vld [vmem:[#allocation5 + $0x7e8] sm:$0xff] }
  0x90   :  { %2049 = vmatpush1.bf16.msra.mxu1 %v17576_v44  ;;  %2007 = vmatprep.subr.bf16.mxu0 %v17761_v57  ;;  %v399_v11 = vld [vmem:[#allocation5 + $0x2280] sm:$0xff]  ;;  %v17833_v15 = vcombine.high %v405_v3, %v408_v4  ;;  %v17832_v19 = vcombine.low %v405_v3, %v408_v4  ;;  %v178_v58 = vld [vmem:[#allocation5 + $0x6c8] sm:$0xff]  ;;  %v17612_v0 = vcombine.low %v184_v49, %v187_v50 }
  0x91   :  { %2050 = vmatprep.subr.bf16.mxu1 %v17571_v45  ;;  %v402_v13 = vld [vmem:[#allocation5 + $0x22e0] sm:$0xff]  ;;  %v181_v59 = vld [vmem:[#allocation5 + $0x728] sm:$0xff] }
  0x92   :  { %v393_v20 = vld [vmem:[#allocation5 + $0x21c0] sm:$0xff]  ;;  %v17827_v24 = vcombine.high %v399_v11, %v402_v13  ;;  %v17826_v28 = vcombine.low %v399_v11, %v402_v13  ;;  %v172_v3 = vld [vmem:[#allocation5 + $0x608] sm:$0xff]  ;;  %v17606_v8 = vcombine.low %v178_v58, %v181_v59 }
  0x93   :  { %2008 = vmatpush1.bf16.msra.mxu0 %v17760_v48  ;;  %v396_v21 = vld [vmem:[#allocation5 + $0x2220] sm:$0xff]  ;;  %v17619_v48 = vcombine.high %v190_v42, %v193_v43  ;;  %v175_v4 = vld [vmem:[#allocation5 + $0x668] sm:$0xff] }
  0x94   :  { %2051 = vmatpush1.bf16.msra.mxu1 %v17570_v51  ;;  %2009 = vmatprep.subr.bf16.mxu0 %v17755_v52  ;;  %v387_v29 = vld [vmem:[#allocation5 + $0x2100] sm:$0xff]  ;;  %v17821_v32 = vcombine.high %v393_v20, %v396_v21  ;;  %v17820_v36 = vcombine.low %v393_v20, %v396_v21  ;;  %v358_v11 = vld [vmem:[#allocation5 + $0x1d48] sm:$0xff]  ;;  %v17600_v17 = vcombine.low %v172_v3, %v175_v4 }
  0x95   :  { %2052 = vmatprep.subr.bf16.mxu1 %v17565_v53  ;;  %v390_v30 = vld [vmem:[#allocation5 + $0x2160] sm:$0xff]  ;;  %v361_v13 = vld [vmem:[#allocation5 + $0x1da8] sm:$0xff] }
  0x96   :  { %v381_v37 = vld [vmem:[#allocation5 + $0x2040] sm:$0xff]  ;;  %v17815_v40 = vcombine.high %v387_v29, %v390_v30  ;;  %v17814_v44 = vcombine.low %v387_v29, %v390_v30  ;;  %v17787_v20 = vcombine.high %v358_v11, %v361_v13  ;;  %v352_v21 = vld [vmem:[#allocation5 + $0x1c88] sm:$0xff]  ;;  %v17786_v27 = vcombine.low %v358_v11, %v361_v13 }
  0x97   :  { %2010 = vmatpush1.bf16.msra.mxu0 %v17754_v56  ;;  %v384_v38 = vld [vmem:[#allocation5 + $0x20a0] sm:$0xff]  ;;  %v17613_v56 = vcombine.high %v184_v49, %v187_v50  ;;  %v253_v26 = vld [vmem:[#allocation5 + $0x1028] sm:$0xff] }
  0x98   :  { %2053 = vmatpush1.bf16.msra.mxu1 %v17564_v61  ;;  %2011 = vmatprep.subr.bf16.mxu0 %v17749_v62  ;;  %v375_v57 = vld [vmem:[#allocation5 + $0x1f80] sm:$0xff]  ;;  %v17809_v47 = vcombine.high %v381_v37, %v384_v38  ;;  %v17808_v51 = vcombine.low %v381_v37, %v384_v38  ;;  %v346_v29 = vld [vmem:[#allocation5 + $0x1bc8] sm:$0xff] }
  0x99   :  { %2054 = vmatprep.subr.bf16.mxu1 %v17559_v63  ;;  %v378_v45 = vld [vmem:[#allocation5 + $0x1fe0] sm:$0xff]  ;;  %v349_v30 = vld [vmem:[#allocation5 + $0x1c28] sm:$0xff] }
  0x9a   :  { %v369_v52 = vld [vmem:[#allocation5 + $0x1ec0] sm:$0xff]  ;;  %v17803_v55 = vcombine.high %v375_v57, %v378_v45  ;;  %v17802_v61 = vcombine.low %v375_v57, %v378_v45  ;;  %v247_v34 = vld [vmem:[#allocation5 + $0xf68] sm:$0xff] }
  0x9b   :  { %2012 = vmatpush1.bf16.msra.mxu0 %v17748_v2  ;;  %v372_v53 = vld [vmem:[#allocation5 + $0x1f20] sm:$0xff]  ;;  %v17607_v2 = vcombine.high %v178_v58, %v181_v59  ;;  %v340_v37 = vld [vmem:[#allocation5 + $0x1b08] sm:$0xff] }
  0x9c   :  { %2055 = vmatpush1.bf16.msra.mxu1 %v17558_v5  ;;  %2013 = vmatprep.subr.bf16.mxu0 %v17743_v6  ;;  %v363_v62 = vld [vmem:[#allocation5 + $0x1e00] sm:$0xff]  ;;  %v17797_v1 = vcombine.high %v369_v52, %v372_v53  ;;  %v17796_v5 = vcombine.low %v369_v52, %v372_v53  ;;  %v262_v6 = vld [vmem:[#allocation5 + $0x1148] sm:$0xff] }
  0x9d   :  { %2056 = vmatprep.subr.bf16.mxu1 %v17553_v7  ;;  %v366_v63 = vld [vmem:[#allocation5 + $0x1e60] sm:$0xff]  ;;  %v265_v7 = vld [vmem:[#allocation5 + $0x11a8] sm:$0xff] }
  0x9e   :  { %v17791_v9 = vcombine.high %v363_v62, %v366_v63  ;;  %v21941_v18 = vld [vmem:[#allocation2 + $0x10] ss:$24 sps:$4 sm:$0xff]   ;;  %v343_v38 = vld [vmem:[#allocation5 + $0x1b68] sm:$0xff] }
  0x9f   :  { %2014 = vmatpush1.bf16.msra.mxu0 %v17742_v10  ;;  %v17601_v10 = vcombine.high %v172_v3, %v175_v4  ;;  %v241_v42 = vld [vmem:[#allocation5 + $0xea8] sm:$0xff]  ;;  %v17769_v45 = vcombine.high %v340_v37, %v343_v38 }
  0xa0   :  { %2057 = vmatpush1.bf16.msra.mxu1 %v17552_v14  ;;  %2015 = vmatprep.subr.bf16.mxu0 %v17833_v15  ;;  %v17790_v14 = vcombine.low %v363_v62, %v366_v63  ;;  %v256_v15 = vld [vmem:[#allocation5 + $0x1088] sm:$0xff] }
  0xa1   :  { %2058 = vmatprep.subr.bf16.mxu1 %v17643_v16  ;;  %v259_v16 = vld [vmem:[#allocation5 + $0x10e8] sm:$0xff] }
  0xa2   :  { %v337_v57 = vld [vmem:[#allocation5 + $0x1aa8] sm:$0xff] }
  0xa3   :  { %2016 = vmatpush2.bf16.msra.mxu0 %v17832_v19  ;;  %v17691_v19 = vcombine.high %v262_v6, %v265_v7  ;;  %v328_v49 = vld [vmem:[#allocation5 + $0x1988] sm:$0xff] }
  0xa4   :  { %2059 = vmatpush2.bf16.msra.mxu1 %v17642_v23  ;;  %2017 = vmatprep.subr.bf16.mxu0 %v17827_v24  ;;  %v355_v23 = vld [vmem:[#allocation5 + $0x1ce8] sm:$0xff]  ;;  %v17690_v24 = vcombine.low %v262_v6, %v265_v7 }
  0xa5   :  { %2060 = vmatprep.subr.bf16.mxu1 %v17637_v25  ;;  %v250_v25 = vld [vmem:[#allocation5 + $0xfc8] sm:$0xff]  ;;  %v17780_v35 = vcombine.low %v352_v21, %v355_v23 }
  0xa6   :  { %v331_v50 = vld [vmem:[#allocation5 + $0x19e8] sm:$0xff] }
  0xa7   :  { %2018 = vmatpush2.bf16.msra.mxu0 %v17826_v28  ;;  %v17685_v28 = vcombine.high %v256_v15, %v259_v16  ;;  %v226_v53 = vld [vmem:[#allocation5 + $0xcc8] sm:$0xff] }
  0xa8   :  { %2061 = vmatpush2.bf16.msra.mxu1 %v17636_v31  ;;  %2019 = vmatprep.subr.bf16.mxu0 %v17821_v32  ;;  %v17781_v31 = vcombine.high %v352_v21, %v355_v23  ;;  %v17684_v32 = vcombine.low %v256_v15, %v259_v16  ;;  %v322_v58 = vld [vmem:[#allocation5 + $0x18c8] sm:$0xff] }
  0xa9   :  { %2062 = vmatprep.subr.bf16.mxu1 %v17631_v33  ;;  %v244_v33 = vld [vmem:[#allocation5 + $0xf08] sm:$0xff] }
  0xaa   :  { %v17673_v43 = vcombine.high %v244_v33, %v247_v34  ;;  %v325_v59 = vld [vmem:[#allocation5 + $0x1928] sm:$0xff] }
  0xab   :  { %2020 = vmatpush2.bf16.msra.mxu0 %v17820_v36  ;;  %v17679_v36 = vcombine.high %v250_v25, %v253_v26  ;;  %v220_v63 = vld [vmem:[#allocation5 + $0xc08] sm:$0xff] }
  0xac   :  { %2063 = vmatpush2.bf16.msra.mxu1 %v17630_v39  ;;  %2021 = vmatprep.subr.bf16.mxu0 %v17815_v40  ;;  %v17775_v39 = vcombine.high %v346_v29, %v349_v30  ;;  %v17678_v40 = vcombine.low %v250_v25, %v253_v26  ;;  %v316_v3 = vld [vmem:[#allocation5 + $0x1808] sm:$0xff] }
  0xad   :  { %2064 = vmatprep.subr.bf16.mxu1 %v17625_v41  ;;  %v238_v41 = vld [vmem:[#allocation5 + $0xe48] sm:$0xff] }
  0xae   :  { %v17666_v52 = vcombine.low %v238_v41, %v241_v42  ;;  %v319_v4 = vld [vmem:[#allocation5 + $0x1868] sm:$0xff] }
  0xaf   :  { %2022 = vmatpush2.bf16.msra.mxu0 %v17814_v44  ;;  %v334_v44 = vld [vmem:[#allocation5 + $0x1a48] sm:$0xff] }
  0xb0   :  { %2065 = vmatpush2.bf16.msra.mxu1 %v17624_v46  ;;  %2023 = vmatprep.subr.bf16.mxu0 %v17809_v47  ;;  %v17672_v46 = vcombine.low %v244_v33, %v247_v34  ;;  %v232_v47 = vld [vmem:[#allocation5 + $0xd88] sm:$0xff] }
  0xb1   :  { %2066 = vmatprep.subr.bf16.mxu1 %v17619_v48  ;;  %v235_v48 = vld [vmem:[#allocation5 + $0xde8] sm:$0xff] }
  0xb2   :  { %v17660_v62 = vcombine.low %v232_v47, %v235_v48  ;;  %v310_v7 = vld [vmem:[#allocation5 + $0x1748] sm:$0xff] }
  0xb3   :  { %2024 = vmatpush2.bf16.msra.mxu0 %v17808_v51  ;;  %v17763_v51 = vcombine.high %v334_v44, %v337_v57  ;;  %v406_v11 = vld [vmem:[#allocation5 + $0x2348] sm:$0xff] }
  0xb4   :  { %2067 = vmatpush2.bf16.msra.mxu1 %v17618_v54  ;;  %2025 = vmatprep.subr.bf16.mxu0 %v17803_v55  ;;  %v229_v54 = vld [vmem:[#allocation5 + $0xd28] sm:$0xff]  ;;  %v17762_v55 = vcombine.low %v334_v44, %v337_v57 }
  0xb5   :  { %2068 = vmatprep.subr.bf16.mxu1 %v17613_v56  ;;  %v17661_v56 = vcombine.high %v232_v47, %v235_v48  ;;  %v17654_v6 = vcombine.low %v226_v53, %v229_v54  ;;  %v409_v13 = vld [vmem:[#allocation5 + $0x23a8] sm:$0xff] }
  0xb6   :  { %v304_v16 = vld [vmem:[#allocation5 + $0x1688] sm:$0xff] }
  0xb7   :  { %2026 = vmatpush2.bf16.msra.mxu0 %v17802_v61  ;;  %v17757_v61 = vcombine.high %v328_v49, %v331_v50  ;;  %v400_v21 = vld [vmem:[#allocation5 + $0x2288] sm:$0xff] }
  0xb8   :  { %2069 = vmatpush2.bf16.msra.mxu1 %v17612_v0  ;;  %2027 = vmatprep.subr.bf16.mxu0 %v17797_v1  ;;  %v223_v0 = vld [vmem:[#allocation5 + $0xc68] sm:$0xff]  ;;  %v17756_v1 = vcombine.low %v328_v49, %v331_v50 }
  0xb9   :  { %2070 = vmatprep.subr.bf16.mxu1 %v17607_v2  ;;  %v17655_v2 = vcombine.high %v226_v53, %v229_v54  ;;  %v17648_v15 = vcombine.low %v220_v63, %v223_v0  ;;  %v403_v23 = vld [vmem:[#allocation5 + $0x22e8] sm:$0xff] }
  0xba   :  { %v298_v26 = vld [vmem:[#allocation5 + $0x15c8] sm:$0xff] }
  0xbb   :  { %2028 = vmatpush2.bf16.msra.mxu0 %v17796_v5  ;;  %v17751_v5 = vcombine.high %v322_v58, %v325_v59  ;;  %v292_v34 = vld [vmem:[#allocation5 + $0x1508] sm:$0xff] }
  0xbc   :  { %2071 = vmatpush2.bf16.msra.mxu1 %v17606_v8  ;;  %2029 = vmatprep.subr.bf16.mxu0 %v17791_v9  ;;  %v313_v8 = vld [vmem:[#allocation5 + $0x17a8] sm:$0xff]  ;;  %v17750_v9 = vcombine.low %v322_v58, %v325_v59 }
  0xbd   :  { %2072 = vmatprep.subr.bf16.mxu1 %v17601_v10  ;;  %v17649_v10 = vcombine.high %v220_v63, %v223_v0  ;;  %v17738_v25 = vcombine.low %v310_v7, %v313_v8  ;;  %v382_v57 = vld [vmem:[#allocation5 + $0x2048] sm:$0xff] }
  0xbe   :  { %v280_v48 = vld [vmem:[#allocation5 + $0x1388] sm:$0xff] }
  0xbf   :  { %2030 = vmatpush2.bf16.msra.mxu0 %v17790_v14  ;;  %v17745_v14 = vcombine.high %v316_v3, %v319_v4  ;;  %v376_v50 = vld [vmem:[#allocation5 + $0x1f88] sm:$0xff] }
  0xc0   :  { %2073 = vmatpush2.bf16.msra.mxu1 %v17600_v17  ;;  %2085 = vmatprep.subr.bf16.mxu0 %v17691_v19  ;;  %v307_v17 = vld [vmem:[#allocation5 + $0x16e8] sm:$0xff]  ;;  %v17744_v19 = vcombine.low %v316_v3, %v319_v4 }
  0xc1   :  { %2128 = vmatprep.subr.bf16.mxu1 %v17787_v20  ;;  %v17739_v20 = vcombine.high %v310_v7, %v313_v8  ;;  %v17732_v33 = vcombine.low %v304_v16, %v307_v17  ;;  %v274_v54 = vld [vmem:[#allocation5 + $0x12c8] sm:$0xff]  ;;  %v167_v8 = vld [vmem:[#allocation5 + $0x550] sm:$0xff] }
  0xc2   :  { %2032 = vmatmul.mubr.bf16.vlgmr.msra.gmra.mxu0 %v21941_v18  ;;  %v370_v59 = vld [vmem:[#allocation5 + $0x1ec8] sm:$0xff] }
  0xc3   :  { %2086 = vmatpush1.bf16.msra.mxu0 %v17690_v24  ;;  %2075 = vmatmul.mubr.bf16.vlgmr.msra.gmra.mxu1 %v21934_v12  ;;  %v17774_v12 = vcombine.low %v346_v29, %v349_v30  ;;  %v17835_v24 = vcombine.high %v406_v11, %v409_v13  ;;  %v17733_v29 = vcombine.high %v304_v16, %v307_v17  ;;  %v394_v30 = vld [vmem:[#allocation5 + $0x21c8] sm:$0xff]  ;;  %v161_v17 = vld [vmem:[#allocation5 + $0x490] sm:$0xff] }
  0xc4   :  { %2129 = vmatpush1.bf16.msra.mxu1 %v17786_v27  ;;  %2087 = vmatprep.subr.bf16.mxu0 %v17685_v28  ;;  %v301_v27 = vld [vmem:[#allocation5 + $0x1628] sm:$0xff]  ;;  %v17834_v28 = vcombine.low %v406_v11, %v409_v13  ;;  %v263_v13 = vld [vmem:[#allocation5 + $0x1150] sm:$0xff] }
  0xc5   :  { %2130 = vmatprep.subr.bf16.mxu1 %v17781_v31  ;;  %2117 = vmatprep.mubr.bf16.mxu0 %v21931_v60  ;;  %v17768_v60 = vcombine.low %v340_v37, %v343_v38  ;;  %v397_v31 = vld [vmem:[#allocation5 + $0x2228] sm:$0xff]  ;;  %v17727_v37 = vcombine.high %v298_v26, %v301_v27 }
  0xc6   :  { %2160 = vmatprep.mubr.bf16.mxu1 %v21936_v22  ;;  %v17667_v22 = vcombine.high %v238_v41, %v241_v42  ;;  %v388_v38 = vld [vmem:[#allocation5 + $0x2108] sm:$0xff]  ;;  %v17726_v41 = vcombine.low %v298_v26, %v301_v27  ;;  %v155_v27 = vld [vmem:[#allocation5 + $0x3d0] sm:$0xff] }
  0xc7   :  { %2088 = vmatpush1.bf16.msra.mxu0 %v17684_v32  ;;  %v17829_v32 = vcombine.high %v400_v21, %v403_v23  ;;  %v286_v42 = vld [vmem:[#allocation5 + $0x1448] sm:$0xff] }
  0xc8   :  { %2131 = vmatpush1.bf16.msra.mxu1 %v17780_v35  ;;  %2089 = vmatprep.subr.bf16.mxu0 %v17679_v36  ;;  %v295_v35 = vld [vmem:[#allocation5 + $0x1568] sm:$0xff]  ;;  %v17828_v36 = vcombine.low %v400_v21, %v403_v23  ;;  %v257_v23 = vld [vmem:[#allocation5 + $0x1090] sm:$0xff] }
  0xc9   :  { %2132 = vmatprep.subr.bf16.mxu1 %v17775_v39  ;;  %v391_v39 = vld [vmem:[#allocation5 + $0x2168] sm:$0xff]  ;;  %v17721_v44 = vcombine.high %v292_v34, %v295_v35  ;;  %v17720_v47 = vcombine.low %v292_v34, %v295_v35  ;;  %v21947_v34 = vld [vmem:[#allocation2 + $0x8] ss:$24 sps:$4 sm:$0xff]  }
  0xca   :  { %v268_v0 = vld [vmem:[#allocation5 + $0x1208] sm:$0xff] }
  0xcb   :  { %2090 = vmatpush1.bf16.msra.mxu0 %v17678_v40  ;;  %v17823_v40 = vcombine.high %v394_v30, %v397_v31  ;;  %v364_v4 = vld [vmem:[#allocation5 + $0x1e08] sm:$0xff] }
  0xcc   :  { %2133 = vmatpush1.bf16.msra.mxu1 %v17774_v12  ;;  %2091 = vmatprep.subr.bf16.mxu0 %v17673_v43  ;;  %v289_v12 = vld [vmem:[#allocation5 + $0x14a8] sm:$0xff]  ;;  %v17822_v43 = vcombine.low %v394_v30, %v397_v31  ;;  %v251_v31 = vld [vmem:[#allocation5 + $0xfd0] sm:$0xff] }
  0xcd   :  { %2134 = vmatprep.subr.bf16.mxu1 %v17769_v45  ;;  %v385_v45 = vld [vmem:[#allocation5 + $0x20a8] sm:$0xff]  ;;  %v17715_v49 = vcombine.high %v286_v42, %v289_v12  ;;  %v17714_v53 = vcombine.low %v286_v42, %v289_v12  ;;  %v248_v42 = vld [vmem:[#allocation5 + $0xf70] sm:$0xff] }
  0xce   :  { %v21700_v12 = vld [vmem:[#allocation2 + $0x4] ss:$24 sps:$4 sm:$0xff]  }
  0xcf   :  { %2092 = vmatpush1.bf16.msra.mxu0 %v17672_v46  ;;  %v17817_v46 = vcombine.high %v388_v38, %v391_v39 }
  0xd0   :  { %2135 = vmatpush1.bf16.msra.mxu1 %v17768_v60  ;;  %2093 = vmatprep.subr.bf16.mxu0 %v17667_v22  ;;  %v283_v60 = vld [vmem:[#allocation5 + $0x13e8] sm:$0xff]  ;;  %v17816_v22 = vcombine.low %v388_v38, %v391_v39 }
  0xd1   :  { %2136 = vmatprep.subr.bf16.mxu1 %v17763_v51  ;;  %v379_v51 = vld [vmem:[#allocation5 + $0x1fe8] sm:$0xff]  ;;  %v17709_v58 = vcombine.high %v280_v48, %v283_v60  ;;  %v17708_v63 = vcombine.low %v280_v48, %v283_v60  ;;  %v242_v60 = vld [vmem:[#allocation5 + $0xeb0] sm:$0xff] }
  0xd3   :  { %2094 = vmatpush1.bf16.msra.mxu0 %v17666_v52  ;;  %v17811_v52 = vcombine.high %v382_v57, %v385_v45 }
  0xd4   :  { %2137 = vmatpush1.bf16.msra.mxu1 %v17762_v55  ;;  %2095 = vmatprep.subr.bf16.mxu0 %v17661_v56  ;;  %v277_v55 = vld [vmem:[#allocation5 + $0x1328] sm:$0xff]  ;;  %v17810_v56 = vcombine.low %v382_v57, %v385_v45  ;;  %v143_v57 = vld [vmem:[#allocation5 + $0x250] sm:$0xff] }
  0xd5   :  { %2138 = vmatprep.subr.bf16.mxu1 %v17757_v61  ;;  %v373_v61 = vld [vmem:[#allocation5 + $0x1f28] sm:$0xff]  ;;  %v17703_v3 = vcombine.high %v274_v54, %v277_v55  ;;  %v17702_v7 = vcombine.low %v274_v54, %v277_v55  ;;  %v146_v45 = vld [vmem:[#allocation5 + $0x2b0] sm:$0xff] }
  0xd6   :  { %v236_v55 = vld [vmem:[#allocation5 + $0xdf0] sm:$0xff] }
  0xd7   :  { %2096 = vmatpush1.bf16.msra.mxu0 %v17660_v62  ;;  %v17805_v62 = vcombine.high %v376_v50, %v379_v51 }
  0xd8   :  { %2139 = vmatpush1.bf16.msra.mxu1 %v17756_v1  ;;  %2097 = vmatprep.subr.bf16.mxu0 %v17655_v2  ;;  %v271_v1 = vld [vmem:[#allocation5 + $0x1268] sm:$0xff]  ;;  %v17804_v2 = vcombine.low %v376_v50, %v379_v51  ;;  %v140_v50 = vld [vmem:[#allocation5 + $0x1f0] sm:$0xff] }
  0xd9   :  { %2140 = vmatprep.subr.bf16.mxu1 %v17751_v5  ;;  %v367_v5 = vld [vmem:[#allocation5 + $0x1e68] sm:$0xff]  ;;  %v17697_v11 = vcombine.high %v268_v0, %v271_v1  ;;  %v17696_v16 = vcombine.low %v268_v0, %v271_v1  ;;  %v230_v1 = vld [vmem:[#allocation5 + $0xd30] sm:$0xff] }
  0xdb   :  { %2098 = vmatpush1.bf16.msra.mxu0 %v17654_v6  ;;  %v17799_v6 = vcombine.high %v370_v59, %v373_v61 }
  0xdc   :  { %2141 = vmatpush1.bf16.msra.mxu1 %v17750_v9  ;;  %2099 = vmatprep.subr.bf16.mxu0 %v17649_v10  ;;  %v170_v9 = vld [vmem:[#allocation5 + $0x5b0] sm:$0xff]  ;;  %v17798_v10 = vcombine.low %v370_v59, %v373_v61 }
  0xdd   :  { %2142 = vmatprep.subr.bf16.mxu1 %v17745_v14  ;;  %v266_v14 = vld [vmem:[#allocation5 + $0x11b0] sm:$0xff]  ;;  %v17597_v21 = vcombine.high %v167_v8, %v170_v9  ;;  %v17596_v26 = vcombine.low %v167_v8, %v170_v9 }
  0xde   :  { %v134_v59 = vld [vmem:[#allocation5 + $0x130] sm:$0xff] }
  0xdf   :  { %2100 = vmatpush1.bf16.msra.mxu0 %v17648_v15  ;;  %v17793_v15 = vcombine.high %v364_v4, %v367_v5  ;;  %v224_v9 = vld [vmem:[#allocation5 + $0xc70] sm:$0xff] }
  0xe0   :  { %2143 = vmatpush1.bf16.msra.mxu1 %v17744_v19  ;;  %2101 = vmatprep.subr.bf16.mxu0 %v17739_v20  ;;  %v164_v19 = vld [vmem:[#allocation5 + $0x4f0] sm:$0xff]  ;;  %v17792_v20 = vcombine.low %v364_v4, %v367_v5 }
  0xe1   :  { %2144 = vmatprep.subr.bf16.mxu1 %v17835_v24  ;;  %v260_v24 = vld [vmem:[#allocation5 + $0x10f0] sm:$0xff]  ;;  %v17591_v30 = vcombine.high %v161_v17, %v164_v19  ;;  %v17590_v35 = vcombine.low %v161_v17, %v164_v19 }
  0xe2   :  { %v17686_v38 = vcombine.low %v257_v23, %v260_v24  ;;  %v128_v4 = vld [vmem:[#allocation5 + $0x70] sm:$0xff] }
  0xe3   :  { %2102 = vmatpush2.bf16.msra.mxu0 %v17738_v25  ;;  %v17693_v25 = vcombine.high %v263_v13, %v266_v14  ;;  %v314_v19 = vld [vmem:[#allocation5 + $0x17b0] sm:$0xff] }
  0xe4   :  { %2145 = vmatpush2.bf16.msra.mxu1 %v17834_v28  ;;  %2103 = vmatprep.subr.bf16.mxu0 %v17733_v29  ;;  %v158_v28 = vld [vmem:[#allocation5 + $0x430] sm:$0xff]  ;;  %v17692_v29 = vcombine.low %v263_v13, %v266_v14 }
  0xe5   :  { %2146 = vmatprep.subr.bf16.mxu1 %v17829_v32  ;;  %v17687_v32 = vcombine.high %v257_v23, %v260_v24  ;;  %v17585_v39 = vcombine.high %v155_v27, %v158_v28  ;;  %v218_v13 = vld [vmem:[#allocation5 + $0xbb0] sm:$0xff] }
  0xe6   :  { %v212_v23 = vld [vmem:[#allocation5 + $0xaf0] sm:$0xff] }
  0xe7   :  { %2104 = vmatpush2.bf16.msra.mxu0 %v17732_v33  ;;  %v254_v33 = vld [vmem:[#allocation5 + $0x1030] sm:$0xff] }
  0xe8   :  { %2147 = vmatpush2.bf16.msra.mxu1 %v17828_v36  ;;  %2105 = vmatprep.subr.bf16.mxu0 %v17727_v37  ;;  %v149_v36 = vld [vmem:[#allocation5 + $0x310] sm:$0xff] }
  0xe9   :  { %2148 = vmatprep.subr.bf16.mxu1 %v17823_v40  ;;  %v152_v37 = vld [vmem:[#allocation5 + $0x370] sm:$0xff] }
  0xea   :  { %v245_v40 = vld [vmem:[#allocation5 + $0xf10] sm:$0xff] }
  0xeb   :  { %2106 = vmatpush2.bf16.msra.mxu0 %v17726_v41  ;;  %v17681_v41 = vcombine.high %v251_v31, %v254_v33  ;;  %v17675_v48 = vcombine.high %v245_v40, %v248_v42  ;;  %v17674_v51 = vcombine.low %v245_v40, %v248_v42  ;;  %v197_v42 = vld [vmem:[#allocation5 + $0x910] sm:$0xff] }
  0xec   :  { %2149 = vmatpush2.bf16.msra.mxu1 %v17822_v43  ;;  %2107 = vmatprep.subr.bf16.mxu0 %v17721_v44  ;;  %v21701_v43 = vld [vmem:[#allocation2 + $0xc] ss:$24 sps:$4 sm:$0xff]   ;;  %v17584_v44 = vcombine.low %v155_v27, %v158_v28 }
  0xed   :  { %2150 = vmatprep.subr.bf16.mxu1 %v17817_v46  ;;  %v17579_v46 = vcombine.high %v149_v36, %v152_v37  ;;  %v308_v28 = vld [vmem:[#allocation5 + $0x16f0] sm:$0xff] }
  0xef   :  { %2108 = vmatpush2.bf16.msra.mxu0 %v17720_v47  ;;  %v239_v47 = vld [vmem:[#allocation5 + $0xe50] sm:$0xff] }
  0xf0   :  { %2151 = vmatpush2.bf16.msra.mxu1 %v17816_v22  ;;  %2109 = vmatprep.subr.bf16.mxu0 %v17715_v49  ;;  %v17578_v22 = vcombine.low %v149_v36, %v152_v37  ;;  %v137_v49 = vld [vmem:[#allocation5 + $0x190] sm:$0xff]  ;;  %v17669_v54 = vcombine.high %v239_v47, %v242_v60  ;;  %v17668_v61 = vcombine.low %v239_v47, %v242_v60 }
  0xf1   :  { %2152 = vmatprep.subr.bf16.mxu1 %v17811_v52  ;;  %v17573_v52 = vcombine.high %v143_v57, %v146_v45  ;;  %v299_v36 = vld [vmem:[#allocation5 + $0x15d0] sm:$0xff] }
  0xf2   :  { %v302_v37 = vld [vmem:[#allocation5 + $0x1630] sm:$0xff] }
  0xf3   :  { %2110 = vmatpush2.bf16.msra.mxu0 %v17714_v53  ;;  %v233_v53 = vld [vmem:[#allocation5 + $0xd90] sm:$0xff] }
  0xf4   :  { %2153 = vmatpush2.bf16.msra.mxu1 %v17810_v56  ;;  %2111 = vmatprep.subr.bf16.mxu0 %v17709_v58  ;;  %v17572_v56 = vcombine.low %v143_v57, %v146_v45  ;;  %v131_v58 = vld [vmem:[#allocation5 + $0xd0] sm:$0xff]  ;;  %v17663_v0 = vcombine.high %v233_v53, %v236_v55  ;;  %v17662_v5 = vcombine.low %v233_v53, %v236_v55 }
  0xf5   :  { %2154 = vmatprep.subr.bf16.mxu1 %v17805_v62  ;;  %v17567_v62 = vcombine.high %v137_v49, %v140_v50  ;;  %v191_v45 = vld [vmem:[#allocation5 + $0x850] sm:$0xff] }
  0xf6   :  { %v290_v60 = vld [vmem:[#allocation5 + $0x14b0] sm:$0xff] }
  0xf7   :  { %2112 = vmatpush2.bf16.msra.mxu0 %v17708_v63  ;;  %v227_v63 = vld [vmem:[#allocation5 + $0xcd0] sm:$0xff] }
  0xf8   :  { %2155 = vmatpush2.bf16.msra.mxu1 %v17804_v2  ;;  %2113 = vmatprep.subr.bf16.mxu0 %v17703_v3  ;;  %v17566_v2 = vcombine.low %v137_v49, %v140_v50  ;;  %v125_v3 = vld [vmem:[#allocation5 + $0x10] sm:$0xff]  ;;  %v17657_v8 = vcombine.high %v227_v63, %v230_v1  ;;  %v17656_v14 = vcombine.low %v227_v63, %v230_v1 }
  0xf9   :  { %2156 = vmatprep.subr.bf16.mxu1 %v17799_v6  ;;  %v17561_v6 = vcombine.high %v131_v58, %v134_v59  ;;  %v185_v50 = vld [vmem:[#allocation5 + $0x790] sm:$0xff] }
  0xfa   :  { %v284_v55 = vld [vmem:[#allocation5 + $0x13f0] sm:$0xff] }
  0xfb   :  { %2114 = vmatpush2.bf16.msra.mxu0 %v17702_v7  ;;  %v221_v7 = vld [vmem:[#allocation5 + $0xc10] sm:$0xff] }
  0xfc   :  { %2157 = vmatpush2.bf16.msra.mxu1 %v17798_v10  ;;  %2115 = vmatprep.subr.bf16.mxu0 %v17697_v11  ;;  %v17560_v10 = vcombine.low %v131_v58, %v134_v59  ;;  %v215_v11 = vld [vmem:[#allocation5 + $0xb50] sm:$0xff]  ;;  %v17651_v17 = vcombine.high %v221_v7, %v224_v9  ;;  %v17650_v24 = vcombine.low %v221_v7, %v224_v9 }
  0xfd   :  { %2158 = vmatprep.subr.bf16.mxu1 %v17793_v15  ;;  %v17555_v15 = vcombine.high %v125_v3, %v128_v4  ;;  %v179_v59 = vld [vmem:[#allocation5 + $0x6d0] sm:$0xff] }
  0xfe   :  { %v278_v1 = vld [vmem:[#allocation5 + $0x1330] sm:$0xff] }
  0xff   :  { %2116 = vmatpush2.bf16.msra.mxu0 %v17696_v16  ;;  %v311_v16 = vld [vmem:[#allocation5 + $0x1750] sm:$0xff] }
 0x100   :  { %2159 = vmatpush2.bf16.msra.mxu1 %v17792_v20  ;;  %2171 = vmatprep.subr.bf16.mxu0 %v17597_v21  ;;  %v17554_v20 = vcombine.low %v125_v3, %v128_v4  ;;  %v209_v21 = vld [vmem:[#allocation5 + $0xa90] sm:$0xff]  ;;  %v17741_v27 = vcombine.high %v311_v16, %v314_v19 }
 0x101   :  { %2214 = vmatprep.subr.bf16.mxu1 %v17693_v25  ;;  %v17645_v25 = vcombine.high %v215_v11, %v218_v13  ;;  %v173_v4 = vld [vmem:[#allocation5 + $0x610] sm:$0xff] }
 0x102   :  { %2118 = vmatmul.mubr.bf16.vlgmr.msra.gmra.mxu0 %v21947_v34  ;;  %v272_v9 = vld [vmem:[#allocation5 + $0x1270] sm:$0xff] }
 0x103   :  { %2172 = vmatpush1.bf16.msra.mxu0 %v17596_v26  ;;  %2161 = vmatmul.mubr.bf16.vlgmr.msra.gmra.mxu1 %v21941_v18  ;;  %v17680_v18 = vcombine.low %v251_v31, %v254_v33  ;;  %v305_v26 = vld [vmem:[#allocation5 + $0x1690] sm:$0xff]  ;;  %v17740_v31 = vcombine.low %v311_v16, %v314_v19 }
 0x104   :  { %2215 = vmatpush1.bf16.msra.mxu1 %v17692_v29  ;;  %2173 = vmatprep.subr.bf16.mxu0 %v17591_v30  ;;  %v17644_v29 = vcombine.low %v215_v11, %v218_v13  ;;  %v203_v30 = vld [vmem:[#allocation5 + $0x9d0] sm:$0xff]  ;;  %v17735_v33 = vcombine.high %v305_v26, %v308_v28 }
 0x105   :  { %2216 = vmatprep.subr.bf16.mxu1 %v17687_v32  ;;  %2203 = vmatprep.mubr.bf16.mxu0 %v21700_v12  ;;  %v17639_v32 = vcombine.high %v209_v21, %v212_v23  ;;  %v200_v12 = vld [vmem:[#allocation5 + $0x970] sm:$0xff] }
 0x106   :  { %2246 = vmatprep.mubr.bf16.mxu1 %v21701_v43  ;;  %v293_v43 = vld [vmem:[#allocation5 + $0x1510] sm:$0xff]  ;;  %v17627_v47 = vcombine.high %v197_v42, %v200_v12  ;;  %v17626_v49 = vcombine.low %v197_v42, %v200_v12 }
 0x107   :  { %2174 = vmatpush1.bf16.msra.mxu0 %v17590_v35  ;;  %v206_v35 = vld [vmem:[#allocation5 + $0xa30] sm:$0xff] }
 0x108   :  { %2217 = vmatpush1.bf16.msra.mxu1 %v17686_v38  ;;  %2175 = vmatprep.subr.bf16.mxu0 %v17585_v39  ;;  %v17638_v38 = vcombine.low %v209_v21, %v212_v23  ;;  %v17734_v39 = vcombine.low %v305_v26, %v308_v28  ;;  %v17633_v40 = vcombine.high %v203_v30, %v206_v35  ;;  %v359_v13 = vld [vmem:[#allocation5 + $0x1d50] sm:$0xff]  ;;  %v19877_v23 = vld [vmem:[#allocation8 + $0x154] ss:$24 sps:$4 sm:$0xff]   ;;  %v19875_v26 = vld [vmem:[#allocation8 + $0x150] ss:$24 sps:$4 sm:$0xff]  }
 0x109   :  { %2218 = vmatprep.subr.bf16.mxu1 %v17681_v41  ;;  %v17729_v41 = vcombine.high %v299_v36, %v302_v37  ;;  %v17632_v57 = vcombine.low %v203_v30, %v206_v35  ;;  %v356_v21 = vld [vmem:[#allocation5 + $0x1cf0] sm:$0xff] }
 0x10a   :  { %v347_v28 = vld [vmem:[#allocation5 + $0x1bd0] sm:$0xff] }
 0x10b   :  { %2176 = vmatpush1.bf16.msra.mxu0 %v17584_v44  ;;  %v296_v44 = vld [vmem:[#allocation5 + $0x1570] sm:$0xff] }
 0x10c   :  { %2219 = vmatpush1.bf16.msra.mxu1 %v17680_v18  ;;  %2177 = vmatprep.subr.bf16.mxu0 %v17579_v46  ;;  %v194_v18 = vld [vmem:[#allocation5 + $0x8b0] sm:$0xff]  ;;  %v17728_v46 = vcombine.low %v299_v36, %v302_v37 }
 0x10d   :  { %2220 = vmatprep.subr.bf16.mxu1 %v17675_v48  ;;  %v287_v48 = vld [vmem:[#allocation5 + $0x1450] sm:$0xff]  ;;  %v17621_v53 = vcombine.high %v191_v45, %v194_v18  ;;  %v17620_v58 = vcombine.low %v191_v45, %v194_v18 }
 0x10e   :  { %v341_v36 = vld [vmem:[#allocation5 + $0x1b10] sm:$0xff] }
 0x10f   :  { %2178 = vmatpush1.bf16.msra.mxu0 %v17578_v22  ;;  %v17723_v22 = vcombine.high %v293_v43, %v296_v44  ;;  %v344_v37 = vld [vmem:[#allocation5 + $0x1b70] sm:$0xff] }
 0x110   :  { %2221 = vmatpush1.bf16.msra.mxu1 %v17674_v51  ;;  %2179 = vmatprep.subr.bf16.mxu0 %v17573_v52  ;;  %v188_v51 = vld [vmem:[#allocation5 + $0x7f0] sm:$0xff]  ;;  %v17722_v52 = vcombine.low %v293_v43, %v296_v44  ;;  %v17770_v45 = vcombine.low %v341_v36, %v344_v37 }
 0x111   :  { %2222 = vmatprep.subr.bf16.mxu1 %v17669_v54  ;;  %v281_v54 = vld [vmem:[#allocation5 + $0x1390] sm:$0xff]  ;;  %v17615_v63 = vcombine.high %v185_v50, %v188_v51  ;;  %v17614_v3 = vcombine.low %v185_v50, %v188_v51 }
 0x112   :  { %v335_v12 = vld [vmem:[#allocation5 + $0x1a50] sm:$0xff] }
 0x113   :  { %2180 = vmatpush1.bf16.msra.mxu0 %v17572_v56  ;;  %v17717_v56 = vcombine.high %v287_v48, %v290_v60  ;;  %v338_v43 = vld [vmem:[#allocation5 + $0x1ab0] sm:$0xff] }
 0x114   :  { %2223 = vmatpush1.bf16.msra.mxu1 %v17668_v61  ;;  %2181 = vmatprep.subr.bf16.mxu0 %v17567_v62  ;;  %v182_v61 = vld [vmem:[#allocation5 + $0x730] sm:$0xff]  ;;  %v17716_v62 = vcombine.low %v287_v48, %v290_v60  ;;  %v17765_v48 = vcombine.high %v335_v12, %v338_v43  ;;  %v19887_v60 = vld [vmem:[#allocation8 + $0x90] ss:$24 sps:$4 sm:$0xff]  }
 0x115   :  { %2224 = vmatprep.subr.bf16.mxu1 %v17663_v0  ;;  %v275_v0 = vld [vmem:[#allocation5 + $0x12d0] sm:$0xff]  ;;  %v17609_v7 = vcombine.high %v179_v59, %v182_v61  ;;  %v17608_v11 = vcombine.low %v179_v59, %v182_v61  ;;  %v19893_v61 = vld [vmem:[#allocation8 + $0x30] ss:$24 sps:$4 sm:$0xff]  }
 0x116   :  { %v19886_v44 = vld [vmem:[#allocation8 + $0xc4] ss:$24 sps:$4 sm:$0xff]  }
 0x117   :  { %2182 = vmatpush1.bf16.msra.mxu0 %v17566_v2  ;;  %v17711_v2 = vcombine.high %v281_v54, %v284_v55  ;;  %v329_v18 = vld [vmem:[#allocation5 + $0x1990] sm:$0xff] }
 0x118   :  { %2225 = vmatpush1.bf16.msra.mxu1 %v17662_v5  ;;  %2183 = vmatprep.subr.bf16.mxu0 %v17561_v6  ;;  %v176_v5 = vld [vmem:[#allocation5 + $0x670] sm:$0xff]  ;;  %v17710_v6 = vcombine.low %v281_v54, %v284_v55 }
 0x119   :  { %2226 = vmatprep.subr.bf16.mxu1 %v17657_v8  ;;  %v269_v8 = vld [vmem:[#allocation5 + $0x1210] sm:$0xff]  ;;  %v17603_v16 = vcombine.high %v173_v4, %v176_v5  ;;  %v17602_v19 = vcombine.low %v173_v4, %v176_v5 }
 0x11a   :  { %v326_v50 = vld [vmem:[#allocation5 + $0x1930] sm:$0xff] }
 0x11b   :  { %2184 = vmatpush1.bf16.msra.mxu0 %v17560_v10  ;;  %v17705_v10 = vcombine.high %v275_v0, %v278_v1  ;;  %v19892_v51 = vld [vmem:[#allocation8 + $0x64] ss:$24 sps:$4 sm:$0xff]  }
 0x11c   :  { %2227 = vmatpush1.bf16.msra.mxu1 %v17656_v14  ;;  %2185 = vmatprep.subr.bf16.mxu0 %v17555_v15  ;;  %v362_v14 = vld [vmem:[#allocation5 + $0x1db0] sm:$0xff]  ;;  %v17704_v15 = vcombine.low %v275_v0, %v278_v1 }
 0x11d   :  { %2228 = vmatprep.subr.bf16.mxu1 %v17651_v17  ;;  %v17699_v17 = vcombine.high %v269_v8, %v272_v9  ;;  %v317_v55 = vld [vmem:[#allocation5 + $0x1810] sm:$0xff] }
 0x11e   :  { %v410_v0 = vld [vmem:[#allocation5 + $0x23b0] sm:$0xff] }
 0x11f   :  { %2186 = vmatpush1.bf16.msra.mxu0 %v17554_v20  ;;  %v353_v20 = vld [vmem:[#allocation5 + $0x1c90] sm:$0xff] }
 0x120   :  { %2229 = vmatpush1.bf16.msra.mxu1 %v17650_v24  ;;  %2187 = vmatprep.subr.bf16.mxu0 %v17645_v25  ;;  %v17698_v24 = vcombine.low %v269_v8, %v272_v9  ;;  %v17789_v25 = vcombine.high %v359_v13, %v362_v14  ;;  %v17783_v30 = vcombine.high %v353_v20, %v356_v21  ;;  %v19898_v1 = vld [vmem:[#allocation8 + $0x4] ss:$24 sps:$4 sm:$0xff]   ;;  %v19899_v9 = vld [vmem:[#allocation8 + $0x2d0] ss:$24 sps:$4 sm:$0xff]  }
 0x121   :  { %2230 = vmatprep.subr.bf16.mxu1 %v17741_v27  ;;  %v17788_v27 = vcombine.low %v359_v13, %v362_v14  ;;  %v17782_v35 = vcombine.low %v353_v20, %v356_v21  ;;  %v401_v5 = vld [vmem:[#allocation5 + $0x2290] sm:$0xff] }
 0x122   :  { %v398_v13 = vld [vmem:[#allocation5 + $0x2230] sm:$0xff] }
 0x123   :  { %2188 = vmatpush2.bf16.msra.mxu0 %v17644_v29  ;;  %v350_v29 = vld [vmem:[#allocation5 + $0x1c30] sm:$0xff] }
 0x124   :  { %2231 = vmatpush2.bf16.msra.mxu1 %v17740_v31  ;;  %2189 = vmatprep.subr.bf16.mxu0 %v17639_v32  ;;  %v19880_v31 = vld [vmem:[#allocation8 + $0x124] ss:$24 sps:$4 sm:$0xff]   ;;  %v21702_v32 = vld [vmem:[#allocation2] ss:$24 sps:$4 sm:$0xff]   ;;  %v17776_v42 = vcombine.low %v347_v28, %v350_v29 }
 0x125   :  { %2232 = vmatprep.subr.bf16.mxu1 %v17735_v33  ;;  %v19878_v33 = vld [vmem:[#allocation8 + $0x120] ss:$24 sps:$4 sm:$0xff]   ;;  %v19904_v14 = vld [vmem:[#allocation8 + $0x2a4] ss:$24 sps:$4 sm:$0xff]  }
 0x126   :  { %v392_v21 = vld [vmem:[#allocation5 + $0x2170] sm:$0xff] }
 0x127   :  { %2190 = vmatpush2.bf16.msra.mxu0 %v17638_v38  ;;  %v17777_v38 = vcombine.high %v347_v28, %v350_v29  ;;  %v386_v28 = vld [vmem:[#allocation5 + $0x20b0] sm:$0xff] }
 0x128   :  { %2233 = vmatpush2.bf16.msra.mxu1 %v17734_v39  ;;  %2191 = vmatprep.subr.bf16.mxu0 %v17633_v40  ;;  %v19883_v39 = vld [vmem:[#allocation8 + $0xf4] ss:$24 sps:$4 sm:$0xff]   ;;  %v19910_v29 = vld [vmem:[#allocation8 + $0x244] ss:$24 sps:$4 sm:$0xff]  }
 0x129   :  { %2234 = vmatprep.subr.bf16.mxu1 %v17729_v41  ;;  %v21703_v40 = vld [vmem:[#allocation2 + $0x14] ss:$24 sps:$4 sm:$0xff]   ;;  %v19881_v41 = vld [vmem:[#allocation8 + $0xf0] ss:$24 sps:$4 sm:$0xff]  }
 0x12b   :  { %2192 = vmatpush2.bf16.msra.mxu0 %v17632_v57  ;;  %v17771_v57 = vcombine.high %v341_v36, %v344_v37  ;;  %v380_v36 = vld [vmem:[#allocation5 + $0x1ff0] sm:$0xff]  ;;  %v19913_v37 = vld [vmem:[#allocation8 + $0x214] ss:$24 sps:$4 sm:$0xff]  }
 0x12c   :  { %2235 = vmatpush2.bf16.msra.mxu1 %v17728_v46  ;;  %2193 = vmatprep.subr.bf16.mxu0 %v17627_v47  ;;  %v332_v46 = vld [vmem:[#allocation5 + $0x19f0] sm:$0xff]  ;;  %v19889_v47 = vld [vmem:[#allocation8 + $0x94] ss:$24 sps:$4 sm:$0xff]  }
 0x12d   :  { %2236 = vmatprep.subr.bf16.mxu1 %v17723_v22  ;;  %v17764_v22 = vcombine.low %v335_v12, %v338_v43  ;;  %v17758_v54 = vcombine.low %v329_v18, %v332_v46  ;;  %v374_v12 = vld [vmem:[#allocation5 + $0x1f30] sm:$0xff] }
 0x12e   :  { %v19916_v43 = vld [vmem:[#allocation8 + $0x1e4] ss:$24 sps:$4 sm:$0xff]  }
 0x12f   :  { %2194 = vmatpush2.bf16.msra.mxu0 %v17626_v49  ;;  %v323_v49 = vld [vmem:[#allocation5 + $0x18d0] sm:$0xff] }
 0x130   :  { %2237 = vmatpush2.bf16.msra.mxu1 %v17722_v52  ;;  %2195 = vmatprep.subr.bf16.mxu0 %v17621_v53  ;;  %v17759_v52 = vcombine.high %v329_v18, %v332_v46  ;;  %v19890_v53 = vld [vmem:[#allocation8 + $0x60] ss:$24 sps:$4 sm:$0xff]   ;;  %v17753_v59 = vcombine.high %v323_v49, %v326_v50 }
 0x131   :  { %2238 = vmatprep.subr.bf16.mxu1 %v17717_v56  ;;  %v320_v56 = vld [vmem:[#allocation5 + $0x1870] sm:$0xff] }
 0x132   :  { %v17746_v4 = vcombine.low %v317_v55, %v320_v56 }
 0x133   :  { %2196 = vmatpush2.bf16.msra.mxu0 %v17620_v58  ;;  %v19895_v58 = vld [vmem:[#allocation8 + $0x34] ss:$24 sps:$4 sm:$0xff]  }
 0x134   :  { %2239 = vmatpush2.bf16.msra.mxu1 %v17716_v62  ;;  %2197 = vmatprep.subr.bf16.mxu0 %v17615_v63  ;;  %v17752_v62 = vcombine.low %v323_v49, %v326_v50  ;;  %v407_v63 = vld [vmem:[#allocation5 + $0x2350] sm:$0xff] }
 0x135   :  { %2240 = vmatprep.subr.bf16.mxu1 %v17711_v2  ;;  %v17747_v2 = vcombine.high %v317_v55, %v320_v56  ;;  %v17837_v8 = vcombine.high %v407_v63, %v410_v0  ;;  %v19922_v55 = vld [vmem:[#allocation8 + $0x184] ss:$24 sps:$4 sm:$0xff]   ;;  %v19920_v56 = vld [vmem:[#allocation8 + $0x180] ss:$24 sps:$4 sm:$0xff]  }
 0x137   :  { %2198 = vmatpush2.bf16.msra.mxu0 %v17614_v3  ;;  %v19896_v3 = vld [vmem:[#allocation8] ss:$24 sps:$4 sm:$0xff]  }
 0x138   :  { %2241 = vmatpush2.bf16.msra.mxu1 %v17710_v6  ;;  %2199 = vmatprep.subr.bf16.mxu0 %v17609_v7  ;;  %v404_v6 = vld [vmem:[#allocation5 + $0x22f0] sm:$0xff]  ;;  %v19901_v7 = vld [vmem:[#allocation8 + $0x2d4] ss:$24 sps:$4 sm:$0xff]  }
 0x139   :  { %2242 = vmatprep.subr.bf16.mxu1 %v17705_v10  ;;  %v17836_v10 = vcombine.low %v407_v63, %v410_v0 }
 0x13b   :  { %2200 = vmatpush2.bf16.msra.mxu0 %v17608_v11  ;;  %v395_v11 = vld [vmem:[#allocation5 + $0x21d0] sm:$0xff] }
 0x13c   :  { %2243 = vmatpush2.bf16.msra.mxu1 %v17704_v15  ;;  %2201 = vmatprep.subr.bf16.mxu0 %v17603_v16  ;;  %v17831_v15 = vcombine.high %v401_v5, %v404_v6  ;;  %v17830_v16 = vcombine.low %v401_v5, %v404_v6  ;;  %v17825_v20 = vcombine.high %v395_v11, %v398_v13 }
 0x13d   :  { %2244 = vmatprep.subr.bf16.mxu1 %v17699_v17  ;;  %v389_v17 = vld [vmem:[#allocation5 + $0x2110] sm:$0xff] }
 0x13f   :  { %2202 = vmatpush2.bf16.msra.mxu0 %v17602_v19  ;;  %v19902_v19 = vld [vmem:[#allocation8 + $0x2a0] ss:$24 sps:$4 sm:$0xff]  }
 0x140   :  { %2245 = vmatpush2.bf16.msra.mxu1 %v17698_v24  ;;  %2257 = vmatprep.subr.bf16.mxu0 %v17789_v25  ;;  %v19905_v24 = vld [vmem:[#allocation8 + $0x270] ss:$24 sps:$4 sm:$0xff]   ;;  %v17824_v25 = vcombine.low %v395_v11, %v398_v13 }
 0x141   :  { %4094 = vmatprep.subr.bf16.mxu1 %v19877_v23  ;;  %v19907_v23 = vld [vmem:[#allocation8 + $0x274] ss:$24 sps:$4 sm:$0xff]  }
 0x142   :  { %2204 = vmatmul.mubr.bf16.vlgmr.msra.gmra.mxu0 %v21702_v32  ;;  %v377_v32 = vld [vmem:[#allocation5 + $0x1f90] sm:$0xff]  ;;  %v1947_v18 = vpop.f32.mrf.mxu0 }
 0x143   :  { %2258 = vmatpush1.bf16.msra.mxu0 %v17788_v27  ;;  %2247 = vmatmul.mubr.bf16.vlgmr.msra.gmra.mxu1 %v21947_v34  ;;  %v19884_v34 = vld [vmem:[#allocation8 + $0xc0] ss:$24 sps:$4 sm:$0xff]   ;;  %v17819_v27 = vcombine.high %v389_v17, %v392_v21 }
 0x144   :  { %2259 = vmatprep.subr.bf16.mxu0 %v17783_v30  ;;  %4095 = vmatpush1.bf16.msra.mxu1 %v19875_v26  ;;  %v383_v26 = vld [vmem:[#allocation5 + $0x2050] sm:$0xff] }
 0x145   :  { %4096 = vmatprep.subr.bf16.mxu1 %v19880_v31  ;;  %2289 = vmatprep.mubr.bf16.mxu0 %v21703_v40  ;;  %v19908_v30 = vld [vmem:[#allocation8 + $0x240] ss:$24 sps:$4 sm:$0xff]   ;;  %v17818_v31 = vcombine.low %v389_v17, %v392_v21 }
 0x146   :  { %v371_v40 = vld [vmem:[#allocation5 + $0x1ed0] sm:$0xff] }
 0x147   :  { %2260 = vmatpush1.bf16.msra.mxu0 %v17782_v35  ;;  %v93_v35 = vlaneseq  ;;  %v17801_v46 = vcombine.high %v371_v40, %v374_v12  ;;  %v17800_v50 = vcombine.low %v371_v40, %v374_v12  ;;  %v19941_v40 = vld [vmem:[#allocation8 + $0x330] ss:$24 sps:$4 sm:$0xff]   ;;  %v19946_v12 = vld [vmem:[#allocation8 + $0x304] ss:$24 sps:$4 sm:$0xff]  }
 0x148   :  { %2261 = vmatprep.subr.bf16.mxu0 %v17777_v38  ;;  %4097 = vmatpush1.bf16.msra.mxu1 %v19878_v33  ;;  %v17813_v33 = vcombine.high %v383_v26, %v386_v28  ;;  %v19911_v38 = vld [vmem:[#allocation8 + $0x210] ss:$24 sps:$4 sm:$0xff]  }
 0x149   :  { %4098 = vmatprep.subr.bf16.mxu1 %v19883_v39  ;;  %v17812_v39 = vcombine.low %v383_v26, %v386_v28  ;;  %v19934_v28 = vld [vmem:[#allocation8 + $0x3c4] ss:$24 sps:$4 sm:$0xff]  }
 0x14b   :  { %2262 = vmatpush1.bf16.msra.mxu0 %v17776_v42  ;;  %v21952_v42 = vshrl.u32 %v93_v35, 7  ;;  %v19937_v35 = vld [vmem:[#allocation8 + $0x394] ss:$24 sps:$4 sm:$0xff]  }
 0x14c   :  { %2263 = vmatprep.subr.bf16.mxu0 %v17771_v57  ;;  %4099 = vmatpush1.bf16.msra.mxu1 %v19881_v41  ;;  %v17807_v41 = vcombine.high %v377_v32, %v380_v36  ;;  %v17806_v57 = vcombine.low %v377_v32, %v380_v36  ;;  %v19932_v32 = vld [vmem:[#allocation8 + $0x3c0] ss:$24 sps:$4 sm:$0xff]   ;;  %v19935_v36 = vld [vmem:[#allocation8 + $0x390] ss:$24 sps:$4 sm:$0xff]  }
 0x14d   :  { %4100 = vmatprep.subr.bf16.mxu1 %v19886_v44  ;;  %v19914_v44 = vld [vmem:[#allocation8 + $0x1e0] ss:$24 sps:$4 sm:$0xff]   ;;  %v21960_v49 = vsub.s32 1, %v21952_v42 }
 0x14f   :  { %2264 = vmatpush1.bf16.msra.mxu0 %v17770_v45  ;;  %v21954_v45 = vld [vmem:[#allocation7] sm:$0x3f] }
 0x150   :  { %2265 = vmatprep.subr.bf16.mxu0 %v17765_v48  ;;  %4101 = vmatpush1.bf16.msra.mxu1 %v19884_v34  ;;  %v365_v34 = vld [vmem:[#allocation5 + $0x1e10] sm:$0xff] }
 0x151   :  { %4102 = vmatprep.subr.bf16.mxu1 %v19889_v47  ;;  %v21957_v47 = vsub.s32 0, %v21952_v42  ;;  %v368_v48 = vld [vmem:[#allocation5 + $0x1e70] sm:$0xff] }
 0x153   :  { %2266 = vmatpush1.bf16.msra.mxu0 %v17764_v22  ;;  %v19917_v22 = vld [vmem:[#allocation8 + $0x1b0] ss:$24 sps:$4 sm:$0xff]  }
 0x154   :  { %2267 = vmatprep.subr.bf16.mxu0 %v17759_v52  ;;  %4103 = vmatpush1.bf16.msra.mxu1 %v19887_v60  ;;  %v19919_v60 = vld [vmem:[#allocation8 + $0x1b4] ss:$24 sps:$4 sm:$0xff]   ;;  %v1990_v52 = vpop.f32.mrf.mxu1 }
 0x155   :  { %4104 = vmatprep.subr.bf16.mxu1 %v19892_v51  ;;  %v1949_v51 = vpop.f32.mrf.mxu0 }
 0x156   :  { %v1992_v63 = vpop.f32.mrf.mxu1 }
 0x157   :  { %2268 = vmatpush1.bf16.msra.mxu0 %v17758_v54  ;;  %v416_v54 = vrot.slane %v21954_v45, %v21957_v47 }
 0x158   :  { %2269 = vmatprep.subr.bf16.mxu0 %v17753_v59  ;;  %4105 = vmatpush1.bf16.msra.mxu1 %v19890_v53  ;;  %v17795_v53 = vcombine.high %v365_v34, %v368_v48  ;;  %v420_v59 = vrot.slane %v21954_v45, %v21960_v49  ;;  %v1994_v5 = vpop.f32.mrf.mxu1 }
 0x159   :  { %4106 = vmatprep.subr.bf16.mxu1 %v19895_v58  ;;  %v19925_v58 = vld [vmem:[#allocation8 + $0x454] ss:$24 sps:$4 sm:$0xff]   ;;  %v1948_v0 = vadd.f32 %v1947_v18, %v416_v54  ;;  %v19944_v18 = vld [vmem:[#allocation8 + $0x300] ss:$24 sps:$4 sm:$0xff]  }
 0x15b   :  { %2270 = vmatpush1.bf16.msra.mxu0 %v17752_v62  ;;  %v1951_v62 = vpop.f32.mrf.mxu0  ;;  %v1991_v6 = vadd.f32 %v1990_v52, %v1948_v0  ;;  %v20021_v0 = vld [vmem:[#allocation8 + $0x754] ss:$24 sps:$4 sm:$0xff]  }
 0x15c   :  { %2271 = vmatprep.subr.bf16.mxu0 %v17747_v2  ;;  %4107 = vmatpush1.bf16.msra.mxu1 %v19893_v61  ;;  %v17794_v61 = vcombine.low %v365_v34, %v368_v48  ;;  %v19928_v2 = vld [vmem:[#allocation8 + $0x424] ss:$24 sps:$4 sm:$0xff]  }
 0x15d   :  { %4108 = vmatprep.subr.bf16.mxu1 %v19898_v1  ;;  %v19923_v1 = vld [vmem:[#allocation8 + $0x450] ss:$24 sps:$4 sm:$0xff]  }
 0x15f   :  { %2272 = vmatpush1.bf16.msra.mxu0 %v17746_v4  ;;  %v1953_v4 = vpop.f32.mrf.mxu0 }
 0x160   :  { %2273 = vmatprep.subr.bf16.mxu0 %v17837_v8  ;;  %4109 = vmatpush1.bf16.msra.mxu1 %v19896_v3  ;;  %v1950_v3 = vadd.f32 %v1949_v51, %v420_v59  ;;  %v1954_v13 = vadd.f32 %v1953_v4, %v420_v59  ;;  %v20027_v4 = vld [vmem:[#allocation8 + $0x724] ss:$24 sps:$4 sm:$0xff]  }
 0x161   :  { %4110 = vmatprep.subr.bf16.mxu1 %v19901_v7  ;;  %v1952_v7 = vadd.f32 %v1951_v62, %v416_v54 }
 0x162   :  { %v1993_v11 = vadd.f32 %v1992_v63, %v1950_v3  ;;  %v19955_v3 = vld [vmem:[#allocation8 + $0x574] ss:$24 sps:$4 sm:$0xff]  }
 0x163   :  { %2274 = vmatpush2.bf16.msra.mxu0 %v17836_v10  ;;  %v19926_v10 = vld [vmem:[#allocation8 + $0x420] ss:$24 sps:$4 sm:$0xff]  }
 0x164   :  { %2275 = vmatprep.subr.bf16.mxu0 %v17831_v15  ;;  %4111 = vmatpush2.bf16.msra.mxu1 %v19899_v9  ;;  %v21704_v9 = vld [vmem:[#allocation2 + $0x10] ss:$24 sps:$4 sm:$0xff]   ;;  %v19931_v15 = vld [vmem:[#allocation8 + $0x3f4] ss:$24 sps:$4 sm:$0xff]  }
 0x165   :  { %4112 = vmatprep.subr.bf16.mxu1 %v19904_v14 }
 0x167   :  { %2276 = vmatpush2.bf16.msra.mxu0 %v17830_v16  ;;  %v1996_v16 = vpop.f32.mrf.mxu1 }
 0x168   :  { %2277 = vmatprep.subr.bf16.mxu0 %v17825_v20  ;;  %4113 = vmatpush2.bf16.msra.mxu1 %v19902_v19  ;;  %v1995_v19 = vadd.f32 %v1994_v5, %v1952_v7  ;;  %v19953_v5 = vld [vmem:[#allocation8 + $0x570] ss:$24 sps:$4 sm:$0xff]   ;;  %v19958_v7 = vld [vmem:[#allocation8 + $0x544] ss:$24 sps:$4 sm:$0xff]  }
 0x169   :  { %4114 = vmatprep.subr.bf16.mxu1 %v19907_v23 }
 0x16b   :  { %2278 = vmatpush2.bf16.msra.mxu0 %v17824_v25  ;;  %v1997_v25 = vadd.f32 %v1996_v16, %v1954_v13  ;;  %v20039_v13 = vld [vmem:[#allocation8 + $0x6c4] ss:$24 sps:$4 sm:$0xff]  }
 0x16c   :  { %2279 = vmatprep.subr.bf16.mxu0 %v17819_v27  ;;  %4115 = vmatpush2.bf16.msra.mxu1 %v19905_v24  ;;  %v19929_v24 = vld [vmem:[#allocation8 + $0x3f0] ss:$24 sps:$4 sm:$0xff]   ;;  %v19964_v16 = vld [vmem:[#allocation8 + $0x4e4] ss:$24 sps:$4 sm:$0xff]  }
 0x16d   :  { %4116 = vmatprep.subr.bf16.mxu1 %v19910_v29 }
 0x16f   :  { %2280 = vmatpush2.bf16.msra.mxu0 %v17818_v31 }
 0x170   :  { %2281 = vmatprep.subr.bf16.mxu0 %v17813_v33  ;;  %4117 = vmatpush2.bf16.msra.mxu1 %v19908_v30 }
 0x171   :  { %4118 = vmatprep.subr.bf16.mxu1 %v19913_v37  ;;  %v19940_v37 = vld [vmem:[#allocation8 + $0x364] ss:$24 sps:$4 sm:$0xff]  }
 0x173   :  { %2282 = vmatpush2.bf16.msra.mxu0 %v17812_v39  ;;  %v19943_v39 = vld [vmem:[#allocation8 + $0x334] ss:$24 sps:$4 sm:$0xff]  }
 0x174   :  { %2283 = vmatprep.subr.bf16.mxu0 %v17807_v41  ;;  %4119 = vmatpush2.bf16.msra.mxu1 %v19911_v38  ;;  %v19938_v38 = vld [vmem:[#allocation8 + $0x360] ss:$24 sps:$4 sm:$0xff]  }
 0x175   :  { %4120 = vmatprep.subr.bf16.mxu1 %v19916_v43 }
 0x177   :  { %2284 = vmatpush2.bf16.msra.mxu0 %v17806_v57 }
 0x178   :  { %2285 = vmatprep.subr.bf16.mxu0 %v17801_v46  ;;  %4121 = vmatpush2.bf16.msra.mxu1 %v19914_v44 }
 0x179   :  { %4122 = vmatprep.subr.bf16.mxu1 %v19919_v60 }
 0x17b   :  { %2286 = vmatpush2.bf16.msra.mxu0 %v17800_v50 }
 0x17c   :  { %2287 = vmatprep.subr.bf16.mxu0 %v17795_v53  ;;  %4123 = vmatpush2.bf16.msra.mxu1 %v19917_v22  ;;  %v19949_v22 = vld [vmem:[#allocation8 + $0x5d4] ss:$24 sps:$4 sm:$0xff]  }
 0x17d   :  { %4124 = vmatprep.subr.bf16.mxu1 %v19922_v55 }
 0x17f   :  { %2288 = vmatpush2.bf16.msra.mxu0 %v17794_v61  ;;  %v19952_v61 = vld [vmem:[#allocation8 + $0x5a4] ss:$24 sps:$4 sm:$0xff]  }
 0x180   :  { %4125 = vmatpush2.bf16.msra.mxu1 %v19920_v56  ;;  %4137 = vmatprep.subr.bf16.mxu0 %v19925_v58  ;;  %v19947_v58 = vld [vmem:[#allocation8 + $0x5d0] ss:$24 sps:$4 sm:$0xff]  }
 0x181   :  { %4180 = vmatprep.subr.bf16.mxu1 %v20021_v0  ;;  %v20081_v0 = vld [vmem:[#allocation8 + $0x874] ss:$24 sps:$4 sm:$0xff]  }
 0x182   :  { %v2033_v8 = vpop.f32.mrf.mxu0  ;;  %2290 = vmatmul.mubr.bf16.vlgmr.msra.gmra.mxu0 %v21704_v9  ;;  %v19956_v9 = vld [vmem:[#allocation8 + $0x540] ss:$24 sps:$4 sm:$0xff]  }
 0x183   :  { %v2034_v14 = vadd.f32 %v2033_v8, %v1991_v6  ;;  %4138 = vmatpush1.bf16.msra.mxu0 %v19923_v1  ;;  %v20019_v1 = vld [vmem:[#allocation8 + $0x750] ss:$24 sps:$4 sm:$0xff]   ;;  %v20025_v6 = vld [vmem:[#allocation8 + $0x720] ss:$24 sps:$4 sm:$0xff]   ;;  %v20033_v8 = vld [vmem:[#allocation8 + $0x6f4] ss:$24 sps:$4 sm:$0xff]  }
 0x184   :  { %v2035_v17 = vpop.f32.mrf.mxu0  ;;  %4139 = vmatprep.subr.bf16.mxu0 %v19928_v2  ;;  %v19950_v2 = vld [vmem:[#allocation8 + $0x5a0] ss:$24 sps:$4 sm:$0xff]  }
 0x185   :  { %v2036_v20 = vadd.f32 %v2035_v17, %v1993_v11  ;;  %v2312_v21 = vmul.f32 0.70710677, %v2034_v14  ;;  %v2300_v53 = vmul.f32 0.5, %v2034_v14  ;;  %v19961_v11 = vld [vmem:[#allocation8 + $0x514] ss:$24 sps:$4 sm:$0xff]  }
 0x186   :  { %v2037_v23 = vpop.f32.mrf.mxu0  ;;  %v19959_v14 = vld [vmem:[#allocation8 + $0x510] ss:$24 sps:$4 sm:$0xff]   ;;  %v20045_v17 = vld [vmem:[#allocation8 + $0x694] ss:$24 sps:$4 sm:$0xff]  }
 0x187   :  { %v2313_v26 = vmul.f32 0.70710677, %v2036_v20  ;;  %v2038_v27 = vadd.f32 %v2037_v23, %v1995_v19  ;;  %4140 = vmatpush1.bf16.msra.mxu0 %v19926_v10  ;;  %v2301_v50 = vmul.f32 0.5, %v2036_v20  ;;  %v20031_v10 = vld [vmem:[#allocation8 + $0x6f0] ss:$24 sps:$4 sm:$0xff]   ;;  %v2076_v23 = vpop.f32.mrf.mxu1 }
 0x188   :  { %v2039_v29 = vpop.f32.mrf.mxu0  ;;  %4141 = vmatprep.subr.bf16.mxu0 %v19931_v15  ;;  %v20037_v15 = vld [vmem:[#allocation8 + $0x6c0] ss:$24 sps:$4 sm:$0xff]   ;;  %v20043_v20 = vld [vmem:[#allocation8 + $0x690] ss:$24 sps:$4 sm:$0xff]  }
 0x189   :  { %21603 = verf.f32 %v2313_v26  ;;  %v2318_v30 = vmul.f32 0.70710677, %v2038_v27  ;;  %v2040_v31 = vadd.f32 %v2039_v29, %v1997_v25  ;;  %v2306_v60 = vmul.f32 0.5, %v2038_v27  ;;  %v19962_v19 = vld [vmem:[#allocation8 + $0x4e0] ss:$24 sps:$4 sm:$0xff]   ;;  %v2078_v29 = vpop.f32.mrf.mxu1 }
 0x18a   :  { %21605 = verf.f32 %v2312_v21  ;;  %v19967_v21 = vld [vmem:[#allocation8 + $0x4b4] ss:$24 sps:$4 sm:$0xff]   ;;  %v19965_v25 = vld [vmem:[#allocation8 + $0x4b0] ss:$24 sps:$4 sm:$0xff]   ;;  %v20049_v26 = vld [vmem:[#allocation8 + $0x660] ss:$24 sps:$4 sm:$0xff]  }
 0x18b   :  { %21607 = verf.f32 %v2318_v30  ;;  %v2319_v33 = vmul.f32 0.70710677, %v2040_v31  ;;  %4142 = vmatpush1.bf16.msra.mxu0 %v19929_v24  ;;  %v2307_v51 = vmul.f32 0.5, %v2040_v31  ;;  %v20051_v24 = vld [vmem:[#allocation8 + $0x664] ss:$24 sps:$4 sm:$0xff]   ;;  %v21976_v31 = vsub.s32 3, %v21952_v42 }
 0x18c   :  { %4143 = vmatprep.subr.bf16.mxu0 %v19934_v28  ;;  %v19970_v27 = vld [vmem:[#allocation8 + $0x484] ss:$24 sps:$4 sm:$0xff]   ;;  %v21973_v28 = vsub.s32 2, %v21952_v42  ;;  %v20057_v30 = vld [vmem:[#allocation8 + $0x634] ss:$24 sps:$4 sm:$0xff]  }
 0x18d   :  { %21609 = verf.f32 %v2319_v33  ;;  %v20055_v33 = vld [vmem:[#allocation8 + $0x630] ss:$24 sps:$4 sm:$0xff]  }
 0x18f   :  { %4144 = vmatpush1.bf16.msra.mxu0 %v19932_v32  ;;  %v19968_v32 = vld [vmem:[#allocation8 + $0x480] ss:$24 sps:$4 sm:$0xff]  }
 0x190   :  { %4145 = vmatprep.subr.bf16.mxu0 %v19937_v35  ;;  %v19973_v35 = vld [vmem:[#allocation8 + $0x15c] ss:$24 sps:$4 sm:$0xff]  }
 0x193   :  { %4146 = vmatpush1.bf16.msra.mxu0 %v19935_v36  ;;  %v424_v36 = vrot.slane %v21954_v45, %v21973_v28 }
 0x194   :  { %4147 = vmatprep.subr.bf16.mxu0 %v19940_v37  ;;  %v2080_v37 = vpop.f32.mrf.mxu1 }
 0x196   :  { %v21604_v41 = vpop.eup %21603 }
 0x197   :  { %v21606_v43 = vpop.eup %21605  ;;  %4148 = vmatpush1.bf16.msra.mxu0 %v19938_v38  ;;  %v2337_v57 = vadd.f32 1.0, %v21604_v41  ;;  %v20063_v38 = vld [vmem:[#allocation8 + $0x604] ss:$24 sps:$4 sm:$0xff]   ;;  %v2077_v41 = vadd.f32 %v2076_v23, %v424_v36 }
 0x198   :  { %v21608_v44 = vpop.eup %21607  ;;  %4149 = vmatprep.subr.bf16.mxu0 %v19943_v39  ;;  %v2336_v48 = vadd.f32 1.0, %v21606_v43  ;;  %v428_v39 = vrot.slane %v21954_v45, %v21976_v31  ;;  %v20069_v43 = vld [vmem:[#allocation8 + $0x8d4] ss:$24 sps:$4 sm:$0xff]  }
 0x199   :  { %v2342_v34 = vadd.f32 1.0, %v21608_v44  ;;  %v2349_v55 = vmul.f32 %v2337_v57, %v2301_v50  ;;  %v20067_v57 = vld [vmem:[#allocation8 + $0x8d0] ss:$24 sps:$4 sm:$0xff]  }
 0x19a   :  { %v21610_v46 = vpop.eup %21609  ;;  %v2348_v59 = vmul.f32 %v2336_v48, %v2300_v53  ;;  %v2079_v44 = vadd.f32 %v2078_v29, %v428_v39  ;;  %v20111_v29 = vld [vmem:[#allocation8 + $0x784] ss:$24 sps:$4 sm:$0xff]  }
 0x19b   :  { %v2343_v52 = vadd.f32 1.0, %v21610_v46  ;;  %4150 = vmatpush1.bf16.msra.mxu0 %v19941_v40  ;;  %v2354_v54 = vmul.f32 %v2342_v34, %v2306_v60  ;;  %v20061_v40 = vld [vmem:[#allocation8 + $0x600] ss:$24 sps:$4 sm:$0xff]   ;;  %v20075_v60 = vld [vmem:[#allocation8 + $0x8a4] ss:$24 sps:$4 sm:$0xff]  }
 0x19c   :  { %4151 = vmatprep.subr.bf16.mxu0 %v19946_v12  ;;  %v2082_v12 = vpop.f32.mrf.mxu1 }
 0x19d   :  { %v2355_v56 = vmul.f32 %v2343_v52, %v2307_v51  ;;  %v21968_v63 = vpack.c.bf16 %v2354_v54, %v2348_v59  ;;  %v20073_v52 = vld [vmem:[#allocation8 + $0x8a0] ss:$24 sps:$4 sm:$0xff]   ;;  %v2083_v54 = vadd.f32 %v2082_v12, %v428_v39 }
 0x19f   :  { %v21966_v62 = vpack.c.bf16 %v2355_v56, %v2349_v55  ;;  %4152 = vmatpush1.bf16.msra.mxu0 %v19944_v18 }
 0x1a0   :  { %4153 = vmatprep.subr.bf16.mxu0 %v19949_v22  ;;  %v2081_v22 = vadd.f32 %v2080_v37, %v424_v36 }
 0x1a1   :  { %4126 = vmatprep.mubr.bf16.mxu1 %v21966_v62 }
 0x1a2   :  { %4127 = vmatmul.mubr.bf16.vlgmr.msra.gmra.mxu1 %v21968_v63 }
 0x1a3   :  { %4154 = vmatpush2.bf16.msra.mxu0 %v19947_v58  ;;  %4181 = vmatpush1.bf16.msra.mxu1 %v20019_v1 }
 0x1a4   :  { %4155 = vmatprep.subr.bf16.mxu0 %v19952_v61  ;;  %4182 = vmatprep.subr.bf16.mxu1 %v20027_v4  ;;  %v20079_v4 = vld [vmem:[#allocation8 + $0x870] ss:$24 sps:$4 sm:$0xff]  }
 0x1a7   :  { %4156 = vmatpush2.bf16.msra.mxu0 %v19950_v2  ;;  %4183 = vmatpush1.bf16.msra.mxu1 %v20025_v6 }
 0x1a8   :  { %4157 = vmatprep.subr.bf16.mxu0 %v19955_v3  ;;  %4184 = vmatprep.subr.bf16.mxu1 %v20033_v8  ;;  %v20087_v8 = vld [vmem:[#allocation8 + $0x844] ss:$24 sps:$4 sm:$0xff]  }
 0x1ab   :  { %4158 = vmatpush2.bf16.msra.mxu0 %v19953_v5  ;;  %4185 = vmatpush1.bf16.msra.mxu1 %v20031_v10  ;;  %v20085_v10 = vld [vmem:[#allocation8 + $0x840] ss:$24 sps:$4 sm:$0xff]  }
 0x1ac   :  { %4159 = vmatprep.subr.bf16.mxu0 %v19958_v7  ;;  %4186 = vmatprep.subr.bf16.mxu1 %v20039_v13  ;;  %v20091_v13 = vld [vmem:[#allocation8 + $0x810] ss:$24 sps:$4 sm:$0xff]  }
 0x1af   :  { %4160 = vmatpush2.bf16.msra.mxu0 %v19956_v9  ;;  %4187 = vmatpush1.bf16.msra.mxu1 %v20037_v15  ;;  %v20097_v15 = vld [vmem:[#allocation8 + $0x7e0] ss:$24 sps:$4 sm:$0xff]  }
 0x1b0   :  { %4161 = vmatprep.subr.bf16.mxu0 %v19961_v11  ;;  %4188 = vmatprep.subr.bf16.mxu1 %v20045_v17  ;;  %v20093_v11 = vld [vmem:[#allocation8 + $0x814] ss:$24 sps:$4 sm:$0xff]  }
 0x1b1   :  { %v20105_v17 = vld [vmem:[#allocation8 + $0x7b4] ss:$24 sps:$4 sm:$0xff]  }
 0x1b3   :  { %4162 = vmatpush2.bf16.msra.mxu0 %v19959_v14  ;;  %4189 = vmatpush1.bf16.msra.mxu1 %v20043_v20  ;;  %v20099_v14 = vld [vmem:[#allocation8 + $0x7e4] ss:$24 sps:$4 sm:$0xff]   ;;  %v20103_v20 = vld [vmem:[#allocation8 + $0x7b0] ss:$24 sps:$4 sm:$0xff]  }
 0x1b4   :  { %4163 = vmatprep.subr.bf16.mxu0 %v19964_v16  ;;  %4190 = vmatprep.subr.bf16.mxu1 %v20051_v24 }
 0x1b7   :  { %4164 = vmatpush2.bf16.msra.mxu0 %v19962_v19  ;;  %4191 = vmatpush1.bf16.msra.mxu1 %v20049_v26 }
 0x1b8   :  { %4165 = vmatprep.subr.bf16.mxu0 %v19967_v21  ;;  %4192 = vmatprep.subr.bf16.mxu1 %v20057_v30 }
 0x1bb   :  { %4166 = vmatpush2.bf16.msra.mxu0 %v19965_v25  ;;  %4193 = vmatpush1.bf16.msra.mxu1 %v20055_v33 }
 0x1bc   :  { %4167 = vmatprep.subr.bf16.mxu0 %v19970_v27  ;;  %4194 = vmatprep.subr.bf16.mxu1 %v20063_v38 }
 0x1bf   :  { %4168 = vmatpush2.bf16.msra.mxu0 %v19968_v32  ;;  %4195 = vmatpush1.bf16.msra.mxu1 %v20061_v40 }
 0x1c0   :  { %4223 = vmatprep.subr.bf16.mxu0 %v19973_v35  ;;  %4196 = vmatprep.subr.bf16.mxu1 %v20069_v43  ;;  %v20109_v35 = vld [vmem:[#allocation8 + $0x780] ss:$24 sps:$4 sm:$0xff]  }
 0x1c1   :  { %v19971_v43 = vld [vmem:[#allocation8 + $0x158] ss:$24 sps:$4 sm:$0xff]  }
 0x1c2   :  { %v2119_v34 = vpop.f32.mrf.mxu0 }
 0x1c3   :  { %v2120_v18 = vadd.f32 %v2119_v34, %v2077_v41  ;;  %v2162_v46 = vpop.f32.mrf.mxu1  ;;  %4197 = vmatpush2.bf16.msra.mxu1 %v20067_v57  ;;  %v20117_v41 = vld [vmem:[#allocation8 + $0x45c] ss:$24 sps:$4 sm:$0xff]   ;;  %v19976_v57 = vld [vmem:[#allocation8 + $0x12c] ss:$24 sps:$4 sm:$0xff]   ;;  %v19974_v34 = vld [vmem:[#allocation8 + $0x128] ss:$24 sps:$4 sm:$0xff]  }
 0x1c4   :  { %v2121_v48 = vpop.f32.mrf.mxu0  ;;  %4198 = vmatprep.subr.bf16.mxu1 %v20075_v60  ;;  %v19980_v60 = vld [vmem:[#allocation8 + $0xc8] ss:$24 sps:$4 sm:$0xff]  }
 0x1c5   :  { %v2122_v50 = vadd.f32 %v2121_v48, %v2079_v44  ;;  %v2163_v45 = vadd.f32 %v2162_v46, %v2120_v18  ;;  %v2164_v51 = vpop.f32.mrf.mxu1  ;;  %v19979_v18 = vld [vmem:[#allocation8 + $0xfc] ss:$24 sps:$4 sm:$0xff]   ;;  %v19977_v46 = vld [vmem:[#allocation8 + $0xf8] ss:$24 sps:$4 sm:$0xff]   ;;  %v19982_v48 = vld [vmem:[#allocation8 + $0xcc] ss:$24 sps:$4 sm:$0xff]  }
 0x1c6   :  { %v2123_v53 = vpop.f32.mrf.mxu0 }
 0x1c7   :  { %v2124_v55 = vadd.f32 %v2123_v53, %v2081_v22  ;;  %v2165_v56 = vadd.f32 %v2164_v51, %v2122_v50  ;;  %v2166_v58 = vpop.f32.mrf.mxu1  ;;  %4199 = vmatpush2.bf16.msra.mxu1 %v20073_v52  ;;  %v2314_v59 = vmul.f32 0.70710677, %v2163_v45  ;;  %v2302_v36 = vmul.f32 0.5, %v2163_v45  ;;  %v19985_v22 = vld [vmem:[#allocation8 + $0x9c] ss:$24 sps:$4 sm:$0xff]  }
 0x1c8   :  { %v2125_v61 = vpop.f32.mrf.mxu0  ;;  %4200 = vmatprep.subr.bf16.mxu1 %v20081_v0  ;;  %v19983_v50 = vld [vmem:[#allocation8 + $0x98] ss:$24 sps:$4 sm:$0xff]   ;;  %v19988_v45 = vld [vmem:[#allocation8 + $0x6c] ss:$24 sps:$4 sm:$0xff]   ;;  %v19986_v51 = vld [vmem:[#allocation8 + $0x68] ss:$24 sps:$4 sm:$0xff]  }
 0x1c9   :  { %v2315_v1 = vmul.f32 0.70710677, %v2165_v56  ;;  %v2126_v2 = vadd.f32 %v2125_v61, %v2083_v54  ;;  %v2168_v3 = vpop.f32.mrf.mxu1  ;;  %v2167_v5 = vadd.f32 %v2166_v58, %v2124_v55  ;;  %v2303_v30 = vmul.f32 0.5, %v2165_v56  ;;  %v19991_v52 = vld [vmem:[#allocation8 + $0x3c] ss:$24 sps:$4 sm:$0xff]  }
 0x1ca   :  { %v19989_v53 = vld [vmem:[#allocation8 + $0x38] ss:$24 sps:$4 sm:$0xff]   ;;  %v19994_v54 = vld [vmem:[#allocation8 + $0xc] ss:$24 sps:$4 sm:$0xff]   ;;  %v19992_v55 = vld [vmem:[#allocation8 + $0x8] ss:$24 sps:$4 sm:$0xff]  }
 0x1cb   :  { %21611 = verf.f32 %v2315_v1  ;;  %v2169_v6 = vadd.f32 %v2168_v3, %v2126_v2  ;;  %4201 = vmatpush2.bf16.msra.mxu1 %v20079_v4  ;;  %v2320_v7 = vmul.f32 0.70710677, %v2167_v5  ;;  %v2308_v24 = vmul.f32 0.5, %v2167_v5  ;;  %v19997_v56 = vld [vmem:[#allocation8 + $0x2dc] ss:$24 sps:$4 sm:$0xff]  }
 0x1cc   :  { %21613 = verf.f32 %v2314_v59  ;;  %4202 = vmatprep.subr.bf16.mxu1 %v20087_v8  ;;  %v19995_v58 = vld [vmem:[#allocation8 + $0x2d8] ss:$24 sps:$4 sm:$0xff]   ;;  %v20000_v59 = vld [vmem:[#allocation8 + $0x2ac] ss:$24 sps:$4 sm:$0xff]   ;;  %v19998_v61 = vld [vmem:[#allocation8 + $0x2a8] ss:$24 sps:$4 sm:$0xff]  }
 0x1cd   :  { %v2321_v9 = vmul.f32 0.70710677, %v2169_v6  ;;  %21615 = verf.f32 %v2320_v7  ;;  %v2309_v32 = vmul.f32 0.5, %v2169_v6  ;;  %v20003_v0 = vld [vmem:[#allocation8 + $0x27c] ss:$24 sps:$4 sm:$0xff]  }
 0x1ce   :  { %v20001_v1 = vld [vmem:[#allocation8 + $0x278] ss:$24 sps:$4 sm:$0xff]   ;;  %v20006_v2 = vld [vmem:[#allocation8 + $0x24c] ss:$24 sps:$4 sm:$0xff]   ;;  %v20004_v3 = vld [vmem:[#allocation8 + $0x248] ss:$24 sps:$4 sm:$0xff]  }
 0x1cf   :  { %21617 = verf.f32 %v2321_v9  ;;  %4203 = vmatpush2.bf16.msra.mxu1 %v20085_v10  ;;  %v20009_v4 = vld [vmem:[#allocation8 + $0x21c] ss:$24 sps:$4 sm:$0xff]   ;;  %v20007_v5 = vld [vmem:[#allocation8 + $0x218] ss:$24 sps:$4 sm:$0xff]   ;;  %v20012_v6 = vld [vmem:[#allocation8 + $0x1ec] ss:$24 sps:$4 sm:$0xff]  }
 0x1d0   :  { %4204 = vmatprep.subr.bf16.mxu1 %v20093_v11  ;;  %v20010_v7 = vld [vmem:[#allocation8 + $0x1e8] ss:$24 sps:$4 sm:$0xff]   ;;  %v20015_v8 = vld [vmem:[#allocation8 + $0x1bc] ss:$24 sps:$4 sm:$0xff]   ;;  %v20013_v9 = vld [vmem:[#allocation8 + $0x1b8] ss:$24 sps:$4 sm:$0xff]  }
 0x1d1   :  { %v20018_v10 = vld [vmem:[#allocation8 + $0x18c] ss:$24 sps:$4 sm:$0xff]   ;;  %v20016_v11 = vld [vmem:[#allocation8 + $0x188] ss:$24 sps:$4 sm:$0xff]  }
 0x1d3   :  { %4205 = vmatpush2.bf16.msra.mxu1 %v20091_v13  ;;  %v20024_v13 = vld [vmem:[#allocation8 + $0x75c] ss:$24 sps:$4 sm:$0xff]  }
 0x1d4   :  { %4206 = vmatprep.subr.bf16.mxu1 %v20099_v14  ;;  %v20022_v14 = vld [vmem:[#allocation8 + $0x758] ss:$24 sps:$4 sm:$0xff]  }
 0x1d7   :  { %4207 = vmatpush2.bf16.msra.mxu1 %v20097_v15  ;;  %v20030_v15 = vld [vmem:[#allocation8 + $0x72c] ss:$24 sps:$4 sm:$0xff]  }
 0x1d8   :  { %v21612_v16 = vpop.eup %21611  ;;  %4208 = vmatprep.subr.bf16.mxu1 %v20105_v17  ;;  %v20036_v17 = vld [vmem:[#allocation8 + $0x6fc] ss:$24 sps:$4 sm:$0xff]  }
 0x1d9   :  { %v21614_v19 = vpop.eup %21613  ;;  %v2339_v23 = vadd.f32 1.0, %v21612_v16  ;;  %v20028_v16 = vld [vmem:[#allocation8 + $0x728] ss:$24 sps:$4 sm:$0xff]  }
 0x1da   :  { %v21616_v21 = vpop.eup %21615  ;;  %v2338_v26 = vadd.f32 1.0, %v21614_v19  ;;  %v20034_v19 = vld [vmem:[#allocation8 + $0x6f8] ss:$24 sps:$4 sm:$0xff]  }
 0x1db   :  { %4209 = vmatpush2.bf16.msra.mxu1 %v20103_v20  ;;  %v2344_v27 = vadd.f32 1.0, %v21616_v21  ;;  %v2351_v38 = vmul.f32 %v2339_v23, %v2303_v30  ;;  %v20042_v20 = vld [vmem:[#allocation8 + $0x6cc] ss:$24 sps:$4 sm:$0xff]   ;;  %v20040_v21 = vld [vmem:[#allocation8 + $0x6c8] ss:$24 sps:$4 sm:$0xff]   ;;  %v21991_v30 = vsub.s32 4, %v21952_v42 }
 0x1dc   :  { %v21618_v25 = vpop.eup %21617  ;;  %4210 = vmatprep.subr.bf16.mxu1 %v20111_v29  ;;  %v2350_v40 = vmul.f32 %v2338_v26, %v2302_v36  ;;  %v20048_v23 = vld [vmem:[#allocation8 + $0x69c] ss:$24 sps:$4 sm:$0xff]   ;;  %v20052_v26 = vld [vmem:[#allocation8 + $0x668] ss:$24 sps:$4 sm:$0xff]  }
 0x1dd   :  { %v2345_v33 = vadd.f32 1.0, %v21618_v25  ;;  %v2356_v37 = vmul.f32 %v2344_v27, %v2308_v24  ;;  %v20046_v24 = vld [vmem:[#allocation8 + $0x698] ss:$24 sps:$4 sm:$0xff]   ;;  %v20054_v25 = vld [vmem:[#allocation8 + $0x66c] ss:$24 sps:$4 sm:$0xff]  }
 0x1de   :  { %v20060_v29 = vld [vmem:[#allocation8 + $0x63c] ss:$24 sps:$4 sm:$0xff]  }
 0x1df   :  { %v2357_v39 = vmul.f32 %v2345_v33, %v2309_v32  ;;  %4211 = vmatpush2.bf16.msra.mxu1 %v20109_v35  ;;  %v21984_v44 = vpack.c.bf16 %v2356_v37, %v2350_v40  ;;  %v21994_v32 = vsub.s32 5, %v21952_v42  ;;  %v20058_v33 = vld [vmem:[#allocation8 + $0x638] ss:$24 sps:$4 sm:$0xff]   ;;  %v20066_v37 = vld [vmem:[#allocation8 + $0x60c] ss:$24 sps:$4 sm:$0xff]  }
 0x1e0   :  { %4266 = vmatprep.subr.bf16.mxu1 %v20117_v41  ;;  %v20064_v41 = vld [vmem:[#allocation8 + $0x608] ss:$24 sps:$4 sm:$0xff]  }
 0x1e1   :  { %v21982_v12 = vpack.c.bf16 %v2357_v39, %v2351_v38  ;;  %v21705_v38 = vld [vmem:[#allocation7] sm:$0x3f] }
 0x1e2   :  { %v432_v39 = vrot.slane %v21705_v38, %v21991_v30  ;;  %v436_v40 = vrot.slane %v21705_v38, %v21994_v32 }
 0x1e3   :  { %4169 = vmatprep.mubr.bf16.mxu0 %v21982_v12 }
 0x1e4   :  { %4170 = vmatmul.mubr.bf16.vlgmr.msra.gmra.mxu0 %v21984_v44 }
 0x1e5   :  { %4224 = vmatpush1.bf16.msra.mxu0 %v19971_v43  ;;  %4255 = vmatprep.mubr.bf16.mxu0 %v21966_v62 }
 0x1e6   :  { %4225 = vmatprep.subr.bf16.mxu0 %v19976_v57 }
 0x1e9   :  { %4226 = vmatpush1.bf16.msra.mxu0 %v19974_v34  ;;  %v20072_v34 = vld [vmem:[#allocation8 + $0x8dc] ss:$24 sps:$4 sm:$0xff]  }
 0x1ea   :  { %4227 = vmatprep.subr.bf16.mxu0 %v19979_v18 }
 0x1ed   :  { %4228 = vmatpush1.bf16.msra.mxu0 %v19977_v46  ;;  %v20070_v46 = vld [vmem:[#allocation8 + $0x8d8] ss:$24 sps:$4 sm:$0xff]  }
 0x1ee   :  { %4229 = vmatprep.subr.bf16.mxu0 %v19982_v48 }
 0x1f1   :  { %4230 = vmatpush1.bf16.msra.mxu0 %v19980_v60 }
 0x1f2   :  { %4231 = vmatprep.subr.bf16.mxu0 %v19985_v22  ;;  %v20078_v22 = vld [vmem:[#allocation8 + $0x8ac] ss:$24 sps:$4 sm:$0xff]  }
 0x1f5   :  { %4232 = vmatpush1.bf16.msra.mxu0 %v19983_v50 }
 0x1f6   :  { %4233 = vmatprep.subr.bf16.mxu0 %v19988_v45 }
 0x1f9   :  { %4234 = vmatpush1.bf16.msra.mxu0 %v19986_v51 }
 0x1fa   :  { %4235 = vmatprep.subr.bf16.mxu0 %v19991_v52 }
 0x1fd   :  { %4236 = vmatpush1.bf16.msra.mxu0 %v19989_v53 }
 0x1fe   :  { %4237 = vmatprep.subr.bf16.mxu0 %v19994_v54 }
 0x201   :  { %4238 = vmatpush1.bf16.msra.mxu0 %v19992_v55  ;;  %v20076_v55 = vld [vmem:[#allocation8 + $0x8a8] ss:$24 sps:$4 sm:$0xff]  }
 0x202   :  { %4239 = vmatprep.subr.bf16.mxu0 %v19997_v56  ;;  %v2205_v27 = vpop.f32.mrf.mxu0 }
 0x203   :  { %v2248_v36 = vpop.f32.mrf.mxu1  ;;  %v2206_v18 = vadd.f32 %v2205_v27, %v432_v39 }
 0x204   :  { %v2207_v35 = vpop.f32.mrf.mxu0 }
 0x205   :  { %4240 = vmatpush2.bf16.msra.mxu0 %v19995_v58  ;;  %v2250_v57 = vpop.f32.mrf.mxu1  ;;  %v2208_v42 = vadd.f32 %v2207_v35, %v436_v40  ;;  %v2249_v50 = vadd.f32 %v2248_v36, %v2206_v18 }
 0x206   :  { %4241 = vmatprep.subr.bf16.mxu0 %v20000_v59  ;;  %v2209_v43 = vpop.f32.mrf.mxu0  ;;  %v20084_v59 = vld [vmem:[#allocation8 + $0x87c] ss:$24 sps:$4 sm:$0xff]  }
 0x207   :  { %v2252_v60 = vpop.f32.mrf.mxu1  ;;  %v2210_v45 = vadd.f32 %v2209_v43, %v432_v39  ;;  %v2251_v52 = vadd.f32 %v2250_v57, %v2208_v42 }
 0x208   :  { %v2211_v48 = vpop.f32.mrf.mxu0 }
 0x209   :  { %4242 = vmatpush2.bf16.msra.mxu0 %v19998_v61  ;;  %v2212_v53 = vadd.f32 %v2211_v48, %v436_v40  ;;  %v2254_v56 = vpop.f32.mrf.mxu1  ;;  %v2253_v61 = vadd.f32 %v2252_v60, %v2210_v45  ;;  %v20120_v48 = vld [vmem:[#allocation8 + $0x464] ss:$24 sps:$4 sm:$0xff]   ;;  %v20121_v45 = vld [vmem:[#allocation8 + $0x428] ss:$24 sps:$4 sm:$0xff]  }
 0x20a   :  { %4243 = vmatprep.subr.bf16.mxu0 %v20003_v0 }
 0x20d   :  { %4244 = vmatpush2.bf16.msra.mxu0 %v20001_v1 }
 0x20e   :  { %4245 = vmatprep.subr.bf16.mxu0 %v20006_v2 }
 0x211   :  { %4246 = vmatpush2.bf16.msra.mxu0 %v20004_v3  ;;  %v2255_v3 = vadd.f32 %v2254_v56, %v2212_v53  ;;  %v20132_v53 = vld [vmem:[#allocation8 + $0x404] ss:$24 sps:$4 sm:$0xff]  }
 0x212   :  { %4247 = vmatprep.subr.bf16.mxu0 %v20009_v4  ;;  %v20135_v56 = vld [vmem:[#allocation8 + $0x3cc] ss:$24 sps:$4 sm:$0xff]  }
 0x215   :  { %4248 = vmatpush2.bf16.msra.mxu0 %v20007_v5 }
 0x216   :  { %4249 = vmatprep.subr.bf16.mxu0 %v20012_v6  ;;  %v20082_v6 = vld [vmem:[#allocation8 + $0x878] ss:$24 sps:$4 sm:$0xff]  }
 0x219   :  { %4250 = vmatpush2.bf16.msra.mxu0 %v20010_v7 }
 0x21a   :  { %4251 = vmatprep.subr.bf16.mxu0 %v20015_v8  ;;  %v20090_v8 = vld [vmem:[#allocation8 + $0x84c] ss:$24 sps:$4 sm:$0xff]  }
 0x21d   :  { %4252 = vmatpush2.bf16.msra.mxu0 %v20013_v9 }
 0x21e   :  { %4253 = vmatprep.subr.bf16.mxu0 %v20018_v10 }
 0x221   :  { %4254 = vmatpush2.bf16.msra.mxu0 %v20016_v11 }
 0x222   :  { %4309 = vmatprep.subr.bf16.mxu0 %v20024_v13  ;;  %v20088_v13 = vld [vmem:[#allocation8 + $0x848] ss:$24 sps:$4 sm:$0xff]  }
 0x224   :  { %4256 = vmatmul.mubr.bf16.vlgmr.msra.gmra.mxu0 %v21968_v63 }
 0x225   :  { %4310 = vmatpush1.bf16.msra.mxu0 %v20022_v14  ;;  %v20096_v14 = vld [vmem:[#allocation8 + $0x81c] ss:$24 sps:$4 sm:$0xff]  }
 0x226   :  { %4311 = vmatprep.subr.bf16.mxu0 %v20030_v15  ;;  %v20094_v15 = vld [vmem:[#allocation8 + $0x818] ss:$24 sps:$4 sm:$0xff]  }
 0x229   :  { %4312 = vmatpush1.bf16.msra.mxu0 %v20028_v16  ;;  %v20102_v16 = vld [vmem:[#allocation8 + $0x7ec] ss:$24 sps:$4 sm:$0xff]  }
 0x22a   :  { %4313 = vmatprep.subr.bf16.mxu0 %v20036_v17  ;;  %v20100_v17 = vld [vmem:[#allocation8 + $0x7e8] ss:$24 sps:$4 sm:$0xff]  }
 0x22d   :  { %4314 = vmatpush1.bf16.msra.mxu0 %v20034_v19  ;;  %v20108_v19 = vld [vmem:[#allocation8 + $0x7bc] ss:$24 sps:$4 sm:$0xff]  }
 0x22e   :  { %4315 = vmatprep.subr.bf16.mxu0 %v20042_v20 }
 0x231   :  { %4316 = vmatpush1.bf16.msra.mxu0 %v20040_v21 }
 0x232   :  { %4317 = vmatprep.subr.bf16.mxu0 %v20048_v23  ;;  %v20106_v23 = vld [vmem:[#allocation8 + $0x7b8] ss:$24 sps:$4 sm:$0xff]  }
 0x235   :  { %4318 = vmatpush1.bf16.msra.mxu0 %v20046_v24 }
 0x236   :  { %4319 = vmatprep.subr.bf16.mxu0 %v20054_v25  ;;  %v20114_v25 = vld [vmem:[#allocation8 + $0x78c] ss:$24 sps:$4 sm:$0xff]  }
 0x239   :  { %4320 = vmatpush1.bf16.msra.mxu0 %v20052_v26 }
 0x23a   :  { %4321 = vmatprep.subr.bf16.mxu0 %v20060_v29 }
 0x23d   :  { %4322 = vmatpush1.bf16.msra.mxu0 %v20058_v33 }
 0x23e   :  { %4323 = vmatprep.subr.bf16.mxu0 %v20066_v37 }
 0x241   :  { %4324 = vmatpush1.bf16.msra.mxu0 %v20064_v41  ;;  %v20112_v41 = vld [vmem:[#allocation8 + $0x788] ss:$24 sps:$4 sm:$0xff]  }
 0x242   :  { %v2291_v51 = vpop.f32.mrf.mxu0  ;;  %4325 = vmatprep.subr.bf16.mxu0 %v20072_v34  ;;  %v20115_v34 = vld [vmem:[#allocation8 + $0x458] ss:$24 sps:$4 sm:$0xff]  }
 0x243   :  { %v2292_v54 = vadd.f32 %v2291_v51, %v2249_v50  ;;  %v20126_v50 = vld [vmem:[#allocation8 + $0x434] ss:$24 sps:$4 sm:$0xff]   ;;  %v20124_v51 = vld [vmem:[#allocation8 + $0x430] ss:$24 sps:$4 sm:$0xff]  }
 0x244   :  { %v2293_v58 = vpop.f32.mrf.mxu0 }
 0x245   :  { %v2294_v0 = vadd.f32 %v2293_v58, %v2251_v52  ;;  %4326 = vmatpush2.bf16.msra.mxu0 %v20070_v46  ;;  %v2316_v1 = vmul.f32 0.70710677, %v2292_v54  ;;  %v2304_v39 = vmul.f32 0.5, %v2292_v54  ;;  %v20118_v46 = vld [vmem:[#allocation8 + $0x460] ss:$24 sps:$4 sm:$0xff]  }
 0x246   :  { %v2295_v2 = vpop.f32.mrf.mxu0  ;;  %4327 = vmatprep.subr.bf16.mxu0 %v20078_v22  ;;  %v20123_v22 = vld [vmem:[#allocation8 + $0x42c] ss:$24 sps:$4 sm:$0xff]   ;;  %v20129_v52 = vld [vmem:[#allocation8 + $0x3fc] ss:$24 sps:$4 sm:$0xff]   ;;  %v20127_v54 = vld [vmem:[#allocation8 + $0x3f8] ss:$24 sps:$4 sm:$0xff]  }
 0x247   :  { %v2317_v4 = vmul.f32 0.70710677, %v2294_v0  ;;  %v2296_v5 = vadd.f32 %v2295_v2, %v2253_v61  ;;  %v2305_v36 = vmul.f32 0.5, %v2294_v0  ;;  %v20138_v58 = vld [vmem:[#allocation8 + $0x3d4] ss:$24 sps:$4 sm:$0xff]  }
 0x248   :  { %v2297_v7 = vpop.f32.mrf.mxu0  ;;  %v20136_v61 = vld [vmem:[#allocation8 + $0x3d0] ss:$24 sps:$4 sm:$0xff]   ;;  %v20141_v0 = vld [vmem:[#allocation8 + $0x39c] ss:$24 sps:$4 sm:$0xff]   ;;  %v20142_v2 = vld [vmem:[#allocation8 + $0x3a0] ss:$24 sps:$4 sm:$0xff]  }
 0x249   :  { %21619 = verf.f32 %v2317_v4  ;;  %v2322_v9 = vmul.f32 0.70710677, %v2296_v5  ;;  %v2298_v10 = vadd.f32 %v2297_v7, %v2255_v3  ;;  %4328 = vmatpush2.bf16.msra.mxu0 %v20076_v55  ;;  %v2310_v35 = vmul.f32 0.5, %v2296_v5  ;;  %v20130_v55 = vld [vmem:[#allocation8 + $0x400] ss:$24 sps:$4 sm:$0xff]  }
 0x24a   :  { %21621 = verf.f32 %v2316_v1  ;;  %4329 = vmatprep.subr.bf16.mxu0 %v20084_v59  ;;  %v20133_v59 = vld [vmem:[#allocation8 + $0x3c8] ss:$24 sps:$4 sm:$0xff]   ;;  %v20144_v1 = vld [vmem:[#allocation8 + $0x3a4] ss:$24 sps:$4 sm:$0xff]   ;;  %v20150_v4 = vld [vmem:[#allocation8 + $0x374] ss:$24 sps:$4 sm:$0xff]  }
 0x24b   :  { %21623 = verf.f32 %v2322_v9  ;;  %v2323_v11 = vmul.f32 0.70710677, %v2298_v10  ;;  %v2311_v37 = vmul.f32 0.5, %v2298_v10  ;;  %v20147_v3 = vld [vmem:[#allocation8 + $0x36c] ss:$24 sps:$4 sm:$0xff]  }
 0x24c   :  { %v20145_v5 = vld [vmem:[#allocation8 + $0x368] ss:$24 sps:$4 sm:$0xff]   ;;  %v20153_v7 = vld [vmem:[#allocation8 + $0x33c] ss:$24 sps:$4 sm:$0xff]   ;;  %v20151_v9 = vld [vmem:[#allocation8 + $0x338] ss:$24 sps:$4 sm:$0xff]  }
 0x24d   :  { %21625 = verf.f32 %v2323_v11  ;;  %4330 = vmatpush2.bf16.msra.mxu0 %v20082_v6  ;;  %v20148_v6 = vld [vmem:[#allocation8 + $0x370] ss:$24 sps:$4 sm:$0xff]   ;;  %v20154_v10 = vld [vmem:[#allocation8 + $0x340] ss:$24 sps:$4 sm:$0xff]   ;;  %v20159_v11 = vld [vmem:[#allocation8 + $0x30c] ss:$24 sps:$4 sm:$0xff]  }
 0x24e   :  { %4331 = vmatprep.subr.bf16.mxu0 %v20090_v8  ;;  %v20156_v8 = vld [vmem:[#allocation8 + $0x344] ss:$24 sps:$4 sm:$0xff]  }
 0x251   :  { %4332 = vmatpush2.bf16.msra.mxu0 %v20088_v13  ;;  %v20162_v13 = vld [vmem:[#allocation8 + $0x314] ss:$24 sps:$4 sm:$0xff]  }
 0x252   :  { %4333 = vmatprep.subr.bf16.mxu0 %v20096_v14  ;;  %v20157_v14 = vld [vmem:[#allocation8 + $0x308] ss:$24 sps:$4 sm:$0xff]  }
 0x255   :  { %4334 = vmatpush2.bf16.msra.mxu0 %v20094_v15  ;;  %v20160_v15 = vld [vmem:[#allocation8 + $0x310] ss:$24 sps:$4 sm:$0xff]  }
 0x256   :  { %v21620_v20 = vpop.eup %21619  ;;  %4335 = vmatprep.subr.bf16.mxu0 %v20102_v16  ;;  %v20165_v16 = vld [vmem:[#allocation8 + $0x5dc] ss:$24 sps:$4 sm:$0xff]  }
 0x257   :  { %v21622_v21 = vpop.eup %21621  ;;  %v2341_v26 = vadd.f32 1.0, %v21620_v20  ;;  %v20166_v20 = vld [vmem:[#allocation8 + $0x5e0] ss:$24 sps:$4 sm:$0xff]  }
 0x258   :  { %v21624_v24 = vpop.eup %21623  ;;  %v2340_v33 = vadd.f32 1.0, %v21622_v21  ;;  %v20171_v21 = vld [vmem:[#allocation8 + $0x5ac] ss:$24 sps:$4 sm:$0xff]  }
 0x259   :  { %v2346_v27 = vadd.f32 1.0, %v21624_v24  ;;  %4336 = vmatpush2.bf16.msra.mxu0 %v20100_v17  ;;  %v2353_v43 = vmul.f32 %v2341_v26, %v2305_v36  ;;  %v20168_v17 = vld [vmem:[#allocation8 + $0x5e4] ss:$24 sps:$4 sm:$0xff]   ;;  %v20169_v24 = vld [vmem:[#allocation8 + $0x5a8] ss:$24 sps:$4 sm:$0xff]  }
 0x25a   :  { %v21626_v29 = vpop.eup %21625  ;;  %4337 = vmatprep.subr.bf16.mxu0 %v20108_v19  ;;  %v2352_v18 = vmul.f32 %v2340_v33, %v2304_v39  ;;  %v20163_v19 = vld [vmem:[#allocation8 + $0x5d8] ss:$24 sps:$4 sm:$0xff]   ;;  %v20177_v26 = vld [vmem:[#allocation8 + $0x57c] ss:$24 sps:$4 sm:$0xff]  }
 0x25b   :  { %v2347_v38 = vadd.f32 1.0, %v21626_v29  ;;  %v2358_v40 = vmul.f32 %v2346_v27, %v2310_v35  ;;  %v20180_v27 = vld [vmem:[#allocation8 + $0x584] ss:$24 sps:$4 sm:$0xff]   ;;  %v20175_v29 = vld [vmem:[#allocation8 + $0x578] ss:$24 sps:$4 sm:$0xff]  }
 0x25c   :  { %v20178_v33 = vld [vmem:[#allocation8 + $0x580] ss:$24 sps:$4 sm:$0xff]   ;;  %v20183_v35 = vld [vmem:[#allocation8 + $0x54c] ss:$24 sps:$4 sm:$0xff]   ;;  %v20184_v39 = vld [vmem:[#allocation8 + $0x550] ss:$24 sps:$4 sm:$0xff]  }
 0x25d   :  { %v2359_v57 = vmul.f32 %v2347_v38, %v2311_v37  ;;  %4338 = vmatpush2.bf16.msra.mxu0 %v20106_v23  ;;  %v22000_v60 = vpack.c.bf16 %v2358_v40, %v2352_v18  ;;  %v20174_v23 = vld [vmem:[#allocation8 + $0x5b4] ss:$24 sps:$4 sm:$0xff]   ;;  %v20181_v37 = vld [vmem:[#allocation8 + $0x548] ss:$24 sps:$4 sm:$0xff]   ;;  %v20192_v40 = vld [vmem:[#allocation8 + $0x524] ss:$24 sps:$4 sm:$0xff]  }
 0x25e   :  { %4339 = vmatprep.subr.bf16.mxu0 %v20114_v25  ;;  %v20172_v25 = vld [vmem:[#allocation8 + $0x5b0] ss:$24 sps:$4 sm:$0xff]   ;;  %v20186_v36 = vld [vmem:[#allocation8 + $0x554] ss:$24 sps:$4 sm:$0xff]  }
 0x25f   :  { %v21998_v42 = vpack.c.bf16 %v2359_v57, %v2353_v43  ;;  %v20189_v38 = vld [vmem:[#allocation8 + $0x51c] ss:$24 sps:$4 sm:$0xff]   ;;  %v20195_v43 = vld [vmem:[#allocation8 + $0x4ec] ss:$24 sps:$4 sm:$0xff]   ;;  %v20190_v57 = vld [vmem:[#allocation8 + $0x520] ss:$24 sps:$4 sm:$0xff]  }
 0x260   :  { %v20193_v18 = vld [vmem:[#allocation8 + $0x4e8] ss:$24 sps:$4 sm:$0xff]  }
 0x261   :  { %4340 = vmatpush2.bf16.msra.mxu0 %v20112_v41  ;;  %4212 = vmatprep.mubr.bf16.mxu1 %v21998_v42  ;;  %v20187_v41 = vld [vmem:[#allocation8 + $0x518] ss:$24 sps:$4 sm:$0xff]  }
 0x262   :  { %4341 = vmatprep.mubr.bf16.mxu0 %v21998_v42  ;;  %4213 = vmatmul.mubr.bf16.vlgmr.msra.gmra.mxu1 %v22000_v60 }
 0x263   :  { %4267 = vmatpush1.bf16.msra.mxu1 %v20115_v34  ;;  %4298 = vmatprep.mubr.bf16.mxu1 %v21982_v12  ;;  %v20198_v34 = vld [vmem:[#allocation8 + $0x4f4] ss:$24 sps:$4 sm:$0xff]  }
 0x264   :  { %4342 = vmatmul.mubr.bf16.vlgmr.msra.gmra.mxu0 %v22000_v60  ;;  %4395 = vmatprep.subr.bf16.mxu0 %v20120_v48  ;;  %v20196_v48 = vld [vmem:[#allocation8 + $0x4f0] ss:$24 sps:$4 sm:$0xff]  }
 0x265   :  { %4396 = vmatpush1.bf16.msra.mxu0 %v20118_v46  ;;  %4427 = vmatprep.mubr.bf16.mxu0 %v21982_v12  ;;  %v20139_v12 = vld [vmem:[#allocation8 + $0x398] ss:$24 sps:$4 sm:$0xff]   ;;  %v20201_v46 = vld [vmem:[#allocation8 + $0x4bc] ss:$24 sps:$4 sm:$0xff]  }
 0x266   :  { %4268 = vmatprep.subr.bf16.mxu1 %v20123_v22  ;;  %4397 = vmatprep.subr.bf16.mxu0 %v20126_v50  ;;  %v20204_v22 = vld [vmem:[#allocation8 + $0x4c4] ss:$24 sps:$4 sm:$0xff]   ;;  %v20199_v50 = vld [vmem:[#allocation8 + $0x4b8] ss:$24 sps:$4 sm:$0xff]  }
 0x267   :  { %4269 = vmatpush1.bf16.msra.mxu1 %v20121_v45  ;;  %v20207_v45 = vld [vmem:[#allocation8 + $0x48c] ss:$24 sps:$4 sm:$0xff]  }
 0x268   :  { %4270 = vmatprep.subr.bf16.mxu1 %v20129_v52  ;;  %v20210_v52 = vld [vmem:[#allocation8 + $0x494] ss:$24 sps:$4 sm:$0xff]  }
 0x269   :  { %4398 = vmatpush1.bf16.msra.mxu0 %v20124_v51  ;;  %v20202_v51 = vld [vmem:[#allocation8 + $0x4c0] ss:$24 sps:$4 sm:$0xff]  }
 0x26a   :  { %4399 = vmatprep.subr.bf16.mxu0 %v20132_v53  ;;  %v20205_v53 = vld [vmem:[#allocation8 + $0x488] ss:$24 sps:$4 sm:$0xff]  }
 0x26b   :  { %4271 = vmatpush1.bf16.msra.mxu1 %v20127_v54  ;;  %v4535_v54 = vld [vmem:[#allocation5 + $0x558] sm:$0xff] }
 0x26c   :  { %4272 = vmatprep.subr.bf16.mxu1 %v20135_v56  ;;  %v20213_v56 = vld [vmem:[#allocation8 + $0x164] ss:$24 sps:$4 sm:$0xff]  }
 0x26d   :  { %4400 = vmatpush1.bf16.msra.mxu0 %v20130_v55  ;;  %v4538_v55 = vld [vmem:[#allocation5 + $0x5b8] sm:$0xff] }
 0x26e   :  { %4401 = vmatprep.subr.bf16.mxu0 %v20138_v58  ;;  %v20208_v58 = vld [vmem:[#allocation8 + $0x490] ss:$24 sps:$4 sm:$0xff]  }
 0x26f   :  { %4273 = vmatpush1.bf16.msra.mxu1 %v20133_v59  ;;  %v18169_v59 = vcombine.high %v4535_v54, %v4538_v55 }
 0x270   :  { %4274 = vmatprep.subr.bf16.mxu1 %v20141_v0  ;;  %v4529_v0 = vld [vmem:[#allocation5 + $0x498] sm:$0xff] }
 0x271   :  { %4402 = vmatpush1.bf16.msra.mxu0 %v20136_v61  ;;  %v20211_v61 = vld [vmem:[#allocation8 + $0x160] ss:$24 sps:$4 sm:$0xff]  }
 0x272   :  { %4403 = vmatprep.subr.bf16.mxu0 %v20144_v1  ;;  %v4532_v1 = vld [vmem:[#allocation5 + $0x4f8] sm:$0xff] }
 0x273   :  { %4275 = vmatpush1.bf16.msra.mxu1 %v20139_v12  ;;  %v20216_v12 = vld [vmem:[#allocation8 + $0x134] ss:$24 sps:$4 sm:$0xff]  }
 0x274   :  { %4276 = vmatprep.subr.bf16.mxu1 %v20147_v3  ;;  %v18163_v3 = vcombine.high %v4529_v0, %v4532_v1 }
 0x275   :  { %4404 = vmatpush1.bf16.msra.mxu0 %v20142_v2  ;;  %v18168_v2 = vcombine.low %v4535_v54, %v4538_v55  ;;  %v4577_v54 = vld [vmem:[#allocation5 + $0xa98] sm:$0xff] }
 0x276   :  { %4405 = vmatprep.subr.bf16.mxu0 %v20150_v4  ;;  %v20214_v4 = vld [vmem:[#allocation8 + $0x130] ss:$24 sps:$4 sm:$0xff]   ;;  %v4580_v55 = vld [vmem:[#allocation5 + $0xaf8] sm:$0xff] }
 0x277   :  { %4277 = vmatpush1.bf16.msra.mxu1 %v20145_v5  ;;  %v4523_v5 = vld [vmem:[#allocation5 + $0x3d8] sm:$0xff] }
 0x278   :  { %4278 = vmatprep.subr.bf16.mxu1 %v20153_v7  ;;  %v20219_v7 = vld [vmem:[#allocation8 + $0x104] ss:$24 sps:$4 sm:$0xff]  }
 0x279   :  { %4406 = vmatpush1.bf16.msra.mxu0 %v20148_v6  ;;  %v4526_v6 = vld [vmem:[#allocation5 + $0x438] sm:$0xff] }
 0x27a   :  { %4407 = vmatprep.subr.bf16.mxu0 %v20156_v8  ;;  %v18162_v8 = vcombine.low %v4529_v0, %v4532_v1  ;;  %v4571_v0 = vld [vmem:[#allocation5 + $0x9d8] sm:$0xff] }
 0x27b   :  { %4279 = vmatpush1.bf16.msra.mxu1 %v20151_v9  ;;  %v21706_v9 = vld [vmem:[#allocation2 + $0x4] ss:$24 sps:$4 sm:$0xff]   ;;  %v4574_v1 = vld [vmem:[#allocation5 + $0xa38] sm:$0xff] }
 0x27c   :  { %4280 = vmatprep.subr.bf16.mxu1 %v20159_v11  ;;  %v20217_v11 = vld [vmem:[#allocation8 + $0x100] ss:$24 sps:$4 sm:$0xff]  }
 0x27d   :  { %4408 = vmatpush1.bf16.msra.mxu0 %v20154_v10  ;;  %v18157_v10 = vcombine.high %v4523_v5, %v4526_v6 }
 0x27e   :  { %4409 = vmatprep.subr.bf16.mxu0 %v20162_v13  ;;  %v4517_v13 = vld [vmem:[#allocation5 + $0x318] sm:$0xff] }
 0x27f   :  { %4281 = vmatpush1.bf16.msra.mxu1 %v20157_v14  ;;  %v4520_v14 = vld [vmem:[#allocation5 + $0x378] sm:$0xff] }
 0x280   :  { %4282 = vmatprep.subr.bf16.mxu1 %v20165_v16  ;;  %v18151_v16 = vcombine.high %v4517_v13, %v4520_v14 }
 0x281   :  { %4410 = vmatpush1.bf16.msra.mxu0 %v20160_v15  ;;  %v20222_v15 = vld [vmem:[#allocation8 + $0xd4] ss:$24 sps:$4 sm:$0xff]  }
 0x282   :  { %4411 = vmatprep.subr.bf16.mxu0 %v20168_v17  ;;  %v4511_v17 = vld [vmem:[#allocation5 + $0x258] sm:$0xff] }
 0x283   :  { %4283 = vmatpush2.bf16.msra.mxu1 %v20163_v19  ;;  %v4514_v19 = vld [vmem:[#allocation5 + $0x2b8] sm:$0xff] }
 0x284   :  { %4284 = vmatprep.subr.bf16.mxu1 %v20171_v21  ;;  %v18150_v21 = vcombine.low %v4517_v13, %v4520_v14  ;;  %v4562_v13 = vld [vmem:[#allocation5 + $0x8b8] sm:$0xff] }
 0x285   :  { %4412 = vmatpush2.bf16.msra.mxu0 %v20166_v20  ;;  %v20225_v20 = vld [vmem:[#allocation8 + $0xa4] ss:$24 sps:$4 sm:$0xff]  }
 0x286   :  { %4413 = vmatprep.subr.bf16.mxu0 %v20174_v23  ;;  %v18145_v23 = vcombine.high %v4511_v17, %v4514_v19  ;;  %v20249_v14 = vld [vmem:[#allocation8 + $0x224] ss:$24 sps:$4 sm:$0xff]  }
 0x287   :  { %4285 = vmatpush2.bf16.msra.mxu1 %v20169_v24  ;;  %v20223_v24 = vld [vmem:[#allocation8 + $0xa0] ss:$24 sps:$4 sm:$0xff]  }
 0x288   :  { %4286 = vmatprep.subr.bf16.mxu1 %v20177_v26  ;;  %v4508_v26 = vld [vmem:[#allocation5 + $0x1f8] sm:$0xff] }
 0x289   :  { %4414 = vmatpush2.bf16.msra.mxu0 %v20172_v25  ;;  %v4505_v25 = vld [vmem:[#allocation5 + $0x198] sm:$0xff] }
 0x28a   :  { %4415 = vmatprep.subr.bf16.mxu0 %v20180_v27  ;;  %v20228_v27 = vld [vmem:[#allocation8 + $0x74] ss:$24 sps:$4 sm:$0xff]  }
 0x28b   :  { %4287 = vmatpush2.bf16.msra.mxu1 %v20175_v29  ;;  %v18144_v29 = vcombine.low %v4511_v17, %v4514_v19  ;;  %v4556_v17 = vld [vmem:[#allocation5 + $0x7f8] sm:$0xff]  ;;  %v20252_v19 = vld [vmem:[#allocation8 + $0x1f4] ss:$24 sps:$4 sm:$0xff]  }
 0x28c   :  { %4288 = vmatprep.subr.bf16.mxu1 %v20183_v35  ;;  %v20226_v35 = vld [vmem:[#allocation8 + $0x70] ss:$24 sps:$4 sm:$0xff]  }
 0x28d   :  { %4416 = vmatpush2.bf16.msra.mxu0 %v20178_v33  ;;  %v18139_v33 = vcombine.high %v4505_v25, %v4508_v26 }
 0x28e   :  { %4417 = vmatprep.subr.bf16.mxu0 %v20186_v36  ;;  %v4499_v36 = vld [vmem:[#allocation5 + $0xd8] sm:$0xff] }
 0x28f   :  { %4289 = vmatpush2.bf16.msra.mxu1 %v20181_v37  ;;  %v4502_v37 = vld [vmem:[#allocation5 + $0x138] sm:$0xff] }
 0x290   :  { %4290 = vmatprep.subr.bf16.mxu1 %v20189_v38  ;;  %v20231_v38 = vld [vmem:[#allocation8 + $0x44] ss:$24 sps:$4 sm:$0xff]  }
 0x291   :  { %4418 = vmatpush2.bf16.msra.mxu0 %v20184_v39  ;;  %v18138_v39 = vcombine.low %v4505_v25, %v4508_v26  ;;  %v4550_v25 = vld [vmem:[#allocation5 + $0x738] sm:$0xff] }
 0x292   :  { %4419 = vmatprep.subr.bf16.mxu0 %v20192_v40  ;;  %v18133_v40 = vcombine.high %v4499_v36, %v4502_v37  ;;  %v20255_v26 = vld [vmem:[#allocation8 + $0x1c4] ss:$24 sps:$4 sm:$0xff]  }
 0x293   :  { %4291 = vmatpush2.bf16.msra.mxu1 %v20187_v41  ;;  %v20229_v41 = vld [vmem:[#allocation8 + $0x40] ss:$24 sps:$4 sm:$0xff]  }
 0x294   :  { %4292 = vmatprep.subr.bf16.mxu1 %v20195_v43  ;;  %v4493_v43 = vld [vmem:[#allocation5 + $0x18] sm:$0xff] }
 0x295   :  { %4420 = vmatpush2.bf16.msra.mxu0 %v20190_v57  ;;  %v4496_v57 = vld [vmem:[#allocation5 + $0x78] sm:$0xff] }
 0x296   :  { %4421 = vmatprep.subr.bf16.mxu0 %v20198_v34  ;;  %v20234_v34 = vld [vmem:[#allocation8 + $0x14] ss:$24 sps:$4 sm:$0xff]  }
 0x297   :  { %4293 = vmatpush2.bf16.msra.mxu1 %v20193_v18  ;;  %v18132_v18 = vcombine.low %v4499_v36, %v4502_v37  ;;  %v4544_v36 = vld [vmem:[#allocation5 + $0x678] sm:$0xff]  ;;  %v20258_v37 = vld [vmem:[#allocation8 + $0x194] ss:$24 sps:$4 sm:$0xff]  }
 0x298   :  { %4294 = vmatprep.subr.bf16.mxu1 %v20201_v46  ;;  %v18127_v46 = vcombine.high %v4493_v43, %v4496_v57 }
 0x299   :  { %4422 = vmatpush2.bf16.msra.mxu0 %v20196_v48  ;;  %v20232_v48 = vld [vmem:[#allocation8 + $0x10] ss:$24 sps:$4 sm:$0xff]  }
 0x29a   :  { %4423 = vmatprep.subr.bf16.mxu0 %v20204_v22  ;;  %v4583_v22 = vld [vmem:[#allocation5 + $0xb58] sm:$0xff] }
 0x29b   :  { %4295 = vmatpush2.bf16.msra.mxu1 %v20199_v50  ;;  %v4586_v50 = vld [vmem:[#allocation5 + $0xbb8] sm:$0xff] }
 0x29c   :  { %4296 = vmatprep.subr.bf16.mxu1 %v20207_v45  ;;  %v20237_v45 = vld [vmem:[#allocation8 + $0x2e4] ss:$24 sps:$4 sm:$0xff]  }
 0x29d   :  { %4424 = vmatpush2.bf16.msra.mxu0 %v20202_v51  ;;  %v18126_v51 = vcombine.low %v4493_v43, %v4496_v57  ;;  %v4730_v43 = vld [vmem:[#allocation5 + $0x1db8] sm:$0xff] }
 0x29e   :  { %4425 = vmatprep.subr.bf16.mxu0 %v20210_v52  ;;  %v18217_v52 = vcombine.high %v4583_v22, %v4586_v50  ;;  %v20261_v57 = vld [vmem:[#allocation8 + $0x764] ss:$24 sps:$4 sm:$0xff]  }
 0x29f   :  { %4297 = vmatpush2.bf16.msra.mxu1 %v20205_v53  ;;  %v20235_v53 = vld [vmem:[#allocation8 + $0x2e0] ss:$24 sps:$4 sm:$0xff]  }
 0x2a0   :  { %4352 = vmatprep.subr.bf16.mxu1 %v20213_v56  ;;  %v20240_v56 = vld [vmem:[#allocation8 + $0x2b4] ss:$24 sps:$4 sm:$0xff]  }
 0x2a1   :  { %4426 = vmatpush2.bf16.msra.mxu0 %v20208_v58  ;;  %v18216_v58 = vcombine.low %v4583_v22, %v4586_v50  ;;  %v4724_v22 = vld [vmem:[#allocation5 + $0x1cf8] sm:$0xff]  ;;  %v20264_v50 = vld [vmem:[#allocation8 + $0x734] ss:$24 sps:$4 sm:$0xff]  }
 0x2a2   :  { %4299 = vmatmul.mubr.bf16.vlgmr.msra.gmra.mxu1 %v21984_v44  ;;  %6253 = vmatprep.subr.bf16.mxu0 %v18169_v59  ;;  %v18211_v59 = vcombine.high %v4577_v54, %v4580_v55 }
 0x2a3   :  { %4353 = vmatpush1.bf16.msra.mxu1 %v20211_v61  ;;  %4384 = vmatprep.mubr.bf16.mxu1 %v21966_v62  ;;  %v18156_v62 = vcombine.low %v4523_v5, %v4526_v6  ;;  %v20238_v61 = vld [vmem:[#allocation8 + $0x2b0] ss:$24 sps:$4 sm:$0xff]   ;;  %v4565_v5 = vld [vmem:[#allocation5 + $0x918] sm:$0xff] }
 0x2a4   :  { %4428 = vmatmul.mubr.bf16.vlgmr.msra.gmra.mxu0 %v21984_v44  ;;  %4354 = vmatprep.subr.bf16.mxu1 %v20216_v12  ;;  %v20220_v44 = vld [vmem:[#allocation8 + $0xd0] ss:$24 sps:$4 sm:$0xff]   ;;  %v20243_v12 = vld [vmem:[#allocation8 + $0x284] ss:$24 sps:$4 sm:$0xff]  }
 0x2a5   :  { %6254 = vmatpush1.bf16.msra.mxu0 %v18168_v2  ;;  %6285 = vmatprep.mubr.bf16.mxu0 %v21706_v9  ;;  %v18210_v2 = vcombine.low %v4577_v54, %v4580_v55  ;;  %v4568_v6 = vld [vmem:[#allocation5 + $0x978] sm:$0xff] }
 0x2a6   :  { %6255 = vmatprep.subr.bf16.mxu0 %v18163_v3  ;;  %v18205_v3 = vcombine.high %v4571_v0, %v4574_v1  ;;  %v18199_v9 = vcombine.high %v4565_v5, %v4568_v6  ;;  %v4718_v54 = vld [vmem:[#allocation5 + $0x1c38] sm:$0xff] }
 0x2a7   :  { %4355 = vmatpush1.bf16.msra.mxu1 %v20214_v4  ;;  %v20241_v4 = vld [vmem:[#allocation8 + $0x280] ss:$24 sps:$4 sm:$0xff]   ;;  %v20267_v55 = vld [vmem:[#allocation8 + $0x704] ss:$24 sps:$4 sm:$0xff]  }
 0x2a8   :  { %4356 = vmatprep.subr.bf16.mxu1 %v20219_v7  ;;  %v20246_v7 = vld [vmem:[#allocation8 + $0x254] ss:$24 sps:$4 sm:$0xff]  }
 0x2a9   :  { %6256 = vmatpush1.bf16.msra.mxu0 %v18162_v8  ;;  %v18204_v8 = vcombine.low %v4571_v0, %v4574_v1  ;;  %v4709_v0 = vld [vmem:[#allocation5 + $0x1b18] sm:$0xff] }
 0x2aa   :  { %6257 = vmatprep.subr.bf16.mxu0 %v18157_v10  ;;  %v20244_v10 = vld [vmem:[#allocation8 + $0x250] ss:$24 sps:$4 sm:$0xff]   ;;  %v4712_v1 = vld [vmem:[#allocation5 + $0x1b78] sm:$0xff] }
 0x2ab   :  { %4357 = vmatpush1.bf16.msra.mxu1 %v20217_v11  ;;  %v4559_v11 = vld [vmem:[#allocation5 + $0x858] sm:$0xff] }
 0x2ac   :  { %4358 = vmatprep.subr.bf16.mxu1 %v20222_v15  ;;  %v18198_v15 = vcombine.low %v4565_v5, %v4568_v6  ;;  %v4706_v5 = vld [vmem:[#allocation5 + $0x1ab8] sm:$0xff] }
 0x2ad   :  { %6258 = vmatpush1.bf16.msra.mxu0 %v18156_v62  ;;  %v18193_v62 = vcombine.high %v4559_v11, %v4562_v13  ;;  %v20273_v6 = vld [vmem:[#allocation8 + $0x6a4] ss:$24 sps:$4 sm:$0xff]  }
 0x2ae   :  { %6259 = vmatprep.subr.bf16.mxu0 %v18151_v16  ;;  %v20247_v16 = vld [vmem:[#allocation8 + $0x220] ss:$24 sps:$4 sm:$0xff]  }
 0x2af   :  { %4359 = vmatpush1.bf16.msra.mxu1 %v20220_v44  ;;  %v4553_v44 = vld [vmem:[#allocation5 + $0x798] sm:$0xff] }
 0x2b0   :  { %4360 = vmatprep.subr.bf16.mxu1 %v20225_v20  ;;  %v18192_v20 = vcombine.low %v4559_v11, %v4562_v13  ;;  %v4700_v11 = vld [vmem:[#allocation5 + $0x19f8] sm:$0xff]  ;;  %v20276_v13 = vld [vmem:[#allocation8 + $0x674] ss:$24 sps:$4 sm:$0xff]  }
 0x2b1   :  { %6260 = vmatpush1.bf16.msra.mxu0 %v18150_v21  ;;  %v18187_v21 = vcombine.high %v4553_v44, %v4556_v17 }
 0x2b2   :  { %6261 = vmatprep.subr.bf16.mxu0 %v18145_v23  ;;  %v20250_v23 = vld [vmem:[#allocation8 + $0x1f0] ss:$24 sps:$4 sm:$0xff]  }
 0x2b3   :  { %4361 = vmatpush1.bf16.msra.mxu1 %v20223_v24  ;;  %v4547_v24 = vld [vmem:[#allocation5 + $0x6d8] sm:$0xff] }
 0x2b4   :  { %4362 = vmatprep.subr.bf16.mxu1 %v20228_v27  ;;  %v18186_v27 = vcombine.low %v4553_v44, %v4556_v17  ;;  %v4694_v44 = vld [vmem:[#allocation5 + $0x1938] sm:$0xff] }
 0x2b5   :  { %6262 = vmatpush1.bf16.msra.mxu0 %v18144_v29  ;;  %v18181_v29 = vcombine.high %v4547_v24, %v4550_v25  ;;  %v20279_v17 = vld [vmem:[#allocation8 + $0x644] ss:$24 sps:$4 sm:$0xff]  }
 0x2b6   :  { %6263 = vmatprep.subr.bf16.mxu0 %v18139_v33  ;;  %v20253_v33 = vld [vmem:[#allocation8 + $0x1c0] ss:$24 sps:$4 sm:$0xff]  }
 0x2b7   :  { %4363 = vmatpush1.bf16.msra.mxu1 %v20226_v35  ;;  %v4541_v35 = vld [vmem:[#allocation5 + $0x618] sm:$0xff] }
 0x2b8   :  { %4364 = vmatprep.subr.bf16.mxu1 %v20231_v38  ;;  %v18180_v38 = vcombine.low %v4547_v24, %v4550_v25  ;;  %v4688_v24 = vld [vmem:[#allocation5 + $0x1878] sm:$0xff]  ;;  %v20282_v25 = vld [vmem:[#allocation8 + $0x614] ss:$24 sps:$4 sm:$0xff]  }
 0x2b9   :  { %6264 = vmatpush1.bf16.msra.mxu0 %v18138_v39  ;;  %v18175_v39 = vcombine.high %v4541_v35, %v4544_v36 }
 0x2ba   :  { %6265 = vmatprep.subr.bf16.mxu0 %v18133_v40  ;;  %v20256_v40 = vld [vmem:[#allocation8 + $0x190] ss:$24 sps:$4 sm:$0xff]  }
 0x2bb   :  { %4365 = vmatpush1.bf16.msra.mxu1 %v20229_v41  ;;  %v4727_v41 = vld [vmem:[#allocation5 + $0x1d58] sm:$0xff] }
 0x2bc   :  { %4366 = vmatprep.subr.bf16.mxu1 %v20234_v34  ;;  %v18174_v34 = vcombine.low %v4541_v35, %v4544_v36  ;;  %v4778_v35 = vld [vmem:[#allocation5 + $0x23b8] sm:$0xff] }
 0x2bd   :  { %6266 = vmatpush1.bf16.msra.mxu0 %v18132_v18  ;;  %v18361_v18 = vcombine.high %v4727_v41, %v4730_v43  ;;  %v20285_v36 = vld [vmem:[#allocation8 + $0x8e4] ss:$24 sps:$4 sm:$0xff]  }
 0x2be   :  { %6267 = vmatprep.subr.bf16.mxu0 %v18127_v46  ;;  %v20259_v46 = vld [vmem:[#allocation8 + $0x760] ss:$24 sps:$4 sm:$0xff]  }
 0x2bf   :  { %4367 = vmatpush1.bf16.msra.mxu1 %v20232_v48  ;;  %v4721_v48 = vld [vmem:[#allocation5 + $0x1c98] sm:$0xff] }
 0x2c0   :  { %4368 = vmatprep.subr.bf16.mxu1 %v20237_v45  ;;  %v18360_v45 = vcombine.low %v4727_v41, %v4730_v43  ;;  %v4772_v41 = vld [vmem:[#allocation5 + $0x22f8] sm:$0xff]  ;;  %v20288_v43 = vld [vmem:[#allocation8 + $0x8b4] ss:$24 sps:$4 sm:$0xff]  }
 0x2c1   :  { %6268 = vmatpush1.bf16.msra.mxu0 %v18126_v51  ;;  %v18355_v51 = vcombine.high %v4721_v48, %v4724_v22 }
 0x2c2   :  { %6269 = vmatprep.subr.bf16.mxu0 %v18217_v52  ;;  %v20262_v52 = vld [vmem:[#allocation8 + $0x730] ss:$24 sps:$4 sm:$0xff]  }
 0x2c3   :  { %4369 = vmatpush2.bf16.msra.mxu1 %v20235_v53  ;;  %v4715_v53 = vld [vmem:[#allocation5 + $0x1bd8] sm:$0xff] }
 0x2c4   :  { %4370 = vmatprep.subr.bf16.mxu1 %v20240_v56  ;;  %v21707_v56 = vld [vmem:[#allocation2] ss:$24 sps:$4 sm:$0xff]  }
 0x2c5   :  { %6270 = vmatpush2.bf16.msra.mxu0 %v18216_v58  ;;  %v18354_v58 = vcombine.low %v4721_v48, %v4724_v22  ;;  %v4766_v48 = vld [vmem:[#allocation5 + $0x2238] sm:$0xff] }
 0x2c6   :  { %6271 = vmatprep.subr.bf16.mxu0 %v18211_v59  ;;  %v21708_v59 = vld [vmem:[#allocation2 + $0x14] ss:$24 sps:$4 sm:$0xff]  }
 0x2c7   :  { %4371 = vmatpush2.bf16.msra.mxu1 %v20238_v61  ;;  %v18349_v61 = vcombine.high %v4715_v53, %v4718_v54  ;;  %v20291_v22 = vld [vmem:[#allocation8 + $0x884] ss:$24 sps:$4 sm:$0xff]  }
 0x2c8   :  { %4372 = vmatprep.subr.bf16.mxu1 %v20243_v12  ;;  %v20270_v12 = vld [vmem:[#allocation8 + $0x6d4] ss:$24 sps:$4 sm:$0xff]  }
 0x2c9   :  { %6272 = vmatpush2.bf16.msra.mxu0 %v18210_v2  ;;  %v18343_v2 = vcombine.high %v4709_v0, %v4712_v1 }
 0x2ca   :  { %6273 = vmatprep.subr.bf16.mxu0 %v18205_v3  ;;  %v20268_v3 = vld [vmem:[#allocation8 + $0x6d0] ss:$24 sps:$4 sm:$0xff]  }
 0x2cb   :  { %4373 = vmatpush2.bf16.msra.mxu1 %v20241_v4  ;;  %v4703_v4 = vld [vmem:[#allocation5 + $0x1a58] sm:$0xff] }
 0x2cc   :  { %4374 = vmatprep.subr.bf16.mxu1 %v20246_v7  ;;  %v18342_v7 = vcombine.low %v4709_v0, %v4712_v1 }
 0x2cd   :  { %6274 = vmatpush2.bf16.msra.mxu0 %v18204_v8  ;;  %v18337_v8 = vcombine.high %v4703_v4, %v4706_v5 }
 0x2ce   :  { %6275 = vmatprep.subr.bf16.mxu0 %v18199_v9  ;;  %v20271_v9 = vld [vmem:[#allocation8 + $0x6a0] ss:$24 sps:$4 sm:$0xff]  }
 0x2cf   :  { %4375 = vmatpush2.bf16.msra.mxu1 %v20244_v10  ;;  %v4697_v10 = vld [vmem:[#allocation5 + $0x1998] sm:$0xff] }
 0x2d0   :  { %4376 = vmatprep.subr.bf16.mxu1 %v20249_v14  ;;  %v18336_v14 = vcombine.low %v4703_v4, %v4706_v5 }
 0x2d1   :  { %6276 = vmatpush2.bf16.msra.mxu0 %v18198_v15  ;;  %v18331_v15 = vcombine.high %v4697_v10, %v4700_v11 }
 0x2d2   :  { %6277 = vmatprep.subr.bf16.mxu0 %v18193_v62  ;;  %v20274_v62 = vld [vmem:[#allocation8 + $0x670] ss:$24 sps:$4 sm:$0xff]  }
 0x2d3   :  { %4377 = vmatpush2.bf16.msra.mxu1 %v20247_v16  ;;  %v4691_v16 = vld [vmem:[#allocation5 + $0x18d8] sm:$0xff] }
 0x2d4   :  { %4378 = vmatprep.subr.bf16.mxu1 %v20252_v19  ;;  %v18330_v19 = vcombine.low %v4697_v10, %v4700_v11  ;;  %v20303_v10 = vld [vmem:[#allocation8 + $0x7c4] ss:$24 sps:$4 sm:$0xff]  }
 0x2d5   :  { %6278 = vmatpush2.bf16.msra.mxu0 %v18192_v20  ;;  %v18325_v20 = vcombine.high %v4691_v16, %v4694_v44 }
 0x2d6   :  { %6279 = vmatprep.subr.bf16.mxu0 %v18187_v21  ;;  %v20277_v21 = vld [vmem:[#allocation8 + $0x640] ss:$24 sps:$4 sm:$0xff]  }
 0x2d7   :  { %4379 = vmatpush2.bf16.msra.mxu1 %v20250_v23  ;;  %v4685_v23 = vld [vmem:[#allocation5 + $0x1818] sm:$0xff] }
 0x2d8   :  { %4380 = vmatprep.subr.bf16.mxu1 %v20255_v26  ;;  %v18324_v26 = vcombine.low %v4691_v16, %v4694_v44  ;;  %v20306_v44 = vld [vmem:[#allocation8 + $0x794] ss:$24 sps:$4 sm:$0xff]  }
 0x2d9   :  { %6280 = vmatpush2.bf16.msra.mxu0 %v18186_v27  ;;  %v18319_v27 = vcombine.high %v4685_v23, %v4688_v24 }
 0x2da   :  { %6281 = vmatprep.subr.bf16.mxu0 %v18181_v29  ;;  %v20280_v29 = vld [vmem:[#allocation8 + $0x610] ss:$24 sps:$4 sm:$0xff]  }
 0x2db   :  { %4381 = vmatpush2.bf16.msra.mxu1 %v20253_v33  ;;  %v4775_v33 = vld [vmem:[#allocation5 + $0x2358] sm:$0xff] }
 0x2dc   :  { %4382 = vmatprep.subr.bf16.mxu1 %v20258_v37  ;;  %v18318_v37 = vcombine.low %v4685_v23, %v4688_v24  ;;  %v20304_v24 = vld [vmem:[#allocation8 + $0x790] ss:$24 sps:$4 sm:$0xff]  }
 0x2dd   :  { %6282 = vmatpush2.bf16.msra.mxu0 %v18180_v38  ;;  %v18409_v38 = vcombine.high %v4775_v33, %v4778_v35 }
 0x2de   :  { %6283 = vmatprep.subr.bf16.mxu0 %v18175_v39  ;;  %v20283_v39 = vld [vmem:[#allocation8 + $0x8e0] ss:$24 sps:$4 sm:$0xff]  }
 0x2df   :  { %4383 = vmatpush2.bf16.msra.mxu1 %v20256_v40  ;;  %v4769_v40 = vld [vmem:[#allocation5 + $0x2298] sm:$0xff] }
 0x2e0   :  { %4438 = vmatprep.subr.bf16.mxu1 %v20261_v57  ;;  %v18408_v57 = vcombine.low %v4775_v33, %v4778_v35  ;;  %v4625_v33 = vld [vmem:[#allocation5 + $0x1098] sm:$0xff] }
 0x2e1   :  { %6284 = vmatpush2.bf16.msra.mxu0 %v18174_v34  ;;  %v18403_v34 = vcombine.high %v4769_v40, %v4772_v41  ;;  %v4628_v35 = vld [vmem:[#allocation5 + $0x10f8] sm:$0xff] }
 0x2e2   :  { %4385 = vmatmul.mubr.bf16.vlgmr.msra.gmra.mxu1 %v21968_v63  ;;  %6339 = vmatprep.subr.bf16.mxu0 %v18361_v18  ;;  %v20265_v63 = vld [vmem:[#allocation8 + $0x700] ss:$24 sps:$4 sm:$0xff]   ;;  %v20286_v18 = vld [vmem:[#allocation8 + $0x8b0] ss:$24 sps:$4 sm:$0xff]  }
 0x2e3   :  { %4439 = vmatpush1.bf16.msra.mxu1 %v20259_v46  ;;  %4470 = vmatprep.mubr.bf16.mxu1 %v21998_v42  ;;  %v18348_v42 = vcombine.low %v4715_v53, %v4718_v54  ;;  %v4763_v46 = vld [vmem:[#allocation5 + $0x21d8] sm:$0xff]  ;;  %v20294_v54 = vld [vmem:[#allocation8 + $0x854] ss:$24 sps:$4 sm:$0xff]  }
 0x2e4   :  { %4440 = vmatprep.subr.bf16.mxu1 %v20264_v50  ;;  %6286 = vmatmul.mubr.bf16.vlgmr.msra.gmra.mxu0 %v21707_v56  ;;  %v18402_v50 = vcombine.low %v4769_v40, %v4772_v41  ;;  %v4760_v53 = vld [vmem:[#allocation5 + $0x2178] sm:$0xff]  ;;  %v4626_v40 = vld [vmem:[#allocation5 + $0x10a0] sm:$0xff] }
 0x2e5   :  { %6340 = vmatpush1.bf16.msra.mxu0 %v18360_v45  ;;  %6371 = vmatprep.mubr.bf16.mxu0 %v21708_v59  ;;  %v18397_v45 = vcombine.high %v4763_v46, %v4766_v48  ;;  %v4751_v59 = vld [vmem:[#allocation5 + $0x2058] sm:$0xff]  ;;  %v4629_v41 = vld [vmem:[#allocation5 + $0x1100] sm:$0xff] }
 0x2e6   :  { %6341 = vmatprep.subr.bf16.mxu0 %v18355_v51  ;;  %v20289_v51 = vld [vmem:[#allocation8 + $0x880] ss:$24 sps:$4 sm:$0xff]  }
 0x2e7   :  { %4441 = vmatpush1.bf16.msra.mxu1 %v20262_v52  ;;  %v4757_v52 = vld [vmem:[#allocation5 + $0x2118] sm:$0xff] }
 0x2e8   :  { %4442 = vmatprep.subr.bf16.mxu1 %v20267_v55  ;;  %v18396_v55 = vcombine.low %v4763_v46, %v4766_v48  ;;  %v18391_v56 = vcombine.high %v4757_v52, %v4760_v53  ;;  %v18390_v0 = vcombine.low %v4757_v52, %v4760_v53  ;;  %v4622_v46 = vld [vmem:[#allocation5 + $0x1038] sm:$0xff]  ;;  %v18258_v53 = vcombine.low %v4625_v33, %v4628_v35 }
 0x2e9   :  { %6342 = vmatpush1.bf16.msra.mxu0 %v18354_v58  ;;  %v20292_v58 = vld [vmem:[#allocation8 + $0x850] ss:$24 sps:$4 sm:$0xff]  }
 0x2ea   :  { %6343 = vmatprep.subr.bf16.mxu0 %v18349_v61  ;;  %v4754_v61 = vld [vmem:[#allocation5 + $0x20b8] sm:$0xff] }
 0x2eb   :  { %4443 = vmatpush1.bf16.msra.mxu1 %v20265_v63  ;;  %v20297_v63 = vld [vmem:[#allocation8 + $0x824] ss:$24 sps:$4 sm:$0xff]   ;;  %v18385_v1 = vcombine.high %v4751_v59, %v4754_v61  ;;  %v18384_v4 = vcombine.low %v4751_v59, %v4754_v61  ;;  %v21710_v61 = vld [vmem:[#allocation2 + $0x10] ss:$24 sps:$4 sm:$0xff]  }
 0x2ec   :  { %4444 = vmatprep.subr.bf16.mxu1 %v20270_v12  ;;  %v20295_v12 = vld [vmem:[#allocation8 + $0x820] ss:$24 sps:$4 sm:$0xff]  }
 0x2ed   :  { %6344 = vmatpush1.bf16.msra.mxu0 %v18348_v42  ;;  %v4745_v42 = vld [vmem:[#allocation5 + $0x1f98] sm:$0xff] }
 0x2ee   :  { %6345 = vmatprep.subr.bf16.mxu0 %v18343_v2  ;;  %v4748_v2 = vld [vmem:[#allocation5 + $0x1ff8] sm:$0xff] }
 0x2ef   :  { %4445 = vmatpush1.bf16.msra.mxu1 %v20268_v3  ;;  %v20300_v3 = vld [vmem:[#allocation8 + $0x7f4] ss:$24 sps:$4 sm:$0xff]   ;;  %v18379_v5 = vcombine.high %v4745_v42, %v4748_v2  ;;  %v18378_v11 = vcombine.low %v4745_v42, %v4748_v2 }
 0x2f0   :  { %4446 = vmatprep.subr.bf16.mxu1 %v20273_v6  ;;  %v20298_v6 = vld [vmem:[#allocation8 + $0x7f0] ss:$24 sps:$4 sm:$0xff]  }
 0x2f1   :  { %6346 = vmatpush1.bf16.msra.mxu0 %v18342_v7  ;;  %v4739_v7 = vld [vmem:[#allocation5 + $0x1ed8] sm:$0xff] }
 0x2f2   :  { %6347 = vmatprep.subr.bf16.mxu0 %v18337_v8  ;;  %v4742_v8 = vld [vmem:[#allocation5 + $0x1f38] sm:$0xff] }
 0x2f3   :  { %4447 = vmatpush1.bf16.msra.mxu1 %v20271_v9  ;;  %v4128_v9 = vpop.f32.mrf.mxu1 }
 0x2f4   :  { %4448 = vmatprep.subr.bf16.mxu1 %v20276_v13  ;;  %v18373_v13 = vcombine.high %v4739_v7, %v4742_v8 }
 0x2f5   :  { %6348 = vmatpush1.bf16.msra.mxu0 %v18336_v14  ;;  %v20301_v14 = vld [vmem:[#allocation8 + $0x7c0] ss:$24 sps:$4 sm:$0xff]   ;;  %v4130_v16 = vpop.f32.mrf.mxu1 }
 0x2f6   :  { %6349 = vmatprep.subr.bf16.mxu0 %v18331_v15  ;;  %v4733_v15 = vld [vmem:[#allocation5 + $0x1e18] sm:$0xff] }
 0x2f7   :  { %4449 = vmatpush1.bf16.msra.mxu1 %v20274_v62  ;;  %v4736_v62 = vld [vmem:[#allocation5 + $0x1e78] sm:$0xff] }
 0x2f8   :  { %4450 = vmatprep.subr.bf16.mxu1 %v20279_v17  ;;  %v4631_v17 = vld [vmem:[#allocation5 + $0x1158] sm:$0xff]  ;;  %v18367_v23 = vcombine.high %v4733_v15, %v4736_v62 }
 0x2f9   :  { %6350 = vmatpush1.bf16.msra.mxu0 %v18330_v19  ;;  %v4634_v19 = vld [vmem:[#allocation5 + $0x11b8] sm:$0xff] }
 0x2fa   :  { %6351 = vmatprep.subr.bf16.mxu0 %v18325_v20  ;;  %v18372_v20 = vcombine.low %v4739_v7, %v4742_v8  ;;  %v4607_v8 = vld [vmem:[#allocation5 + $0xe58] sm:$0xff] }
 0x2fb   :  { %4451 = vmatpush1.bf16.msra.mxu1 %v20277_v21  ;;  %v4171_v21 = vpop.f32.mrf.mxu0 }
 0x2fc   :  { %4452 = vmatprep.subr.bf16.mxu1 %v20282_v25  ;;  %v4632_v25 = vld [vmem:[#allocation5 + $0x1160] sm:$0xff] }
 0x2fd   :  { %6352 = vmatpush1.bf16.msra.mxu0 %v18324_v26  ;;  %v4635_v26 = vld [vmem:[#allocation5 + $0x11c0] sm:$0xff] }
 0x2fe   :  { %6353 = vmatprep.subr.bf16.mxu0 %v18319_v27  ;;  %v4132_v27 = vpop.f32.mrf.mxu1  ;;  %v18266_v48 = vcombine.low %v4632_v25, %v4635_v26 }
 0x2ff   :  { %4453 = vmatpush1.bf16.msra.mxu1 %v20280_v29  ;;  %v18265_v29 = vcombine.high %v4631_v17, %v4634_v19 }
 0x300   :  { %4454 = vmatprep.subr.bf16.mxu1 %v20285_v36  ;;  %v18366_v36 = vcombine.low %v4733_v15, %v4736_v62  ;;  %v4611_v15 = vld [vmem:[#allocation5 + $0xec0] sm:$0xff] }
 0x301   :  { %6354 = vmatpush1.bf16.msra.mxu0 %v18318_v37  ;;  %v4173_v37 = vpop.f32.mrf.mxu0 }
 0x302   :  { %6355 = vmatprep.subr.bf16.mxu0 %v18409_v38  ;;  %v18267_v38 = vcombine.high %v4632_v25, %v4635_v26  ;;  %v4595_v25 = vld [vmem:[#allocation5 + $0xcd8] sm:$0xff] }
 0x303   :  { %4455 = vmatpush2.bf16.msra.mxu1 %v20283_v39  ;;  %v18264_v39 = vcombine.low %v4631_v17, %v4634_v19  ;;  %v4598_v26 = vld [vmem:[#allocation5 + $0xd38] sm:$0xff] }
 0x304   :  { %4456 = vmatprep.subr.bf16.mxu1 %v20288_v43  ;;  %v22013_v43 = vpop.f32.mrf.mxu1 }
 0x305   :  { %6356 = vmatpush2.bf16.msra.mxu0 %v18408_v57  ;;  %v18259_v57 = vcombine.high %v4625_v33, %v4628_v35  ;;  %v4596_v35 = vld [vmem:[#allocation5 + $0xce0] sm:$0xff] }
 0x306   :  { %6357 = vmatprep.subr.bf16.mxu0 %v18403_v34  ;;  %v4172_v34 = vadd.f32 %v4171_v21, %v4128_v9  ;;  %v4610_v9 = vld [vmem:[#allocation5 + $0xeb8] sm:$0xff]  ;;  %v4602_v21 = vld [vmem:[#allocation5 + $0xda0] sm:$0xff] }
 0x307   :  { %4457 = vmatpush2.bf16.msra.mxu1 %v20286_v18  ;;  %v4619_v18 = vld [vmem:[#allocation5 + $0xfd8] sm:$0xff]  ;;  %v18241_v62 = vcombine.high %v4607_v8, %v4610_v9 }
 0x308   :  { %4458 = vmatprep.subr.bf16.mxu1 %v20291_v22  ;;  %v4175_v22 = vpop.f32.mrf.mxu0  ;;  %v18253_v59 = vcombine.high %v4619_v18, %v4622_v46 }
 0x309   :  { %6358 = vmatpush2.bf16.msra.mxu0 %v18402_v50 }
 0x30a   :  { %6359 = vmatprep.subr.bf16.mxu0 %v18397_v45  ;;  %v18261_v45 = vcombine.high %v4626_v40, %v4629_v41 }
 0x30b   :  { %4459 = vmatpush2.bf16.msra.mxu1 %v20289_v51  ;;  %v4174_v51 = vadd.f32 %v4173_v37, %v4130_v16  ;;  %v4601_v16 = vld [vmem:[#allocation5 + $0xd98] sm:$0xff]  ;;  %v18229_v37 = vcombine.high %v4595_v25, %v4598_v26 }
 0x30c   :  { %4460 = vmatprep.subr.bf16.mxu1 %v20294_v54  ;;  %v21709_v54 = vld [vmem:[#allocation2 + $0xc] ss:$24 sps:$4 sm:$0xff]  }
 0x30d   :  { %6360 = vmatpush2.bf16.msra.mxu0 %v18396_v55  ;;  %v4620_v55 = vld [vmem:[#allocation5 + $0xfe0] sm:$0xff] }
 0x30e   :  { %6361 = vmatprep.subr.bf16.mxu0 %v18391_v56  ;;  %v4623_v56 = vld [vmem:[#allocation5 + $0x1040] sm:$0xff] }
 0x30f   :  { %4461 = vmatpush2.bf16.msra.mxu1 %v20292_v58  ;;  %v18255_v2 = vcombine.high %v4620_v55, %v4623_v56 }
 0x310   :  { %4462 = vmatprep.subr.bf16.mxu1 %v20297_v63  ;;  %v4176_v63 = vadd.f32 %v4175_v22, %v4132_v27  ;;  %v4682_v22 = vld [vmem:[#allocation5 + $0x17b8] sm:$0xff] }
 0x311   :  { %6362 = vmatpush2.bf16.msra.mxu0 %v18390_v0 }
 0x312   :  { %6363 = vmatprep.subr.bf16.mxu0 %v18385_v1  ;;  %v4616_v1 = vld [vmem:[#allocation5 + $0xf78] sm:$0xff] }
 0x313   :  { %4463 = vmatpush2.bf16.msra.mxu1 %v20295_v12  ;;  %v18260_v12 = vcombine.low %v4626_v40, %v4629_v41 }
 0x314   :  { %4464 = vmatprep.subr.bf16.mxu1 %v20300_v3 }
 0x315   :  { %6364 = vmatpush2.bf16.msra.mxu0 %v18384_v4  ;;  %v18252_v4 = vcombine.low %v4619_v18, %v4622_v46  ;;  %v4593_v18 = vld [vmem:[#allocation5 + $0xc80] sm:$0xff] }
 0x316   :  { %6365 = vmatprep.subr.bf16.mxu0 %v18379_v5  ;;  %v4614_v5 = vld [vmem:[#allocation5 + $0xf20] sm:$0xff] }
 0x317   :  { %4465 = vmatpush2.bf16.msra.mxu1 %v20298_v6  ;;  %v4617_v6 = vld [vmem:[#allocation5 + $0xf80] sm:$0xff] }
 0x318   :  { %4466 = vmatprep.subr.bf16.mxu1 %v20303_v10  ;;  %v18254_v10 = vcombine.low %v4620_v55, %v4623_v56  ;;  %v18248_v17 = vcombine.low %v4614_v5, %v4617_v6  ;;  %v4673_v56 = vld [vmem:[#allocation5 + $0x1698] sm:$0xff] }
 0x319   :  { %6366 = vmatpush2.bf16.msra.mxu0 %v18378_v11  ;;  %v18249_v11 = vcombine.high %v4614_v5, %v4617_v6 }
 0x31a   :  { %6367 = vmatprep.subr.bf16.mxu0 %v18373_v13 }
 0x31b   :  { %4467 = vmatpush2.bf16.msra.mxu1 %v20301_v14  ;;  %v4608_v14 = vld [vmem:[#allocation5 + $0xe60] sm:$0xff] }
 0x31c   :  { %4468 = vmatprep.subr.bf16.mxu1 %v20306_v44  ;;  %v4604_v44 = vld [vmem:[#allocation5 + $0xdf8] sm:$0xff]  ;;  %v18243_v19 = vcombine.high %v4608_v14, %v4611_v15  ;;  %v18242_v27 = vcombine.low %v4608_v14, %v4611_v15 }
 0x31d   :  { %6368 = vmatpush2.bf16.msra.mxu0 %v18372_v20  ;;  %v18240_v20 = vcombine.low %v4607_v8, %v4610_v9  ;;  %v18234_v33 = vcombine.low %v4601_v16, %v4604_v44  ;;  %v4671_v8 = vld [vmem:[#allocation5 + $0x1640] sm:$0xff] }
 0x31e   :  { %6369 = vmatprep.subr.bf16.mxu0 %v18367_v23  ;;  %v4605_v23 = vld [vmem:[#allocation5 + $0xe00] sm:$0xff] }
 0x31f   :  { %4469 = vmatpush2.bf16.msra.mxu1 %v20304_v24  ;;  %v18235_v24 = vcombine.high %v4601_v16, %v4604_v44  ;;  %v18236_v40 = vcombine.low %v4602_v21, %v4605_v23  ;;  %v4665_v16 = vld [vmem:[#allocation5 + $0x1580] sm:$0xff] }
 0x320   :  { %6296 = vmatprep.subr.bf16.mxu1 %v18265_v29  ;;  %v18237_v29 = vcombine.high %v4602_v21, %v4605_v23 }
 0x321   :  { %6370 = vmatpush2.bf16.msra.mxu0 %v18366_v36  ;;  %v4599_v36 = vld [vmem:[#allocation5 + $0xd40] sm:$0xff] }
 0x322   :  { %4471 = vmatmul.mubr.bf16.vlgmr.msra.gmra.mxu1 %v22000_v60  ;;  %v4214_v50 = vpop.f32.mrf.mxu1  ;;  %6425 = vmatprep.subr.bf16.mxu0 %v18267_v38  ;;  %v4613_v60 = vld [vmem:[#allocation5 + $0xf18] sm:$0xff]  ;;  %v18231_v41 = vcombine.high %v4596_v35, %v4599_v36 }
 0x323   :  { %v22016_v52 = vadd.f32 %v4214_v50, %v4172_v34  ;;  %6297 = vmatpush1.bf16.msra.mxu1 %v18264_v39  ;;  %6328 = vmatprep.mubr.bf16.mxu1 %v21709_v54  ;;  %v18247_v7 = vcombine.high %v4613_v60, %v4616_v1  ;;  %v18246_v13 = vcombine.low %v4613_v60, %v4616_v1  ;;  %v4589_v38 = vld [vmem:[#allocation5 + $0xc18] sm:$0xff]  ;;  %v4590_v34 = vld [vmem:[#allocation5 + $0xc20] sm:$0xff] }
 0x324   :  { %v4216_v58 = vpop.f32.mrf.mxu1  ;;  %6298 = vmatprep.subr.bf16.mxu1 %v18259_v57  ;;  %6372 = vmatmul.mubr.bf16.vlgmr.msra.gmra.mxu0 %v21710_v61  ;;  %v4592_v39 = vld [vmem:[#allocation5 + $0xc78] sm:$0xff]  ;;  %v18228_v57 = vcombine.low %v4595_v25, %v4598_v26  ;;  %v18230_v50 = vcombine.low %v4596_v35, %v4599_v36  ;;  %v4674_v60 = vld [vmem:[#allocation5 + $0x16a0] sm:$0xff] }
 0x325   :  { %v22018_v0 = vadd.f32 %v4216_v58, %v4174_v51  ;;  %6426 = vmatpush1.bf16.msra.mxu0 %v18266_v48  ;;  %6457 = vmatprep.mubr.bf16.mxu0 %v21709_v54  ;;  %v18223_v46 = vcombine.high %v4589_v38, %v4592_v39  ;;  %v4679_v48 = vld [vmem:[#allocation5 + $0x1758] sm:$0xff]  ;;  %v18222_v51 = vcombine.low %v4589_v38, %v4592_v39  ;;  %v4683_v54 = vld [vmem:[#allocation5 + $0x17c0] sm:$0xff]  ;;  %v22022_v39 = vpop.f32.mrf.mxu0 }
 0x326   :  { %v4218_v42 = vpop.f32.mrf.mxu1  ;;  %6427 = vmatprep.subr.bf16.mxu0 %v18261_v45  ;;  %v18225_v45 = vcombine.high %v4590_v34, %v4593_v18  ;;  %v18313_v55 = vcombine.high %v4679_v48, %v4682_v22  ;;  %v4676_v58 = vld [vmem:[#allocation5 + $0x16f8] sm:$0xff]  ;;  %v4677_v1 = vld [vmem:[#allocation5 + $0x1700] sm:$0xff] }
 0x327   :  { %v22020_v3 = vadd.f32 %v4218_v42, %v4176_v63  ;;  %6299 = vmatpush1.bf16.msra.mxu1 %v18258_v53  ;;  %v4680_v53 = vld [vmem:[#allocation5 + $0x1760] sm:$0xff]  ;;  %v18312_v63 = vcombine.low %v4679_v48, %v4682_v22  ;;  %v4667_v42 = vld [vmem:[#allocation5 + $0x15d8] sm:$0xff]  ;;  %v18309_v5 = vcombine.high %v4674_v60, %v4677_v1  ;;  %v18306_v6 = vcombine.low %v4673_v56, %v4676_v58 }
 0x328   :  { %6300 = vmatprep.subr.bf16.mxu1 %v18253_v59  ;;  %v18224_v59 = vcombine.low %v4590_v34, %v4593_v18  ;;  %v18315_v61 = vcombine.high %v4680_v53, %v4683_v54  ;;  %v4659_v25 = vld [vmem:[#allocation5 + $0x14c0] sm:$0xff]  ;;  %v4257_v18 = vpop.f32.mrf.mxu0 }
 0x329   :  { %6428 = vmatpush1.bf16.msra.mxu0 %v18260_v12  ;;  %v18307_v12 = vcombine.high %v4673_v56, %v4676_v58  ;;  %v4653_v38 = vld [vmem:[#allocation5 + $0x1400] sm:$0xff] }
 0x32a   :  { %6429 = vmatprep.subr.bf16.mxu0 %v18255_v2  ;;  %v4670_v2 = vld [vmem:[#allocation5 + $0x1638] sm:$0xff]  ;;  %v4644_v22 = vld [vmem:[#allocation5 + $0x12e0] sm:$0xff] }
 0x32b   :  { %6301 = vmatpush1.bf16.msra.mxu1 %v18252_v4  ;;  %v18314_v4 = vcombine.low %v4680_v53, %v4683_v54  ;;  %v18301_v9 = vcombine.high %v4667_v42, %v4670_v2  ;;  %v18300_v15 = vcombine.low %v4667_v42, %v4670_v2  ;;  %v4640_v53 = vld [vmem:[#allocation5 + $0x1278] sm:$0xff] }
 0x32c   :  { %6302 = vmatprep.subr.bf16.mxu1 %v18247_v7  ;;  %v4668_v7 = vld [vmem:[#allocation5 + $0x15e0] sm:$0xff] }
 0x32d   :  { %6430 = vmatpush1.bf16.msra.mxu0 %v18254_v10  ;;  %v4661_v10 = vld [vmem:[#allocation5 + $0x1518] sm:$0xff]  ;;  %v18303_v14 = vcombine.high %v4668_v7, %v4671_v8 }
 0x32e   :  { %6431 = vmatprep.subr.bf16.mxu0 %v18249_v11  ;;  %v4664_v11 = vld [vmem:[#allocation5 + $0x1578] sm:$0xff] }
 0x32f   :  { %6303 = vmatpush1.bf16.msra.mxu1 %v18246_v13  ;;  %v18308_v13 = vcombine.low %v4674_v60, %v4677_v1  ;;  %v18295_v44 = vcombine.high %v4661_v10, %v4664_v11  ;;  %v18294_v23 = vcombine.low %v4661_v10, %v4664_v11  ;;  %v4536_v60 = vld [vmem:[#allocation5 + $0x560] sm:$0xff] }
 0x330   :  { %6304 = vmatprep.subr.bf16.mxu1 %v18241_v62  ;;  %v4662_v62 = vld [vmem:[#allocation5 + $0x1520] sm:$0xff] }
 0x331   :  { %6432 = vmatpush1.bf16.msra.mxu0 %v18248_v17  ;;  %v4655_v17 = vld [vmem:[#allocation5 + $0x1458] sm:$0xff]  ;;  %v18297_v21 = vcombine.high %v4662_v62, %v4665_v16  ;;  %v4539_v1 = vld [vmem:[#allocation5 + $0x5c0] sm:$0xff] }
 0x332   :  { %6433 = vmatprep.subr.bf16.mxu0 %v18243_v19  ;;  %v4658_v19 = vld [vmem:[#allocation5 + $0x14b8] sm:$0xff] }
 0x333   :  { %6305 = vmatpush1.bf16.msra.mxu1 %v18240_v20  ;;  %v18302_v20 = vcombine.low %v4668_v7, %v4671_v8  ;;  %v18289_v26 = vcombine.high %v4655_v17, %v4658_v19  ;;  %v18288_v36 = vcombine.low %v4655_v17, %v4658_v19  ;;  %v18171_v7 = vcombine.high %v4536_v60, %v4539_v1  ;;  %v4530_v8 = vld [vmem:[#allocation5 + $0x4a0] sm:$0xff] }
 0x334   :  { %6306 = vmatprep.subr.bf16.mxu1 %v18235_v24  ;;  %v4656_v24 = vld [vmem:[#allocation5 + $0x1460] sm:$0xff] }
 0x335   :  { %6434 = vmatpush1.bf16.msra.mxu0 %v18242_v27  ;;  %v4649_v27 = vld [vmem:[#allocation5 + $0x1398] sm:$0xff]  ;;  %v18291_v35 = vcombine.high %v4656_v24, %v4659_v25  ;;  %v18290_v34 = vcombine.low %v4656_v24, %v4659_v25  ;;  %v4524_v19 = vld [vmem:[#allocation5 + $0x3e0] sm:$0xff] }
 0x336   :  { %6435 = vmatprep.subr.bf16.mxu0 %v18237_v29  ;;  %v4652_v29 = vld [vmem:[#allocation5 + $0x13f8] sm:$0xff] }
 0x337   :  { %6307 = vmatpush1.bf16.msra.mxu1 %v18234_v33  ;;  %v18296_v33 = vcombine.low %v4662_v62, %v4665_v16  ;;  %v18282_v48 = vcombine.low %v4649_v27, %v4652_v29  ;;  %v4534_v62 = vld [vmem:[#allocation5 + $0x508] sm:$0xff]  ;;  %v21711_v24 = vld [vmem:[#allocation2 + $0x8] ss:$24 sps:$4 sm:$0xff]  }
 0x338   :  { %6308 = vmatprep.subr.bf16.mxu1 %v18229_v37  ;;  %v4650_v37 = vld [vmem:[#allocation5 + $0x13a0] sm:$0xff] }
 0x339   :  { %6436 = vmatpush1.bf16.msra.mxu0 %v18236_v40  ;;  %v18283_v40 = vcombine.high %v4649_v27, %v4652_v29  ;;  %v18284_v54 = vcombine.low %v4650_v37, %v4653_v38  ;;  %v21712_v29 = vld [vmem:[#allocation2 + $0x4] ss:$24 sps:$4 sm:$0xff]  }
 0x33a   :  { %6437 = vmatprep.subr.bf16.mxu0 %v18231_v41  ;;  %v4643_v41 = vld [vmem:[#allocation5 + $0x12d8] sm:$0xff] }
 0x33b   :  { %6309 = vmatpush1.bf16.msra.mxu1 %v18228_v57  ;;  %v4646_v57 = vld [vmem:[#allocation5 + $0x1338] sm:$0xff] }
 0x33c   :  { %6310 = vmatprep.subr.bf16.mxu1 %v18223_v46  ;;  %v18285_v46 = vcombine.high %v4650_v37, %v4653_v38  ;;  %v18276_v58 = vcombine.low %v4643_v41, %v4646_v57 }
 0x33d   :  { %6438 = vmatpush1.bf16.msra.mxu0 %v18230_v50  ;;  %v4647_v50 = vld [vmem:[#allocation5 + $0x1340] sm:$0xff] }
 0x33e   :  { %6439 = vmatprep.subr.bf16.mxu0 %v18225_v45  ;;  %v18277_v45 = vcombine.high %v4643_v41, %v4646_v57  ;;  %v18279_v56 = vcombine.high %v4644_v22, %v4647_v50  ;;  %v4518_v57 = vld [vmem:[#allocation5 + $0x320] sm:$0xff] }
 0x33f   :  { %6311 = vmatpush1.bf16.msra.mxu1 %v18222_v51  ;;  %v4637_v51 = vld [vmem:[#allocation5 + $0x1218] sm:$0xff] }
 0x340   :  { %6312 = vmatprep.subr.bf16.mxu1 %v18313_v55  ;;  %v4259_v55 = vpop.f32.mrf.mxu0 }
 0x341   :  { %6440 = vmatpush1.bf16.msra.mxu0 %v18224_v59  ;;  %v4638_v59 = vld [vmem:[#allocation5 + $0x1220] sm:$0xff] }
 0x342   :  { %6441 = vmatprep.subr.bf16.mxu0 %v18315_v61  ;;  %v4641_v61 = vld [vmem:[#allocation5 + $0x1280] sm:$0xff]  ;;  %v4261_v42 = vpop.f32.mrf.mxu0 }
 0x343   :  { %6313 = vmatpush2.bf16.msra.mxu1 %v18312_v63  ;;  %v18271_v63 = vcombine.high %v4637_v51, %v4640_v53  ;;  %v18273_v2 = vcombine.high %v4638_v59, %v4641_v61  ;;  %v18272_v10 = vcombine.low %v4638_v59, %v4641_v61  ;;  %v4515_v59 = vld [vmem:[#allocation5 + $0x2c0] sm:$0xff] }
 0x344   :  { %6314 = vmatprep.subr.bf16.mxu1 %v18307_v12  ;;  %v18278_v12 = vcombine.low %v4644_v22, %v4647_v50  ;;  %v22024_v11 = vpop.f32.mrf.mxu0 }
 0x345   :  { %6442 = vmatpush2.bf16.msra.mxu0 %v18314_v4  ;;  %v18270_v4 = vcombine.low %v4637_v51, %v4640_v53  ;;  %v4519_v51 = vld [vmem:[#allocation5 + $0x328] sm:$0xff] }
 0x346   :  { %6443 = vmatprep.subr.bf16.mxu0 %v18309_v5  ;;  %v4537_v5 = vld [vmem:[#allocation5 + $0x568] sm:$0xff]  ;;  %v4343_v16 = vpop.f32.mrf.mxu0 }
 0x347   :  { %6315 = vmatpush2.bf16.msra.mxu1 %v18306_v6  ;;  %v4540_v6 = vld [vmem:[#allocation5 + $0x5c8] sm:$0xff] }
 0x348   :  { %6316 = vmatprep.subr.bf16.mxu1 %v18301_v9  ;;  %v4533_v9 = vld [vmem:[#allocation5 + $0x500] sm:$0xff]  ;;  %v4522_v53 = vld [vmem:[#allocation5 + $0x388] sm:$0xff] }
 0x349   :  { %6444 = vmatpush2.bf16.msra.mxu0 %v18308_v13  ;;  %v18173_v13 = vcombine.high %v4537_v5, %v4540_v6  ;;  %v18165_v17 = vcombine.high %v4530_v8, %v4533_v9  ;;  %v18164_v27 = vcombine.low %v4530_v8, %v4533_v9  ;;  %v4507_v8 = vld [vmem:[#allocation5 + $0x1a8] sm:$0xff] }
 0x34a   :  { %6445 = vmatprep.subr.bf16.mxu0 %v18303_v14  ;;  %v18170_v14 = vcombine.low %v4536_v60, %v4539_v1  ;;  %v4513_v1 = vld [vmem:[#allocation5 + $0x268] sm:$0xff] }
 0x34b   :  { %6317 = vmatpush2.bf16.msra.mxu1 %v18300_v15  ;;  %v4531_v15 = vld [vmem:[#allocation5 + $0x4a8] sm:$0xff] }
 0x34c   :  { %6318 = vmatprep.subr.bf16.mxu1 %v18295_v44  ;;  %v22026_v44 = vpop.f32.mrf.mxu1  ;;  %v18167_v25 = vcombine.high %v4531_v15, %v4534_v62  ;;  %v4510_v9 = vld [vmem:[#allocation5 + $0x208] sm:$0xff] }
 0x34d   :  { %6446 = vmatpush2.bf16.msra.mxu0 %v18302_v20  ;;  %v4527_v20 = vld [vmem:[#allocation5 + $0x440] sm:$0xff] }
 0x34e   :  { %6447 = vmatprep.subr.bf16.mxu0 %v18297_v21  ;;  %v18172_v21 = vcombine.low %v4537_v5, %v4540_v6  ;;  %v18159_v38 = vcombine.high %v4524_v19, %v4527_v20  ;;  %v18154_v5 = vcombine.low %v4519_v51, %v4522_v53 }
 0x34f   :  { %6319 = vmatpush2.bf16.msra.mxu1 %v18294_v23 }
 0x350   :  { %6320 = vmatprep.subr.bf16.mxu1 %v18289_v26 }
 0x351   :  { %6448 = vmatpush2.bf16.msra.mxu0 %v18296_v33  ;;  %v4525_v33 = vld [vmem:[#allocation5 + $0x3e8] sm:$0xff] }
 0x352   :  { %6449 = vmatprep.subr.bf16.mxu0 %v18291_v35  ;;  %v4528_v35 = vld [vmem:[#allocation5 + $0x448] sm:$0xff] }
 0x353   :  { %6321 = vmatpush2.bf16.msra.mxu1 %v18288_v36  ;;  %v4345_v36 = vpop.f32.mrf.mxu0  ;;  %v18160_v61 = vcombine.low %v4525_v33, %v4528_v35 }
 0x354   :  { %6322 = vmatprep.subr.bf16.mxu1 %v18283_v40 }
 0x355   :  { %6450 = vmatpush2.bf16.msra.mxu0 %v18290_v34  ;;  %v4521_v34 = vld [vmem:[#allocation5 + $0x380] sm:$0xff] }
 0x356   :  { %6451 = vmatprep.subr.bf16.mxu0 %v18285_v46  ;;  %v18166_v46 = vcombine.low %v4531_v15, %v4534_v62  ;;  %v18152_v60 = vcombine.low %v4518_v57, %v4521_v34  ;;  %v18143_v62 = vcombine.high %v4507_v8, %v4510_v9 }
 0x357   :  { %6323 = vmatpush2.bf16.msra.mxu1 %v18282_v48  ;;  %v18161_v48 = vcombine.high %v4525_v33, %v4528_v35  ;;  %v4584_v35 = vld [vmem:[#allocation5 + $0xb60] sm:$0xff] }
 0x358   :  { %6324 = vmatprep.subr.bf16.mxu1 %v18277_v45  ;;  %v18158_v45 = vcombine.low %v4524_v19, %v4527_v20  ;;  %v4504_v19 = vld [vmem:[#allocation5 + $0x148] sm:$0xff] }
 0x359   :  { %6452 = vmatpush2.bf16.msra.mxu0 %v18284_v54  ;;  %v4347_v54 = vpop.f32.mrf.mxu0 }
 0x35a   :  { %6453 = vmatprep.subr.bf16.mxu0 %v18279_v56  ;;  %v18153_v56 = vcombine.high %v4518_v57, %v4521_v34  ;;  %v4585_v57 = vld [vmem:[#allocation5 + $0xb68] sm:$0xff] }
 0x35b   :  { %6325 = vmatpush2.bf16.msra.mxu1 %v18276_v58  ;;  %v4588_v34 = vld [vmem:[#allocation5 + $0xbc8] sm:$0xff] }
 0x35c   :  { %6326 = vmatprep.subr.bf16.mxu1 %v18271_v63  ;;  %v18155_v63 = vcombine.high %v4519_v51, %v4522_v53  ;;  %v4579_v53 = vld [vmem:[#allocation5 + $0xaa8] sm:$0xff] }
 0x35d   :  { %6454 = vmatpush2.bf16.msra.mxu0 %v18278_v12  ;;  %v4516_v12 = vld [vmem:[#allocation5 + $0x2c8] sm:$0xff] }
 0x35e   :  { %6455 = vmatprep.subr.bf16.mxu0 %v18273_v2  ;;  %v4506_v2 = vld [vmem:[#allocation5 + $0x1a0] sm:$0xff]  ;;  %v18149_v6 = vcombine.high %v4513_v1, %v4516_v12  ;;  %v18148_v15 = vcombine.low %v4513_v1, %v4516_v12  ;;  %v4573_v1 = vld [vmem:[#allocation5 + $0x9e8] sm:$0xff] }
 0x35f   :  { %6327 = vmatpush2.bf16.msra.mxu1 %v18270_v4  ;;  %v4509_v4 = vld [vmem:[#allocation5 + $0x200] sm:$0xff]  ;;  %v4576_v12 = vld [vmem:[#allocation5 + $0xa48] sm:$0xff] }
 0x360   :  { %6382 = vmatprep.subr.bf16.mxu1 %v18171_v7 }
 0x361   :  { %6456 = vmatpush2.bf16.msra.mxu0 %v18272_v10  ;;  %v18141_v10 = vcombine.high %v4506_v2, %v4509_v4 }
 0x362   :  { %v4300_v23 = vpop.f32.mrf.mxu1  ;;  %6329 = vmatmul.mubr.bf16.vlgmr.msra.gmra.mxu1 %v21711_v24  ;;  %6511 = vmatprep.subr.bf16.mxu0 %v18173_v13  ;;  %v4500_v13 = vld [vmem:[#allocation5 + $0xe0] sm:$0xff] }
 0x363   :  { %v4301_v26 = vadd.f32 %v4300_v23, %v4257_v18  ;;  %6383 = vmatpush1.bf16.msra.mxu1 %v18170_v14  ;;  %6414 = vmatprep.mubr.bf16.mxu1 %v21712_v29  ;;  %v4503_v14 = vld [vmem:[#allocation5 + $0x140] sm:$0xff] }
 0x364   :  { %v4302_v37 = vpop.f32.mrf.mxu1  ;;  %6384 = vmatprep.subr.bf16.mxu1 %v18165_v17  ;;  %6458 = vmatmul.mubr.bf16.vlgmr.msra.gmra.mxu0 %v21711_v24  ;;  %v4501_v17 = vld [vmem:[#allocation5 + $0xe8] sm:$0xff]  ;;  %v18135_v20 = vcombine.high %v4500_v13, %v4503_v14  ;;  %v4497_v23 = vld [vmem:[#allocation5 + $0x80] sm:$0xff]  ;;  %v18142_v24 = vcombine.low %v4507_v8, %v4510_v9 }
 0x365   :  { %v22028_v40 = vadd.f32 %v4343_v16, %v4301_v26  ;;  %v4303_v41 = vadd.f32 %v4302_v37, %v4259_v55  ;;  %6512 = vmatpush1.bf16.msra.mxu0 %v18172_v21  ;;  %6543 = vmatprep.mubr.bf16.mxu0 %v21712_v29  ;;  %v4512_v55 = vld [vmem:[#allocation5 + $0x260] sm:$0xff]  ;;  %v18140_v16 = vcombine.low %v4506_v2, %v4509_v4  ;;  %v4498_v29 = vld [vmem:[#allocation5 + $0x88] sm:$0xff] }
 0x366   :  { %v4304_v18 = vpop.f32.mrf.mxu1  ;;  %6513 = vmatprep.subr.bf16.mxu0 %v18167_v25  ;;  %v18146_v7 = vcombine.low %v4512_v55, %v4515_v59  ;;  %v4494_v21 = vld [vmem:[#allocation5 + $0x20] sm:$0xff]  ;;  %v18137_v25 = vcombine.high %v4501_v17, %v4504_v19  ;;  %v18134_v26 = vcombine.low %v4500_v13, %v4503_v14  ;;  %v18136_v37 = vcombine.low %v4501_v17, %v4504_v19  ;;  %v4567_v8 = vld [vmem:[#allocation5 + $0x928] sm:$0xff] }
 0x367   :  { %v22030_v22 = vadd.f32 %v4345_v36, %v4303_v41  ;;  %v4305_v50 = vadd.f32 %v4304_v18, %v4261_v42  ;;  %6385 = vmatpush1.bf16.msra.mxu1 %v18164_v27  ;;  %v18147_v42 = vcombine.high %v4512_v55, %v4515_v59  ;;  %v4495_v27 = vld [vmem:[#allocation5 + $0x28] sm:$0xff]  ;;  %v18129_v33 = vcombine.high %v4494_v21, %v4497_v23  ;;  %v4587_v36 = vld [vmem:[#allocation5 + $0xbc0] sm:$0xff] }
 0x368   :  { %6386 = vmatprep.subr.bf16.mxu1 %v18159_v38  ;;  %v18131_v38 = vcombine.high %v4495_v27, %v4498_v29  ;;  %v18128_v41 = vcombine.low %v4494_v21, %v4497_v23  ;;  %v4578_v18 = vld [vmem:[#allocation5 + $0xaa0] sm:$0xff]  ;;  %v18218_v51 = vcombine.low %v4584_v35, %v4587_v36  ;;  %v4570_v9 = vld [vmem:[#allocation5 + $0x988] sm:$0xff] }
 0x369   :  { %v22032_v58 = vadd.f32 %v4347_v54, %v4305_v50  ;;  %6514 = vmatpush1.bf16.msra.mxu0 %v18166_v46  ;;  %v18219_v46 = vcombine.high %v4584_v35, %v4587_v36  ;;  %v18130_v50 = vcombine.low %v4495_v27, %v4498_v29  ;;  %v4582_v54 = vld [vmem:[#allocation5 + $0xb08] sm:$0xff]  ;;  %v4572_v55 = vld [vmem:[#allocation5 + $0x9e0] sm:$0xff] }
 0x36a   :  { %6515 = vmatprep.subr.bf16.mxu0 %v18161_v48  ;;  %v4581_v48 = vld [vmem:[#allocation5 + $0xb00] sm:$0xff]  ;;  %v4561_v17 = vld [vmem:[#allocation5 + $0x868] sm:$0xff] }
 0x36b   :  { %6387 = vmatpush1.bf16.msra.mxu1 %v18158_v45  ;;  %v18221_v45 = vcombine.high %v4585_v57, %v4588_v34  ;;  %v4575_v59 = vld [vmem:[#allocation5 + $0xa40] sm:$0xff]  ;;  %v4564_v19 = vld [vmem:[#allocation5 + $0x8c8] sm:$0xff] }
 0x36c   :  { %6388 = vmatprep.subr.bf16.mxu1 %v18153_v56  ;;  %v18213_v56 = vcombine.high %v4578_v18, %v4581_v48  ;;  %v4566_v2 = vld [vmem:[#allocation5 + $0x920] sm:$0xff]  ;;  %v4555_v27 = vld [vmem:[#allocation5 + $0x7a8] sm:$0xff] }
 0x36d   :  { %6516 = vmatpush1.bf16.msra.mxu0 %v18160_v61  ;;  %v18220_v61 = vcombine.low %v4585_v57, %v4588_v34  ;;  %v4569_v4 = vld [vmem:[#allocation5 + $0x980] sm:$0xff]  ;;  %v4558_v29 = vld [vmem:[#allocation5 + $0x808] sm:$0xff] }
 0x36e   :  { %6517 = vmatprep.subr.bf16.mxu0 %v18155_v63  ;;  %v18215_v63 = vcombine.high %v4579_v53, %v4582_v54  ;;  %v4560_v13 = vld [vmem:[#allocation5 + $0x860] sm:$0xff]  ;;  %v4549_v57 = vld [vmem:[#allocation5 + $0x6e8] sm:$0xff] }
 0x36f   :  { %6389 = vmatpush1.bf16.msra.mxu1 %v18152_v60  ;;  %v18212_v60 = vcombine.low %v4578_v18, %v4581_v48  ;;  %v4563_v14 = vld [vmem:[#allocation5 + $0x8c0] sm:$0xff]  ;;  %v4552_v34 = vld [vmem:[#allocation5 + $0x748] sm:$0xff] }
 0x370   :  { %6390 = vmatprep.subr.bf16.mxu1 %v18147_v42  ;;  %v18207_v42 = vcombine.high %v4572_v55, %v4575_v59  ;;  %v4554_v21 = vld [vmem:[#allocation5 + $0x7a0] sm:$0xff] }
 0x371   :  { %6518 = vmatpush1.bf16.msra.mxu0 %v18154_v5  ;;  %v18214_v5 = vcombine.low %v4579_v53, %v4582_v54  ;;  %v4557_v23 = vld [vmem:[#allocation5 + $0x800] sm:$0xff]  ;;  %v4543_v53 = vld [vmem:[#allocation5 + $0x628] sm:$0xff] }
 0x372   :  { %6519 = vmatprep.subr.bf16.mxu0 %v18149_v6  ;;  %v18209_v6 = vcombine.high %v4573_v1, %v4576_v12  ;;  %v4548_v35 = vld [vmem:[#allocation5 + $0x6e0] sm:$0xff]  ;;  %v4546_v54 = vld [vmem:[#allocation5 + $0x688] sm:$0xff] }
 0x373   :  { %6391 = vmatpush1.bf16.msra.mxu1 %v18146_v7  ;;  %v18206_v7 = vcombine.low %v4572_v55, %v4575_v59  ;;  %v4551_v36 = vld [vmem:[#allocation5 + $0x740] sm:$0xff] }
 0x374   :  { %6392 = vmatprep.subr.bf16.mxu1 %v18141_v10  ;;  %v18201_v10 = vcombine.high %v4566_v2, %v4569_v4  ;;  %v4542_v18 = vld [vmem:[#allocation5 + $0x620] sm:$0xff] }
 0x375   :  { %6520 = vmatpush1.bf16.msra.mxu0 %v18148_v15  ;;  %v18208_v15 = vcombine.low %v4573_v1, %v4576_v12  ;;  %v4545_v48 = vld [vmem:[#allocation5 + $0x680] sm:$0xff]  ;;  %v4729_v1 = vld [vmem:[#allocation5 + $0x1d68] sm:$0xff] }
 0x376   :  { %6521 = vmatprep.subr.bf16.mxu0 %v18143_v62  ;;  %v18203_v62 = vcombine.high %v4567_v8, %v4570_v9  ;;  %v4728_v55 = vld [vmem:[#allocation5 + $0x1d60] sm:$0xff]  ;;  %v4732_v12 = vld [vmem:[#allocation5 + $0x1dc8] sm:$0xff] }
 0x377   :  { %6393 = vmatpush1.bf16.msra.mxu1 %v18140_v16  ;;  %v18200_v16 = vcombine.low %v4566_v2, %v4569_v4  ;;  %v4731_v59 = vld [vmem:[#allocation5 + $0x1dc0] sm:$0xff] }
 0x378   :  { %6394 = vmatprep.subr.bf16.mxu1 %v18135_v20  ;;  %v18195_v20 = vcombine.high %v4560_v13, %v4563_v14  ;;  %v18363_v2 = vcombine.high %v4728_v55, %v4731_v59  ;;  %v4722_v4 = vld [vmem:[#allocation5 + $0x1ca0] sm:$0xff] }
 0x379   :  { %6522 = vmatpush1.bf16.msra.mxu0 %v18142_v24  ;;  %v18202_v24 = vcombine.low %v4567_v8, %v4570_v9  ;;  %v18365_v8 = vcombine.high %v4729_v1, %v4732_v12  ;;  %v18362_v9 = vcombine.low %v4728_v55, %v4731_v59 }
 0x37a   :  { %6523 = vmatprep.subr.bf16.mxu0 %v18137_v25  ;;  %v18197_v25 = vcombine.high %v4561_v17, %v4564_v19 }
 0x37b   :  { %6395 = vmatpush1.bf16.msra.mxu1 %v18134_v26  ;;  %v18194_v26 = vcombine.low %v4560_v13, %v4563_v14  ;;  %v4726_v13 = vld [vmem:[#allocation5 + $0x1d08] sm:$0xff]  ;;  %v22036_v14 = vpop.f32.mrf.mxu1 }
 0x37c   :  { %6396 = vmatprep.subr.bf16.mxu1 %v18129_v33  ;;  %v18189_v33 = vcombine.high %v4554_v21, %v4557_v23 }
 0x37d   :  { %6524 = vmatpush1.bf16.msra.mxu0 %v18136_v37  ;;  %v18196_v37 = vcombine.low %v4561_v17, %v4564_v19  ;;  %v18364_v17 = vcombine.low %v4729_v1, %v4732_v12  ;;  %v4698_v1 = vld [vmem:[#allocation5 + $0x19a0] sm:$0xff] }
 0x37e   :  { %6525 = vmatprep.subr.bf16.mxu0 %v18131_v38  ;;  %v18191_v38 = vcombine.high %v4555_v27, %v4558_v29  ;;  %v4701_v12 = vld [vmem:[#allocation5 + $0x1a00] sm:$0xff] }
 0x37f   :  { %6397 = vmatpush1.bf16.msra.mxu1 %v18128_v41  ;;  %v18188_v41 = vcombine.low %v4554_v21, %v4557_v23  ;;  %v21713_v21 = vld [vmem:[#allocation2] ss:$24 sps:$4 sm:$0xff]  }
 0x380   :  { %6398 = vmatprep.subr.bf16.mxu1 %v18219_v46  ;;  %v18183_v46 = vcombine.high %v4548_v35, %v4551_v36 }
 0x381   :  { %6526 = vmatpush1.bf16.msra.mxu0 %v18130_v50  ;;  %v18190_v50 = vcombine.low %v4555_v27, %v4558_v29  ;;  %v4717_v27 = vld [vmem:[#allocation5 + $0x1be8] sm:$0xff] }
 0x382   :  { %6527 = vmatprep.subr.bf16.mxu0 %v18221_v45  ;;  %v18185_v45 = vcombine.high %v4549_v57, %v4552_v34  ;;  %v4720_v29 = vld [vmem:[#allocation5 + $0x1c48] sm:$0xff] }
 0x383   :  { %6399 = vmatpush2.bf16.msra.mxu1 %v18218_v51  ;;  %v18182_v51 = vcombine.low %v4548_v35, %v4551_v36 }
 0x384   :  { %6400 = vmatprep.subr.bf16.mxu1 %v18213_v56  ;;  %v18177_v56 = vcombine.high %v4542_v18, %v4545_v48 }
 0x385   :  { %6528 = vmatpush2.bf16.msra.mxu0 %v18220_v61  ;;  %v18184_v61 = vcombine.low %v4549_v57, %v4552_v34 }
 0x386   :  { %6529 = vmatprep.subr.bf16.mxu0 %v18215_v63  ;;  %v18179_v63 = vcombine.high %v4543_v53, %v4546_v54 }
 0x387   :  { %6401 = vmatpush2.bf16.msra.mxu1 %v18212_v60  ;;  %v18176_v60 = vcombine.low %v4542_v18, %v4545_v48 }
 0x388   :  { %6402 = vmatprep.subr.bf16.mxu1 %v18207_v42  ;;  %v22034_v42 = vpop.f32.mrf.mxu0 }
 0x389   :  { %6530 = vmatpush2.bf16.msra.mxu0 %v18214_v5  ;;  %v4725_v5 = vld [vmem:[#allocation5 + $0x1d00] sm:$0xff] }
 0x38a   :  { %6531 = vmatprep.subr.bf16.mxu0 %v18209_v6  ;;  %v18178_v6 = vcombine.low %v4543_v53, %v4546_v54  ;;  %v4704_v53 = vld [vmem:[#allocation5 + $0x1a60] sm:$0xff] }
 0x38b   :  { %6403 = vmatpush2.bf16.msra.mxu1 %v18206_v7  ;;  %v4429_v7 = vpop.f32.mrf.mxu0  ;;  %v4707_v54 = vld [vmem:[#allocation5 + $0x1ac0] sm:$0xff] }
 0x38c   :  { %6404 = vmatprep.subr.bf16.mxu1 %v18201_v10  ;;  %v4723_v10 = vld [vmem:[#allocation5 + $0x1ca8] sm:$0xff] }
 0x38d   :  { %6532 = vmatpush2.bf16.msra.mxu0 %v18208_v15  ;;  %v18357_v15 = vcombine.high %v4722_v4, %v4725_v5  ;;  %v4431_v19 = vpop.f32.mrf.mxu0  ;;  %v18359_v23 = vcombine.high %v4723_v10, %v4726_v13 }
 0x38e   :  { %6533 = vmatprep.subr.bf16.mxu0 %v18203_v62  ;;  %v4716_v62 = vld [vmem:[#allocation5 + $0x1be0] sm:$0xff] }
 0x38f   :  { %6405 = vmatpush2.bf16.msra.mxu1 %v18200_v16  ;;  %v4719_v16 = vld [vmem:[#allocation5 + $0x1c40] sm:$0xff]  ;;  %v4433_v57 = vpop.f32.mrf.mxu0 }
 0x390   :  { %6406 = vmatprep.subr.bf16.mxu1 %v18195_v20  ;;  %v18351_v35 = vcombine.high %v4716_v62, %v4719_v16  ;;  %v18350_v48 = vcombine.low %v4716_v62, %v4719_v16  ;;  %v18332_v62 = vcombine.low %v4698_v1, %v4701_v12  ;;  %v4693_v16 = vld [vmem:[#allocation5 + $0x18e8] sm:$0xff] }
 0x391   :  { %6534 = vmatpush2.bf16.msra.mxu0 %v18202_v24 }
 0x392   :  { %6535 = vmatprep.subr.bf16.mxu0 %v18197_v25  ;;  %v18356_v25 = vcombine.low %v4722_v4, %v4725_v5  ;;  %v18338_v5 = vcombine.low %v4704_v53, %v4707_v54 }
 0x393   :  { %6407 = vmatpush2.bf16.msra.mxu1 %v18194_v26  ;;  %v21714_v26 = vld [vmem:[#allocation2 + $0x14] ss:$24 sps:$4 sm:$0xff]  }
 0x394   :  { %6408 = vmatprep.subr.bf16.mxu1 %v18189_v33 }
 0x395   :  { %6536 = vmatpush2.bf16.msra.mxu0 %v18196_v37  ;;  %v4710_v37 = vld [vmem:[#allocation5 + $0x1b20] sm:$0xff] }
 0x396   :  { %6537 = vmatprep.subr.bf16.mxu0 %v18191_v38  ;;  %v4713_v38 = vld [vmem:[#allocation5 + $0x1b80] sm:$0xff] }
 0x397   :  { %6409 = vmatpush2.bf16.msra.mxu1 %v18188_v41  ;;  %v18358_v41 = vcombine.low %v4723_v10, %v4726_v13  ;;  %v18344_v59 = vcombine.low %v4710_v37, %v4713_v38  ;;  %v4695_v10 = vld [vmem:[#allocation5 + $0x1940] sm:$0xff] }
 0x398   :  { %6410 = vmatprep.subr.bf16.mxu1 %v18183_v46  ;;  %v18353_v46 = vcombine.high %v4717_v27, %v4720_v29 }
 0x399   :  { %6538 = vmatpush2.bf16.msra.mxu0 %v18190_v50  ;;  %v4711_v50 = vld [vmem:[#allocation5 + $0x1b28] sm:$0xff] }
 0x39a   :  { %6539 = vmatprep.subr.bf16.mxu0 %v18185_v45  ;;  %v4714_v45 = vld [vmem:[#allocation5 + $0x1b88] sm:$0xff] }
 0x39b   :  { %6411 = vmatpush2.bf16.msra.mxu1 %v18182_v51  ;;  %v18345_v51 = vcombine.high %v4710_v37, %v4713_v38  ;;  %v18347_v55 = vcombine.high %v4711_v50, %v4714_v45  ;;  %v4779_v37 = vld [vmem:[#allocation5 + $0x23c0] sm:$0xff] }
 0x39c   :  { %6412 = vmatprep.subr.bf16.mxu1 %v18177_v56  ;;  %v18352_v56 = vcombine.low %v4717_v27, %v4720_v29  ;;  %v4687_v27 = vld [vmem:[#allocation5 + $0x1828] sm:$0xff] }
 0x39d   :  { %6540 = vmatpush2.bf16.msra.mxu0 %v18184_v61  ;;  %v4705_v61 = vld [vmem:[#allocation5 + $0x1a68] sm:$0xff] }
 0x39e   :  { %6541 = vmatprep.subr.bf16.mxu0 %v18179_v63  ;;  %v4708_v63 = vld [vmem:[#allocation5 + $0x1ac8] sm:$0xff] }
 0x39f   :  { %6413 = vmatpush2.bf16.msra.mxu1 %v18176_v60  ;;  %v18339_v60 = vcombine.high %v4704_v53, %v4707_v54  ;;  %v18341_v4 = vcombine.high %v4705_v61, %v4708_v63  ;;  %v18340_v13 = vcombine.low %v4705_v61, %v4708_v63  ;;  %v4690_v29 = vld [vmem:[#allocation5 + $0x1888] sm:$0xff]  ;;  %v4764_v61 = vld [vmem:[#allocation5 + $0x21e0] sm:$0xff] }
 0x3a0   :  { %6468 = vmatprep.subr.bf16.mxu1 %v18363_v2  ;;  %v18346_v2 = vcombine.low %v4711_v50, %v4714_v45  ;;  %v4770_v50 = vld [vmem:[#allocation5 + $0x22a0] sm:$0xff] }
 0x3a1   :  { %6542 = vmatpush2.bf16.msra.mxu0 %v18178_v6  ;;  %v4699_v6 = vld [vmem:[#allocation5 + $0x19a8] sm:$0xff]  ;;  %v4773_v45 = vld [vmem:[#allocation5 + $0x2300] sm:$0xff] }
 0x3a2   :  { %v4386_v20 = vpop.f32.mrf.mxu1  ;;  %6415 = vmatmul.mubr.bf16.vlgmr.msra.gmra.mxu1 %v21713_v21  ;;  %6597 = vmatprep.subr.bf16.mxu0 %v18365_v8  ;;  %v18333_v8 = vcombine.high %v4698_v1, %v4701_v12  ;;  %v4767_v63 = vld [vmem:[#allocation5 + $0x2240] sm:$0xff]  ;;  %v18404_v12 = vcombine.low %v4770_v50, %v4773_v45 }
 0x3a3   :  { %v22038_v24 = vadd.f32 %v4429_v7, %v4386_v20  ;;  %6469 = vmatpush1.bf16.msra.mxu1 %v18362_v9  ;;  %6500 = vmatprep.mubr.bf16.mxu1 %v21714_v26  ;;  %v4702_v7 = vld [vmem:[#allocation5 + $0x1a08] sm:$0xff]  ;;  %v4692_v9 = vld [vmem:[#allocation5 + $0x18e0] sm:$0xff] }
 0x3a4   :  { %v4388_v33 = vpop.f32.mrf.mxu1  ;;  %6470 = vmatprep.subr.bf16.mxu1 %v18357_v15  ;;  %6544 = vmatmul.mubr.bf16.vlgmr.msra.gmra.mxu0 %v21713_v21  ;;  %v18335_v15 = vcombine.high %v4699_v6, %v4702_v7  ;;  %v4686_v20 = vld [vmem:[#allocation5 + $0x1820] sm:$0xff] }
 0x3a5   :  { %v22040_v36 = vadd.f32 %v4431_v19, %v4388_v33  ;;  %6598 = vmatpush1.bf16.msra.mxu0 %v18364_v17  ;;  %6629 = vmatprep.mubr.bf16.mxu0 %v21714_v26  ;;  %v4696_v17 = vld [vmem:[#allocation5 + $0x1948] sm:$0xff]  ;;  %v18327_v19 = vcombine.high %v4692_v9, %v4695_v10  ;;  %v4689_v21 = vld [vmem:[#allocation5 + $0x1880] sm:$0xff]  ;;  %v18326_v26 = vcombine.low %v4692_v9, %v4695_v10 }
 0x3a6   :  { %v4390_v34 = vpop.f32.mrf.mxu1  ;;  %6599 = vmatprep.subr.bf16.mxu0 %v18359_v23  ;;  %v18334_v23 = vcombine.low %v4699_v6, %v4702_v7  ;;  %v18321_v33 = vcombine.high %v4686_v20, %v4689_v21  ;;  %v18328_v38 = vcombine.low %v4693_v16, %v4696_v17  ;;  %v4758_v6 = vld [vmem:[#allocation5 + $0x2120] sm:$0xff]  ;;  %v18398_v10 = vcombine.low %v4764_v61, %v4767_v63 }
 0x3a7   :  { %v22042_v18 = vadd.f32 %v4433_v57, %v4390_v34  ;;  %6471 = vmatpush1.bf16.msra.mxu1 %v18356_v25  ;;  %v18329_v25 = vcombine.high %v4693_v16, %v4696_v17  ;;  %v18320_v57 = vcombine.low %v4686_v20, %v4689_v21  ;;  %v4777_v34 = vld [vmem:[#allocation5 + $0x2368] sm:$0xff]  ;;  %v4761_v7 = vld [vmem:[#allocation5 + $0x2180] sm:$0xff] }
 0x3a8   :  { %6472 = vmatprep.subr.bf16.mxu1 %v18351_v35  ;;  %v4776_v35 = vld [vmem:[#allocation5 + $0x2360] sm:$0xff]  ;;  %v18392_v21 = vcombine.low %v4758_v6, %v4761_v7 }
 0x3a9   :  { %6600 = vmatpush1.bf16.msra.mxu0 %v18358_v41  ;;  %v18323_v41 = vcombine.high %v4687_v27, %v4690_v29  ;;  %v18410_v54 = vcombine.low %v4776_v35, %v4779_v37  ;;  %v4752_v16 = vld [vmem:[#allocation5 + $0x2060] sm:$0xff] }
 0x3aa   :  { %6601 = vmatprep.subr.bf16.mxu0 %v18353_v46  ;;  %v4780_v46 = vld [vmem:[#allocation5 + $0x23c8] sm:$0xff]  ;;  %v4755_v17 = vld [vmem:[#allocation5 + $0x20c0] sm:$0xff] }
 0x3ab   :  { %6473 = vmatpush1.bf16.msra.mxu1 %v18350_v48  ;;  %v18411_v48 = vcombine.high %v4776_v35, %v4779_v37  ;;  %v18413_v53 = vcombine.high %v4777_v34, %v4780_v46  ;;  %v18386_v37 = vcombine.low %v4752_v16, %v4755_v17 }
 0x3ac   :  { %6474 = vmatprep.subr.bf16.mxu1 %v18345_v51  ;;  %v18322_v51 = vcombine.low %v4687_v27, %v4690_v29  ;;  %v4746_v27 = vld [vmem:[#allocation5 + $0x1fa0] sm:$0xff] }
 0x3ad   :  { %6602 = vmatpush1.bf16.msra.mxu0 %v18352_v56  ;;  %v4771_v56 = vld [vmem:[#allocation5 + $0x22a8] sm:$0xff]  ;;  %v4749_v29 = vld [vmem:[#allocation5 + $0x2000] sm:$0xff] }
 0x3ae   :  { %6603 = vmatprep.subr.bf16.mxu0 %v18347_v55  ;;  %v4774_v55 = vld [vmem:[#allocation5 + $0x2308] sm:$0xff] }
 0x3af   :  { %6475 = vmatpush1.bf16.msra.mxu1 %v18344_v59  ;;  %v18405_v59 = vcombine.high %v4770_v50, %v4773_v45  ;;  %v18407_v1 = vcombine.high %v4771_v56, %v4774_v55  ;;  %v18380_v45 = vcombine.low %v4746_v27, %v4749_v29 }
 0x3b0   :  { %6476 = vmatprep.subr.bf16.mxu1 %v18339_v60  ;;  %v18412_v60 = vcombine.low %v4777_v34, %v4780_v46  ;;  %v4740_v34 = vld [vmem:[#allocation5 + $0x1ee0] sm:$0xff] }
 0x3b1   :  { %6604 = vmatpush1.bf16.msra.mxu0 %v18346_v2  ;;  %v4765_v2 = vld [vmem:[#allocation5 + $0x21e8] sm:$0xff]  ;;  %v4743_v46 = vld [vmem:[#allocation5 + $0x1f40] sm:$0xff] }
 0x3b2   :  { %6605 = vmatprep.subr.bf16.mxu0 %v18341_v4  ;;  %v4768_v4 = vld [vmem:[#allocation5 + $0x2248] sm:$0xff] }
 0x3b3   :  { %6477 = vmatpush1.bf16.msra.mxu1 %v18338_v5  ;;  %v18399_v5 = vcombine.high %v4764_v61, %v4767_v63  ;;  %v18401_v9 = vcombine.high %v4765_v2, %v4768_v4  ;;  %v18374_v63 = vcombine.low %v4740_v34, %v4743_v46 }
 0x3b4   :  { %6478 = vmatprep.subr.bf16.mxu1 %v18333_v8  ;;  %v18406_v8 = vcombine.low %v4771_v56, %v4774_v55  ;;  %v4734_v56 = vld [vmem:[#allocation5 + $0x1e20] sm:$0xff] }
 0x3b5   :  { %6606 = vmatpush1.bf16.msra.mxu0 %v18340_v13  ;;  %v4759_v13 = vld [vmem:[#allocation5 + $0x2128] sm:$0xff]  ;;  %v4737_v55 = vld [vmem:[#allocation5 + $0x1e80] sm:$0xff] }
 0x3b6   :  { %6607 = vmatprep.subr.bf16.mxu0 %v18335_v15  ;;  %v4762_v15 = vld [vmem:[#allocation5 + $0x2188] sm:$0xff] }
 0x3b7   :  { %6479 = vmatpush1.bf16.msra.mxu1 %v18332_v62  ;;  %v18393_v62 = vcombine.high %v4758_v6, %v4761_v7  ;;  %v18395_v20 = vcombine.high %v4759_v13, %v4762_v15  ;;  %v18368_v7 = vcombine.low %v4734_v56, %v4737_v55 }
 0x3b8   :  { %6480 = vmatprep.subr.bf16.mxu1 %v18327_v19  ;;  %v18400_v19 = vcombine.low %v4765_v2, %v4768_v4  ;;  %v4633_v2 = vld [vmem:[#allocation5 + $0x1168] sm:$0xff] }
 0x3b9   :  { %6608 = vmatpush1.bf16.msra.mxu0 %v18334_v23  ;;  %v4753_v23 = vld [vmem:[#allocation5 + $0x2068] sm:$0xff] }
 0x3ba   :  { %6609 = vmatprep.subr.bf16.mxu0 %v18329_v25  ;;  %v4756_v25 = vld [vmem:[#allocation5 + $0x20c8] sm:$0xff] }
 0x3bb   :  { %6481 = vmatpush1.bf16.msra.mxu1 %v18326_v26  ;;  %v18387_v26 = vcombine.high %v4752_v16, %v4755_v17  ;;  %v18389_v35 = vcombine.high %v4753_v23, %v4756_v25  ;;  %v4636_v4 = vld [vmem:[#allocation5 + $0x11c8] sm:$0xff] }
 0x3bc   :  { %6482 = vmatprep.subr.bf16.mxu1 %v18321_v33  ;;  %v18394_v33 = vcombine.low %v4759_v13, %v4762_v15  ;;  %v18268_v15 = vcombine.low %v4633_v2, %v4636_v4  ;;  %v4621_v17 = vld [vmem:[#allocation5 + $0xfe8] sm:$0xff] }
 0x3bd   :  { %6610 = vmatpush1.bf16.msra.mxu0 %v18328_v38  ;;  %v4747_v38 = vld [vmem:[#allocation5 + $0x1fa8] sm:$0xff] }
 0x3be   :  { %6611 = vmatprep.subr.bf16.mxu0 %v18323_v41  ;;  %v4750_v41 = vld [vmem:[#allocation5 + $0x2008] sm:$0xff] }
 0x3bf   :  { %6483 = vmatpush1.bf16.msra.mxu1 %v18320_v57  ;;  %v18381_v57 = vcombine.high %v4746_v27, %v4749_v29  ;;  %v18383_v50 = vcombine.high %v4747_v38, %v4750_v41 }
 0x3c0   :  { %6484 = vmatprep.subr.bf16.mxu1 %v18411_v48  ;;  %v18388_v48 = vcombine.low %v4753_v23, %v4756_v25 }
 0x3c1   :  { %6612 = vmatpush1.bf16.msra.mxu0 %v18322_v51  ;;  %v4741_v51 = vld [vmem:[#allocation5 + $0x1ee8] sm:$0xff] }
 0x3c2   :  { %6613 = vmatprep.subr.bf16.mxu0 %v18413_v53  ;;  %v4744_v53 = vld [vmem:[#allocation5 + $0x1f48] sm:$0xff] }
 0x3c3   :  { %6485 = vmatpush2.bf16.msra.mxu1 %v18410_v54  ;;  %v18375_v54 = vcombine.high %v4740_v34, %v4743_v46  ;;  %v18377_v61 = vcombine.high %v4741_v51, %v4744_v53 }
 0x3c4   :  { %6486 = vmatprep.subr.bf16.mxu1 %v18405_v59  ;;  %v18382_v59 = vcombine.low %v4747_v38, %v4750_v41  ;;  %v4435_v38 = vpop.f32.mrf.mxu0 }
 0x3c5   :  { %6614 = vmatpush2.bf16.msra.mxu0 %v18412_v60  ;;  %v4735_v60 = vld [vmem:[#allocation5 + $0x1e28] sm:$0xff] }
 0x3c6   :  { %6615 = vmatprep.subr.bf16.mxu0 %v18407_v1  ;;  %v4738_v1 = vld [vmem:[#allocation5 + $0x1e88] sm:$0xff] }
 0x3c7   :  { %6487 = vmatpush2.bf16.msra.mxu1 %v18404_v12  ;;  %v18369_v12 = vcombine.high %v4734_v56, %v4737_v55  ;;  %v18371_v6 = vcombine.high %v4735_v60, %v4738_v1  ;;  %v18370_v13 = vcombine.low %v4735_v60, %v4738_v1 }
 0x3c8   :  { %6488 = vmatprep.subr.bf16.mxu1 %v18399_v5  ;;  %v18376_v5 = vcombine.low %v4741_v51, %v4744_v53  ;;  %v4612_v51 = vld [vmem:[#allocation5 + $0xec8] sm:$0xff] }
 0x3c9   :  { %6616 = vmatpush2.bf16.msra.mxu0 %v18406_v8  ;;  %v18269_v8 = vcombine.high %v4633_v2, %v4636_v4  ;;  %v20355_v53 = vld [vmem:[#allocation8 + $0xd50] ss:$24 sps:$4 sm:$0xff]  }
 0x3ca   :  { %6617 = vmatprep.subr.bf16.mxu0 %v18401_v9  ;;  %v4627_v9 = vld [vmem:[#allocation5 + $0x10a8] sm:$0xff] }
 0x3cb   :  { %6489 = vmatpush2.bf16.msra.mxu1 %v18398_v10  ;;  %v4630_v10 = vld [vmem:[#allocation5 + $0x1108] sm:$0xff] }
 0x3cc   :  { %6490 = vmatprep.subr.bf16.mxu1 %v18393_v62  ;;  %v4392_v62 = vpop.f32.mrf.mxu1  ;;  %v18263_v16 = vcombine.high %v4627_v9, %v4630_v10  ;;  %v18262_v25 = vcombine.low %v4627_v9, %v4630_v10  ;;  %v4597_v2 = vld [vmem:[#allocation5 + $0xce8] sm:$0xff] }
 0x3cd   :  { %6618 = vmatpush2.bf16.msra.mxu0 %v18400_v19  ;;  %v4624_v19 = vld [vmem:[#allocation5 + $0x1048] sm:$0xff] }
 0x3ce   :  { %6619 = vmatprep.subr.bf16.mxu0 %v18395_v20  ;;  %v18257_v29 = vcombine.high %v4621_v17, %v4624_v19  ;;  %v4600_v4 = vld [vmem:[#allocation5 + $0xd48] sm:$0xff] }
 0x3cf   :  { %6491 = vmatpush2.bf16.msra.mxu1 %v18392_v21  ;;  %v21715_v21 = vld [vmem:[#allocation2 + $0x10] ss:$24 sps:$4 sm:$0xff]   ;;  %v4591_v9 = vld [vmem:[#allocation5 + $0xc28] sm:$0xff] }
 0x3d0   :  { %6492 = vmatprep.subr.bf16.mxu1 %v18387_v26  ;;  %v21716_v26 = vld [vmem:[#allocation2 + $0xc] ss:$24 sps:$4 sm:$0xff]   ;;  %v4594_v10 = vld [vmem:[#allocation5 + $0xc88] sm:$0xff] }
 0x3d1   :  { %6620 = vmatpush2.bf16.msra.mxu0 %v18394_v33 }
 0x3d2   :  { %6621 = vmatprep.subr.bf16.mxu0 %v18389_v35  ;;  %v4615_v35 = vld [vmem:[#allocation5 + $0xf28] sm:$0xff] }
 0x3d3   :  { %6493 = vmatpush2.bf16.msra.mxu1 %v18386_v37  ;;  %v4618_v37 = vld [vmem:[#allocation5 + $0xf88] sm:$0xff] }
 0x3d4   :  { %6494 = vmatprep.subr.bf16.mxu1 %v18381_v57  ;;  %v4436_v57 = vadd.f32 %v4435_v38, %v4392_v62  ;;  %v18250_v56 = vcombine.low %v4615_v35, %v4618_v37  ;;  %v18227_v62 = vcombine.high %v4591_v9, %v4594_v10 }
 0x3d5   :  { %6622 = vmatpush2.bf16.msra.mxu0 %v18388_v48  ;;  %v18251_v48 = vcombine.high %v4615_v35, %v4618_v37  ;;  %v20375_v35 = vld [vmem:[#allocation8 + $0xc34] ss:$24 sps:$4 sm:$0xff]  }
 0x3d6   :  { %6623 = vmatprep.subr.bf16.mxu0 %v18383_v50  ;;  %v4609_v50 = vld [vmem:[#allocation5 + $0xe68] sm:$0xff] }
 0x3d7   :  { %6495 = vmatpush2.bf16.msra.mxu1 %v18380_v45  ;;  %v18245_v55 = vcombine.high %v4609_v50, %v4612_v51  ;;  %v18244_v60 = vcombine.low %v4609_v50, %v4612_v51  ;;  %v20376_v51 = vld [vmem:[#allocation8 + $0xc00] ss:$24 sps:$4 sm:$0xff]  }
 0x3d8   :  { %6496 = vmatprep.subr.bf16.mxu1 %v18375_v54  ;;  %v20360_v54 = vld [vmem:[#allocation8 + $0xd24] ss:$24 sps:$4 sm:$0xff]  }
 0x3d9   :  { %6624 = vmatpush2.bf16.msra.mxu0 %v18382_v59  ;;  %v4603_v59 = vld [vmem:[#allocation5 + $0xda8] sm:$0xff] }
 0x3da   :  { %6625 = vmatprep.subr.bf16.mxu0 %v18377_v61  ;;  %v4606_v61 = vld [vmem:[#allocation5 + $0xe08] sm:$0xff] }
 0x3db   :  { %6497 = vmatpush2.bf16.msra.mxu1 %v18374_v63  ;;  %v20363_v63 = vld [vmem:[#allocation8 + $0xcf4] ss:$24 sps:$4 sm:$0xff]   ;;  %v18239_v1 = vcombine.high %v4603_v59, %v4606_v61 }
 0x3dc   :  { %6498 = vmatprep.subr.bf16.mxu1 %v18369_v12  ;;  %v20361_v12 = vld [vmem:[#allocation8 + $0xcf0] ss:$24 sps:$4 sm:$0xff]  }
 0x3dd   :  { %6626 = vmatpush2.bf16.msra.mxu0 %v18376_v5  ;;  %v20366_v5 = vld [vmem:[#allocation8 + $0xcc4] ss:$24 sps:$4 sm:$0xff]  }
 0x3de   :  { %6627 = vmatprep.subr.bf16.mxu0 %v18371_v6  ;;  %v18238_v6 = vcombine.low %v4603_v59, %v4606_v61  ;;  %v4657_v59 = vld [vmem:[#allocation5 + $0x1468] sm:$0xff] }
 0x3df   :  { %6499 = vmatpush2.bf16.msra.mxu1 %v18368_v7  ;;  %v18233_v7 = vcombine.high %v4597_v2, %v4600_v4  ;;  %v4660_v61 = vld [vmem:[#allocation5 + $0x14c8] sm:$0xff] }
 0x3e0   :  { %6554 = vmatprep.subr.bf16.mxu1 %v18269_v8  ;;  %v20364_v8 = vld [vmem:[#allocation8 + $0xcc0] ss:$24 sps:$4 sm:$0xff]  }
 0x3e1   :  { %6628 = vmatpush2.bf16.msra.mxu0 %v18370_v13  ;;  %v20369_v13 = vld [vmem:[#allocation8 + $0xc94] ss:$24 sps:$4 sm:$0xff]  }
 0x3e2   :  { %v4472_v20 = vpop.f32.mrf.mxu1  ;;  %6501 = vmatmul.mubr.bf16.vlgmr.msra.gmra.mxu1 %v21715_v21 }
 0x3e3   :  { %v22045_v23 = vadd.f32 %v4472_v20, %v22038_v24  ;;  %6555 = vmatpush1.bf16.msra.mxu1 %v18268_v15  ;;  %6586 = vmatprep.mubr.bf16.mxu1 %v21716_v26  ;;  %v18256_v24 = vcombine.low %v4621_v17, %v4624_v19  ;;  %v18232_v15 = vcombine.low %v4597_v2, %v4600_v4  ;;  %v4681_v17 = vld [vmem:[#allocation5 + $0x1768] sm:$0xff]  ;;  %v20372_v20 = vld [vmem:[#allocation8 + $0xc64] ss:$24 sps:$4 sm:$0xff]   ;;  %v20370_v26 = vld [vmem:[#allocation8 + $0xc60] ss:$24 sps:$4 sm:$0xff]  }
 0x3e4   :  { %v4474_v27 = vpop.f32.mrf.mxu1  ;;  %6556 = vmatprep.subr.bf16.mxu1 %v18263_v16  ;;  %6630 = vmatmul.mubr.bf16.vlgmr.msra.gmra.mxu0 %v21715_v21  ;;  %v20367_v16 = vld [vmem:[#allocation8 + $0xc90] ss:$24 sps:$4 sm:$0xff]   ;;  %v18226_v21 = vcombine.low %v4591_v9, %v4594_v10  ;;  %v18292_v2 = vcombine.low %v4657_v59, %v4660_v61 }
 0x3e5   :  { %v22048_v33 = vadd.f32 %v4474_v27, %v22040_v36  ;;  %v20357_v36 = vld [vmem:[#allocation8 + $0xd54] ss:$24 sps:$4 sm:$0xff]  }
 0x3e6   :  { %v4476_v41 = vpop.f32.mrf.mxu1  ;;  %8477 = vmatprep.subr.bf16.mxu0 %v20357_v36  ;;  %v4684_v19 = vld [vmem:[#allocation5 + $0x17c8] sm:$0xff] }
 0x3e7   :  { %v22051_v34 = vadd.f32 %v4476_v41, %v22042_v18  ;;  %6557 = vmatpush1.bf16.msra.mxu1 %v18262_v25  ;;  %8478 = vmatpush1.bf16.msra.mxu0 %v20355_v53  ;;  %v20358_v18 = vld [vmem:[#allocation8 + $0xd20] ss:$24 sps:$4 sm:$0xff]   ;;  %v18317_v25 = vcombine.high %v4681_v17, %v4684_v19  ;;  %v4675_v27 = vld [vmem:[#allocation5 + $0x16a8] sm:$0xff]  ;;  %v18316_v37 = vcombine.low %v4681_v17, %v4684_v19 }
 0x3e8   :  { %v4478_v46 = vpop.f32.mrf.mxu1  ;;  %6558 = vmatprep.subr.bf16.mxu1 %v18257_v29  ;;  %8479 = vmatprep.subr.bf16.mxu0 %v20360_v54  ;;  %v4678_v29 = vld [vmem:[#allocation5 + $0x1708] sm:$0xff] }
 0x3e9   :  { %v22053_v45 = vadd.f32 %v4478_v46, %v4436_v57  ;;  %v18311_v38 = vcombine.high %v4675_v27, %v4678_v29  ;;  %v20373_v41 = vld [vmem:[#allocation8 + $0xc30] ss:$24 sps:$4 sm:$0xff]   ;;  %v20378_v46 = vld [vmem:[#allocation8 + $0xc04] ss:$24 sps:$4 sm:$0xff]   ;;  %v20381_v54 = vld [vmem:[#allocation8 + $0xed4] ss:$24 sps:$4 sm:$0xff]  }
 0x3ea   :  { %v4669_v57 = vld [vmem:[#allocation5 + $0x15e8] sm:$0xff] }
 0x3eb   :  { %6559 = vmatpush1.bf16.msra.mxu1 %v18256_v24  ;;  %8480 = vmatpush1.bf16.msra.mxu0 %v20358_v18  ;;  %v4672_v24 = vld [vmem:[#allocation5 + $0x1648] sm:$0xff] }
 0x3ec   :  { %6560 = vmatprep.subr.bf16.mxu1 %v18251_v48  ;;  %8481 = vmatprep.subr.bf16.mxu0 %v20363_v63  ;;  %v18310_v48 = vcombine.low %v4675_v27, %v4678_v29  ;;  %v18305_v50 = vcombine.high %v4669_v57, %v4672_v24  ;;  %v4663_v53 = vld [vmem:[#allocation5 + $0x1528] sm:$0xff] }
 0x3ed   :  { %v4666_v36 = vld [vmem:[#allocation5 + $0x1588] sm:$0xff] }
 0x3ee   :  { %v20379_v18 = vld [vmem:[#allocation8 + $0xed0] ss:$24 sps:$4 sm:$0xff]   ;;  %v18298_v63 = vcombine.low %v4663_v53, %v4666_v36 }
 0x3ef   :  { %6561 = vmatpush1.bf16.msra.mxu1 %v18250_v56  ;;  %8482 = vmatpush1.bf16.msra.mxu0 %v20361_v12  ;;  %v18304_v56 = vcombine.low %v4669_v57, %v4672_v24  ;;  %v4654_v12 = vld [vmem:[#allocation5 + $0x1408] sm:$0xff]  ;;  %v20310_v24 = vld [vmem:[#allocation8 + $0xa20] ss:$24 sps:$4 sm:$0xff]  }
 0x3f0   :  { %6562 = vmatprep.subr.bf16.mxu1 %v18245_v55  ;;  %8483 = vmatprep.subr.bf16.mxu0 %v20366_v5  ;;  %v18299_v55 = vcombine.high %v4663_v53, %v4666_v36  ;;  %v22055_v5 = vpop.f32.mrf.mxu0  ;;  %v20307_v29 = vld [vmem:[#allocation8 + $0xa50] ss:$24 sps:$4 sm:$0xff]   ;;  %v20382_v53 = vld [vmem:[#allocation8 + $0xea0] ss:$24 sps:$4 sm:$0xff]  }
 0x3f2   :  { %v6289_v10 = vpop.f32.mrf.mxu0 }
 0x3f3   :  { %6563 = vmatpush1.bf16.msra.mxu1 %v18244_v60  ;;  %8484 = vmatpush1.bf16.msra.mxu0 %v20364_v8  ;;  %v18293_v60 = vcombine.high %v4657_v59, %v4660_v61  ;;  %v20318_v61 = vld [vmem:[#allocation8 + $0x9c4] ss:$24 sps:$4 sm:$0xff]  }
 0x3f4   :  { %6564 = vmatprep.subr.bf16.mxu1 %v18239_v1  ;;  %8485 = vmatprep.subr.bf16.mxu0 %v20369_v13  ;;  %v4651_v1 = vld [vmem:[#allocation5 + $0x13a8] sm:$0xff]  ;;  %v22057_v17 = vpop.f32.mrf.mxu0 }
 0x3f5   :  { %v18287_v4 = vcombine.high %v4651_v1, %v4654_v12  ;;  %v18286_v8 = vcombine.low %v4651_v1, %v4654_v12  ;;  %v4639_v13 = vld [vmem:[#allocation5 + $0x1228] sm:$0xff] }
 0x3f6   :  { %v20385_v1 = vld [vmem:[#allocation8 + $0xe70] ss:$24 sps:$4 sm:$0xff]  }
 0x3f7   :  { %6565 = vmatpush1.bf16.msra.mxu1 %v18238_v6  ;;  %8486 = vmatpush1.bf16.msra.mxu0 %v20367_v16  ;;  %v4645_v6 = vld [vmem:[#allocation5 + $0x12e8] sm:$0xff] }
 0x3f8   :  { %6566 = vmatprep.subr.bf16.mxu1 %v18233_v7  ;;  %8487 = vmatprep.subr.bf16.mxu0 %v20372_v20  ;;  %v4648_v7 = vld [vmem:[#allocation5 + $0x1348] sm:$0xff] }
 0x3f9   :  { %v18281_v9 = vcombine.high %v4645_v6, %v4648_v7  ;;  %v22059_v20 = vld [vmem:[#allocation7 + $0x6] sm:$0x3f] }
 0x3fb   :  { %6567 = vmatpush1.bf16.msra.mxu1 %v18232_v15  ;;  %8488 = vmatpush1.bf16.msra.mxu0 %v20370_v26  ;;  %v4642_v15 = vld [vmem:[#allocation5 + $0x1288] sm:$0xff]  ;;  %v4790_v26 = vrot.slane %v22059_v20, %v21960_v49 }
 0x3fc   :  { %6568 = vmatprep.subr.bf16.mxu1 %v18227_v62  ;;  %8489 = vmatprep.subr.bf16.mxu0 %v20375_v35  ;;  %v18280_v62 = vcombine.low %v4645_v6, %v4648_v7  ;;  %v18275_v16 = vcombine.high %v4639_v13, %v4642_v15  ;;  %v18274_v19 = vcombine.low %v4639_v13, %v4642_v15  ;;  %v20312_v35 = vld [vmem:[#allocation8 + $0xa24] ss:$24 sps:$4 sm:$0xff]   ;;  %v20321_v7 = vld [vmem:[#allocation8 + $0x994] ss:$24 sps:$4 sm:$0xff]   ;;  %v20319_v13 = vld [vmem:[#allocation8 + $0x990] ss:$24 sps:$4 sm:$0xff]  }
 0x3fd   :  { %v20324_v15 = vld [vmem:[#allocation8 + $0x964] ss:$24 sps:$4 sm:$0xff]  }
 0x3ff   :  { %6569 = vmatpush1.bf16.msra.mxu1 %v18226_v21  ;;  %8490 = vmatpush1.bf16.msra.mxu0 %v20373_v41  ;;  %v20309_v21 = vld [vmem:[#allocation8 + $0xa54] ss:$24 sps:$4 sm:$0xff]   ;;  %v6290_v41 = vadd.f32 %v6289_v10, %v4790_v26 }
 0x400   :  { %6570 = vmatprep.subr.bf16.mxu1 %v18317_v25  ;;  %8491 = vmatprep.subr.bf16.mxu0 %v20378_v46  ;;  %v6293_v25 = vpop.f32.mrf.mxu0 }
 0x402   :  { %v22063_v27 = vpop.f32.mrf.mxu0 }
 0x403   :  { %6571 = vmatpush2.bf16.msra.mxu1 %v18316_v37  ;;  %8492 = vmatpush1.bf16.msra.mxu0 %v20376_v51 }
 0x404   :  { %6572 = vmatprep.subr.bf16.mxu1 %v18311_v38  ;;  %8493 = vmatprep.subr.bf16.mxu0 %v20381_v54  ;;  %v21717_v38 = vld [vmem:[#allocation2 + $0x8] ss:$24 sps:$4 sm:$0xff]   ;;  %v6375_v57 = vpop.f32.mrf.mxu0 }
 0x406   :  { %v22067_v54 = vpop.f32.mrf.mxu0 }
 0x407   :  { %6573 = vmatpush2.bf16.msra.mxu1 %v18310_v48  ;;  %8494 = vmatpush2.bf16.msra.mxu0 %v20379_v18  ;;  %v20315_v48 = vld [vmem:[#allocation8 + $0x9f4] ss:$24 sps:$4 sm:$0xff]   ;;  %v6294_v18 = vadd.f32 %v6293_v25, %v4790_v26  ;;  %v20396_v25 = vld [vmem:[#allocation8 + $0xde4] ss:$24 sps:$4 sm:$0xff]   ;;  %v20394_v26 = vld [vmem:[#allocation8 + $0xde0] ss:$24 sps:$4 sm:$0xff]  }
 0x408   :  { %6574 = vmatprep.subr.bf16.mxu1 %v18305_v50  ;;  %v20384_v50 = vld [vmem:[#allocation8 + $0xea4] ss:$24 sps:$4 sm:$0xff]  }
 0x409   :  { %8495 = vmatprep.subr.bf16.mxu0 %v20384_v50 }
 0x40b   :  { %6575 = vmatpush2.bf16.msra.mxu1 %v18304_v56  ;;  %8496 = vmatpush2.bf16.msra.mxu0 %v20382_v53  ;;  %v20333_v53 = vld [vmem:[#allocation8 + $0xbd4] ss:$24 sps:$4 sm:$0xff]  }
 0x40c   :  { %6576 = vmatprep.subr.bf16.mxu1 %v18299_v55  ;;  %v20313_v55 = vld [vmem:[#allocation8 + $0x9f0] ss:$24 sps:$4 sm:$0xff]  }
 0x40f   :  { %6577 = vmatpush2.bf16.msra.mxu1 %v18298_v63  ;;  %v20387_v63 = vld [vmem:[#allocation8 + $0xe74] ss:$24 sps:$4 sm:$0xff]  }
 0x410   :  { %6578 = vmatprep.subr.bf16.mxu1 %v18293_v60  ;;  %8497 = vmatprep.subr.bf16.mxu0 %v20387_v63 }
 0x411   :  { %8498 = vmatpush2.bf16.msra.mxu0 %v20385_v1 }
 0x413   :  { %6579 = vmatpush2.bf16.msra.mxu1 %v18292_v2  ;;  %v6379_v2 = vpop.f32.mrf.mxu0 }
 0x414   :  { %6580 = vmatprep.subr.bf16.mxu1 %v18287_v4  ;;  %v20316_v4 = vld [vmem:[#allocation8 + $0x9c0] ss:$24 sps:$4 sm:$0xff]  }
 0x417   :  { %6581 = vmatpush2.bf16.msra.mxu1 %v18286_v8  ;;  %v20390_v8 = vld [vmem:[#allocation8 + $0xe44] ss:$24 sps:$4 sm:$0xff]  }
 0x418   :  { %6582 = vmatprep.subr.bf16.mxu1 %v18281_v9  ;;  %v20388_v9 = vld [vmem:[#allocation8 + $0xe40] ss:$24 sps:$4 sm:$0xff]   ;;  %8499 = vmatprep.subr.bf16.mxu0 %v20390_v8 }
 0x419   :  { %8500 = vmatpush2.bf16.msra.mxu0 %v20388_v9 }
 0x41b   :  { %6583 = vmatpush2.bf16.msra.mxu1 %v18280_v62  ;;  %v20393_v62 = vld [vmem:[#allocation8 + $0xe14] ss:$24 sps:$4 sm:$0xff]  }
 0x41c   :  { %6584 = vmatprep.subr.bf16.mxu1 %v18275_v16  ;;  %v20391_v16 = vld [vmem:[#allocation8 + $0xe10] ss:$24 sps:$4 sm:$0xff]   ;;  %8501 = vmatprep.subr.bf16.mxu0 %v20393_v62 }
 0x41d   :  { %8502 = vmatpush2.bf16.msra.mxu0 %v20391_v16  ;;  %v20343_v62 = vld [vmem:[#allocation8 + $0xb10] ss:$24 sps:$4 sm:$0xff]   ;;  %v20348_v16 = vld [vmem:[#allocation8 + $0xae4] ss:$24 sps:$4 sm:$0xff]  }
 0x41e   :  { %8503 = vmatprep.subr.bf16.mxu0 %v20396_v25 }
 0x41f   :  { %6585 = vmatpush2.bf16.msra.mxu1 %v18274_v19  ;;  %v20322_v19 = vld [vmem:[#allocation8 + $0x960] ss:$24 sps:$4 sm:$0xff]  }
 0x420   :  { %8434 = vmatprep.subr.bf16.mxu1 %v20309_v21  ;;  %v20327_v21 = vld [vmem:[#allocation8 + $0x934] ss:$24 sps:$4 sm:$0xff]  }
 0x421   :  { %8504 = vmatpush2.bf16.msra.mxu0 %v20394_v26 }
 0x422   :  { %v22065_v37 = vpop.f32.mrf.mxu1  ;;  %6587 = vmatmul.mubr.bf16.vlgmr.msra.gmra.mxu1 %v21717_v38  ;;  %v20330_v38 = vld [vmem:[#allocation8 + $0x904] ss:$24 sps:$4 sm:$0xff]  }
 0x423   :  { %8435 = vmatpush1.bf16.msra.mxu1 %v20307_v29  ;;  %v4786_v29 = vrot.slane %v22059_v20, %v21957_v47 }
 0x424   :  { %v6332_v46 = vpop.f32.mrf.mxu1  ;;  %8436 = vmatprep.subr.bf16.mxu1 %v20312_v35  ;;  %v20325_v35 = vld [vmem:[#allocation8 + $0x930] ss:$24 sps:$4 sm:$0xff]  }
 0x425   :  { %v6333_v51 = vadd.f32 %v6332_v46, %v6290_v41  ;;  %v20399_v41 = vld [vmem:[#allocation8 + $0xdb4] ss:$24 sps:$4 sm:$0xff]   ;;  %v6292_v46 = vadd.f32 %v22057_v17, %v4786_v29  ;;  %v6288_v50 = vadd.f32 %v22055_v5, %v4786_v29  ;;  %v20331_v17 = vld [vmem:[#allocation8 + $0xbd0] ss:$24 sps:$4 sm:$0xff]  }
 0x426   :  { %v6334_v36 = vpop.f32.mrf.mxu1  ;;  %8505 = vmatprep.subr.bf16.mxu0 %v20399_v41  ;;  %v20349_v29 = vld [vmem:[#allocation8 + $0xab0] ss:$24 sps:$4 sm:$0xff]  }
 0x427   :  { %v22069_v56 = vadd.f32 %v6375_v57, %v6333_v51  ;;  %8437 = vmatpush1.bf16.msra.mxu1 %v20310_v24  ;;  %v20397_v24 = vld [vmem:[#allocation8 + $0xdb0] ss:$24 sps:$4 sm:$0xff]   ;;  %v6335_v51 = vadd.f32 %v6334_v36, %v6292_v46  ;;  %v6331_v63 = vadd.f32 %v22065_v37, %v6288_v50  ;;  %v20334_v37 = vld [vmem:[#allocation8 + $0xba0] ss:$24 sps:$4 sm:$0xff]   ;;  %v20408_v50 = vld [vmem:[#allocation8 + $0x1054] ss:$24 sps:$4 sm:$0xff]  }
 0x428   :  { %v6336_v59 = vpop.f32.mrf.mxu1  ;;  %8438 = vmatprep.subr.bf16.mxu1 %v20315_v48  ;;  %v20328_v48 = vld [vmem:[#allocation8 + $0x900] ss:$24 sps:$4 sm:$0xff]   ;;  %8506 = vmatpush2.bf16.msra.mxu0 %v20397_v24 }
 0x429   :  { %v6653_v60 = vmul.f32 0.70710677, %v22069_v56  ;;  %v6337_v12 = vadd.f32 %v6336_v59, %v6294_v18  ;;  %v20402_v18 = vld [vmem:[#allocation8 + $0xd84] ss:$24 sps:$4 sm:$0xff]   ;;  %v6374_v8 = vadd.f32 %v22063_v27, %v6331_v63  ;;  %v20345_v27 = vld [vmem:[#allocation8 + $0xb14] ss:$24 sps:$4 sm:$0xff]  }
 0x42a   :  { %8507 = vmatprep.subr.bf16.mxu0 %v20402_v18  ;;  %v20352_v24 = vld [vmem:[#allocation8 + $0xa80] ss:$24 sps:$4 sm:$0xff]   ;;  %v20414_v18 = vld [vmem:[#allocation8 + $0x1024] ss:$24 sps:$4 sm:$0xff]   ;;  %v20418_v63 = vld [vmem:[#allocation8 + $0xff0] ss:$24 sps:$4 sm:$0xff]  }
 0x42b   :  { %8439 = vmatpush1.bf16.msra.mxu1 %v20313_v55  ;;  %21627 = verf.f32 %v6653_v60  ;;  %v6380_v6 = vadd.f32 %v6379_v2, %v6337_v12  ;;  %v6641_v60 = vmul.f32 0.5, %v22069_v56  ;;  %v6378_v2 = vadd.f32 %v22067_v54, %v6335_v51  ;;  %v20337_v54 = vld [vmem:[#allocation8 + $0xb70] ss:$24 sps:$4 sm:$0xff]  }
 0x42c   :  { %8440 = vmatprep.subr.bf16.mxu1 %v20318_v61  ;;  %v20400_v61 = vld [vmem:[#allocation8 + $0xd80] ss:$24 sps:$4 sm:$0xff]   ;;  %v6640_v46 = vmul.f32 0.5, %v6374_v8 }
 0x42d   :  { %v6659_v10 = vmul.f32 0.70710677, %v6380_v6  ;;  %v6647_v1 = vmul.f32 0.5, %v6380_v6  ;;  %8508 = vmatpush2.bf16.msra.mxu0 %v20400_v61  ;;  %v6658_v56 = vmul.f32 0.70710677, %v6378_v2 }
 0x42e   :  { %v20339_v6 = vld [vmem:[#allocation8 + $0xb74] ss:$24 sps:$4 sm:$0xff]  }
 0x42f   :  { %8441 = vmatpush1.bf16.msra.mxu1 %v20316_v4  ;;  %21629 = verf.f32 %v6659_v10  ;;  %v20336_v4 = vld [vmem:[#allocation8 + $0xba4] ss:$24 sps:$4 sm:$0xff]   ;;  %v6652_v10 = vmul.f32 0.70710677, %v6374_v8  ;;  %v20420_v61 = vld [vmem:[#allocation8 + $0xff4] ss:$24 sps:$4 sm:$0xff]  }
 0x430   :  { %8442 = vmatprep.subr.bf16.mxu1 %v20321_v7  ;;  %v20405_v7 = vld [vmem:[#allocation8 + $0xa5c] ss:$24 sps:$4 sm:$0xff]   ;;  %21631 = verf.f32 %v6658_v56  ;;  %v20448_v8 = vld [vmem:[#allocation8 + $0xf00] ss:$24 sps:$4 sm:$0xff]   ;;  %v20454_v56 = vld [vmem:[#allocation8 + $0x11d0] ss:$24 sps:$4 sm:$0xff]  }
 0x431   :  { %8563 = vmatprep.subr.bf16.mxu0 %v20405_v7  ;;  %21633 = verf.f32 %v6652_v10  ;;  %v20450_v7 = vld [vmem:[#allocation8 + $0xf04] ss:$24 sps:$4 sm:$0xff]   ;;  %v20460_v10 = vld [vmem:[#allocation8 + $0x11a0] ss:$24 sps:$4 sm:$0xff]  }
 0x433   :  { %8443 = vmatpush1.bf16.msra.mxu1 %v20319_v13  ;;  %v20342_v13 = vld [vmem:[#allocation8 + $0xb44] ss:$24 sps:$4 sm:$0xff]  }
 0x434   :  { %8444 = vmatprep.subr.bf16.mxu1 %v20324_v15  ;;  %v20340_v15 = vld [vmem:[#allocation8 + $0xb40] ss:$24 sps:$4 sm:$0xff]  }
 0x437   :  { %8445 = vmatpush1.bf16.msra.mxu1 %v20322_v19  ;;  %v20346_v19 = vld [vmem:[#allocation8 + $0xae0] ss:$24 sps:$4 sm:$0xff]  }
 0x438   :  { %8446 = vmatprep.subr.bf16.mxu1 %v20327_v21  ;;  %v21628_v57 = vpop.eup %21627  ;;  %v20351_v21 = vld [vmem:[#allocation8 + $0xab4] ss:$24 sps:$4 sm:$0xff]  }
 0x439   :  { %v6677_v55 = vadd.f32 1.0, %v21628_v57  ;;  %v6646_v57 = vmul.f32 0.5, %v6378_v2  ;;  %v20438_v2 = vld [vmem:[#allocation8 + $0xf64] ss:$24 sps:$4 sm:$0xff]  }
 0x43b   :  { %8447 = vmatpush1.bf16.msra.mxu1 %v20325_v35  ;;  %v6689_v5 = vmul.f32 %v6677_v55, %v6641_v60  ;;  %v20426_v60 = vld [vmem:[#allocation8 + $0xfc4] ss:$24 sps:$4 sm:$0xff]  }
 0x43c   :  { %8448 = vmatprep.subr.bf16.mxu1 %v20330_v38  ;;  %v21630_v59 = vpop.eup %21629  ;;  %v20354_v38 = vld [vmem:[#allocation8 + $0xa84] ss:$24 sps:$4 sm:$0xff]  }
 0x43d   :  { %v6683_v12 = vadd.f32 1.0, %v21630_v59  ;;  %v21632_v25 = vpop.eup %21631  ;;  %v20412_v59 = vld [vmem:[#allocation8 + $0x1020] ss:$24 sps:$4 sm:$0xff]  }
 0x43e   :  { %v21634_v26 = vpop.eup %21633  ;;  %v6682_v35 = vadd.f32 1.0, %v21632_v25 }
 0x43f   :  { %8449 = vmatpush1.bf16.msra.mxu1 %v20328_v48  ;;  %v6695_v36 = vmul.f32 %v6683_v12, %v6647_v1  ;;  %v6676_v41 = vadd.f32 1.0, %v21634_v26  ;;  %v20424_v1 = vld [vmem:[#allocation8 + $0xfc0] ss:$24 sps:$4 sm:$0xff]   ;;  %v20432_v12 = vld [vmem:[#allocation8 + $0xf94] ss:$24 sps:$4 sm:$0xff]  }
 0x440   :  { %8450 = vmatprep.subr.bf16.mxu1 %v20333_v53  ;;  %v6694_v48 = vmul.f32 %v6682_v35, %v6646_v57  ;;  %v20406_v53 = vld [vmem:[#allocation8 + $0x1050] ss:$24 sps:$4 sm:$0xff]   ;;  %v20492_v26 = vld [vmem:[#allocation8 + $0x10b4] ss:$24 sps:$4 sm:$0xff]   ;;  %v6459_v57 = vpop.f32.mrf.mxu0 }
 0x441   :  { %v22080_v9 = vpack.c.bf16 %v6695_v36, %v6689_v5  ;;  %v6688_v51 = vmul.f32 %v6676_v41, %v6640_v46  ;;  %v20436_v5 = vld [vmem:[#allocation8 + $0xf60] ss:$24 sps:$4 sm:$0xff]   ;;  %v20444_v36 = vld [vmem:[#allocation8 + $0xf34] ss:$24 sps:$4 sm:$0xff]   ;;  %v4794_v41 = vrot.slane %v22059_v20, %v21973_v28 }
 0x442   :  { %v20496_v46 = vld [vmem:[#allocation8 + $0x1080] ss:$24 sps:$4 sm:$0xff]  }
 0x443   :  { %8451 = vmatpush2.bf16.msra.mxu1 %v20331_v17  ;;  %8466 = vmatprep.mubr.bf16.mxu1 %v22080_v9  ;;  %v22083_v55 = vpack.c.bf16 %v6694_v48, %v6688_v51  ;;  %v20430_v17 = vld [vmem:[#allocation8 + $0xf90] ss:$24 sps:$4 sm:$0xff]  }
 0x444   :  { %8452 = vmatprep.subr.bf16.mxu1 %v20336_v4  ;;  %v20442_v4 = vld [vmem:[#allocation8 + $0xf30] ss:$24 sps:$4 sm:$0xff]  }
 0x447   :  { %8453 = vmatpush2.bf16.msra.mxu1 %v20334_v37  ;;  %v20456_v37 = vld [vmem:[#allocation8 + $0x11d4] ss:$24 sps:$4 sm:$0xff]  }
 0x448   :  { %8454 = vmatprep.subr.bf16.mxu1 %v20339_v6  ;;  %v20462_v6 = vld [vmem:[#allocation8 + $0x11a4] ss:$24 sps:$4 sm:$0xff]  }
 0x44b   :  { %8455 = vmatpush2.bf16.msra.mxu1 %v20337_v54  ;;  %v20468_v54 = vld [vmem:[#allocation8 + $0x1174] ss:$24 sps:$4 sm:$0xff]  }
 0x44c   :  { %8456 = vmatprep.subr.bf16.mxu1 %v20342_v13  ;;  %v20466_v13 = vld [vmem:[#allocation8 + $0x1170] ss:$24 sps:$4 sm:$0xff]  }
 0x44f   :  { %8457 = vmatpush2.bf16.msra.mxu1 %v20340_v15  ;;  %v20474_v15 = vld [vmem:[#allocation8 + $0x1144] ss:$24 sps:$4 sm:$0xff]  }
 0x450   :  { %8458 = vmatprep.subr.bf16.mxu1 %v20345_v27  ;;  %v20472_v27 = vld [vmem:[#allocation8 + $0x1140] ss:$24 sps:$4 sm:$0xff]  }
 0x453   :  { %8459 = vmatpush2.bf16.msra.mxu1 %v20343_v62  ;;  %v20480_v62 = vld [vmem:[#allocation8 + $0x1114] ss:$24 sps:$4 sm:$0xff]  }
 0x454   :  { %8460 = vmatprep.subr.bf16.mxu1 %v20348_v16  ;;  %v20478_v16 = vld [vmem:[#allocation8 + $0x1110] ss:$24 sps:$4 sm:$0xff]  }
 0x457   :  { %8461 = vmatpush2.bf16.msra.mxu1 %v20346_v19  ;;  %v20486_v19 = vld [vmem:[#allocation8 + $0x10e4] ss:$24 sps:$4 sm:$0xff]  }
 0x458   :  { %8462 = vmatprep.subr.bf16.mxu1 %v20351_v21  ;;  %v20484_v21 = vld [vmem:[#allocation8 + $0x10e0] ss:$24 sps:$4 sm:$0xff]  }
 0x45b   :  { %8463 = vmatpush2.bf16.msra.mxu1 %v20349_v29  ;;  %v20490_v29 = vld [vmem:[#allocation8 + $0x10b0] ss:$24 sps:$4 sm:$0xff]  }
 0x45c   :  { %8464 = vmatprep.subr.bf16.mxu1 %v20354_v38  ;;  %v20498_v38 = vld [vmem:[#allocation8 + $0x1084] ss:$24 sps:$4 sm:$0xff]  }
 0x45f   :  { %8465 = vmatpush2.bf16.msra.mxu1 %v20352_v24  ;;  %v4798_v24 = vrot.slane %v22059_v20, %v21976_v31 }
 0x460   :  { %8520 = vmatprep.subr.bf16.mxu1 %v20408_v50  ;;  %v20504_v50 = vld [vmem:[#allocation8 + $0xd5c] ss:$24 sps:$4 sm:$0xff]  }
 0x462   :  { %8467 = vmatmul.mubr.bf16.vlgmr.msra.gmra.mxu1 %v22083_v55  ;;  %v6416_v25 = vpop.f32.mrf.mxu1 }
 0x463   :  { %8521 = vmatpush1.bf16.msra.mxu1 %v20406_v53  ;;  %v6417_v51 = vadd.f32 %v6416_v25, %v4794_v41  ;;  %v6461_v53 = vpop.f32.mrf.mxu0 }
 0x464   :  { %8522 = vmatprep.subr.bf16.mxu1 %v20414_v18  ;;  %v6418_v35 = vpop.f32.mrf.mxu1 }
 0x465   :  { %v6419_v18 = vadd.f32 %v6418_v35, %v4798_v24 }
 0x466   :  { %v6420_v48 = vpop.f32.mrf.mxu1 }
 0x467   :  { %8523 = vmatpush1.bf16.msra.mxu1 %v20412_v59 }
 0x468   :  { %8524 = vmatprep.subr.bf16.mxu1 %v20420_v61  ;;  %v6422_v59 = vpop.f32.mrf.mxu1  ;;  %v6421_v61 = vadd.f32 %v6420_v48, %v4794_v41 }
 0x46b   :  { %8525 = vmatpush1.bf16.msra.mxu1 %v20418_v63  ;;  %v6460_v63 = vadd.f32 %v6459_v57, %v6417_v51 }
 0x46c   :  { %8526 = vmatprep.subr.bf16.mxu1 %v20426_v60  ;;  %v6463_v60 = vpop.f32.mrf.mxu0 }
 0x46f   :  { %8527 = vmatpush1.bf16.msra.mxu1 %v20424_v1 }
 0x470   :  { %8528 = vmatprep.subr.bf16.mxu1 %v20432_v12  ;;  %v6423_v12 = vadd.f32 %v6422_v59, %v4798_v24 }
 0x473   :  { %8529 = vmatpush1.bf16.msra.mxu1 %v20430_v17 }
 0x474   :  { %8530 = vmatprep.subr.bf16.mxu1 %v20438_v2  ;;  %v6462_v2 = vadd.f32 %v6461_v53, %v6419_v18  ;;  %v20403_v18 = vld [vmem:[#allocation8 + $0xa58] ss:$24 sps:$4 sm:$0xff]  }
 0x477   :  { %8531 = vmatpush1.bf16.msra.mxu1 %v20436_v5 }
 0x478   :  { %8532 = vmatprep.subr.bf16.mxu1 %v20444_v36 }
 0x47b   :  { %8533 = vmatpush1.bf16.msra.mxu1 %v20442_v4  ;;  %v6464_v4 = vadd.f32 %v6463_v60, %v6421_v61  ;;  %v20411_v61 = vld [vmem:[#allocation8 + $0xa2c] ss:$24 sps:$4 sm:$0xff]   ;;  %v20417_v60 = vld [vmem:[#allocation8 + $0x9fc] ss:$24 sps:$4 sm:$0xff]  }
 0x47c   :  { %8534 = vmatprep.subr.bf16.mxu1 %v20450_v7  ;;  %v6465_v7 = vpop.f32.mrf.mxu0 }
 0x47f   :  { %8535 = vmatpush1.bf16.msra.mxu1 %v20448_v8 }
 0x480   :  { %8536 = vmatprep.subr.bf16.mxu1 %v20456_v37 }
 0x483   :  { %8537 = vmatpush2.bf16.msra.mxu1 %v20454_v56 }
 0x484   :  { %8538 = vmatprep.subr.bf16.mxu1 %v20462_v6 }
 0x487   :  { %8539 = vmatpush2.bf16.msra.mxu1 %v20460_v10  ;;  %v6466_v10 = vadd.f32 %v6465_v7, %v6423_v12  ;;  %v20423_v12 = vld [vmem:[#allocation8 + $0x9cc] ss:$24 sps:$4 sm:$0xff]   ;;  %v20433_v7 = vld [vmem:[#allocation8 + $0x968] ss:$24 sps:$4 sm:$0xff]  }
 0x488   :  { %8540 = vmatprep.subr.bf16.mxu1 %v20468_v54 }
 0x48b   :  { %8541 = vmatpush2.bf16.msra.mxu1 %v20466_v13 }
 0x48c   :  { %8542 = vmatprep.subr.bf16.mxu1 %v20474_v15 }
 0x48f   :  { %8543 = vmatpush2.bf16.msra.mxu1 %v20472_v27 }
 0x490   :  { %8544 = vmatprep.subr.bf16.mxu1 %v20480_v62 }
 0x493   :  { %8545 = vmatpush2.bf16.msra.mxu1 %v20478_v16 }
 0x494   :  { %8546 = vmatprep.subr.bf16.mxu1 %v20486_v19 }
 0x497   :  { %8547 = vmatpush2.bf16.msra.mxu1 %v20484_v21 }
 0x498   :  { %8548 = vmatprep.subr.bf16.mxu1 %v20492_v26 }
 0x49b   :  { %8549 = vmatpush2.bf16.msra.mxu1 %v20490_v29 }
 0x49c   :  { %8550 = vmatprep.subr.bf16.mxu1 %v20498_v38 }
 0x49f   :  { %8551 = vmatpush2.bf16.msra.mxu1 %v20496_v46 }
 0x4a0   :  { %8606 = vmatprep.subr.bf16.mxu1 %v20504_v50 }
 0x4a2   :  { %v6502_v1 = vpop.f32.mrf.mxu1 }
 0x4a3   :  { %v6503_v17 = vadd.f32 %v6502_v1, %v6460_v63  ;;  %v20409_v63 = vld [vmem:[#allocation8 + $0xa28] ss:$24 sps:$4 sm:$0xff]   ;;  %v20415_v1 = vld [vmem:[#allocation8 + $0x9f8] ss:$24 sps:$4 sm:$0xff]  }
 0x4a4   :  { %v6504_v5 = vpop.f32.mrf.mxu1 }
 0x4a5   :  { %v6505_v36 = vadd.f32 %v6504_v5, %v6462_v2  ;;  %v6654_v8 = vmul.f32 0.70710677, %v6503_v17  ;;  %v6642_v24 = vmul.f32 0.5, %v6503_v17  ;;  %v20421_v17 = vld [vmem:[#allocation8 + $0x9c8] ss:$24 sps:$4 sm:$0xff]  }
 0x4a6   :  { %v6506_v37 = vpop.f32.mrf.mxu1  ;;  %v20429_v2 = vld [vmem:[#allocation8 + $0x99c] ss:$24 sps:$4 sm:$0xff]   ;;  %v20427_v5 = vld [vmem:[#allocation8 + $0x998] ss:$24 sps:$4 sm:$0xff]  }
 0x4a7   :  { %v6655_v56 = vmul.f32 0.70710677, %v6505_v36  ;;  %v6507_v6 = vadd.f32 %v6506_v37, %v6464_v4  ;;  %v6643_v38 = vmul.f32 0.5, %v6505_v36  ;;  %v20435_v36 = vld [vmem:[#allocation8 + $0x96c] ss:$24 sps:$4 sm:$0xff]   ;;  %v6545_v4 = vpop.f32.mrf.mxu0 }
 0x4a8   :  { %v6508_v54 = vpop.f32.mrf.mxu1 }
 0x4a9   :  { %21635 = verf.f32 %v6655_v56  ;;  %v6660_v13 = vmul.f32 0.70710677, %v6507_v6  ;;  %v6509_v15 = vadd.f32 %v6508_v54, %v6466_v10  ;;  %v6648_v35 = vmul.f32 0.5, %v6507_v6  ;;  %v6547_v37 = vpop.f32.mrf.mxu0  ;;  %v20439_v56 = vld [vmem:[#allocation8 + $0x938] ss:$24 sps:$4 sm:$0xff]  }
 0x4aa   :  { %21637 = verf.f32 %v6654_v8  ;;  %v20441_v8 = vld [vmem:[#allocation8 + $0x93c] ss:$24 sps:$4 sm:$0xff]   ;;  %v20447_v6 = vld [vmem:[#allocation8 + $0x90c] ss:$24 sps:$4 sm:$0xff]   ;;  %v20445_v54 = vld [vmem:[#allocation8 + $0x908] ss:$24 sps:$4 sm:$0xff]  }
 0x4ab   :  { %21639 = verf.f32 %v6660_v13  ;;  %v6661_v27 = vmul.f32 0.70710677, %v6509_v15  ;;  %v6649_v41 = vmul.f32 0.5, %v6509_v15  ;;  %v6549_v10 = vpop.f32.mrf.mxu0  ;;  %v20453_v13 = vld [vmem:[#allocation8 + $0xbdc] ss:$24 sps:$4 sm:$0xff]   ;;  %v4802_v15 = vrot.slane %v22059_v20, %v21991_v30 }
 0x4ad   :  { %21641 = verf.f32 %v6661_v27  ;;  %v6551_v27 = vpop.f32.mrf.mxu0 }
 0x4b6   :  { %v21636_v62 = vpop.eup %21635 }
 0x4b7   :  { %v21638_v16 = vpop.eup %21637  ;;  %v6679_v21 = vadd.f32 1.0, %v21636_v62  ;;  %v4806_v62 = vrot.slane %v22059_v20, %v21994_v32 }
 0x4b8   :  { %v21640_v19 = vpop.eup %21639  ;;  %v6678_v29 = vadd.f32 1.0, %v21638_v16  ;;  %v6631_v16 = vpop.f32.mrf.mxu0 }
 0x4b9   :  { %v6684_v25 = vadd.f32 1.0, %v21640_v19  ;;  %v6691_v48 = vmul.f32 %v6679_v21, %v6643_v38  ;;  %v20451_v19 = vld [vmem:[#allocation8 + $0xbd8] ss:$24 sps:$4 sm:$0xff]   ;;  %v20459_v21 = vld [vmem:[#allocation8 + $0xbac] ss:$24 sps:$4 sm:$0xff]  }
 0x4ba   :  { %v21642_v26 = vpop.eup %21641  ;;  %v6690_v51 = vmul.f32 %v6678_v29, %v6642_v24  ;;  %v6548_v29 = vadd.f32 %v6547_v37, %v4806_v62  ;;  %v20465_v24 = vld [vmem:[#allocation8 + $0xb7c] ss:$24 sps:$4 sm:$0xff]  }
 0x4bb   :  { %v6685_v57 = vadd.f32 1.0, %v21642_v26  ;;  %v6696_v46 = vmul.f32 %v6684_v25, %v6648_v35  ;;  %v6546_v25 = vadd.f32 %v6545_v4, %v4802_v15  ;;  %v6633_v35 = vpop.f32.mrf.mxu0 }
 0x4bd   :  { %v6697_v50 = vmul.f32 %v6685_v57, %v6649_v41  ;;  %v22092_v59 = vpack.c.bf16 %v6696_v46, %v6690_v51  ;;  %v20457_v41 = vld [vmem:[#allocation8 + $0xba8] ss:$24 sps:$4 sm:$0xff]   ;;  %v6550_v46 = vadd.f32 %v6549_v10, %v4802_v15  ;;  %v20475_v10 = vld [vmem:[#allocation8 + $0xb18] ss:$24 sps:$4 sm:$0xff]   ;;  %v20489_v15 = vld [vmem:[#allocation8 + $0xabc] ss:$24 sps:$4 sm:$0xff]  }
 0x4bf   :  { %v22090_v53 = vpack.c.bf16 %v6697_v50, %v6691_v48 }
 0x4c1   :  { %8509 = vmatprep.mubr.bf16.mxu0 %v22090_v53 }
 0x4c2   :  { %8510 = vmatmul.mubr.bf16.vlgmr.msra.gmra.mxu0 %v22092_v59 }
 0x4c3   :  { %8564 = vmatpush1.bf16.msra.mxu0 %v20403_v18  ;;  %8595 = vmatprep.mubr.bf16.mxu0 %v22080_v9  ;;  %v6635_v18 = vpop.f32.mrf.mxu0 }
 0x4c4   :  { %8565 = vmatprep.subr.bf16.mxu0 %v20411_v61 }
 0x4c5   :  { %v6637_v4 = vpop.f32.mrf.mxu0 }
 0x4c7   :  { %8566 = vmatpush1.bf16.msra.mxu0 %v20409_v63 }
 0x4c8   :  { %8567 = vmatprep.subr.bf16.mxu0 %v20417_v60  ;;  %v20463_v60 = vld [vmem:[#allocation8 + $0xb78] ss:$24 sps:$4 sm:$0xff]  }
 0x4cb   :  { %8568 = vmatpush1.bf16.msra.mxu0 %v20415_v1  ;;  %v6552_v1 = vadd.f32 %v6551_v27, %v4806_v62  ;;  %v20487_v27 = vld [vmem:[#allocation8 + $0xab8] ss:$24 sps:$4 sm:$0xff]  }
 0x4cc   :  { %8569 = vmatprep.subr.bf16.mxu0 %v20423_v12 }
 0x4cf   :  { %8570 = vmatpush1.bf16.msra.mxu0 %v20421_v17  ;;  %v20471_v17 = vld [vmem:[#allocation8 + $0xb4c] ss:$24 sps:$4 sm:$0xff]  }
 0x4d0   :  { %8571 = vmatprep.subr.bf16.mxu0 %v20429_v2 }
 0x4d3   :  { %8572 = vmatpush1.bf16.msra.mxu0 %v20427_v5 }
 0x4d4   :  { %8573 = vmatprep.subr.bf16.mxu0 %v20435_v36 }
 0x4d7   :  { %8574 = vmatpush1.bf16.msra.mxu0 %v20433_v7 }
 0x4d8   :  { %8575 = vmatprep.subr.bf16.mxu0 %v20441_v8  ;;  %v20469_v8 = vld [vmem:[#allocation8 + $0xb48] ss:$24 sps:$4 sm:$0xff]  }
 0x4db   :  { %8576 = vmatpush1.bf16.msra.mxu0 %v20439_v56  ;;  %v20477_v56 = vld [vmem:[#allocation8 + $0xb1c] ss:$24 sps:$4 sm:$0xff]  }
 0x4dc   :  { %8577 = vmatprep.subr.bf16.mxu0 %v20447_v6 }
 0x4df   :  { %8578 = vmatpush1.bf16.msra.mxu0 %v20445_v54  ;;  %v20483_v54 = vld [vmem:[#allocation8 + $0xaec] ss:$24 sps:$4 sm:$0xff]  }
 0x4e0   :  { %8579 = vmatprep.subr.bf16.mxu0 %v20453_v13  ;;  %v20481_v13 = vld [vmem:[#allocation8 + $0xae8] ss:$24 sps:$4 sm:$0xff]  }
 0x4e2   :  { %v6588_v26 = vpop.f32.mrf.mxu1 }
 0x4e3   :  { %v6589_v38 = vadd.f32 %v6588_v26, %v6546_v25  ;;  %8580 = vmatpush2.bf16.msra.mxu0 %v20451_v19  ;;  %v20493_v26 = vld [vmem:[#allocation8 + $0xa88] ss:$24 sps:$4 sm:$0xff]  }
 0x4e4   :  { %v6590_v57 = vpop.f32.mrf.mxu1  ;;  %8581 = vmatprep.subr.bf16.mxu0 %v20459_v21 }
 0x4e5   :  { %v6632_v48 = vadd.f32 %v6631_v16, %v6589_v38  ;;  %v6591_v50 = vadd.f32 %v6590_v57, %v6548_v29  ;;  %v20495_v16 = vld [vmem:[#allocation8 + $0xa8c] ss:$24 sps:$4 sm:$0xff]   ;;  %v20501_v29 = vld [vmem:[#allocation8 + $0x105c] ss:$24 sps:$4 sm:$0xff]  }
 0x4e6   :  { %v6592_v51 = vpop.f32.mrf.mxu1 }
 0x4e7   :  { %v6656_v20 = vmul.f32 0.70710677, %v6632_v48  ;;  %v6634_v61 = vadd.f32 %v6633_v35, %v6591_v50  ;;  %v6593_v63 = vadd.f32 %v6592_v51, %v6550_v46  ;;  %8582 = vmatpush2.bf16.msra.mxu0 %v20457_v41  ;;  %v6644_v51 = vmul.f32 0.5, %v6632_v48  ;;  %v20513_v48 = vld [vmem:[#allocation8 + $0xffc] ss:$24 sps:$4 sm:$0xff]  }
 0x4e8   :  { %v6594_v12 = vpop.f32.mrf.mxu1  ;;  %8583 = vmatprep.subr.bf16.mxu0 %v20465_v24 }
 0x4e9   :  { %v6657_v2 = vmul.f32 0.70710677, %v6634_v61  ;;  %v6636_v5 = vadd.f32 %v6635_v18, %v6593_v63  ;;  %v6595_v36 = vadd.f32 %v6594_v12, %v6552_v1  ;;  %21643 = verf.f32 %v6656_v20  ;;  %v20499_v18 = vld [vmem:[#allocation8 + $0x1058] ss:$24 sps:$4 sm:$0xff]   ;;  %v20507_v12 = vld [vmem:[#allocation8 + $0x102c] ss:$24 sps:$4 sm:$0xff]  }
 0x4ea   :  { %v6645_v24 = vmul.f32 0.5, %v6634_v61  ;;  %v20505_v61 = vld [vmem:[#allocation8 + $0x1028] ss:$24 sps:$4 sm:$0xff]  }
 0x4eb   :  { %v6662_v7 = vmul.f32 0.70710677, %v6636_v5  ;;  %8584 = vmatpush2.bf16.msra.mxu0 %v20463_v60  ;;  %21645 = verf.f32 %v6657_v2  ;;  %v6638_v37 = vadd.f32 %v6637_v4, %v6595_v36  ;;  %v6650_v57 = vmul.f32 0.5, %v6636_v5  ;;  %v20502_v2 = vld [vmem:[#allocation8 + $0xd58] ss:$24 sps:$4 sm:$0xff]  }
 0x4ec   :  { %8585 = vmatprep.subr.bf16.mxu0 %v20471_v17  ;;  %v20510_v5 = vld [vmem:[#allocation8 + $0xd2c] ss:$24 sps:$4 sm:$0xff]   ;;  %v20508_v4 = vld [vmem:[#allocation8 + $0xd28] ss:$24 sps:$4 sm:$0xff]  }
 0x4ed   :  { %21647 = verf.f32 %v6662_v7  ;;  %v6663_v6 = vmul.f32 0.70710677, %v6638_v37  ;;  %v6651_v46 = vmul.f32 0.5, %v6638_v37  ;;  %v20511_v7 = vld [vmem:[#allocation8 + $0xff8] ss:$24 sps:$4 sm:$0xff]  }
 0x4ee   :  { %v20519_v37 = vld [vmem:[#allocation8 + $0xfcc] ss:$24 sps:$4 sm:$0xff]  }
 0x4ef   :  { %8586 = vmatpush2.bf16.msra.mxu0 %v20469_v8  ;;  %21649 = verf.f32 %v6663_v6  ;;  %v20516_v8 = vld [vmem:[#allocation8 + $0xcfc] ss:$24 sps:$4 sm:$0xff]   ;;  %v20517_v6 = vld [vmem:[#allocation8 + $0xfc8] ss:$24 sps:$4 sm:$0xff]  }
 0x4f0   :  { %8587 = vmatprep.subr.bf16.mxu0 %v20477_v56  ;;  %v20514_v56 = vld [vmem:[#allocation8 + $0xcf8] ss:$24 sps:$4 sm:$0xff]  }
 0x4f3   :  { %8588 = vmatpush2.bf16.msra.mxu0 %v20475_v10  ;;  %v20522_v10 = vld [vmem:[#allocation8 + $0xccc] ss:$24 sps:$4 sm:$0xff]  }
 0x4f4   :  { %8589 = vmatprep.subr.bf16.mxu0 %v20483_v54  ;;  %v20525_v54 = vld [vmem:[#allocation8 + $0xf9c] ss:$24 sps:$4 sm:$0xff]  }
 0x4f6   :  { %v21644_v62 = vpop.eup %21643 }
 0x4f7   :  { %8590 = vmatpush2.bf16.msra.mxu0 %v20481_v13  ;;  %v6680_v41 = vadd.f32 1.0, %v21644_v62  ;;  %v20520_v13 = vld [vmem:[#allocation8 + $0xcc8] ss:$24 sps:$4 sm:$0xff]   ;;  %v20531_v62 = vld [vmem:[#allocation8 + $0xf6c] ss:$24 sps:$4 sm:$0xff]  }
 0x4f8   :  { %8591 = vmatprep.subr.bf16.mxu0 %v20489_v15  ;;  %v21646_v19 = vpop.eup %21645  ;;  %v20523_v15 = vld [vmem:[#allocation8 + $0xf98] ss:$24 sps:$4 sm:$0xff]  }
 0x4f9   :  { %v6681_v35 = vadd.f32 1.0, %v21646_v19  ;;  %v6692_v1 = vmul.f32 %v6680_v41, %v6644_v51  ;;  %v20529_v19 = vld [vmem:[#allocation8 + $0xf68] ss:$24 sps:$4 sm:$0xff]   ;;  %v20538_v41 = vld [vmem:[#allocation8 + $0xc38] ss:$24 sps:$4 sm:$0xff]  }
 0x4fa   :  { %v21648_v21 = vpop.eup %21647  ;;  %v20547_v51 = vld [vmem:[#allocation8 + $0x11d8] ss:$24 sps:$4 sm:$0xff]  }
 0x4fb   :  { %v6686_v25 = vadd.f32 1.0, %v21648_v21  ;;  %8592 = vmatpush2.bf16.msra.mxu0 %v20487_v27  ;;  %v6693_v63 = vmul.f32 %v6681_v35, %v6645_v24  ;;  %v20528_v27 = vld [vmem:[#allocation8 + $0xc9c] ss:$24 sps:$4 sm:$0xff]   ;;  %v20534_v21 = vld [vmem:[#allocation8 + $0xc6c] ss:$24 sps:$4 sm:$0xff]  }
 0x4fc   :  { %8593 = vmatprep.subr.bf16.mxu0 %v20495_v16  ;;  %v21650_v38 = vpop.eup %21649  ;;  %v20526_v16 = vld [vmem:[#allocation8 + $0xc98] ss:$24 sps:$4 sm:$0xff]   ;;  %v20540_v35 = vld [vmem:[#allocation8 + $0xc3c] ss:$24 sps:$4 sm:$0xff]   ;;  %v20546_v24 = vld [vmem:[#allocation8 + $0xc0c] ss:$24 sps:$4 sm:$0xff]  }
 0x4fd   :  { %v6687_v50 = vadd.f32 1.0, %v21650_v38  ;;  %v6698_v20 = vmul.f32 %v6686_v25, %v6650_v57  ;;  %v20537_v25 = vld [vmem:[#allocation8 + $0xf3c] ss:$24 sps:$4 sm:$0xff]   ;;  %v20543_v38 = vld [vmem:[#allocation8 + $0xf0c] ss:$24 sps:$4 sm:$0xff]  }
 0x4fe   :  { %v20541_v57 = vld [vmem:[#allocation8 + $0xf08] ss:$24 sps:$4 sm:$0xff]  }
 0x4ff   :  { %8594 = vmatpush2.bf16.msra.mxu0 %v20493_v26  ;;  %v6699_v60 = vmul.f32 %v6687_v50, %v6651_v46  ;;  %v22104_v36 = vpack.c.bf16 %v6698_v20, %v6692_v1  ;;  %v20532_v26 = vld [vmem:[#allocation8 + $0xc68] ss:$24 sps:$4 sm:$0xff]   ;;  %v20549_v46 = vld [vmem:[#allocation8 + $0x11dc] ss:$24 sps:$4 sm:$0xff]   ;;  %v20558_v1 = vld [vmem:[#allocation8 + $0xeac] ss:$24 sps:$4 sm:$0xff]  }
 0x500   :  { %8649 = vmatprep.subr.bf16.mxu0 %v20501_v29  ;;  %v20535_v29 = vld [vmem:[#allocation8 + $0xf38] ss:$24 sps:$4 sm:$0xff]   ;;  %v20544_v50 = vld [vmem:[#allocation8 + $0xc08] ss:$24 sps:$4 sm:$0xff]   ;;  %v20552_v20 = vld [vmem:[#allocation8 + $0xedc] ss:$24 sps:$4 sm:$0xff]  }
 0x501   :  { %v22102_v17 = vpack.c.bf16 %v6699_v60, %v6693_v63  ;;  %v20550_v63 = vld [vmem:[#allocation8 + $0xed8] ss:$24 sps:$4 sm:$0xff]   ;;  %v20553_v60 = vld [vmem:[#allocation8 + $0x11a8] ss:$24 sps:$4 sm:$0xff]  }
 0x502   :  { %8596 = vmatmul.mubr.bf16.vlgmr.msra.gmra.mxu0 %v22083_v55 }
 0x503   :  { %8650 = vmatpush1.bf16.msra.mxu0 %v20499_v18  ;;  %8552 = vmatprep.mubr.bf16.mxu1 %v22102_v17  ;;  %v20555_v18 = vld [vmem:[#allocation8 + $0x11ac] ss:$24 sps:$4 sm:$0xff]  }
 0x504   :  { %8681 = vmatprep.mubr.bf16.mxu0 %v22102_v17  ;;  %8553 = vmatmul.mubr.bf16.vlgmr.msra.gmra.mxu1 %v22104_v36 }
 0x505   :  { %8651 = vmatprep.subr.bf16.mxu0 %v20507_v12  ;;  %8607 = vmatpush1.bf16.msra.mxu1 %v20502_v2  ;;  %v20561_v12 = vld [vmem:[#allocation8 + $0x117c] ss:$24 sps:$4 sm:$0xff]   ;;  %v20556_v2 = vld [vmem:[#allocation8 + $0xea8] ss:$24 sps:$4 sm:$0xff]  }
 0x506   :  { %8638 = vmatprep.mubr.bf16.mxu1 %v22090_v53  ;;  %8608 = vmatprep.subr.bf16.mxu1 %v20510_v5  ;;  %v20564_v5 = vld [vmem:[#allocation8 + $0xe7c] ss:$24 sps:$4 sm:$0xff]  }
 0x507   :  { %8652 = vmatpush1.bf16.msra.mxu0 %v20505_v61  ;;  %v20559_v61 = vld [vmem:[#allocation8 + $0x1178] ss:$24 sps:$4 sm:$0xff]  }
 0x508   :  { %8653 = vmatprep.subr.bf16.mxu0 %v20513_v48  ;;  %v20567_v48 = vld [vmem:[#allocation8 + $0x114c] ss:$24 sps:$4 sm:$0xff]  }
 0x509   :  { %8609 = vmatpush1.bf16.msra.mxu1 %v20508_v4  ;;  %v20562_v4 = vld [vmem:[#allocation8 + $0xe78] ss:$24 sps:$4 sm:$0xff]  }
 0x50a   :  { %8610 = vmatprep.subr.bf16.mxu1 %v20516_v8  ;;  %v20570_v8 = vld [vmem:[#allocation8 + $0xe4c] ss:$24 sps:$4 sm:$0xff]  }
 0x50b   :  { %8654 = vmatpush1.bf16.msra.mxu0 %v20511_v7  ;;  %v20565_v7 = vld [vmem:[#allocation8 + $0x1148] ss:$24 sps:$4 sm:$0xff]  }
 0x50c   :  { %8655 = vmatprep.subr.bf16.mxu0 %v20519_v37  ;;  %v20573_v37 = vld [vmem:[#allocation8 + $0x111c] ss:$24 sps:$4 sm:$0xff]  }
 0x50d   :  { %8611 = vmatpush1.bf16.msra.mxu1 %v20514_v56  ;;  %v20568_v56 = vld [vmem:[#allocation8 + $0xe48] ss:$24 sps:$4 sm:$0xff]  }
 0x50e   :  { %8612 = vmatprep.subr.bf16.mxu1 %v20522_v10  ;;  %v20576_v10 = vld [vmem:[#allocation8 + $0xe1c] ss:$24 sps:$4 sm:$0xff]  }
 0x50f   :  { %8656 = vmatpush1.bf16.msra.mxu0 %v20517_v6  ;;  %v20571_v6 = vld [vmem:[#allocation8 + $0x1118] ss:$24 sps:$4 sm:$0xff]  }
 0x510   :  { %8657 = vmatprep.subr.bf16.mxu0 %v20525_v54  ;;  %v20579_v54 = vld [vmem:[#allocation8 + $0x10ec] ss:$24 sps:$4 sm:$0xff]  }
 0x511   :  { %8613 = vmatpush1.bf16.msra.mxu1 %v20520_v13  ;;  %v20574_v13 = vld [vmem:[#allocation8 + $0xe18] ss:$24 sps:$4 sm:$0xff]  }
 0x512   :  { %8614 = vmatprep.subr.bf16.mxu1 %v20528_v27  ;;  %v20582_v27 = vld [vmem:[#allocation8 + $0xdec] ss:$24 sps:$4 sm:$0xff]  }
 0x513   :  { %8658 = vmatpush1.bf16.msra.mxu0 %v20523_v15  ;;  %v20577_v15 = vld [vmem:[#allocation8 + $0x10e8] ss:$24 sps:$4 sm:$0xff]  }
 0x514   :  { %8659 = vmatprep.subr.bf16.mxu0 %v20531_v62  ;;  %v20585_v62 = vld [vmem:[#allocation8 + $0x10bc] ss:$24 sps:$4 sm:$0xff]  }
 0x515   :  { %8615 = vmatpush1.bf16.msra.mxu1 %v20526_v16  ;;  %v20580_v16 = vld [vmem:[#allocation8 + $0xde8] ss:$24 sps:$4 sm:$0xff]  }
 0x516   :  { %8616 = vmatprep.subr.bf16.mxu1 %v20534_v21  ;;  %v20588_v21 = vld [vmem:[#allocation8 + $0xdbc] ss:$24 sps:$4 sm:$0xff]  }
 0x517   :  { %8660 = vmatpush1.bf16.msra.mxu0 %v20529_v19  ;;  %v20583_v19 = vld [vmem:[#allocation8 + $0x10b8] ss:$24 sps:$4 sm:$0xff]  }
 0x518   :  { %8661 = vmatprep.subr.bf16.mxu0 %v20537_v25  ;;  %v20591_v25 = vld [vmem:[#allocation8 + $0x108c] ss:$24 sps:$4 sm:$0xff]  }
 0x519   :  { %8617 = vmatpush1.bf16.msra.mxu1 %v20532_v26  ;;  %v20586_v26 = vld [vmem:[#allocation8 + $0xdb8] ss:$24 sps:$4 sm:$0xff]  }
 0x51a   :  { %8618 = vmatprep.subr.bf16.mxu1 %v20540_v35  ;;  %v20594_v35 = vld [vmem:[#allocation8 + $0xd8c] ss:$24 sps:$4 sm:$0xff]  }
 0x51b   :  { %8662 = vmatpush1.bf16.msra.mxu0 %v20535_v29  ;;  %v20589_v29 = vld [vmem:[#allocation8 + $0x1088] ss:$24 sps:$4 sm:$0xff]  }
 0x51c   :  { %8663 = vmatprep.subr.bf16.mxu0 %v20543_v38  ;;  %v20597_v38 = vld [vmem:[#allocation8 + $0xd64] ss:$24 sps:$4 sm:$0xff]  }
 0x51d   :  { %8619 = vmatpush1.bf16.msra.mxu1 %v20538_v41  ;;  %v20592_v41 = vld [vmem:[#allocation8 + $0xd88] ss:$24 sps:$4 sm:$0xff]  }
 0x51e   :  { %8620 = vmatprep.subr.bf16.mxu1 %v20546_v24  ;;  %v20600_v24 = vld [vmem:[#allocation8 + $0xa64] ss:$24 sps:$4 sm:$0xff]  }
 0x51f   :  { %8664 = vmatpush1.bf16.msra.mxu0 %v20541_v57  ;;  %v20595_v57 = vld [vmem:[#allocation8 + $0xd60] ss:$24 sps:$4 sm:$0xff]  }
 0x520   :  { %8665 = vmatprep.subr.bf16.mxu0 %v20549_v46  ;;  %v20603_v46 = vld [vmem:[#allocation8 + $0xd34] ss:$24 sps:$4 sm:$0xff]  }
 0x521   :  { %8621 = vmatpush1.bf16.msra.mxu1 %v20544_v50  ;;  %v20598_v50 = vld [vmem:[#allocation8 + $0xa60] ss:$24 sps:$4 sm:$0xff]  }
 0x522   :  { %8622 = vmatprep.subr.bf16.mxu1 %v20552_v20  ;;  %v20606_v20 = vld [vmem:[#allocation8 + $0xa34] ss:$24 sps:$4 sm:$0xff]  }
 0x523   :  { %8666 = vmatpush2.bf16.msra.mxu0 %v20547_v51  ;;  %v20601_v51 = vld [vmem:[#allocation8 + $0xd30] ss:$24 sps:$4 sm:$0xff]  }
 0x524   :  { %8667 = vmatprep.subr.bf16.mxu0 %v20555_v18  ;;  %v20609_v18 = vld [vmem:[#allocation8 + $0xd04] ss:$24 sps:$4 sm:$0xff]  }
 0x525   :  { %8623 = vmatpush2.bf16.msra.mxu1 %v20550_v63  ;;  %v20604_v63 = vld [vmem:[#allocation8 + $0xa30] ss:$24 sps:$4 sm:$0xff]  }
 0x526   :  { %8624 = vmatprep.subr.bf16.mxu1 %v20558_v1  ;;  %v20612_v1 = vld [vmem:[#allocation8 + $0xa04] ss:$24 sps:$4 sm:$0xff]  }
 0x527   :  { %8668 = vmatpush2.bf16.msra.mxu0 %v20553_v60  ;;  %v20607_v60 = vld [vmem:[#allocation8 + $0xd00] ss:$24 sps:$4 sm:$0xff]  }
 0x528   :  { %8669 = vmatprep.subr.bf16.mxu0 %v20561_v12  ;;  %v20615_v12 = vld [vmem:[#allocation8 + $0xcd4] ss:$24 sps:$4 sm:$0xff]  }
 0x529   :  { %8625 = vmatpush2.bf16.msra.mxu1 %v20556_v2  ;;  %v20610_v2 = vld [vmem:[#allocation8 + $0xa00] ss:$24 sps:$4 sm:$0xff]  }
 0x52a   :  { %8626 = vmatprep.subr.bf16.mxu1 %v20564_v5  ;;  %v20621_v5 = vld [vmem:[#allocation8 + $0xca4] ss:$24 sps:$4 sm:$0xff]  }
 0x52b   :  { %8670 = vmatpush2.bf16.msra.mxu0 %v20559_v61  ;;  %v20618_v61 = vld [vmem:[#allocation8 + $0x9d4] ss:$24 sps:$4 sm:$0xff]  }
 0x52c   :  { %8671 = vmatprep.subr.bf16.mxu0 %v20567_v48  ;;  %v20616_v48 = vld [vmem:[#allocation8 + $0x9d0] ss:$24 sps:$4 sm:$0xff]  }
 0x52d   :  { %8627 = vmatpush2.bf16.msra.mxu1 %v20562_v4  ;;  %v20624_v4 = vld [vmem:[#allocation8 + $0x9a4] ss:$24 sps:$4 sm:$0xff]  }
 0x52e   :  { %8628 = vmatprep.subr.bf16.mxu1 %v20570_v8  ;;  %v20622_v8 = vld [vmem:[#allocation8 + $0x9a0] ss:$24 sps:$4 sm:$0xff]  }
 0x52f   :  { %8672 = vmatpush2.bf16.msra.mxu0 %v20565_v7  ;;  %v20627_v7 = vld [vmem:[#allocation8 + $0xc74] ss:$24 sps:$4 sm:$0xff]  }
 0x530   :  { %8673 = vmatprep.subr.bf16.mxu0 %v20573_v37  ;;  %v20625_v37 = vld [vmem:[#allocation8 + $0xc70] ss:$24 sps:$4 sm:$0xff]  }
 0x531   :  { %8629 = vmatpush2.bf16.msra.mxu1 %v20568_v56  ;;  %v20630_v56 = vld [vmem:[#allocation8 + $0x974] ss:$24 sps:$4 sm:$0xff]  }
 0x532   :  { %8630 = vmatprep.subr.bf16.mxu1 %v20576_v10  ;;  %v20628_v10 = vld [vmem:[#allocation8 + $0x970] ss:$24 sps:$4 sm:$0xff]  }
 0x533   :  { %8674 = vmatpush2.bf16.msra.mxu0 %v20571_v6  ;;  %v20633_v6 = vld [vmem:[#allocation8 + $0xc44] ss:$24 sps:$4 sm:$0xff]  }
 0x534   :  { %8675 = vmatprep.subr.bf16.mxu0 %v20579_v54  ;;  %v20631_v54 = vld [vmem:[#allocation8 + $0xc40] ss:$24 sps:$4 sm:$0xff]  }
 0x535   :  { %8631 = vmatpush2.bf16.msra.mxu1 %v20574_v13  ;;  %v20636_v13 = vld [vmem:[#allocation8 + $0x944] ss:$24 sps:$4 sm:$0xff]  }
 0x536   :  { %8632 = vmatprep.subr.bf16.mxu1 %v20582_v27  ;;  %v20634_v27 = vld [vmem:[#allocation8 + $0x940] ss:$24 sps:$4 sm:$0xff]  }
 0x537   :  { %8676 = vmatpush2.bf16.msra.mxu0 %v20577_v15  ;;  %v20639_v15 = vld [vmem:[#allocation8 + $0xc14] ss:$24 sps:$4 sm:$0xff]  }
 0x538   :  { %8677 = vmatprep.subr.bf16.mxu0 %v20585_v62  ;;  %v20637_v62 = vld [vmem:[#allocation8 + $0xc10] ss:$24 sps:$4 sm:$0xff]  }
 0x539   :  { %8633 = vmatpush2.bf16.msra.mxu1 %v20580_v16  ;;  %v20642_v16 = vld [vmem:[#allocation8 + $0x914] ss:$24 sps:$4 sm:$0xff]  }
 0x53a   :  { %8634 = vmatprep.subr.bf16.mxu1 %v20588_v21  ;;  %v20640_v21 = vld [vmem:[#allocation8 + $0x910] ss:$24 sps:$4 sm:$0xff]  }
 0x53b   :  { %8678 = vmatpush2.bf16.msra.mxu0 %v20583_v19  ;;  %v20645_v19 = vld [vmem:[#allocation8 + $0xee4] ss:$24 sps:$4 sm:$0xff]  }
 0x53c   :  { %8679 = vmatprep.subr.bf16.mxu0 %v20591_v25  ;;  %v20643_v25 = vld [vmem:[#allocation8 + $0xee0] ss:$24 sps:$4 sm:$0xff]  }
 0x53d   :  { %8635 = vmatpush2.bf16.msra.mxu1 %v20586_v26  ;;  %v20648_v26 = vld [vmem:[#allocation8 + $0xbe4] ss:$24 sps:$4 sm:$0xff]  }
 0x53e   :  { %8636 = vmatprep.subr.bf16.mxu1 %v20594_v35  ;;  %v20646_v35 = vld [vmem:[#allocation8 + $0xbe0] ss:$24 sps:$4 sm:$0xff]  }
 0x53f   :  { %8680 = vmatpush2.bf16.msra.mxu0 %v20589_v29  ;;  %v20651_v29 = vld [vmem:[#allocation8 + $0xeb4] ss:$24 sps:$4 sm:$0xff]  }
 0x540   :  { %8735 = vmatprep.subr.bf16.mxu0 %v20597_v38  ;;  %v20649_v38 = vld [vmem:[#allocation8 + $0xeb0] ss:$24 sps:$4 sm:$0xff]  }
 0x541   :  { %8637 = vmatpush2.bf16.msra.mxu1 %v20592_v41  ;;  %v20654_v41 = vld [vmem:[#allocation8 + $0xbb4] ss:$24 sps:$4 sm:$0xff]  }
 0x542   :  { %8682 = vmatmul.mubr.bf16.vlgmr.msra.gmra.mxu0 %v22104_v36  ;;  %8692 = vmatprep.subr.bf16.mxu1 %v20600_v24  ;;  %v20652_v24 = vld [vmem:[#allocation8 + $0xbb0] ss:$24 sps:$4 sm:$0xff]  }
 0x543   :  { %8736 = vmatpush1.bf16.msra.mxu0 %v20595_v57  ;;  %8767 = vmatprep.mubr.bf16.mxu0 %v22090_v53  ;;  %v20613_v53 = vld [vmem:[#allocation8 + $0xcd0] ss:$24 sps:$4 sm:$0xff]   ;;  %v20657_v57 = vld [vmem:[#allocation8 + $0xe84] ss:$24 sps:$4 sm:$0xff]  }
 0x544   :  { %8737 = vmatprep.subr.bf16.mxu0 %v20603_v46  ;;  %8639 = vmatmul.mubr.bf16.vlgmr.msra.gmra.mxu1 %v22092_v59  ;;  %v20655_v46 = vld [vmem:[#allocation8 + $0xe80] ss:$24 sps:$4 sm:$0xff]  }
 0x545   :  { %8693 = vmatpush1.bf16.msra.mxu1 %v20598_v50  ;;  %8724 = vmatprep.mubr.bf16.mxu1 %v22080_v9  ;;  %v20619_v9 = vld [vmem:[#allocation8 + $0xca0] ss:$24 sps:$4 sm:$0xff]   ;;  %v20660_v50 = vld [vmem:[#allocation8 + $0xb84] ss:$24 sps:$4 sm:$0xff]  }
 0x546   :  { %8694 = vmatprep.subr.bf16.mxu1 %v20606_v20  ;;  %v20658_v20 = vld [vmem:[#allocation8 + $0xb80] ss:$24 sps:$4 sm:$0xff]  }
 0x547   :  { %8738 = vmatpush1.bf16.msra.mxu0 %v20601_v51  ;;  %v20663_v51 = vld [vmem:[#allocation8 + $0xe54] ss:$24 sps:$4 sm:$0xff]  }
 0x548   :  { %8739 = vmatprep.subr.bf16.mxu0 %v20609_v18  ;;  %v20661_v18 = vld [vmem:[#allocation8 + $0xe50] ss:$24 sps:$4 sm:$0xff]  }
 0x549   :  { %8695 = vmatpush1.bf16.msra.mxu1 %v20604_v63  ;;  %v20666_v63 = vld [vmem:[#allocation8 + $0xb54] ss:$24 sps:$4 sm:$0xff]  }
 0x54a   :  { %8696 = vmatprep.subr.bf16.mxu1 %v20612_v1  ;;  %v20664_v1 = vld [vmem:[#allocation8 + $0xb50] ss:$24 sps:$4 sm:$0xff]  }
 0x54b   :  { %8740 = vmatpush1.bf16.msra.mxu0 %v20607_v60  ;;  %v20669_v60 = vld [vmem:[#allocation8 + $0xe24] ss:$24 sps:$4 sm:$0xff]  }
 0x54c   :  { %8741 = vmatprep.subr.bf16.mxu0 %v20615_v12  ;;  %v20667_v12 = vld [vmem:[#allocation8 + $0xe20] ss:$24 sps:$4 sm:$0xff]  }
 0x54d   :  { %8697 = vmatpush1.bf16.msra.mxu1 %v20610_v2  ;;  %v20672_v2 = vld [vmem:[#allocation8 + $0xb24] ss:$24 sps:$4 sm:$0xff]  }
 0x54e   :  { %8698 = vmatprep.subr.bf16.mxu1 %v20618_v61  ;;  %v20670_v61 = vld [vmem:[#allocation8 + $0xb20] ss:$24 sps:$4 sm:$0xff]  }
 0x54f   :  { %8742 = vmatpush1.bf16.msra.mxu0 %v20613_v53  ;;  %v20675_v53 = vld [vmem:[#allocation8 + $0xdf4] ss:$24 sps:$4 sm:$0xff]  }
 0x550   :  { %8743 = vmatprep.subr.bf16.mxu0 %v20621_v5  ;;  %v20673_v5 = vld [vmem:[#allocation8 + $0xdf0] ss:$24 sps:$4 sm:$0xff]  }
 0x551   :  { %8699 = vmatpush1.bf16.msra.mxu1 %v20616_v48  ;;  %v20678_v48 = vld [vmem:[#allocation8 + $0xaf4] ss:$24 sps:$4 sm:$0xff]  }
 0x552   :  { %8700 = vmatprep.subr.bf16.mxu1 %v20624_v4  ;;  %v20676_v4 = vld [vmem:[#allocation8 + $0xaf0] ss:$24 sps:$4 sm:$0xff]  }
 0x553   :  { %8744 = vmatpush1.bf16.msra.mxu0 %v20619_v9  ;;  %v20681_v9 = vld [vmem:[#allocation8 + $0xdc4] ss:$24 sps:$4 sm:$0xff]  }
 0x554   :  { %8745 = vmatprep.subr.bf16.mxu0 %v20627_v7  ;;  %v20679_v7 = vld [vmem:[#allocation8 + $0xdc0] ss:$24 sps:$4 sm:$0xff]  }
 0x555   :  { %8701 = vmatpush1.bf16.msra.mxu1 %v20622_v8  ;;  %v20684_v8 = vld [vmem:[#allocation8 + $0xac4] ss:$24 sps:$4 sm:$0xff]  }
 0x556   :  { %8702 = vmatprep.subr.bf16.mxu1 %v20630_v56  ;;  %v8875_v56 = vld [vmem:[#allocation5 + $0x570] sm:$0xff] }
 0x557   :  { %8746 = vmatpush1.bf16.msra.mxu0 %v20625_v37  ;;  %v20687_v37 = vld [vmem:[#allocation8 + $0xd94] ss:$24 sps:$4 sm:$0xff]  }
 0x558   :  { %8747 = vmatprep.subr.bf16.mxu0 %v20633_v6  ;;  %v8878_v6 = vld [vmem:[#allocation5 + $0x5d0] sm:$0xff] }
 0x559   :  { %8703 = vmatpush1.bf16.msra.mxu1 %v20628_v10  ;;  %v20682_v10 = vld [vmem:[#allocation8 + $0xac0] ss:$24 sps:$4 sm:$0xff]  }
 0x55a   :  { %8704 = vmatprep.subr.bf16.mxu1 %v20636_v13  ;;  %v20690_v13 = vld [vmem:[#allocation8 + $0xa94] ss:$24 sps:$4 sm:$0xff]  }
 0x55b   :  { %8748 = vmatpush1.bf16.msra.mxu0 %v20631_v54  ;;  %v20685_v54 = vld [vmem:[#allocation8 + $0xd90] ss:$24 sps:$4 sm:$0xff]  }
 0x55c   :  { %8749 = vmatprep.subr.bf16.mxu0 %v20639_v15  ;;  %v22114_v15 = vpop.f32.mrf.mxu1 }
 0x55d   :  { %8705 = vmatpush1.bf16.msra.mxu1 %v20634_v27  ;;  %v18745_v27 = vcombine.high %v8875_v56, %v8878_v6 }
 0x55e   :  { %8706 = vmatprep.subr.bf16.mxu1 %v20642_v16  ;;  %v8872_v16 = vld [vmem:[#allocation5 + $0x510] sm:$0xff] }
 0x55f   :  { %8750 = vmatpush1.bf16.msra.mxu0 %v20637_v62  ;;  %v8869_v62 = vld [vmem:[#allocation5 + $0x4b0] sm:$0xff] }
 0x560   :  { %8751 = vmatprep.subr.bf16.mxu0 %v20645_v19  ;;  %v20688_v19 = vld [vmem:[#allocation8 + $0xa90] ss:$24 sps:$4 sm:$0xff]  }
 0x561   :  { %8707 = vmatpush1.bf16.msra.mxu1 %v20640_v21  ;;  %v18744_v21 = vcombine.low %v8875_v56, %v8878_v6  ;;  %v8848_v56 = vld [vmem:[#allocation5 + $0x210] sm:$0xff]  ;;  %v20700_v6 = vld [vmem:[#allocation8 + $0xfd0] ss:$24 sps:$4 sm:$0xff]  }
 0x562   :  { %8708 = vmatprep.subr.bf16.mxu1 %v20648_v26  ;;  %v22116_v26 = vpop.f32.mrf.mxu1 }
 0x563   :  { %8752 = vmatpush2.bf16.msra.mxu0 %v20643_v25  ;;  %v20693_v25 = vld [vmem:[#allocation8 + $0x1064] ss:$24 sps:$4 sm:$0xff]  }
 0x564   :  { %8753 = vmatprep.subr.bf16.mxu0 %v20651_v29  ;;  %v18739_v29 = vcombine.high %v8869_v62, %v8872_v16 }
 0x565   :  { %8709 = vmatpush2.bf16.msra.mxu1 %v20646_v35  ;;  %v8863_v35 = vld [vmem:[#allocation5 + $0x3f0] sm:$0xff] }
 0x566   :  { %8710 = vmatprep.subr.bf16.mxu1 %v20654_v41 }
 0x567   :  { %8754 = vmatpush2.bf16.msra.mxu0 %v20649_v38  ;;  %v8866_v38 = vld [vmem:[#allocation5 + $0x450] sm:$0xff] }
 0x568   :  { %8755 = vmatprep.subr.bf16.mxu0 %v20657_v57  ;;  %v20691_v57 = vld [vmem:[#allocation8 + $0x1060] ss:$24 sps:$4 sm:$0xff]  }
 0x569   :  { %8711 = vmatpush2.bf16.msra.mxu1 %v20652_v24  ;;  %v18738_v24 = vcombine.low %v8869_v62, %v8872_v16  ;;  %v8842_v62 = vld [vmem:[#allocation5 + $0x150] sm:$0xff] }
 0x56a   :  { %8712 = vmatprep.subr.bf16.mxu1 %v20660_v50  ;;  %v22121_v50 = vpop.f32.mrf.mxu1  ;;  %v20703_v16 = vld [vmem:[#allocation8 + $0xfa0] ss:$24 sps:$4 sm:$0xff]  }
 0x56b   :  { %8756 = vmatpush2.bf16.msra.mxu0 %v20655_v46  ;;  %v20696_v46 = vld [vmem:[#allocation8 + $0x1034] ss:$24 sps:$4 sm:$0xff]  }
 0x56c   :  { %8757 = vmatprep.subr.bf16.mxu0 %v20663_v51 }
 0x56d   :  { %8713 = vmatpush2.bf16.msra.mxu1 %v20658_v20  ;;  %v18733_v20 = vcombine.high %v8863_v35, %v8866_v38 }
 0x56e   :  { %8714 = vmatprep.subr.bf16.mxu1 %v20666_v63  ;;  %v8860_v63 = vld [vmem:[#allocation5 + $0x390] sm:$0xff] }
 0x56f   :  { %8758 = vmatpush2.bf16.msra.mxu0 %v20661_v18  ;;  %v22125_v18 = vld [vmem:[#allocation2 + $0x4] ss:$24 sps:$4 sm:$0xff]  }
 0x570   :  { %8759 = vmatprep.subr.bf16.mxu0 %v20669_v60 }
 0x571   :  { %8715 = vmatpush2.bf16.msra.mxu1 %v20664_v1  ;;  %v20694_v1 = vld [vmem:[#allocation8 + $0x1030] ss:$24 sps:$4 sm:$0xff]  }
 0x572   :  { %8716 = vmatprep.subr.bf16.mxu1 %v20672_v2  ;;  %v20699_v2 = vld [vmem:[#allocation8 + $0x1004] ss:$24 sps:$4 sm:$0xff]  }
 0x573   :  { %8760 = vmatpush2.bf16.msra.mxu0 %v20667_v12  ;;  %v18732_v12 = vcombine.low %v8863_v35, %v8866_v38  ;;  %v8836_v35 = vld [vmem:[#allocation5 + $0x90] sm:$0xff]  ;;  %v20706_v38 = vld [vmem:[#allocation8 + $0xf70] ss:$24 sps:$4 sm:$0xff]  }
 0x574   :  { %8761 = vmatprep.subr.bf16.mxu0 %v20675_v53  ;;  %v8474_v53 = vpop.f32.mrf.mxu1 }
 0x575   :  { %8717 = vmatpush2.bf16.msra.mxu1 %v20670_v61 }
 0x576   :  { %8718 = vmatprep.subr.bf16.mxu1 %v20678_v48 }
 0x577   :  { %8762 = vmatpush2.bf16.msra.mxu0 %v20673_v5 }
 0x578   :  { %8763 = vmatprep.subr.bf16.mxu0 %v20681_v9  ;;  %v8851_v9 = vld [vmem:[#allocation5 + $0x270] sm:$0xff] }
 0x579   :  { %8719 = vmatpush2.bf16.msra.mxu1 %v20676_v4  ;;  %v20697_v4 = vld [vmem:[#allocation8 + $0x1000] ss:$24 sps:$4 sm:$0xff]  }
 0x57a   :  { %8720 = vmatprep.subr.bf16.mxu1 %v20684_v8 }
 0x57b   :  { %8764 = vmatpush2.bf16.msra.mxu0 %v20679_v7  ;;  %v20702_v7 = vld [vmem:[#allocation8 + $0xfd4] ss:$24 sps:$4 sm:$0xff]  }
 0x57c   :  { %8765 = vmatprep.subr.bf16.mxu0 %v20687_v37  ;;  %v8845_v37 = vld [vmem:[#allocation5 + $0x1b0] sm:$0xff] }
 0x57d   :  { %8721 = vmatpush2.bf16.msra.mxu1 %v20682_v10 }
 0x57e   :  { %8722 = vmatprep.subr.bf16.mxu1 %v20690_v13  ;;  %v18715_v13 = vcombine.high %v8845_v37, %v8848_v56 }
 0x57f   :  { %8766 = vmatpush2.bf16.msra.mxu0 %v20685_v54  ;;  %v20705_v54 = vld [vmem:[#allocation8 + $0xfa4] ss:$24 sps:$4 sm:$0xff]  }
 0x580   :  { %10593 = vmatprep.subr.bf16.mxu0 %v18745_v27  ;;  %v8839_v27 = vld [vmem:[#allocation5 + $0xf0] sm:$0xff] }
 0x581   :  { %8723 = vmatpush2.bf16.msra.mxu1 %v20688_v19  ;;  %v18714_v19 = vcombine.low %v8845_v37, %v8848_v56  ;;  %v20720_v56 = vld [vmem:[#allocation8 + $0x11b4] ss:$24 sps:$4 sm:$0xff]  }
 0x582   :  { %8768 = vmatmul.mubr.bf16.vlgmr.msra.gmra.mxu0 %v22092_v59  ;;  %v22119_v41 = vpop.f32.mrf.mxu0  ;;  %8778 = vmatprep.subr.bf16.mxu1 %v20693_v25  ;;  %v8857_v59 = vld [vmem:[#allocation5 + $0x330] sm:$0xff]  ;;  %v18709_v25 = vcombine.high %v8839_v27, %v8842_v62 }
 0x583   :  { %10594 = vmatpush1.bf16.msra.mxu0 %v18744_v21  ;;  %10625 = vmatprep.mubr.bf16.mxu0 %v22125_v18  ;;  %v18727_v5 = vcombine.high %v8857_v59, %v8860_v63  ;;  %v20708_v21 = vld [vmem:[#allocation8 + $0xf74] ss:$24 sps:$4 sm:$0xff]  }
 0x584   :  { %v22123_v51 = vpop.f32.mrf.mxu0  ;;  %10595 = vmatprep.subr.bf16.mxu0 %v18739_v29  ;;  %8725 = vmatmul.mubr.bf16.vlgmr.msra.gmra.mxu1 %v22083_v55  ;;  %v8854_v55 = vld [vmem:[#allocation5 + $0x2d0] sm:$0xff] }
 0x585   :  { %8779 = vmatpush1.bf16.msra.mxu1 %v20691_v57  ;;  %8810 = vmatprep.mubr.bf16.mxu1 %v22102_v17  ;;  %v18726_v17 = vcombine.low %v8857_v59, %v8860_v63  ;;  %v18721_v8 = vcombine.high %v8851_v9, %v8854_v55  ;;  %v18720_v10 = vcombine.low %v8851_v9, %v8854_v55  ;;  %v8833_v29 = vld [vmem:[#allocation5 + $0x30] sm:$0xff] }
 0x586   :  { %v22130_v60 = vpop.f32.mrf.mxu0  ;;  %8780 = vmatprep.subr.bf16.mxu1 %v20696_v46  ;;  %v18708_v57 = vcombine.low %v8839_v27, %v8842_v62  ;;  %v18703_v46 = vcombine.high %v8833_v29, %v8836_v35  ;;  %v8926_v59 = vld [vmem:[#allocation5 + $0xbd0] sm:$0xff] }
 0x587   :  { %10596 = vmatpush1.bf16.msra.mxu0 %v18738_v24  ;;  %v20711_v24 = vld [vmem:[#allocation8 + $0xf44] ss:$24 sps:$4 sm:$0xff]   ;;  %v20709_v63 = vld [vmem:[#allocation8 + $0xf40] ss:$24 sps:$4 sm:$0xff]  }
 0x588   :  { %v8517_v61 = vpop.f32.mrf.mxu0  ;;  %10597 = vmatprep.subr.bf16.mxu0 %v18733_v20  ;;  %v8923_v20 = vld [vmem:[#allocation5 + $0xb70] sm:$0xff] }
 0x589   :  { %v22132_v48 = vadd.f32 %v8517_v61, %v8474_v53  ;;  %8781 = vmatpush1.bf16.msra.mxu1 %v20694_v1  ;;  %v18702_v1 = vcombine.low %v8833_v29, %v8836_v35  ;;  %v8917_v53 = vld [vmem:[#allocation5 + $0xab0] sm:$0xff]  ;;  %v18792_v9 = vcombine.low %v8923_v20, %v8926_v59  ;;  %v20726_v35 = vld [vmem:[#allocation8 + $0x1154] ss:$24 sps:$4 sm:$0xff]  }
 0x58a   :  { %8782 = vmatprep.subr.bf16.mxu1 %v20699_v2  ;;  %v18793_v2 = vcombine.high %v8923_v20, %v8926_v59  ;;  %v8920_v61 = vld [vmem:[#allocation5 + $0xb10] sm:$0xff] }
 0x58b   :  { %10598 = vmatpush1.bf16.msra.mxu0 %v18732_v12  ;;  %v20714_v12 = vld [vmem:[#allocation8 + $0xf14] ss:$24 sps:$4 sm:$0xff]   ;;  %v20717_v55 = vld [vmem:[#allocation8 + $0x11e4] ss:$24 sps:$4 sm:$0xff]   ;;  %v18786_v37 = vcombine.low %v8917_v53, %v8920_v61 }
 0x58c   :  { %10599 = vmatprep.subr.bf16.mxu0 %v18727_v5  ;;  %v20712_v5 = vld [vmem:[#allocation8 + $0xf10] ss:$24 sps:$4 sm:$0xff]   ;;  %v20723_v62 = vld [vmem:[#allocation8 + $0x1184] ss:$24 sps:$4 sm:$0xff]  }
 0x58d   :  { %8783 = vmatpush1.bf16.msra.mxu1 %v20697_v4  ;;  %v18787_v4 = vcombine.high %v8917_v53, %v8920_v61  ;;  %v20729_v59 = vld [vmem:[#allocation8 + $0x1124] ss:$24 sps:$4 sm:$0xff]   ;;  %v20732_v61 = vld [vmem:[#allocation8 + $0x10f4] ss:$24 sps:$4 sm:$0xff]  }
 0x58e   :  { %8784 = vmatprep.subr.bf16.mxu1 %v20702_v7  ;;  %v8914_v7 = vld [vmem:[#allocation5 + $0xa50] sm:$0xff] }
 0x58f   :  { %10600 = vmatpush1.bf16.msra.mxu0 %v18726_v17  ;;  %v8911_v17 = vld [vmem:[#allocation5 + $0x9f0] sm:$0xff] }
 0x590   :  { %10601 = vmatprep.subr.bf16.mxu0 %v18721_v8  ;;  %v20715_v8 = vld [vmem:[#allocation8 + $0x11e0] ss:$24 sps:$4 sm:$0xff]   ;;  %v18780_v27 = vcombine.low %v8911_v17, %v8914_v7 }
 0x591   :  { %8785 = vmatpush1.bf16.msra.mxu1 %v20700_v6  ;;  %v18781_v6 = vcombine.high %v8911_v17, %v8914_v7  ;;  %v20735_v7 = vld [vmem:[#allocation8 + $0x10c4] ss:$24 sps:$4 sm:$0xff]  }
 0x592   :  { %8786 = vmatprep.subr.bf16.mxu1 %v20705_v54  ;;  %v8908_v54 = vld [vmem:[#allocation5 + $0x990] sm:$0xff] }
 0x593   :  { %10602 = vmatpush1.bf16.msra.mxu0 %v18720_v10  ;;  %v8905_v10 = vld [vmem:[#allocation5 + $0x930] sm:$0xff] }
 0x594   :  { %10603 = vmatprep.subr.bf16.mxu0 %v18715_v13  ;;  %v20718_v13 = vld [vmem:[#allocation8 + $0x11b0] ss:$24 sps:$4 sm:$0xff]   ;;  %v18774_v29 = vcombine.low %v8905_v10, %v8908_v54 }
 0x595   :  { %8787 = vmatpush1.bf16.msra.mxu1 %v20703_v16  ;;  %v18775_v16 = vcombine.high %v8905_v10, %v8908_v54  ;;  %v20738_v54 = vld [vmem:[#allocation8 + $0x1094] ss:$24 sps:$4 sm:$0xff]  }
 0x596   :  { %8788 = vmatprep.subr.bf16.mxu1 %v20708_v21  ;;  %v8902_v21 = vld [vmem:[#allocation5 + $0x8d0] sm:$0xff] }
 0x597   :  { %10604 = vmatpush1.bf16.msra.mxu0 %v18714_v19  ;;  %v8899_v19 = vld [vmem:[#allocation5 + $0x870] sm:$0xff] }
 0x598   :  { %10605 = vmatprep.subr.bf16.mxu0 %v18709_v25  ;;  %v20721_v25 = vld [vmem:[#allocation8 + $0x1180] ss:$24 sps:$4 sm:$0xff]   ;;  %v18768_v20 = vcombine.low %v8899_v19, %v8902_v21 }
 0x599   :  { %8789 = vmatpush1.bf16.msra.mxu1 %v20706_v38  ;;  %v18769_v38 = vcombine.high %v8899_v19, %v8902_v21  ;;  %v9064_v19 = vld [vmem:[#allocation5 + $0x1d10] sm:$0xff]  ;;  %v22134_v21 = vld [vmem:[#allocation10] sm:$0x3f] }
 0x59a   :  { %8790 = vmatprep.subr.bf16.mxu1 %v20711_v24  ;;  %v8896_v24 = vld [vmem:[#allocation5 + $0x810] sm:$0xff] }
 0x59b   :  { %10606 = vmatpush1.bf16.msra.mxu0 %v18708_v57  ;;  %v8893_v57 = vld [vmem:[#allocation5 + $0x7b0] sm:$0xff] }
 0x59c   :  { %10607 = vmatprep.subr.bf16.mxu0 %v18703_v46  ;;  %v20724_v46 = vld [vmem:[#allocation8 + $0x1150] ss:$24 sps:$4 sm:$0xff]   ;;  %v18762_v53 = vcombine.low %v8893_v57, %v8896_v24 }
 0x59d   :  { %8791 = vmatpush1.bf16.msra.mxu1 %v20709_v63  ;;  %v18763_v63 = vcombine.high %v8893_v57, %v8896_v24  ;;  %v8965_v57 = vld [vmem:[#allocation5 + $0x10b0] sm:$0xff] }
 0x59e   :  { %8792 = vmatprep.subr.bf16.mxu1 %v20714_v12  ;;  %v8890_v12 = vld [vmem:[#allocation5 + $0x750] sm:$0xff] }
 0x59f   :  { %10608 = vmatpush1.bf16.msra.mxu0 %v18702_v1  ;;  %v8887_v1 = vld [vmem:[#allocation5 + $0x6f0] sm:$0xff] }
 0x5a0   :  { %10609 = vmatprep.subr.bf16.mxu0 %v18793_v2  ;;  %v20727_v2 = vld [vmem:[#allocation8 + $0x1120] ss:$24 sps:$4 sm:$0xff]   ;;  %v18756_v17 = vcombine.low %v8887_v1, %v8890_v12 }
 0x5a1   :  { %8793 = vmatpush1.bf16.msra.mxu1 %v20712_v5  ;;  %v18757_v5 = vcombine.high %v8887_v1, %v8890_v12  ;;  %v8968_v24 = vld [vmem:[#allocation5 + $0x1110] sm:$0xff]  ;;  %v22143_v12 = vrot.slane %v22134_v21, %v21960_v49 }
 0x5a2   :  { %8794 = vmatprep.subr.bf16.mxu1 %v20717_v55  ;;  %v8884_v55 = vld [vmem:[#allocation5 + $0x690] sm:$0xff] }
 0x5a3   :  { %10610 = vmatpush2.bf16.msra.mxu0 %v18792_v9  ;;  %v8881_v9 = vld [vmem:[#allocation5 + $0x630] sm:$0xff] }
 0x5a4   :  { %10611 = vmatprep.subr.bf16.mxu0 %v18787_v4  ;;  %v20730_v4 = vld [vmem:[#allocation8 + $0x10f0] ss:$24 sps:$4 sm:$0xff]   ;;  %v18750_v10 = vcombine.low %v8881_v9, %v8884_v55 }
 0x5a5   :  { %8795 = vmatpush2.bf16.msra.mxu1 %v20715_v8  ;;  %v18751_v8 = vcombine.high %v8881_v9, %v8884_v55  ;;  %v8959_v9 = vld [vmem:[#allocation5 + $0xff0] sm:$0xff] }
 0x5a6   :  { %8796 = vmatprep.subr.bf16.mxu1 %v20720_v56  ;;  %v9070_v56 = vld [vmem:[#allocation5 + $0x1dd0] sm:$0xff] }
 0x5a7   :  { %10612 = vmatpush2.bf16.msra.mxu0 %v18786_v37  ;;  %v9067_v37 = vld [vmem:[#allocation5 + $0x1d70] sm:$0xff] }
 0x5a8   :  { %10613 = vmatprep.subr.bf16.mxu0 %v18781_v6  ;;  %v20733_v6 = vld [vmem:[#allocation8 + $0x10c0] ss:$24 sps:$4 sm:$0xff]  }
 0x5a9   :  { %8797 = vmatpush2.bf16.msra.mxu1 %v20718_v13  ;;  %v18937_v13 = vcombine.high %v9067_v37, %v9070_v56  ;;  %v8962_v55 = vld [vmem:[#allocation5 + $0x1050] sm:$0xff] }
 0x5aa   :  { %8798 = vmatprep.subr.bf16.mxu1 %v20723_v62  ;;  %v8974_v62 = vld [vmem:[#allocation5 + $0x11d0] sm:$0xff] }
 0x5ab   :  { %10614 = vmatpush2.bf16.msra.mxu0 %v18780_v27  ;;  %v8971_v27 = vld [vmem:[#allocation5 + $0x1170] sm:$0xff] }
 0x5ac   :  { %10615 = vmatprep.subr.bf16.mxu0 %v18775_v16  ;;  %v9061_v16 = vld [vmem:[#allocation5 + $0x1cb0] sm:$0xff]  ;;  %v18840_v1 = vcombine.low %v8971_v27, %v8974_v62 }
 0x5ad   :  { %8799 = vmatpush2.bf16.msra.mxu1 %v20721_v25  ;;  %v20736_v25 = vld [vmem:[#allocation8 + $0x1090] ss:$24 sps:$4 sm:$0xff]  }
 0x5ae   :  { %8800 = vmatprep.subr.bf16.mxu1 %v20726_v35  ;;  %v18841_v35 = vcombine.high %v8971_v27, %v8974_v62  ;;  %v8953_v62 = vld [vmem:[#allocation5 + $0xf30] sm:$0xff] }
 0x5af   :  { %10616 = vmatpush2.bf16.msra.mxu0 %v18774_v29  ;;  %v18936_v29 = vcombine.low %v9067_v37, %v9070_v56  ;;  %v9052_v37 = vld [vmem:[#allocation5 + $0x1b90] sm:$0xff]  ;;  %v8514_v56 = vadd.f32 %v22123_v51, %v22116_v26 }
 0x5b0   :  { %10617 = vmatprep.subr.bf16.mxu0 %v18769_v38  ;;  %v18931_v38 = vcombine.high %v9061_v16, %v9064_v19 }
 0x5b1   :  { %8801 = vmatpush2.bf16.msra.mxu1 %v20724_v46  ;;  %v96_v46 = vrot.slane %v22134_v21, %v21957_v47 }
 0x5b2   :  { %8802 = vmatprep.subr.bf16.mxu1 %v20729_v59  ;;  %v9058_v59 = vld [vmem:[#allocation5 + $0x1c50] sm:$0xff] }
 0x5b3   :  { %10618 = vmatpush2.bf16.msra.mxu0 %v18768_v20  ;;  %v9055_v20 = vld [vmem:[#allocation5 + $0x1bf0] sm:$0xff] }
 0x5b4   :  { %10619 = vmatprep.subr.bf16.mxu0 %v18763_v63  ;;  %v22138_v63 = vld [vmem:[#allocation2] ss:$24 sps:$4 sm:$0xff]  }
 0x5b5   :  { %8803 = vmatpush2.bf16.msra.mxu1 %v20727_v2  ;;  %v18930_v2 = vcombine.low %v9061_v16, %v9064_v19  ;;  %v8956_v16 = vld [vmem:[#allocation5 + $0xf90] sm:$0xff] }
 0x5b6   :  { %8804 = vmatprep.subr.bf16.mxu1 %v20732_v61  ;;  %v8512_v61 = vadd.f32 %v22119_v41, %v22114_v15  ;;  %v18834_v15 = vcombine.low %v8965_v57, %v8968_v24  ;;  %v22154_v41 = vld [vmem:[#allocation2 + $0xc] ss:$24 sps:$4 sm:$0xff]  }
 0x5b7   :  { %10620 = vmatpush2.bf16.msra.mxu0 %v18762_v53  ;;  %v18835_v53 = vcombine.high %v8965_v57, %v8968_v24  ;;  %v18828_v57 = vcombine.low %v8959_v9, %v8962_v55 }
 0x5b8   :  { %10621 = vmatprep.subr.bf16.mxu0 %v18757_v5  ;;  %v18925_v5 = vcombine.high %v9055_v20, %v9058_v59 }
 0x5b9   :  { %8805 = vmatpush2.bf16.msra.mxu1 %v20730_v4  ;;  %v22147_v4 = vld [vmem:[#allocation2 + $0x14] ss:$24 sps:$4 sm:$0xff]  }
 0x5ba   :  { %8806 = vmatprep.subr.bf16.mxu1 %v20735_v7 }
 0x5bb   :  { %10622 = vmatpush2.bf16.msra.mxu0 %v18756_v17  ;;  %v4481_v17 = vadd.f32 %v22016_v52, %v96_v46  ;;  %v18924_v52 = vcombine.low %v9055_v20, %v9058_v59 }
 0x5bc   :  { %10623 = vmatprep.subr.bf16.mxu0 %v18751_v8  ;;  %v9049_v8 = vld [vmem:[#allocation5 + $0x1b30] sm:$0xff] }
 0x5bd   :  { %8807 = vmatpush2.bf16.msra.mxu1 %v20733_v6  ;;  %v18919_v51 = vcombine.high %v9049_v8, %v9052_v37 }
 0x5be   :  { %8808 = vmatprep.subr.bf16.mxu1 %v20738_v54 }
 0x5bf   :  { %10624 = vmatpush2.bf16.msra.mxu0 %v18750_v10  ;;  %v4482_v10 = vadd.f32 %v22018_v0, %v22143_v12  ;;  %v4487_v0 = vadd.f32 %v22020_v3, %v96_v46  ;;  %v9037_v3 = vld [vmem:[#allocation5 + $0x19b0] sm:$0xff] }
 0x5c0   :  { %10679 = vmatprep.subr.bf16.mxu0 %v18937_v13  ;;  %v8516_v13 = vadd.f32 %v22130_v60, %v22121_v50  ;;  %v18918_v50 = vcombine.low %v9049_v8, %v9052_v37  ;;  %v18823_v60 = vcombine.high %v8953_v62, %v8956_v16  ;;  %v9040_v46 = vld [vmem:[#allocation5 + $0x1a10] sm:$0xff] }
 0x5c1   :  { %8809 = vmatpush2.bf16.msra.mxu1 %v20736_v25  ;;  %v9043_v25 = vld [vmem:[#allocation5 + $0x1a70] sm:$0xff] }
 0x5c2   :  { %10626 = vmatmul.mubr.bf16.vlgmr.msra.gmra.mxu0 %v22138_v63  ;;  %10636 = vmatprep.subr.bf16.mxu1 %v18841_v35  ;;  %v9031_v8 = vld [vmem:[#allocation5 + $0x18f0] sm:$0xff] }
 0x5c3   :  { %10680 = vmatpush1.bf16.msra.mxu0 %v18936_v29  ;;  %10711 = vmatprep.mubr.bf16.mxu0 %v22147_v4  ;;  %v9046_v29 = vld [vmem:[#allocation5 + $0x1ad0] sm:$0xff] }
 0x5c4   :  { %10681 = vmatprep.subr.bf16.mxu0 %v18931_v38  ;;  %8811 = vmatmul.mubr.bf16.vlgmr.msra.gmra.mxu1 %v22104_v36  ;;  %v8554_v7 = vpop.f32.mrf.mxu1  ;;  %v18829_v36 = vcombine.high %v8959_v9, %v8962_v55  ;;  %v18907_v55 = vcombine.high %v9037_v3, %v9040_v46  ;;  %v9034_v37 = vld [vmem:[#allocation5 + $0x1950] sm:$0xff] }
 0x5c5   :  { %v8555_v6 = vadd.f32 %v8554_v7, %v8512_v61  ;;  %10637 = vmatpush1.bf16.msra.mxu1 %v18840_v1  ;;  %10668 = vmatprep.mubr.bf16.mxu1 %v22154_v41  ;;  %v18913_v1 = vcombine.high %v9043_v25, %v9046_v29  ;;  %v18822_v61 = vcombine.low %v8953_v62, %v8956_v16  ;;  %v8944_v7 = vld [vmem:[#allocation5 + $0xe10] sm:$0xff] }
 0x5c6   :  { %v8556_v54 = vpop.f32.mrf.mxu1  ;;  %10638 = vmatprep.subr.bf16.mxu1 %v18835_v53  ;;  %v8950_v53 = vld [vmem:[#allocation5 + $0xed0] sm:$0xff] }
 0x5c7   :  { %10682 = vmatpush1.bf16.msra.mxu0 %v18930_v2  ;;  %v22161_v27 = vadd.f32 %v8555_v6, %v4481_v17  ;;  %v8557_v26 = vadd.f32 %v8556_v54, %v8514_v56  ;;  %v8947_v2 = vld [vmem:[#allocation5 + $0xe70] sm:$0xff]  ;;  %v18906_v56 = vcombine.low %v9037_v3, %v9040_v46 }
 0x5c8   :  { %10683 = vmatprep.subr.bf16.mxu0 %v18925_v5  ;;  %v8558_v19 = vpop.f32.mrf.mxu1  ;;  %v18912_v5 = vcombine.low %v9043_v25, %v9046_v29  ;;  %v18817_v9 = vcombine.high %v8947_v2, %v8950_v53  ;;  %v8941_v17 = vld [vmem:[#allocation5 + $0xdb0] sm:$0xff] }
 0x5c9   :  { %v22164_v35 = vadd.f32 %v8557_v26, %v4482_v10  ;;  %v8559_v38 = vadd.f32 %v8558_v19, %v8516_v13  ;;  %10639 = vmatpush1.bf16.msra.mxu1 %v18834_v15  ;;  %v18811_v6 = vcombine.high %v8941_v17, %v8944_v7  ;;  %v18901_v15 = vcombine.high %v9031_v8, %v9034_v37  ;;  %v8935_v10 = vld [vmem:[#allocation5 + $0xcf0] sm:$0xff] }
 0x5ca   :  { %v8560_v24 = vpop.f32.mrf.mxu1  ;;  %10640 = vmatprep.subr.bf16.mxu1 %v18829_v36  ;;  %v8938_v54 = vld [vmem:[#allocation5 + $0xd50] sm:$0xff]  ;;  %v18810_v13 = vcombine.low %v8941_v17, %v8944_v7  ;;  %v18900_v26 = vcombine.low %v9031_v8, %v9034_v37 }
 0x5cb   :  { %10684 = vmatpush1.bf16.msra.mxu0 %v18924_v52  ;;  %v22166_v20 = vadd.f32 %v8559_v38, %v4487_v0  ;;  %v22169_v59 = vadd.f32 %v8560_v24, %v22132_v48  ;;  %v18816_v48 = vcombine.low %v8947_v2, %v8950_v53  ;;  %v9025_v52 = vld [vmem:[#allocation5 + $0x1830] sm:$0xff]  ;;  %v18804_v0 = vcombine.low %v8935_v10, %v8938_v54 }
 0x5cc   :  { %10685 = vmatprep.subr.bf16.mxu0 %v18919_v51  ;;  %v9028_v36 = vld [vmem:[#allocation5 + $0x1890] sm:$0xff]  ;;  %v18805_v51 = vcombine.high %v8935_v10, %v8938_v54 }
 0x5cd   :  { %10641 = vmatpush1.bf16.msra.mxu1 %v18828_v57  ;;  %v18895_v62 = vcombine.high %v9025_v52, %v9028_v36  ;;  %v8929_v16 = vld [vmem:[#allocation5 + $0xc30] sm:$0xff]  ;;  %v18894_v38 = vcombine.low %v9025_v52, %v9028_v36 }
 0x5ce   :  { %10642 = vmatprep.subr.bf16.mxu1 %v18823_v60  ;;  %v8932_v19 = vld [vmem:[#allocation5 + $0xc90] sm:$0xff] }
 0x5cf   :  { %10686 = vmatpush1.bf16.msra.mxu0 %v18918_v50  ;;  %v9115_v25 = vld [vmem:[#allocation5 + $0x2370] sm:$0xff]  ;;  %v18799_v57 = vcombine.high %v8929_v16, %v8932_v19  ;;  %v18798_v53 = vcombine.low %v8929_v16, %v8932_v19 }
 0x5d0   :  { %10687 = vmatprep.subr.bf16.mxu0 %v18913_v1  ;;  %v9118_v29 = vld [vmem:[#allocation5 + $0x23d0] sm:$0xff] }
 0x5d1   :  { %10643 = vmatpush1.bf16.msra.mxu1 %v18822_v61  ;;  %v18985_v24 = vcombine.high %v9115_v25, %v9118_v29  ;;  %v9019_v50 = vld [vmem:[#allocation5 + $0x1770] sm:$0xff]  ;;  %v18984_v3 = vcombine.low %v9115_v25, %v9118_v29 }
 0x5d2   :  { %10644 = vmatprep.subr.bf16.mxu1 %v18817_v9  ;;  %v9022_v60 = vld [vmem:[#allocation5 + $0x17d0] sm:$0xff] }
 0x5d3   :  { %10688 = vmatpush1.bf16.msra.mxu0 %v18912_v5  ;;  %v9109_v1 = vld [vmem:[#allocation5 + $0x22b0] sm:$0xff]  ;;  %v18889_v46 = vcombine.high %v9019_v50, %v9022_v60  ;;  %v18888_v7 = vcombine.low %v9019_v50, %v9022_v60 }
 0x5d4   :  { %10689 = vmatprep.subr.bf16.mxu0 %v18907_v55  ;;  %v9112_v2 = vld [vmem:[#allocation5 + $0x2310] sm:$0xff] }
 0x5d5   :  { %10645 = vmatpush1.bf16.msra.mxu1 %v18816_v48  ;;  %v18979_v61 = vcombine.high %v9109_v1, %v9112_v2  ;;  %v9013_v5 = vld [vmem:[#allocation5 + $0x16b0] sm:$0xff]  ;;  %v18978_v8 = vcombine.low %v9109_v1, %v9112_v2 }
 0x5d6   :  { %10646 = vmatprep.subr.bf16.mxu1 %v18811_v6  ;;  %v9016_v9 = vld [vmem:[#allocation5 + $0x1710] sm:$0xff] }
 0x5d7   :  { %10690 = vmatpush1.bf16.msra.mxu0 %v18906_v56  ;;  %v9103_v55 = vld [vmem:[#allocation5 + $0x21f0] sm:$0xff]  ;;  %v18883_v37 = vcombine.high %v9013_v5, %v9016_v9  ;;  %v18882_v54 = vcombine.low %v9013_v5, %v9016_v9 }
 0x5d8   :  { %10691 = vmatprep.subr.bf16.mxu0 %v18901_v15  ;;  %v9106_v17 = vld [vmem:[#allocation5 + $0x2250] sm:$0xff] }
 0x5d9   :  { %10647 = vmatpush1.bf16.msra.mxu1 %v18810_v13  ;;  %v18973_v48 = vcombine.high %v9103_v55, %v9106_v17  ;;  %v9007_v56 = vld [vmem:[#allocation5 + $0x15f0] sm:$0xff]  ;;  %v18972_v52 = vcombine.low %v9103_v55, %v9106_v17 }
 0x5da   :  { %10648 = vmatprep.subr.bf16.mxu1 %v18805_v51  ;;  %v9010_v6 = vld [vmem:[#allocation5 + $0x1650] sm:$0xff] }
 0x5db   :  { %10692 = vmatpush1.bf16.msra.mxu0 %v18900_v26  ;;  %v9097_v15 = vld [vmem:[#allocation5 + $0x2130] sm:$0xff]  ;;  %v18877_v36 = vcombine.high %v9007_v56, %v9010_v6  ;;  %v18876_v19 = vcombine.low %v9007_v56, %v9010_v6 }
 0x5dc   :  { %10693 = vmatprep.subr.bf16.mxu0 %v18895_v62  ;;  %v9100_v10 = vld [vmem:[#allocation5 + $0x2190] sm:$0xff] }
 0x5dd   :  { %10649 = vmatpush1.bf16.msra.mxu1 %v18804_v0  ;;  %v18967_v13 = vcombine.high %v9097_v15, %v9100_v10  ;;  %v9001_v26 = vld [vmem:[#allocation5 + $0x1530] sm:$0xff]  ;;  %v18966_v25 = vcombine.low %v9097_v15, %v9100_v10 }
 0x5de   :  { %10650 = vmatprep.subr.bf16.mxu1 %v18799_v57  ;;  %v9004_v51 = vld [vmem:[#allocation5 + $0x1590] sm:$0xff] }
 0x5df   :  { %10694 = vmatpush1.bf16.msra.mxu0 %v18894_v38  ;;  %v9091_v62 = vld [vmem:[#allocation5 + $0x2070] sm:$0xff]  ;;  %v18871_v29 = vcombine.high %v9001_v26, %v9004_v51  ;;  %v18870_v60 = vcombine.low %v9001_v26, %v9004_v51  ;;  %v8972_v51 = vld [vmem:[#allocation5 + $0x1178] sm:$0xff] }
 0x5e0   :  { %10695 = vmatprep.subr.bf16.mxu0 %v18985_v24  ;;  %v9094_v16 = vld [vmem:[#allocation5 + $0x20d0] sm:$0xff] }
 0x5e1   :  { %10651 = vmatpush1.bf16.msra.mxu1 %v18798_v53  ;;  %v18961_v0 = vcombine.high %v9091_v62, %v9094_v16  ;;  %v8995_v38 = vld [vmem:[#allocation5 + $0x1470] sm:$0xff]  ;;  %v18960_v1 = vcombine.low %v9091_v62, %v9094_v16  ;;  %v8975_v62 = vld [vmem:[#allocation5 + $0x11d8] sm:$0xff] }
 0x5e2   :  { %10652 = vmatprep.subr.bf16.mxu1 %v18889_v46  ;;  %v8998_v57 = vld [vmem:[#allocation5 + $0x14d0] sm:$0xff] }
 0x5e3   :  { %10696 = vmatpush2.bf16.msra.mxu0 %v18984_v3  ;;  %v9085_v24 = vld [vmem:[#allocation5 + $0x1fb0] sm:$0xff]  ;;  %v18865_v2 = vcombine.high %v8995_v38, %v8998_v57  ;;  %v18864_v9 = vcombine.low %v8995_v38, %v8998_v57  ;;  %v8876_v38 = vld [vmem:[#allocation5 + $0x578] sm:$0xff] }
 0x5e4   :  { %10697 = vmatprep.subr.bf16.mxu0 %v18979_v61  ;;  %v9088_v50 = vld [vmem:[#allocation5 + $0x2010] sm:$0xff]  ;;  %v8879_v57 = vld [vmem:[#allocation5 + $0x5d8] sm:$0xff] }
 0x5e5   :  { %10653 = vmatpush2.bf16.msra.mxu1 %v18888_v7  ;;  %v18955_v53 = vcombine.high %v9085_v24, %v9088_v50  ;;  %v8989_v3 = vld [vmem:[#allocation5 + $0x13b0] sm:$0xff]  ;;  %v18954_v55 = vcombine.low %v9085_v24, %v9088_v50  ;;  %v22171_v7 = vpop.f32.mrf.mxu0  ;;  %v8966_v24 = vld [vmem:[#allocation5 + $0x10b8] sm:$0xff] }
 0x5e6   :  { %10654 = vmatprep.subr.bf16.mxu1 %v18883_v37  ;;  %v8992_v46 = vld [vmem:[#allocation5 + $0x1410] sm:$0xff]  ;;  %v8969_v50 = vld [vmem:[#allocation5 + $0x1118] sm:$0xff] }
 0x5e7   :  { %10698 = vmatpush2.bf16.msra.mxu0 %v18978_v8  ;;  %v9079_v61 = vld [vmem:[#allocation5 + $0x1ef0] sm:$0xff]  ;;  %v18859_v17 = vcombine.high %v8989_v3, %v8992_v46  ;;  %v18858_v15 = vcombine.low %v8989_v3, %v8992_v46  ;;  %v18837_v3 = vcombine.high %v8966_v24, %v8969_v50  ;;  %v8870_v46 = vld [vmem:[#allocation5 + $0x4b8] sm:$0xff] }
 0x5e8   :  { %10699 = vmatprep.subr.bf16.mxu0 %v18973_v48  ;;  %v9082_v5 = vld [vmem:[#allocation5 + $0x1f50] sm:$0xff] }
 0x5e9   :  { %10655 = vmatpush2.bf16.msra.mxu1 %v18882_v54  ;;  %v18949_v8 = vcombine.high %v9079_v61, %v9082_v5  ;;  %v8983_v37 = vld [vmem:[#allocation5 + $0x12f0] sm:$0xff]  ;;  %v18948_v10 = vcombine.low %v9079_v61, %v9082_v5  ;;  %v8873_v61 = vld [vmem:[#allocation5 + $0x518] sm:$0xff] }
 0x5ea   :  { %10656 = vmatprep.subr.bf16.mxu1 %v18877_v36  ;;  %v8986_v48 = vld [vmem:[#allocation5 + $0x1350] sm:$0xff]  ;;  %v8960_v5 = vld [vmem:[#allocation5 + $0xff8] sm:$0xff] }
 0x5eb   :  { %10700 = vmatpush2.bf16.msra.mxu0 %v18972_v52  ;;  %v9073_v56 = vld [vmem:[#allocation5 + $0x1e30] sm:$0xff]  ;;  %v18853_v54 = vcombine.high %v8983_v37, %v8986_v48  ;;  %v22173_v52 = vpop.f32.mrf.mxu0  ;;  %v18852_v16 = vcombine.low %v8983_v37, %v8986_v48  ;;  %v18836_v37 = vcombine.low %v8966_v24, %v8969_v50  ;;  %v18741_v48 = vcombine.high %v8870_v46, %v8873_v61  ;;  %v8858_v50 = vld [vmem:[#allocation5 + $0x338] sm:$0xff] }
 0x5ec   :  { %10701 = vmatprep.subr.bf16.mxu0 %v18967_v13  ;;  %v9076_v6 = vld [vmem:[#allocation5 + $0x1e90] sm:$0xff] }
 0x5ed   :  { %10657 = vmatpush2.bf16.msra.mxu1 %v18876_v19  ;;  %v18943_v36 = vcombine.high %v9073_v56, %v9076_v6  ;;  %v8977_v13 = vld [vmem:[#allocation5 + $0x1230] sm:$0xff]  ;;  %v18942_v19 = vcombine.low %v9073_v56, %v9076_v6  ;;  %v104_v56 = vrot.slane %v22134_v21, %v21973_v28 }
 0x5ee   :  { %10658 = vmatprep.subr.bf16.mxu1 %v18871_v29  ;;  %v8980_v26 = vld [vmem:[#allocation5 + $0x1290] sm:$0xff]  ;;  %v22175_v29 = vpop.f32.mrf.mxu0 }
 0x5ef   :  { %10702 = vmatpush2.bf16.msra.mxu0 %v18966_v25  ;;  %v18847_v25 = vcombine.high %v8977_v13, %v8980_v26 }
 0x5f0   :  { %10703 = vmatprep.subr.bf16.mxu0 %v18961_v0  ;;  %v18843_v0 = vcombine.high %v8972_v51, %v8975_v62 }
 0x5f1   :  { %10659 = vmatpush2.bf16.msra.mxu1 %v18870_v60  ;;  %v18846_v60 = vcombine.low %v8977_v13, %v8980_v26  ;;  %v22189_v26 = vld [vmem:[#allocation2 + $0x8] ss:$24 sps:$4 sm:$0xff]  }
 0x5f2   :  { %10660 = vmatprep.subr.bf16.mxu1 %v18865_v2  ;;  %v18747_v2 = vcombine.high %v8876_v38, %v8879_v57 }
 0x5f3   :  { %10704 = vmatpush2.bf16.msra.mxu0 %v18960_v1  ;;  %v18842_v1 = vcombine.low %v8972_v51, %v8975_v62  ;;  %v8954_v51 = vld [vmem:[#allocation5 + $0xf38] sm:$0xff] }
 0x5f4   :  { %10705 = vmatprep.subr.bf16.mxu0 %v18955_v53  ;;  %v22177_v53 = vpop.f32.mrf.mxu0  ;;  %v8957_v62 = vld [vmem:[#allocation5 + $0xf98] sm:$0xff] }
 0x5f5   :  { %10661 = vmatpush2.bf16.msra.mxu1 %v18864_v9  ;;  %v8963_v9 = vld [vmem:[#allocation5 + $0x1058] sm:$0xff]  ;;  %v18825_v24 = vcombine.high %v8954_v51, %v8957_v62 }
 0x5f6   :  { %10662 = vmatprep.subr.bf16.mxu1 %v18859_v17  ;;  %v22179_v17 = vld [vmem:[#allocation2 + $0x10] ss:$24 sps:$4 sm:$0xff]   ;;  %v18831_v6 = vcombine.high %v8960_v5, %v8963_v9 }
 0x5f7   :  { %10706 = vmatpush2.bf16.msra.mxu0 %v18954_v55 }
 0x5f8   :  { %10707 = vmatprep.subr.bf16.mxu0 %v18949_v8  ;;  %v18746_v8 = vcombine.low %v8876_v38, %v8879_v57 }
 0x5f9   :  { %10663 = vmatpush2.bf16.msra.mxu1 %v18858_v15  ;;  %v8864_v15 = vld [vmem:[#allocation5 + $0x3f8] sm:$0xff] }
 0x5fa   :  { %10664 = vmatprep.subr.bf16.mxu1 %v18853_v54  ;;  %v22187_v54 = vrot.slane %v22134_v21, %v21976_v31 }
 0x5fb   :  { %10708 = vmatpush2.bf16.msra.mxu0 %v18948_v10  ;;  %v8867_v10 = vld [vmem:[#allocation5 + $0x458] sm:$0xff] }
 0x5fc   :  { %10709 = vmatprep.subr.bf16.mxu0 %v18943_v36  ;;  %v18735_v21 = vcombine.high %v8864_v15, %v8867_v10 }
 0x5fd   :  { %10665 = vmatpush2.bf16.msra.mxu1 %v18852_v16 }
 0x5fe   :  { %10666 = vmatprep.subr.bf16.mxu1 %v18847_v25 }
 0x5ff   :  { %10710 = vmatpush2.bf16.msra.mxu0 %v18942_v19  ;;  %v18740_v19 = vcombine.low %v8870_v46, %v8873_v61 }
 0x600   :  { %10765 = vmatprep.subr.bf16.mxu0 %v18843_v0  ;;  %v4483_v0 = vadd.f32 %v22028_v40, %v104_v56  ;;  %v18734_v40 = vcombine.low %v8864_v15, %v8867_v10 }
 0x601   :  { %10667 = vmatpush2.bf16.msra.mxu1 %v18846_v60  ;;  %v8861_v60 = vld [vmem:[#allocation5 + $0x398] sm:$0xff] }
 0x602   :  { %v8683_v55 = vpop.f32.mrf.mxu0  ;;  %10712 = vmatmul.mubr.bf16.vlgmr.msra.gmra.mxu0 %v22179_v17  ;;  %10722 = vmatprep.subr.bf16.mxu1 %v18747_v2 }
 0x603   :  { %10766 = vmatpush1.bf16.msra.mxu0 %v18842_v1  ;;  %10797 = vmatprep.mubr.bf16.mxu0 %v22154_v41  ;;  %v18830_v41 = vcombine.low %v8960_v5, %v8963_v9 }
 0x604   :  { %10767 = vmatprep.subr.bf16.mxu0 %v18837_v3  ;;  %v8640_v36 = vpop.f32.mrf.mxu1  ;;  %v8685_v13 = vpop.f32.mrf.mxu0  ;;  %10669 = vmatmul.mubr.bf16.vlgmr.msra.gmra.mxu1 %v22189_v26  ;;  %v8951_v3 = vld [vmem:[#allocation5 + $0xed8] sm:$0xff] }
 0x605   :  { %v8641_v16 = vadd.f32 %v8640_v36, %v22171_v7  ;;  %10723 = vmatpush1.bf16.msra.mxu1 %v18746_v8  ;;  %10754 = vmatprep.mubr.bf16.mxu1 %v22125_v18  ;;  %v4484_v7 = vadd.f32 %v22030_v22, %v22187_v54  ;;  %v8948_v18 = vld [vmem:[#allocation5 + $0xe78] sm:$0xff]  ;;  %v18729_v8 = vcombine.high %v8858_v50, %v8861_v60 }
 0x606   :  { %v8642_v25 = vpop.f32.mrf.mxu1  ;;  %10724 = vmatprep.subr.bf16.mxu1 %v18741_v48  ;;  %v8687_v1 = vpop.f32.mrf.mxu0  ;;  %v8852_v36 = vld [vmem:[#allocation5 + $0x278] sm:$0xff]  ;;  %v18818_v10 = vcombine.low %v8948_v18, %v8951_v3 }
 0x607   :  { %10768 = vmatpush1.bf16.msra.mxu0 %v18836_v37  ;;  %v8684_v38 = vadd.f32 %v8683_v55, %v8641_v16  ;;  %v8643_v57 = vadd.f32 %v8642_v25, %v22173_v52  ;;  %v4489_v52 = vadd.f32 %v22032_v58, %v104_v56  ;;  %v18824_v55 = vcombine.low %v8954_v51, %v8957_v62  ;;  %v8849_v25 = vld [vmem:[#allocation5 + $0x218] sm:$0xff] }
 0x608   :  { %10769 = vmatprep.subr.bf16.mxu0 %v18831_v6  ;;  %v8644_v2 = vpop.f32.mrf.mxu1  ;;  %v18819_v6 = vcombine.high %v8948_v18, %v8951_v3  ;;  %v8689_v16 = vpop.f32.mrf.mxu0  ;;  %v18728_v56 = vcombine.low %v8858_v50, %v8861_v60  ;;  %v8843_v50 = vld [vmem:[#allocation5 + $0x158] sm:$0xff] }
 0x609   :  { %v22198_v46 = vadd.f32 %v8684_v38, %v4483_v0  ;;  %v8686_v61 = vadd.f32 %v8685_v13, %v8643_v57  ;;  %v8645_v5 = vadd.f32 %v8644_v2, %v22175_v29  ;;  %10725 = vmatpush1.bf16.msra.mxu1 %v18740_v19  ;;  %v8855_v13 = vld [vmem:[#allocation5 + $0x2d8] sm:$0xff] }
 0x60a   :  { %v8646_v9 = vpop.f32.mrf.mxu1  ;;  %10726 = vmatprep.subr.bf16.mxu1 %v18735_v21  ;;  %v8942_v29 = vld [vmem:[#allocation5 + $0xdb8] sm:$0xff]  ;;  %v18723_v51 = vcombine.high %v8852_v36, %v8855_v13  ;;  %v18722_v0 = vcombine.low %v8852_v36, %v8855_v13 }
 0x60b   :  { %10770 = vmatpush1.bf16.msra.mxu0 %v18830_v41  ;;  %v22202_v37 = vadd.f32 %v8686_v61, %v4484_v7  ;;  %v8688_v22 = vadd.f32 %v8687_v1, %v8645_v5  ;;  %v8647_v48 = vadd.f32 %v8646_v9, %v22177_v53  ;;  %v8945_v19 = vld [vmem:[#allocation5 + $0xe18] sm:$0xff] }
 0x60c   :  { %10771 = vmatprep.subr.bf16.mxu0 %v18825_v24  ;;  %v18813_v62 = vcombine.high %v8942_v29, %v8945_v19  ;;  %v8846_v53 = vld [vmem:[#allocation5 + $0x1b8] sm:$0xff]  ;;  %v18812_v38 = vcombine.low %v8942_v29, %v8945_v19 }
 0x60d   :  { %v22205_v15 = vadd.f32 %v8688_v22, %v4489_v52  ;;  %v22207_v58 = vadd.f32 %v8689_v16, %v8647_v48  ;;  %10727 = vmatpush1.bf16.msra.mxu1 %v18734_v40  ;;  %v8936_v41 = vld [vmem:[#allocation5 + $0xcf8] sm:$0xff]  ;;  %v18717_v57 = vcombine.high %v8846_v53, %v8849_v25  ;;  %v18716_v2 = vcombine.low %v8846_v53, %v8849_v25 }
 0x60e   :  { %10728 = vmatprep.subr.bf16.mxu1 %v18729_v8  ;;  %v8939_v21 = vld [vmem:[#allocation5 + $0xd58] sm:$0xff] }
 0x60f   :  { %10772 = vmatpush1.bf16.msra.mxu0 %v18824_v55  ;;  %v18807_v24 = vcombine.high %v8936_v41, %v8939_v21  ;;  %v8840_v7 = vld [vmem:[#allocation5 + $0xf8] sm:$0xff]  ;;  %v18806_v18 = vcombine.low %v8936_v41, %v8939_v21 }
 0x610   :  { %10773 = vmatprep.subr.bf16.mxu0 %v18819_v6  ;;  %v8930_v60 = vld [vmem:[#allocation5 + $0xc38] sm:$0xff]  ;;  %v18711_v3 = vcombine.high %v8840_v7, %v8843_v50  ;;  %v18710_v55 = vcombine.low %v8840_v7, %v8843_v50 }
 0x611   :  { %10729 = vmatpush1.bf16.msra.mxu1 %v18728_v56  ;;  %v8933_v1 = vld [vmem:[#allocation5 + $0xc98] sm:$0xff] }
 0x612   :  { %10730 = vmatprep.subr.bf16.mxu1 %v18723_v51  ;;  %v18801_v61 = vcombine.high %v8930_v60, %v8933_v1  ;;  %v8834_v5 = vld [vmem:[#allocation5 + $0x38] sm:$0xff]  ;;  %v18800_v8 = vcombine.low %v8930_v60, %v8933_v1 }
 0x613   :  { %10774 = vmatpush1.bf16.msra.mxu0 %v18818_v10  ;;  %v8837_v40 = vld [vmem:[#allocation5 + $0x98] sm:$0xff] }
 0x614   :  { %10775 = vmatprep.subr.bf16.mxu0 %v18813_v62  ;;  %v9020_v52 = vld [vmem:[#allocation5 + $0x1778] sm:$0xff]  ;;  %v18705_v22 = vcombine.high %v8834_v5, %v8837_v40  ;;  %v18704_v29 = vcombine.low %v8834_v5, %v8837_v40 }
 0x615   :  { %10731 = vmatpush1.bf16.msra.mxu1 %v18722_v0  ;;  %v9023_v9 = vld [vmem:[#allocation5 + $0x17d8] sm:$0xff] }
 0x616   :  { %10732 = vmatprep.subr.bf16.mxu1 %v18717_v57  ;;  %v18891_v48 = vcombine.high %v9020_v52, %v9023_v9  ;;  %v8924_v6 = vld [vmem:[#allocation5 + $0xb78] sm:$0xff]  ;;  %v18890_v19 = vcombine.low %v9020_v52, %v9023_v9 }
 0x617   :  { %10776 = vmatpush1.bf16.msra.mxu0 %v18812_v38  ;;  %v8927_v36 = vld [vmem:[#allocation5 + $0xbd8] sm:$0xff] }
 0x618   :  { %10777 = vmatprep.subr.bf16.mxu0 %v18807_v24  ;;  %v9014_v13 = vld [vmem:[#allocation5 + $0x16b8] sm:$0xff]  ;;  %v18795_v56 = vcombine.high %v8924_v6, %v8927_v36  ;;  %v18794_v41 = vcombine.low %v8924_v6, %v8927_v36 }
 0x619   :  { %10733 = vmatpush1.bf16.msra.mxu1 %v18716_v2  ;;  %v9017_v16 = vld [vmem:[#allocation5 + $0x1718] sm:$0xff] }
 0x61a   :  { %10734 = vmatprep.subr.bf16.mxu1 %v18711_v3  ;;  %v18885_v10 = vcombine.high %v9014_v13, %v9017_v16  ;;  %v8918_v51 = vld [vmem:[#allocation5 + $0xab8] sm:$0xff]  ;;  %v18884_v21 = vcombine.low %v9014_v13, %v9017_v16 }
 0x61b   :  { %10778 = vmatpush1.bf16.msra.mxu0 %v18806_v18  ;;  %v8921_v62 = vld [vmem:[#allocation5 + $0xb18] sm:$0xff] }
 0x61c   :  { %10779 = vmatprep.subr.bf16.mxu0 %v18801_v61  ;;  %v9008_v53 = vld [vmem:[#allocation5 + $0x15f8] sm:$0xff]  ;;  %v18789_v0 = vcombine.high %v8918_v51, %v8921_v62  ;;  %v18788_v60 = vcombine.low %v8918_v51, %v8921_v62 }
 0x61d   :  { %10735 = vmatpush1.bf16.msra.mxu1 %v18710_v55  ;;  %v9011_v25 = vld [vmem:[#allocation5 + $0x1658] sm:$0xff] }
 0x61e   :  { %10736 = vmatprep.subr.bf16.mxu1 %v18705_v22  ;;  %v18879_v38 = vcombine.high %v9008_v53, %v9011_v25  ;;  %v8912_v57 = vld [vmem:[#allocation5 + $0x9f8] sm:$0xff]  ;;  %v18878_v1 = vcombine.low %v9008_v53, %v9011_v25 }
 0x61f   :  { %10780 = vmatpush1.bf16.msra.mxu0 %v18800_v8  ;;  %v8915_v24 = vld [vmem:[#allocation5 + $0xa58] sm:$0xff] }
 0x620   :  { %10781 = vmatprep.subr.bf16.mxu0 %v18891_v48  ;;  %v9002_v7 = vld [vmem:[#allocation5 + $0x1538] sm:$0xff]  ;;  %v18783_v2 = vcombine.high %v8912_v57, %v8915_v24  ;;  %v18782_v52 = vcombine.low %v8912_v57, %v8915_v24 }
 0x621   :  { %10737 = vmatpush1.bf16.msra.mxu1 %v18704_v29  ;;  %v9005_v50 = vld [vmem:[#allocation5 + $0x1598] sm:$0xff] }
 0x622   :  { %10738 = vmatprep.subr.bf16.mxu1 %v18795_v56  ;;  %v18873_v18 = vcombine.high %v9002_v7, %v9005_v50  ;;  %v8906_v3 = vld [vmem:[#allocation5 + $0x938] sm:$0xff]  ;;  %v18872_v9 = vcombine.low %v9002_v7, %v9005_v50 }
 0x623   :  { %10782 = vmatpush2.bf16.msra.mxu0 %v18890_v19  ;;  %v8909_v61 = vld [vmem:[#allocation5 + $0x998] sm:$0xff] }
 0x624   :  { %10783 = vmatprep.subr.bf16.mxu0 %v18885_v10  ;;  %v8996_v5 = vld [vmem:[#allocation5 + $0x1478] sm:$0xff]  ;;  %v18777_v55 = vcombine.high %v8906_v3, %v8909_v61  ;;  %v18776_v13 = vcombine.low %v8906_v3, %v8909_v61  ;;  %v8877_v3 = vld [vmem:[#allocation5 + $0x580] sm:$0xff] }
 0x625   :  { %10739 = vmatpush2.bf16.msra.mxu1 %v18794_v41  ;;  %v8999_v40 = vld [vmem:[#allocation5 + $0x14d8] sm:$0xff]  ;;  %v8880_v61 = vld [vmem:[#allocation5 + $0x5e0] sm:$0xff] }
 0x626   :  { %10740 = vmatprep.subr.bf16.mxu1 %v18789_v0  ;;  %v18867_v8 = vcombine.high %v8996_v5, %v8999_v40  ;;  %v8900_v22 = vld [vmem:[#allocation5 + $0x878] sm:$0xff]  ;;  %v18866_v16 = vcombine.low %v8996_v5, %v8999_v40 }
 0x627   :  { %10784 = vmatpush2.bf16.msra.mxu0 %v18884_v21  ;;  %v8903_v48 = vld [vmem:[#allocation5 + $0x8d8] sm:$0xff] }
 0x628   :  { %10785 = vmatprep.subr.bf16.mxu0 %v18879_v38  ;;  %v8990_v6 = vld [vmem:[#allocation5 + $0x13b8] sm:$0xff]  ;;  %v18771_v29 = vcombine.high %v8900_v22, %v8903_v48  ;;  %v18770_v53 = vcombine.low %v8900_v22, %v8903_v48  ;;  %v8871_v22 = vld [vmem:[#allocation5 + $0x4c0] sm:$0xff] }
 0x629   :  { %10741 = vmatpush2.bf16.msra.mxu1 %v18788_v60  ;;  %v8993_v36 = vld [vmem:[#allocation5 + $0x1418] sm:$0xff]  ;;  %v8874_v48 = vld [vmem:[#allocation5 + $0x520] sm:$0xff] }
 0x62a   :  { %10742 = vmatprep.subr.bf16.mxu1 %v18783_v2  ;;  %v18861_v19 = vcombine.high %v8990_v6, %v8993_v36  ;;  %v8894_v56 = vld [vmem:[#allocation5 + $0x7b8] sm:$0xff]  ;;  %v18860_v25 = vcombine.low %v8990_v6, %v8993_v36  ;;  %v18748_v36 = vcombine.low %v8877_v3, %v8880_v61 }
 0x62b   :  { %10786 = vmatpush2.bf16.msra.mxu0 %v18878_v1  ;;  %v8897_v10 = vld [vmem:[#allocation5 + $0x818] sm:$0xff] }
 0x62c   :  { %10787 = vmatprep.subr.bf16.mxu0 %v18873_v18  ;;  %v8984_v51 = vld [vmem:[#allocation5 + $0x12f8] sm:$0xff]  ;;  %v18765_v41 = vcombine.high %v8894_v56, %v8897_v10  ;;  %v18764_v7 = vcombine.low %v8894_v56, %v8897_v10  ;;  %v8865_v56 = vld [vmem:[#allocation5 + $0x400] sm:$0xff] }
 0x62d   :  { %10743 = vmatpush2.bf16.msra.mxu1 %v18782_v52  ;;  %v8987_v62 = vld [vmem:[#allocation5 + $0x1358] sm:$0xff]  ;;  %v8868_v10 = vld [vmem:[#allocation5 + $0x460] sm:$0xff] }
 0x62e   :  { %10744 = vmatprep.subr.bf16.mxu1 %v18777_v55  ;;  %v18855_v21 = vcombine.high %v8984_v51, %v8987_v62  ;;  %v8888_v0 = vld [vmem:[#allocation5 + $0x6f8] sm:$0xff]  ;;  %v18854_v50 = vcombine.low %v8984_v51, %v8987_v62 }
 0x62f   :  { %10788 = vmatpush2.bf16.msra.mxu0 %v18872_v9  ;;  %v8891_v38 = vld [vmem:[#allocation5 + $0x758] sm:$0xff]  ;;  %v18749_v9 = vcombine.high %v8877_v3, %v8880_v61 }
 0x630   :  { %10789 = vmatprep.subr.bf16.mxu0 %v18867_v8  ;;  %v8978_v57 = vld [vmem:[#allocation5 + $0x1238] sm:$0xff]  ;;  %v18759_v60 = vcombine.high %v8888_v0, %v8891_v38  ;;  %v18758_v5 = vcombine.low %v8888_v0, %v8891_v38 }
 0x631   :  { %10745 = vmatpush2.bf16.msra.mxu1 %v18776_v13  ;;  %v8981_v24 = vld [vmem:[#allocation5 + $0x1298] sm:$0xff] }
 0x632   :  { %10746 = vmatprep.subr.bf16.mxu1 %v18771_v29  ;;  %v18849_v1 = vcombine.high %v8978_v57, %v8981_v24  ;;  %v8882_v2 = vld [vmem:[#allocation5 + $0x638] sm:$0xff]  ;;  %v18848_v40 = vcombine.low %v8978_v57, %v8981_v24  ;;  %v21724_v57 = vld [vmem:[#allocation2 + $0x4] ss:$24 sps:$4 sm:$0xff]  }
 0x633   :  { %10790 = vmatpush2.bf16.msra.mxu0 %v18866_v16  ;;  %v8885_v18 = vld [vmem:[#allocation5 + $0x698] sm:$0xff]  ;;  %v18743_v16 = vcombine.high %v8871_v22, %v8874_v48 }
 0x634   :  { %10791 = vmatprep.subr.bf16.mxu0 %v18861_v19  ;;  %v18753_v52 = vcombine.high %v8882_v2, %v8885_v18  ;;  %v9068_v55 = vld [vmem:[#allocation5 + $0x1d78] sm:$0xff]  ;;  %v18752_v6 = vcombine.low %v8882_v2, %v8885_v18  ;;  %v18736_v18 = vcombine.low %v8865_v56, %v8868_v10 }
 0x635   :  { %10747 = vmatpush2.bf16.msra.mxu1 %v18770_v53  ;;  %v9071_v8 = vld [vmem:[#allocation5 + $0x1dd8] sm:$0xff]  ;;  %v18742_v53 = vcombine.low %v8871_v22, %v8874_v48 }
 0x636   :  { %10748 = vmatprep.subr.bf16.mxu1 %v18765_v41  ;;  %v18939_v13 = vcombine.high %v9068_v55, %v9071_v8  ;;  %v9062_v29 = vld [vmem:[#allocation5 + $0x1cb8] sm:$0xff]  ;;  %v18938_v62 = vcombine.low %v9068_v55, %v9071_v8  ;;  %v8856_v55 = vld [vmem:[#allocation5 + $0x2e0] sm:$0xff] }
 0x637   :  { %10792 = vmatpush2.bf16.msra.mxu0 %v18860_v25  ;;  %v9065_v19 = vld [vmem:[#allocation5 + $0x1d18] sm:$0xff] }
 0x638   :  { %10793 = vmatprep.subr.bf16.mxu0 %v18855_v21  ;;  %v18933_v25 = vcombine.high %v9062_v29, %v9065_v19  ;;  %v18737_v21 = vcombine.high %v8865_v56, %v8868_v10  ;;  %v9056_v0 = vld [vmem:[#allocation5 + $0x1bf8] sm:$0xff]  ;;  %v8847_v56 = vld [vmem:[#allocation5 + $0x1c0] sm:$0xff] }
 0x639   :  { %10749 = vmatpush2.bf16.msra.mxu1 %v18764_v7  ;;  %v9059_v38 = vld [vmem:[#allocation5 + $0x1c58] sm:$0xff]  ;;  %v8859_v7 = vld [vmem:[#allocation5 + $0x340] sm:$0xff] }
 0x63a   :  { %10750 = vmatprep.subr.bf16.mxu1 %v18759_v60  ;;  %v18927_v3 = vcombine.high %v9056_v0, %v9059_v38  ;;  %v18926_v22 = vcombine.low %v9056_v0, %v9059_v38  ;;  %v8850_v10 = vld [vmem:[#allocation5 + $0x220] sm:$0xff] }
 0x63b   :  { %10794 = vmatpush2.bf16.msra.mxu0 %v18854_v50  ;;  %v8862_v50 = vld [vmem:[#allocation5 + $0x3a0] sm:$0xff] }
 0x63c   :  { %10795 = vmatprep.subr.bf16.mxu0 %v18849_v1  ;;  %v8841_v0 = vld [vmem:[#allocation5 + $0x100] sm:$0xff] }
 0x63d   :  { %10751 = vmatpush2.bf16.msra.mxu1 %v18758_v5  ;;  %v18731_v5 = vcombine.high %v8859_v7, %v8862_v50  ;;  %v8844_v38 = vld [vmem:[#allocation5 + $0x160] sm:$0xff] }
 0x63e   :  { %10752 = vmatprep.subr.bf16.mxu1 %v18753_v52 }
 0x63f   :  { %10796 = vmatpush2.bf16.msra.mxu0 %v18848_v40  ;;  %v9050_v40 = vld [vmem:[#allocation5 + $0x1b38] sm:$0xff] }
 0x640   :  { %10851 = vmatprep.subr.bf16.mxu0 %v18749_v9  ;;  %v8853_v9 = vld [vmem:[#allocation5 + $0x280] sm:$0xff] }
 0x641   :  { %10753 = vmatpush2.bf16.msra.mxu1 %v18752_v6  ;;  %v18730_v6 = vcombine.low %v8859_v7, %v8862_v50  ;;  %v18713_v50 = vcombine.high %v8841_v0, %v8844_v38 }
 0x642   :  { %v8769_v51 = vpop.f32.mrf.mxu0  ;;  %10798 = vmatmul.mubr.bf16.vlgmr.msra.gmra.mxu0 %v22189_v26  ;;  %10808 = vmatprep.subr.bf16.mxu1 %v18939_v13  ;;  %v18932_v26 = vcombine.low %v9062_v29, %v9065_v19  ;;  %v9044_v29 = vld [vmem:[#allocation5 + $0x1a78] sm:$0xff] }
 0x643   :  { %10852 = vmatpush1.bf16.msra.mxu0 %v18748_v36  ;;  %10883 = vmatprep.mubr.bf16.mxu0 %v21724_v57  ;;  %v9047_v19 = vld [vmem:[#allocation5 + $0x1ad8] sm:$0xff] }
 0x644   :  { %v8771_v41 = vpop.f32.mrf.mxu0  ;;  %10853 = vmatprep.subr.bf16.mxu0 %v18743_v16  ;;  %v8726_v24 = vpop.f32.mrf.mxu1  ;;  %10755 = vmatmul.mubr.bf16.vlgmr.msra.gmra.mxu1 %v22138_v63  ;;  %v9053_v63 = vld [vmem:[#allocation5 + $0x1b98] sm:$0xff]  ;;  %v18725_v16 = vcombine.high %v8853_v9, %v8856_v55  ;;  %v18914_v57 = vcombine.low %v9044_v29, %v9047_v19 }
 0x645   :  { %v22211_v60 = vadd.f32 %v8769_v51, %v8726_v24  ;;  %10809 = vmatpush1.bf16.msra.mxu1 %v18938_v62  ;;  %10840 = vmatprep.mubr.bf16.mxu1 %v22147_v4  ;;  %v18921_v36 = vcombine.high %v9050_v40, %v9053_v63  ;;  %v18920_v51 = vcombine.low %v9050_v40, %v9053_v63 }
 0x646   :  { %v8728_v1 = vpop.f32.mrf.mxu1  ;;  %v8773_v2 = vpop.f32.mrf.mxu0  ;;  %10810 = vmatprep.subr.bf16.mxu1 %v18933_v25  ;;  %v18724_v62 = vcombine.low %v8853_v9, %v8856_v55  ;;  %v18719_v25 = vcombine.high %v8847_v56, %v8850_v10  ;;  %v18718_v24 = vcombine.low %v8847_v56, %v8850_v10  ;;  %v9029_v9 = vld [vmem:[#allocation5 + $0x1898] sm:$0xff]  ;;  %v8925_v55 = vld [vmem:[#allocation5 + $0xb80] sm:$0xff] }
 0x647   :  { %10854 = vmatpush1.bf16.msra.mxu0 %v18742_v53  ;;  %v22214_v61 = vadd.f32 %v8771_v41, %v8728_v1  ;;  %v18915_v53 = vcombine.high %v9044_v29, %v9047_v19  ;;  %v9038_v41 = vld [vmem:[#allocation5 + $0x19b8] sm:$0xff]  ;;  %v8919_v19 = vld [vmem:[#allocation5 + $0xac0] sm:$0xff] }
 0x648   :  { %10855 = vmatprep.subr.bf16.mxu0 %v18737_v21  ;;  %v8730_v52 = vpop.f32.mrf.mxu1  ;;  %v8775_v4 = vpop.f32.mrf.mxu0  ;;  %v9041_v21 = vld [vmem:[#allocation5 + $0x1a18] sm:$0xff]  ;;  %v8922_v56 = vld [vmem:[#allocation5 + $0xb20] sm:$0xff] }
 0x649   :  { %v22216_v8 = vadd.f32 %v8773_v2, %v8730_v52  ;;  %10811 = vmatpush1.bf16.msra.mxu1 %v18932_v26  ;;  %v18909_v7 = vcombine.high %v9038_v41, %v9041_v21  ;;  %v9032_v26 = vld [vmem:[#allocation5 + $0x18f8] sm:$0xff]  ;;  %v8835_v2 = vld [vmem:[#allocation5 + $0x40] sm:$0xff] }
 0x64a   :  { %v8732_v48 = vpop.f32.mrf.mxu1  ;;  %10812 = vmatprep.subr.bf16.mxu1 %v18927_v3  ;;  %v9035_v1 = vld [vmem:[#allocation5 + $0x1958] sm:$0xff]  ;;  %v18908_v3 = vcombine.low %v9038_v41, %v9041_v21  ;;  %v8913_v21 = vld [vmem:[#allocation5 + $0xa00] sm:$0xff] }
 0x64b   :  { %10856 = vmatpush1.bf16.msra.mxu0 %v18736_v18  ;;  %v22218_v13 = vadd.f32 %v8775_v4, %v8732_v48  ;;  %v8838_v18 = vld [vmem:[#allocation5 + $0xa0] sm:$0xff]  ;;  %v18903_v40 = vcombine.high %v9032_v26, %v9035_v1  ;;  %v9026_v52 = vld [vmem:[#allocation5 + $0x1838] sm:$0xff]  ;;  %v18902_v4 = vcombine.low %v9032_v26, %v9035_v1 }
 0x64c   :  { %10857 = vmatprep.subr.bf16.mxu0 %v18731_v5  ;;  %v18712_v5 = vcombine.low %v8841_v0, %v8844_v38  ;;  %v18707_v63 = vcombine.high %v8835_v2, %v8838_v18  ;;  %v18706_v48 = vcombine.low %v8835_v2, %v8838_v18  ;;  %v9119_v29 = vld [vmem:[#allocation5 + $0x23d8] sm:$0xff]  ;;  %v18896_v10 = vcombine.low %v9026_v52, %v9029_v9  ;;  %v8916_v0 = vld [vmem:[#allocation5 + $0xa60] sm:$0xff] }
 0x64d   :  { %10813 = vmatpush1.bf16.msra.mxu1 %v18926_v22  ;;  %v8928_v22 = vld [vmem:[#allocation5 + $0xbe0] sm:$0xff]  ;;  %v9113_v41 = vld [vmem:[#allocation5 + $0x2318] sm:$0xff] }
 0x64e   :  { %10814 = vmatprep.subr.bf16.mxu1 %v18921_v36  ;;  %v18797_v36 = vcombine.high %v8925_v55, %v8928_v22  ;;  %v9107_v26 = vld [vmem:[#allocation5 + $0x2258] sm:$0xff]  ;;  %v8907_v1 = vld [vmem:[#allocation5 + $0x940] sm:$0xff] }
 0x64f   :  { %10858 = vmatpush1.bf16.msra.mxu0 %v18730_v6  ;;  %v18897_v6 = vcombine.high %v9026_v52, %v9029_v9  ;;  %v8910_v2 = vld [vmem:[#allocation5 + $0x9a0] sm:$0xff]  ;;  %v9101_v52 = vld [vmem:[#allocation5 + $0x2198] sm:$0xff] }
 0x650   :  { %10859 = vmatprep.subr.bf16.mxu0 %v18725_v16  ;;  %v9116_v16 = vld [vmem:[#allocation5 + $0x2378] sm:$0xff]  ;;  %v8901_v9 = vld [vmem:[#allocation5 + $0x880] sm:$0xff] }
 0x651   :  { %10815 = vmatpush1.bf16.msra.mxu1 %v18920_v51  ;;  %v18796_v51 = vcombine.low %v8925_v55, %v8928_v22  ;;  %v18986_v38 = vcombine.low %v9116_v16, %v9119_v29  ;;  %v8904_v55 = vld [vmem:[#allocation5 + $0x8e0] sm:$0xff] }
 0x652   :  { %10816 = vmatprep.subr.bf16.mxu1 %v18915_v53  ;;  %v18791_v53 = vcombine.high %v8919_v19, %v8922_v56 }
 0x653   :  { %10860 = vmatpush1.bf16.msra.mxu0 %v18724_v62  ;;  %v18987_v62 = vcombine.high %v9116_v16, %v9119_v29  ;;  %v9095_v16 = vld [vmem:[#allocation5 + $0x20d8] sm:$0xff]  ;;  %v8895_v29 = vld [vmem:[#allocation5 + $0x7c0] sm:$0xff] }
 0x654   :  { %10861 = vmatprep.subr.bf16.mxu0 %v18719_v25  ;;  %v9110_v25 = vld [vmem:[#allocation5 + $0x22b8] sm:$0xff] }
 0x655   :  { %10817 = vmatpush1.bf16.msra.mxu1 %v18914_v57  ;;  %v18790_v57 = vcombine.low %v8919_v19, %v8922_v56  ;;  %v18980_v18 = vcombine.low %v9110_v25, %v9113_v41  ;;  %v8898_v19 = vld [vmem:[#allocation5 + $0x820] sm:$0xff] }
 0x656   :  { %10818 = vmatprep.subr.bf16.mxu1 %v18909_v7  ;;  %v18785_v7 = vcombine.high %v8913_v21, %v8916_v0 }
 0x657   :  { %10862 = vmatpush1.bf16.msra.mxu0 %v18718_v24  ;;  %v18981_v24 = vcombine.high %v9110_v25, %v9113_v41  ;;  %v9089_v25 = vld [vmem:[#allocation5 + $0x2018] sm:$0xff]  ;;  %v8889_v41 = vld [vmem:[#allocation5 + $0x700] sm:$0xff] }
 0x658   :  { %10863 = vmatprep.subr.bf16.mxu0 %v18713_v50  ;;  %v9104_v50 = vld [vmem:[#allocation5 + $0x21f8] sm:$0xff] }
 0x659   :  { %10819 = vmatpush1.bf16.msra.mxu1 %v18908_v3  ;;  %v18784_v3 = vcombine.low %v8913_v21, %v8916_v0  ;;  %v18974_v22 = vcombine.low %v9104_v50, %v9107_v26  ;;  %v8892_v21 = vld [vmem:[#allocation5 + $0x760] sm:$0xff] }
 0x65a   :  { %10820 = vmatprep.subr.bf16.mxu1 %v18903_v40  ;;  %v18779_v40 = vcombine.high %v8907_v1, %v8910_v2 }
 0x65b   :  { %10864 = vmatpush1.bf16.msra.mxu0 %v18712_v5  ;;  %v18975_v5 = vcombine.high %v9104_v50, %v9107_v26  ;;  %v9083_v50 = vld [vmem:[#allocation5 + $0x1f58] sm:$0xff]  ;;  %v8883_v26 = vld [vmem:[#allocation5 + $0x640] sm:$0xff] }
 0x65c   :  { %10865 = vmatprep.subr.bf16.mxu0 %v18707_v63  ;;  %v9098_v63 = vld [vmem:[#allocation5 + $0x2138] sm:$0xff] }
 0x65d   :  { %10821 = vmatpush1.bf16.msra.mxu1 %v18902_v4  ;;  %v18778_v4 = vcombine.low %v8907_v1, %v8910_v2  ;;  %v18968_v56 = vcombine.low %v9098_v63, %v9101_v52  ;;  %v8886_v1 = vld [vmem:[#allocation5 + $0x6a0] sm:$0xff] }
 0x65e   :  { %10822 = vmatprep.subr.bf16.mxu1 %v18897_v6  ;;  %v18773_v6 = vcombine.high %v8901_v9, %v8904_v55 }
 0x65f   :  { %10866 = vmatpush1.bf16.msra.mxu0 %v18706_v48  ;;  %v18969_v48 = vcombine.high %v9098_v63, %v9101_v52  ;;  %v9077_v63 = vld [vmem:[#allocation5 + $0x1e98] sm:$0xff]  ;;  %v9069_v52 = vld [vmem:[#allocation5 + $0x1d80] sm:$0xff] }
 0x660   :  { %10867 = vmatprep.subr.bf16.mxu0 %v18797_v36  ;;  %v9092_v36 = vld [vmem:[#allocation5 + $0x2078] sm:$0xff] }
 0x661   :  { %10823 = vmatpush1.bf16.msra.mxu1 %v18896_v10  ;;  %v18772_v10 = vcombine.low %v8901_v9, %v8904_v55  ;;  %v18962_v0 = vcombine.low %v9092_v36, %v9095_v16  ;;  %v9072_v9 = vld [vmem:[#allocation5 + $0x1de0] sm:$0xff] }
 0x662   :  { %10824 = vmatprep.subr.bf16.mxu1 %v18987_v62  ;;  %v18767_v62 = vcombine.high %v8895_v29, %v8898_v19 }
 0x663   :  { %10868 = vmatpush2.bf16.msra.mxu0 %v18796_v51  ;;  %v18963_v51 = vcombine.high %v9092_v36, %v9095_v16  ;;  %v8976_v36 = vld [vmem:[#allocation5 + $0x11e0] sm:$0xff] }
 0x664   :  { %10869 = vmatprep.subr.bf16.mxu0 %v18791_v53  ;;  %v9086_v53 = vld [vmem:[#allocation5 + $0x1fb8] sm:$0xff]  ;;  %v9063_v16 = vld [vmem:[#allocation5 + $0x1cc0] sm:$0xff] }
 0x665   :  { %10825 = vmatpush2.bf16.msra.mxu1 %v18986_v38  ;;  %v18766_v38 = vcombine.low %v8895_v29, %v8898_v19  ;;  %v18956_v2 = vcombine.low %v9086_v53, %v9089_v25  ;;  %v9066_v29 = vld [vmem:[#allocation5 + $0x1d20] sm:$0xff] }
 0x666   :  { %10826 = vmatprep.subr.bf16.mxu1 %v18981_v24  ;;  %v18761_v24 = vcombine.high %v8889_v41, %v8892_v21 }
 0x667   :  { %10870 = vmatpush2.bf16.msra.mxu0 %v18790_v57  ;;  %v18957_v57 = vcombine.high %v9086_v53, %v9089_v25  ;;  %v8970_v53 = vld [vmem:[#allocation5 + $0x1120] sm:$0xff] }
 0x668   :  { %10871 = vmatprep.subr.bf16.mxu0 %v18785_v7  ;;  %v9080_v7 = vld [vmem:[#allocation5 + $0x1ef8] sm:$0xff]  ;;  %v9057_v25 = vld [vmem:[#allocation5 + $0x1c00] sm:$0xff] }
 0x669   :  { %10827 = vmatpush2.bf16.msra.mxu1 %v18980_v18  ;;  %v18760_v18 = vcombine.low %v8889_v41, %v8892_v21  ;;  %v18950_v55 = vcombine.low %v9080_v7, %v9083_v50  ;;  %v9060_v41 = vld [vmem:[#allocation5 + $0x1c60] sm:$0xff]  ;;  %v21725_v21 = vld [vmem:[#allocation10] sm:$0x3f] }
 0x66a   :  { %10828 = vmatprep.subr.bf16.mxu1 %v18975_v5  ;;  %v18755_v5 = vcombine.high %v8883_v26, %v8886_v1 }
 0x66b   :  { %10872 = vmatpush2.bf16.msra.mxu0 %v18784_v3  ;;  %v18951_v3 = vcombine.high %v9080_v7, %v9083_v50  ;;  %v116_v50 = vrot.slane %v21725_v21, %v21994_v32 }
 0x66c   :  { %10873 = vmatprep.subr.bf16.mxu0 %v18779_v40  ;;  %v9074_v40 = vld [vmem:[#allocation5 + $0x1e38] sm:$0xff] }
 0x66d   :  { %10829 = vmatpush2.bf16.msra.mxu1 %v18974_v22  ;;  %v18754_v22 = vcombine.low %v8883_v26, %v8886_v1  ;;  %v18944_v19 = vcombine.low %v9074_v40, %v9077_v63  ;;  %v18929_v26 = vcombine.high %v9057_v25, %v9060_v41  ;;  %v8961_v1 = vld [vmem:[#allocation5 + $0x1000] sm:$0xff] }
 0x66e   :  { %10830 = vmatprep.subr.bf16.mxu1 %v18969_v48  ;;  %v18941_v48 = vcombine.high %v9069_v52, %v9072_v9 }
 0x66f   :  { %10874 = vmatpush2.bf16.msra.mxu0 %v18778_v4  ;;  %v18945_v4 = vcombine.high %v9074_v40, %v9077_v63  ;;  %v9054_v40 = vld [vmem:[#allocation5 + $0x1ba0] sm:$0xff] }
 0x670   :  { %10875 = vmatprep.subr.bf16.mxu0 %v18773_v6  ;;  %v8973_v6 = vld [vmem:[#allocation5 + $0x1180] sm:$0xff] }
 0x671   :  { %10831 = vmatpush2.bf16.msra.mxu1 %v18968_v56  ;;  %v18940_v56 = vcombine.low %v9069_v52, %v9072_v9 }
 0x672   :  { %10832 = vmatprep.subr.bf16.mxu1 %v18963_v51  ;;  %v18935_v51 = vcombine.high %v9063_v16, %v9066_v29 }
 0x673   :  { %10876 = vmatpush2.bf16.msra.mxu0 %v18772_v10  ;;  %v18845_v10 = vcombine.high %v8973_v6, %v8976_v36 }
 0x674   :  { %10877 = vmatprep.subr.bf16.mxu0 %v18767_v62  ;;  %v8967_v62 = vld [vmem:[#allocation5 + $0x10c0] sm:$0xff] }
 0x675   :  { %10833 = vmatpush2.bf16.msra.mxu1 %v18962_v0  ;;  %v112_v0 = vrot.slane %v21725_v21, %v21991_v30  ;;  %v18839_v7 = vcombine.high %v8967_v62, %v8970_v53  ;;  %v18838_v9 = vcombine.low %v8967_v62, %v8970_v53 }
 0x676   :  { %10834 = vmatprep.subr.bf16.mxu1 %v18957_v57  ;;  %v18844_v57 = vcombine.low %v8973_v6, %v8976_v36  ;;  %v4486_v6 = vadd.f32 %v22048_v33, %v116_v50 }
 0x677   :  { %10878 = vmatpush2.bf16.msra.mxu0 %v18766_v38  ;;  %v21726_v38 = vld [vmem:[#allocation2] ss:$24 sps:$4 sm:$0xff]   ;;  %v4485_v63 = vadd.f32 %v22045_v23, %v112_v0  ;;  %v8955_v23 = vld [vmem:[#allocation5 + $0xf40] sm:$0xff] }
 0x678   :  { %10879 = vmatprep.subr.bf16.mxu0 %v18761_v24  ;;  %v18934_v24 = vcombine.low %v9063_v16, %v9066_v29  ;;  %v8958_v29 = vld [vmem:[#allocation5 + $0xfa0] sm:$0xff] }
 0x679   :  { %10835 = vmatpush2.bf16.msra.mxu1 %v18956_v2  ;;  %v8964_v2 = vld [vmem:[#allocation5 + $0x1060] sm:$0xff] }
 0x67a   :  { %10836 = vmatprep.subr.bf16.mxu1 %v18951_v3  ;;  %v18832_v53 = vcombine.low %v8961_v1, %v8964_v2 }
 0x67b   :  { %10880 = vmatpush2.bf16.msra.mxu0 %v18760_v18  ;;  %v21727_v18 = vld [vmem:[#allocation2 + $0x14] ss:$24 sps:$4 sm:$0xff]  }
 0x67c   :  { %10881 = vmatprep.subr.bf16.mxu0 %v18755_v5  ;;  %v9051_v5 = vld [vmem:[#allocation5 + $0x1b40] sm:$0xff] }
 0x67d   :  { %10837 = vmatpush2.bf16.msra.mxu1 %v18950_v55  ;;  %v21728_v55 = vld [vmem:[#allocation2 + $0xc] ss:$24 sps:$4 sm:$0xff]   ;;  %v18923_v16 = vcombine.high %v9051_v5, %v9054_v40 }
 0x67e   :  { %10838 = vmatprep.subr.bf16.mxu1 %v18945_v4  ;;  %v18928_v4 = vcombine.low %v9057_v25, %v9060_v41  ;;  %v18922_v25 = vcombine.low %v9051_v5, %v9054_v40  ;;  %v4492_v41 = vadd.f32 %v22053_v45, %v116_v50  ;;  %v8943_v50 = vld [vmem:[#allocation5 + $0xdc0] sm:$0xff] }
 0x67f   :  { %10882 = vmatpush2.bf16.msra.mxu0 %v18754_v22 }
 0x680   :  { %10937 = vmatprep.subr.bf16.mxu0 %v18941_v48  ;;  %v18833_v48 = vcombine.high %v8961_v1, %v8964_v2 }
 0x681   :  { %10839 = vmatpush2.bf16.msra.mxu1 %v18944_v19  ;;  %v9045_v19 = vld [vmem:[#allocation5 + $0x1a80] sm:$0xff] }
 0x682   :  { %10884 = vmatmul.mubr.bf16.vlgmr.msra.gmra.mxu0 %v21726_v38  ;;  %10894 = vmatprep.subr.bf16.mxu1 %v18845_v10  ;;  %v4491_v10 = vadd.f32 %v22051_v34, %v112_v0  ;;  %v8949_v34 = vld [vmem:[#allocation5 + $0xe80] sm:$0xff] }
 0x683   :  { %10938 = vmatpush1.bf16.msra.mxu0 %v18940_v56  ;;  %10969 = vmatprep.mubr.bf16.mxu0 %v21727_v18  ;;  %v9048_v56 = vld [vmem:[#allocation5 + $0x1ae0] sm:$0xff] }
 0x684   :  { %10939 = vmatprep.subr.bf16.mxu0 %v18935_v51  ;;  %v8812_v3 = vpop.f32.mrf.mxu1  ;;  %10841 = vmatmul.mubr.bf16.vlgmr.msra.gmra.mxu1 %v22179_v17  ;;  %v8952_v0 = vld [vmem:[#allocation5 + $0xee0] sm:$0xff]  ;;  %v18916_v1 = vcombine.low %v9045_v19, %v9048_v56 }
 0x685   :  { %v8813_v52 = vadd.f32 %v8812_v3, %v22211_v60  ;;  %10895 = vmatpush1.bf16.msra.mxu1 %v18844_v57  ;;  %10926 = vmatprep.mubr.bf16.mxu1 %v21728_v55  ;;  %v18917_v57 = vcombine.high %v9045_v19, %v9048_v56  ;;  %v18821_v2 = vcombine.high %v8949_v34, %v8952_v0  ;;  %v8946_v18 = vld [vmem:[#allocation5 + $0xe20] sm:$0xff] }
 0x686   :  { %v8814_v22 = vpop.f32.mrf.mxu1  ;;  %10896 = vmatprep.subr.bf16.mxu1 %v18839_v7  ;;  %v9042_v7 = vld [vmem:[#allocation5 + $0x1a20] sm:$0xff]  ;;  %v18820_v5 = vcombine.low %v8949_v34, %v8952_v0 }
 0x687   :  { %10940 = vmatpush1.bf16.msra.mxu0 %v18934_v24  ;;  %v22226_v36 = vadd.f32 %v8813_v52, %v4485_v63  ;;  %v8815_v17 = vadd.f32 %v8814_v22, %v22214_v61  ;;  %v18827_v61 = vcombine.high %v8955_v23, %v8958_v29  ;;  %v9039_v24 = vld [vmem:[#allocation5 + $0x19c0] sm:$0xff]  ;;  %v18815_v63 = vcombine.high %v8943_v50, %v8946_v18 }
 0x688   :  { %10941 = vmatprep.subr.bf16.mxu0 %v18929_v26  ;;  %v8816_v60 = vpop.f32.mrf.mxu1  ;;  %v18826_v26 = vcombine.low %v8955_v23, %v8958_v29  ;;  %v18911_v45 = vcombine.high %v9039_v24, %v9042_v7  ;;  %v9033_v3 = vld [vmem:[#allocation5 + $0x1900] sm:$0xff]  ;;  %v18910_v40 = vcombine.low %v9039_v24, %v9042_v7 }
 0x689   :  { %v22230_v51 = vadd.f32 %v8815_v17, %v4486_v6  ;;  %v8817_v62 = vadd.f32 %v8816_v60, %v22216_v8  ;;  %10897 = vmatpush1.bf16.msra.mxu1 %v18838_v9  ;;  %v8937_v9 = vld [vmem:[#allocation5 + $0xd00] sm:$0xff] }
 0x68a   :  { %v8818_v33 = vpop.f32.mrf.mxu1  ;;  %10898 = vmatprep.subr.bf16.mxu1 %v18833_v48  ;;  %v8940_v55 = vld [vmem:[#allocation5 + $0xd60] sm:$0xff]  ;;  %v18814_v48 = vcombine.low %v8943_v50, %v8946_v18 }
 0x68b   :  { %10942 = vmatpush1.bf16.msra.mxu0 %v18928_v4  ;;  %v22234_v21 = vadd.f32 %v8817_v62, %v4491_v10  ;;  %v8819_v38 = vadd.f32 %v8818_v33, %v22218_v13  ;;  %v9036_v13 = vld [vmem:[#allocation5 + $0x1960] sm:$0xff]  ;;  %v18809_v17 = vcombine.high %v8937_v9, %v8940_v55  ;;  %v18808_v56 = vcombine.low %v8937_v9, %v8940_v55 }
 0x68c   :  { %10943 = vmatprep.subr.bf16.mxu0 %v18923_v16  ;;  %v18905_v52 = vcombine.high %v9033_v3, %v9036_v13  ;;  %v9027_v22 = vld [vmem:[#allocation5 + $0x1840] sm:$0xff]  ;;  %v18904_v6 = vcombine.low %v9033_v3, %v9036_v13 }
 0x68d   :  { %v22237_v8 = vadd.f32 %v8819_v38, %v4492_v41  ;;  %10899 = vmatpush1.bf16.msra.mxu1 %v18832_v53  ;;  %v9030_v4 = vld [vmem:[#allocation5 + $0x18a0] sm:$0xff] }
 0x68e   :  { %10900 = vmatprep.subr.bf16.mxu1 %v18827_v61  ;;  %v18899_v16 = vcombine.high %v9027_v22, %v9030_v4  ;;  %v8931_v23 = vld [vmem:[#allocation5 + $0xc40] sm:$0xff]  ;;  %v18898_v10 = vcombine.low %v9027_v22, %v9030_v4 }
 0x68f   :  { %10944 = vmatpush1.bf16.msra.mxu0 %v18922_v25  ;;  %v8934_v29 = vld [vmem:[#allocation5 + $0xca0] sm:$0xff] }
 0x690   :  { %10945 = vmatprep.subr.bf16.mxu0 %v18917_v57  ;;  %v9117_v60 = vld [vmem:[#allocation5 + $0x2380] sm:$0xff]  ;;  %v18803_v62 = vcombine.high %v8931_v23, %v8934_v29  ;;  %v18802_v38 = vcombine.low %v8931_v23, %v8934_v29 }
 0x691   :  { %10901 = vmatpush1.bf16.msra.mxu1 %v18826_v26  ;;  %v9120_v19 = vld [vmem:[#allocation5 + $0x23e0] sm:$0xff] }
 0x692   :  { %10902 = vmatprep.subr.bf16.mxu1 %v18821_v2  ;;  %v18989_v53 = vcombine.high %v9117_v60, %v9120_v19  ;;  %v9021_v33 = vld [vmem:[#allocation5 + $0x1780] sm:$0xff]  ;;  %v18988_v57 = vcombine.low %v9117_v60, %v9120_v19 }
 0x693   :  { %10946 = vmatpush1.bf16.msra.mxu0 %v18916_v1  ;;  %v9024_v25 = vld [vmem:[#allocation5 + $0x17e0] sm:$0xff] }
 0x694   :  { %10947 = vmatprep.subr.bf16.mxu0 %v18911_v45  ;;  %v9111_v61 = vld [vmem:[#allocation5 + $0x22c0] sm:$0xff]  ;;  %v18893_v34 = vcombine.high %v9021_v33, %v9024_v25  ;;  %v18892_v2 = vcombine.low %v9021_v33, %v9024_v25 }
 0x695   :  { %10903 = vmatpush1.bf16.msra.mxu1 %v18820_v5  ;;  %v9114_v41 = vld [vmem:[#allocation5 + $0x2320] sm:$0xff] }
 0x696   :  { %10904 = vmatprep.subr.bf16.mxu1 %v18815_v63  ;;  %v18983_v0 = vcombine.high %v9111_v61, %v9114_v41  ;;  %v9015_v24 = vld [vmem:[#allocation5 + $0x16c0] sm:$0xff]  ;;  %v18982_v45 = vcombine.low %v9111_v61, %v9114_v41 }
 0x697   :  { %10948 = vmatpush1.bf16.msra.mxu0 %v18910_v40  ;;  %v9018_v7 = vld [vmem:[#allocation5 + $0x1720] sm:$0xff] }
 0x698   :  { %10949 = vmatprep.subr.bf16.mxu0 %v18905_v52  ;;  %v9105_v26 = vld [vmem:[#allocation5 + $0x2200] sm:$0xff]  ;;  %v18887_v50 = vcombine.high %v9015_v24, %v9018_v7  ;;  %v18886_v63 = vcombine.low %v9015_v24, %v9018_v7  ;;  %v22239_v7 = vpop.f32.mrf.mxu0 }
 0x699   :  { %10905 = vmatpush1.bf16.msra.mxu1 %v18814_v48  ;;  %v9108_v1 = vld [vmem:[#allocation5 + $0x2260] sm:$0xff] }
 0x69a   :  { %10906 = vmatprep.subr.bf16.mxu1 %v18809_v17  ;;  %v18977_v18 = vcombine.high %v9105_v26, %v9108_v1  ;;  %v9009_v3 = vld [vmem:[#allocation5 + $0x1600] sm:$0xff]  ;;  %v18976_v52 = vcombine.low %v9105_v26, %v9108_v1 }
 0x69b   :  { %10950 = vmatpush1.bf16.msra.mxu0 %v18904_v6  ;;  %v9012_v13 = vld [vmem:[#allocation5 + $0x1660] sm:$0xff] }
 0x69c   :  { %10951 = vmatprep.subr.bf16.mxu0 %v18899_v16  ;;  %v9099_v5 = vld [vmem:[#allocation5 + $0x2140] sm:$0xff]  ;;  %v18881_v9 = vcombine.high %v9009_v3, %v9012_v13  ;;  %v18880_v17 = vcombine.low %v9009_v3, %v9012_v13 }
 0x69d   :  { %10907 = vmatpush1.bf16.msra.mxu1 %v18808_v56  ;;  %v9102_v40 = vld [vmem:[#allocation5 + $0x21a0] sm:$0xff] }
 0x69e   :  { %10908 = vmatprep.subr.bf16.mxu1 %v18803_v62  ;;  %v18971_v55 = vcombine.high %v9099_v5, %v9102_v40  ;;  %v9003_v22 = vld [vmem:[#allocation5 + $0x1540] sm:$0xff]  ;;  %v18970_v16 = vcombine.low %v9099_v5, %v9102_v40  ;;  %v10629_v5 = vpop.f32.mrf.mxu0 }
 0x69f   :  { %10952 = vmatpush1.bf16.msra.mxu0 %v18898_v10  ;;  %v9006_v4 = vld [vmem:[#allocation5 + $0x15a0] sm:$0xff] }
 0x6a0   :  { %10953 = vmatprep.subr.bf16.mxu0 %v18989_v53  ;;  %v9093_v48 = vld [vmem:[#allocation5 + $0x2080] sm:$0xff]  ;;  %v18875_v23 = vcombine.high %v9003_v22, %v9006_v4  ;;  %v18874_v62 = vcombine.low %v9003_v22, %v9006_v4  ;;  %v22241_v4 = vpop.f32.mrf.mxu0 }
 0x6a1   :  { %10909 = vmatpush1.bf16.msra.mxu1 %v18802_v38  ;;  %v9096_v6 = vld [vmem:[#allocation5 + $0x20e0] sm:$0xff] }
 0x6a2   :  { %10910 = vmatprep.subr.bf16.mxu1 %v18893_v34  ;;  %v18965_v29 = vcombine.high %v9093_v48, %v9096_v6  ;;  %v8997_v60 = vld [vmem:[#allocation5 + $0x1480] sm:$0xff]  ;;  %v18964_v53 = vcombine.low %v9093_v48, %v9096_v6 }
 0x6a3   :  { %10954 = vmatpush2.bf16.msra.mxu0 %v18988_v57  ;;  %v9000_v19 = vld [vmem:[#allocation5 + $0x14e0] sm:$0xff] }
 0x6a4   :  { %10955 = vmatprep.subr.bf16.mxu0 %v18983_v0  ;;  %v9087_v56 = vld [vmem:[#allocation5 + $0x1fc0] sm:$0xff]  ;;  %v18869_v33 = vcombine.high %v8997_v60, %v9000_v19  ;;  %v18868_v34 = vcombine.low %v8997_v60, %v9000_v19  ;;  %v20792_v60 = vld [vmem:[#allocation8 + $0x1624] ss:$24 sps:$4 sm:$0xff]  }
 0x6a5   :  { %10911 = vmatpush2.bf16.msra.mxu1 %v18892_v2  ;;  %v9090_v10 = vld [vmem:[#allocation5 + $0x2020] sm:$0xff] }
 0x6a6   :  { %10912 = vmatprep.subr.bf16.mxu1 %v18887_v50  ;;  %v18959_v25 = vcombine.high %v9087_v56, %v9090_v10  ;;  %v8991_v61 = vld [vmem:[#allocation5 + $0x13c0] sm:$0xff]  ;;  %v18958_v0 = vcombine.low %v9087_v56, %v9090_v10 }
 0x6a7   :  { %10956 = vmatpush2.bf16.msra.mxu0 %v18982_v45  ;;  %v8994_v41 = vld [vmem:[#allocation5 + $0x1420] sm:$0xff] }
 0x6a8   :  { %10957 = vmatprep.subr.bf16.mxu0 %v18977_v18  ;;  %v9081_v38 = vld [vmem:[#allocation5 + $0x1f00] sm:$0xff]  ;;  %v18863_v24 = vcombine.high %v8991_v61, %v8994_v41  ;;  %v18862_v18 = vcombine.low %v8991_v61, %v8994_v41  ;;  %v21730_v41 = vld [vmem:[#allocation2 + $0x8] ss:$24 sps:$4 sm:$0xff]  }
 0x6a9   :  { %10913 = vmatpush2.bf16.msra.mxu1 %v18886_v63  ;;  %v9084_v57 = vld [vmem:[#allocation5 + $0x1f60] sm:$0xff] }
 0x6aa   :  { %10914 = vmatprep.subr.bf16.mxu1 %v18881_v9  ;;  %v18953_v26 = vcombine.high %v9081_v38, %v9084_v57  ;;  %v8985_v1 = vld [vmem:[#allocation5 + $0x1300] sm:$0xff]  ;;  %v18952_v3 = vcombine.low %v9081_v38, %v9084_v57 }
 0x6ab   :  { %10958 = vmatpush2.bf16.msra.mxu0 %v18976_v52  ;;  %v8988_v2 = vld [vmem:[#allocation5 + $0x1360] sm:$0xff] }
 0x6ac   :  { %10959 = vmatprep.subr.bf16.mxu0 %v18971_v55  ;;  %v9075_v45 = vld [vmem:[#allocation5 + $0x1e40] sm:$0xff]  ;;  %v18857_v13 = vcombine.high %v8985_v1, %v8988_v2  ;;  %v18856_v9 = vcombine.low %v8985_v1, %v8988_v2  ;;  %v20798_v2 = vld [vmem:[#allocation8 + $0x15c4] ss:$24 sps:$4 sm:$0xff]  }
 0x6ad   :  { %10915 = vmatpush2.bf16.msra.mxu1 %v18880_v17  ;;  %v9078_v50 = vld [vmem:[#allocation5 + $0x1ea0] sm:$0xff]  ;;  %v22243_v17 = vld [vmem:[#allocation7 + $0xc] sm:$0x3f] }
 0x6ae   :  { %10916 = vmatprep.subr.bf16.mxu1 %v18875_v23  ;;  %v18947_v40 = vcombine.high %v9075_v45, %v9078_v50  ;;  %v8979_v63 = vld [vmem:[#allocation5 + $0x1240] sm:$0xff]  ;;  %v18946_v55 = vcombine.low %v9075_v45, %v9078_v50  ;;  %v9130_v19 = vrot.slane %v22243_v17, %v21960_v49 }
 0x6af   :  { %10960 = vmatpush2.bf16.msra.mxu0 %v18970_v16  ;;  %v8982_v52 = vld [vmem:[#allocation5 + $0x12a0] sm:$0xff] }
 0x6b0   :  { %10961 = vmatprep.subr.bf16.mxu0 %v18965_v29  ;;  %v18851_v22 = vcombine.high %v8979_v63, %v8982_v52  ;;  %v20789_v48 = vld [vmem:[#allocation8 + $0x1654] ss:$24 sps:$4 sm:$0xff]   ;;  %v18850_v6 = vcombine.low %v8979_v63, %v8982_v52  ;;  %v20787_v23 = vld [vmem:[#allocation8 + $0x1650] ss:$24 sps:$4 sm:$0xff]   ;;  %v10633_v29 = vpop.f32.mrf.mxu0  ;;  %v10630_v38 = vadd.f32 %v10629_v5, %v9130_v19  ;;  %v20796_v63 = vld [vmem:[#allocation8 + $0x15c0] ss:$24 sps:$4 sm:$0xff]  }
 0x6b1   :  { %10917 = vmatpush2.bf16.msra.mxu1 %v18874_v62  ;;  %v20741_v16 = vld [vmem:[#allocation8 + $0x1354] ss:$24 sps:$4 sm:$0xff]   ;;  %v21729_v10 = vld [vmem:[#allocation2 + $0x10] ss:$24 sps:$4 sm:$0xff]  }
 0x6b2   :  { %10918 = vmatprep.subr.bf16.mxu1 %v18869_v33  ;;  %v20739_v62 = vld [vmem:[#allocation8 + $0x1350] ss:$24 sps:$4 sm:$0xff]   ;;  %v20790_v33 = vld [vmem:[#allocation8 + $0x1620] ss:$24 sps:$4 sm:$0xff]  }
 0x6b3   :  { %10962 = vmatpush2.bf16.msra.mxu0 %v18964_v53  ;;  %v20744_v53 = vld [vmem:[#allocation8 + $0x1324] ss:$24 sps:$4 sm:$0xff]  }
 0x6b4   :  { %10963 = vmatprep.subr.bf16.mxu0 %v18959_v25  ;;  %v20795_v25 = vld [vmem:[#allocation8 + $0x15f4] ss:$24 sps:$4 sm:$0xff]  }
 0x6b5   :  { %10919 = vmatpush2.bf16.msra.mxu1 %v18868_v34  ;;  %v20742_v34 = vld [vmem:[#allocation8 + $0x1320] ss:$24 sps:$4 sm:$0xff]  }
 0x6b6   :  { %10920 = vmatprep.subr.bf16.mxu1 %v18863_v24  ;;  %v20747_v24 = vld [vmem:[#allocation8 + $0x12f4] ss:$24 sps:$4 sm:$0xff]  }
 0x6b7   :  { %10964 = vmatpush2.bf16.msra.mxu0 %v18958_v0 }
 0x6b8   :  { %10965 = vmatprep.subr.bf16.mxu0 %v18953_v26  ;;  %v20793_v26 = vld [vmem:[#allocation8 + $0x15f0] ss:$24 sps:$4 sm:$0xff]  }
 0x6b9   :  { %10921 = vmatpush2.bf16.msra.mxu1 %v18862_v18 }
 0x6ba   :  { %10922 = vmatprep.subr.bf16.mxu1 %v18857_v13  ;;  %v10634_v13 = vadd.f32 %v10633_v29, %v9130_v19  ;;  %v20804_v29 = vld [vmem:[#allocation8 + $0x1564] ss:$24 sps:$4 sm:$0xff]   ;;  %v20751_v19 = vld [vmem:[#allocation8 + $0x1290] ss:$24 sps:$4 sm:$0xff]  }
 0x6bb   :  { %10966 = vmatpush2.bf16.msra.mxu0 %v18952_v3  ;;  %v20745_v3 = vld [vmem:[#allocation8 + $0x12f0] ss:$24 sps:$4 sm:$0xff]  }
 0x6bc   :  { %10967 = vmatprep.subr.bf16.mxu0 %v18947_v40  ;;  %v20750_v40 = vld [vmem:[#allocation8 + $0x12c4] ss:$24 sps:$4 sm:$0xff]  }
 0x6bd   :  { %10923 = vmatpush2.bf16.msra.mxu1 %v18856_v9  ;;  %v20801_v9 = vld [vmem:[#allocation8 + $0x1594] ss:$24 sps:$4 sm:$0xff]  }
 0x6be   :  { %10924 = vmatprep.subr.bf16.mxu1 %v18851_v22 }
 0x6bf   :  { %10968 = vmatpush2.bf16.msra.mxu0 %v18946_v55 }
 0x6c0   :  { %12817 = vmatprep.subr.bf16.mxu0 %v20789_v48  ;;  %v20748_v48 = vld [vmem:[#allocation8 + $0x12c0] ss:$24 sps:$4 sm:$0xff]  }
 0x6c1   :  { %10925 = vmatpush2.bf16.msra.mxu1 %v18850_v6 }
 0x6c2   :  { %v22247_v56 = vpop.f32.mrf.mxu0  ;;  %10970 = vmatmul.mubr.bf16.vlgmr.msra.gmra.mxu0 %v21729_v10  ;;  %12774 = vmatprep.subr.bf16.mxu1 %v20741_v16  ;;  %v20753_v16 = vld [vmem:[#allocation8 + $0x1294] ss:$24 sps:$4 sm:$0xff]   ;;  %v20756_v10 = vld [vmem:[#allocation8 + $0x1264] ss:$24 sps:$4 sm:$0xff]  }
 0x6c3   :  { %12818 = vmatpush1.bf16.msra.mxu0 %v20787_v23  ;;  %v20799_v23 = vld [vmem:[#allocation8 + $0x1590] ss:$24 sps:$4 sm:$0xff]  }
 0x6c4   :  { %12819 = vmatprep.subr.bf16.mxu0 %v20792_v60  ;;  %v22249_v61 = vpop.f32.mrf.mxu1  ;;  %10927 = vmatmul.mubr.bf16.vlgmr.msra.gmra.mxu1 %v21730_v41  ;;  %v10715_v57 = vpop.f32.mrf.mxu0  ;;  %v20805_v41 = vld [vmem:[#allocation8 + $0x1530] ss:$24 sps:$4 sm:$0xff]  }
 0x6c5   :  { %12775 = vmatpush1.bf16.msra.mxu1 %v20739_v62  ;;  %v20802_v62 = vld [vmem:[#allocation8 + $0x1560] ss:$24 sps:$4 sm:$0xff]  }
 0x6c6   :  { %v10672_v0 = vpop.f32.mrf.mxu1  ;;  %12776 = vmatprep.subr.bf16.mxu1 %v20744_v53  ;;  %v22253_v18 = vpop.f32.mrf.mxu0  ;;  %v20807_v53 = vld [vmem:[#allocation8 + $0x1534] ss:$24 sps:$4 sm:$0xff]  }
 0x6c7   :  { %12820 = vmatpush1.bf16.msra.mxu0 %v20790_v33  ;;  %v10673_v1 = vadd.f32 %v10672_v0, %v10630_v38  ;;  %v20754_v33 = vld [vmem:[#allocation8 + $0x1260] ss:$24 sps:$4 sm:$0xff]   ;;  %v20810_v38 = vld [vmem:[#allocation8 + $0x1504] ss:$24 sps:$4 sm:$0xff]  }
 0x6c8   :  { %12821 = vmatprep.subr.bf16.mxu0 %v20795_v25  ;;  %v10674_v45 = vpop.f32.mrf.mxu1  ;;  %v10719_v22 = vpop.f32.mrf.mxu0  ;;  %v20759_v25 = vld [vmem:[#allocation8 + $0x1234] ss:$24 sps:$4 sm:$0xff]   ;;  %v20762_v0 = vld [vmem:[#allocation8 + $0x1204] ss:$24 sps:$4 sm:$0xff]  }
 0x6c9   :  { %v22251_v50 = vadd.f32 %v10715_v57, %v10673_v1  ;;  %12777 = vmatpush1.bf16.msra.mxu1 %v20742_v34  ;;  %v9126_v57 = vrot.slane %v22243_v17, %v21957_v47  ;;  %v20757_v34 = vld [vmem:[#allocation8 + $0x1230] ss:$24 sps:$4 sm:$0xff]   ;;  %v20813_v1 = vld [vmem:[#allocation8 + $0x17d4] ss:$24 sps:$4 sm:$0xff]  }
 0x6ca   :  { %v10676_v5 = vpop.f32.mrf.mxu1  ;;  %12778 = vmatprep.subr.bf16.mxu1 %v20747_v24  ;;  %v20808_v24 = vld [vmem:[#allocation8 + $0x1500] ss:$24 sps:$4 sm:$0xff]  }
 0x6cb   :  { %12822 = vmatpush1.bf16.msra.mxu0 %v20793_v26  ;;  %v10993_v52 = vmul.f32 0.70710677, %v22251_v50  ;;  %v10677_v55 = vadd.f32 %v10676_v5, %v10634_v13  ;;  %v10628_v13 = vadd.f32 %v22239_v7, %v9126_v57 }
 0x6cc   :  { %12823 = vmatprep.subr.bf16.mxu0 %v20798_v2  ;;  %v10632_v2 = vadd.f32 %v22241_v4, %v9126_v57  ;;  %v20763_v4 = vld [vmem:[#allocation8 + $0x14d0] ss:$24 sps:$4 sm:$0xff]   ;;  %v20825_v57 = vld [vmem:[#allocation8 + $0x1714] ss:$24 sps:$4 sm:$0xff]  }
 0x6cd   :  { %12779 = vmatpush1.bf16.msra.mxu1 %v20745_v3  ;;  %21651 = verf.f32 %v10993_v52  ;;  %v10720_v6 = vadd.f32 %v10719_v22, %v10677_v55  ;;  %v20760_v3 = vld [vmem:[#allocation8 + $0x1200] ss:$24 sps:$4 sm:$0xff]   ;;  %v20811_v52 = vld [vmem:[#allocation8 + $0x17d0] ss:$24 sps:$4 sm:$0xff]   ;;  %v20816_v55 = vld [vmem:[#allocation8 + $0x17a4] ss:$24 sps:$4 sm:$0xff]   ;;  %v10671_v22 = vadd.f32 %v22249_v61, %v10628_v13 }
 0x6ce   :  { %12780 = vmatprep.subr.bf16.mxu1 %v20750_v40  ;;  %v10675_v5 = vadd.f32 %v10674_v45, %v10632_v2  ;;  %v20765_v40 = vld [vmem:[#allocation8 + $0x14d4] ss:$24 sps:$4 sm:$0xff]   ;;  %v20780_v2 = vld [vmem:[#allocation8 + $0x13e4] ss:$24 sps:$4 sm:$0xff]  }
 0x6cf   :  { %12824 = vmatpush1.bf16.msra.mxu0 %v20796_v63  ;;  %v10999_v60 = vmul.f32 0.70710677, %v10720_v6  ;;  %v20819_v61 = vld [vmem:[#allocation8 + $0x1774] ss:$24 sps:$4 sm:$0xff]  }
 0x6d0   :  { %12825 = vmatprep.subr.bf16.mxu0 %v20801_v9  ;;  %v20831_v13 = vld [vmem:[#allocation8 + $0x16b4] ss:$24 sps:$4 sm:$0xff]  }
 0x6d1   :  { %12781 = vmatpush1.bf16.msra.mxu1 %v20748_v48  ;;  %21653 = verf.f32 %v10999_v60  ;;  %v10981_v48 = vmul.f32 0.5, %v22251_v50  ;;  %v20768_v60 = vld [vmem:[#allocation8 + $0x14a4] ss:$24 sps:$4 sm:$0xff]   ;;  %v20766_v50 = vld [vmem:[#allocation8 + $0x14a0] ss:$24 sps:$4 sm:$0xff]  }
 0x6d2   :  { %12782 = vmatprep.subr.bf16.mxu1 %v20753_v16  ;;  %v10987_v16 = vmul.f32 0.5, %v10720_v6 }
 0x6d3   :  { %12826 = vmatpush1.bf16.msra.mxu0 %v20799_v23 }
 0x6d4   :  { %12827 = vmatprep.subr.bf16.mxu0 %v20804_v29  ;;  %v22263_v29 = vadd.f32 %v22253_v18, %v10675_v5  ;;  %v20771_v18 = vld [vmem:[#allocation8 + $0x1474] ss:$24 sps:$4 sm:$0xff]   ;;  %v20778_v5 = vld [vmem:[#allocation8 + $0x13e0] ss:$24 sps:$4 sm:$0xff]  }
 0x6d5   :  { %12783 = vmatpush1.bf16.msra.mxu1 %v20751_v19  ;;  %v20814_v19 = vld [vmem:[#allocation8 + $0x17a0] ss:$24 sps:$4 sm:$0xff]  }
 0x6d6   :  { %12784 = vmatprep.subr.bf16.mxu1 %v20756_v10  ;;  %v10714_v10 = vadd.f32 %v22247_v56, %v10671_v22  ;;  %v10998_v6 = vmul.f32 0.70710677, %v22263_v29  ;;  %v20774_v56 = vld [vmem:[#allocation8 + $0x1444] ss:$24 sps:$4 sm:$0xff]   ;;  %v20781_v22 = vld [vmem:[#allocation8 + $0x13b0] ss:$24 sps:$4 sm:$0xff]  }
 0x6d7   :  { %12828 = vmatpush1.bf16.msra.mxu0 %v20802_v62 }
 0x6d8   :  { %12829 = vmatprep.subr.bf16.mxu0 %v20807_v53  ;;  %v20817_v53 = vld [vmem:[#allocation8 + $0x1770] ss:$24 sps:$4 sm:$0xff]   ;;  %21655 = verf.f32 %v10998_v6 }
 0x6d9   :  { %12785 = vmatpush1.bf16.msra.mxu1 %v20754_v33  ;;  %v10992_v33 = vmul.f32 0.70710677, %v10714_v10 }
 0x6da   :  { %12786 = vmatprep.subr.bf16.mxu1 %v20759_v25  ;;  %v21652_v26 = vpop.eup %21651  ;;  %v20822_v25 = vld [vmem:[#allocation8 + $0x1744] ss:$24 sps:$4 sm:$0xff]  }
 0x6db   :  { %12830 = vmatpush1.bf16.msra.mxu0 %v20805_v41  ;;  %v11017_v63 = vadd.f32 1.0, %v21652_v26  ;;  %v20769_v41 = vld [vmem:[#allocation8 + $0x1470] ss:$24 sps:$4 sm:$0xff]   ;;  %21657 = verf.f32 %v10992_v33  ;;  %v20828_v26 = vld [vmem:[#allocation8 + $0x16e4] ss:$24 sps:$4 sm:$0xff]  }
 0x6dc   :  { %12831 = vmatprep.subr.bf16.mxu0 %v20810_v38  ;;  %v20820_v38 = vld [vmem:[#allocation8 + $0x1740] ss:$24 sps:$4 sm:$0xff]   ;;  %v20846_v33 = vld [vmem:[#allocation8 + $0x1924] ss:$24 sps:$4 sm:$0xff]  }
 0x6dd   :  { %12787 = vmatpush1.bf16.msra.mxu1 %v20757_v34  ;;  %v11029_v7 = vmul.f32 %v11017_v63, %v10981_v48  ;;  %v20772_v34 = vld [vmem:[#allocation8 + $0x1440] ss:$24 sps:$4 sm:$0xff]  }
 0x6de   :  { %12788 = vmatprep.subr.bf16.mxu1 %v20762_v0  ;;  %v21654_v9 = vpop.eup %21653  ;;  %v20777_v0 = vld [vmem:[#allocation8 + $0x1414] ss:$24 sps:$4 sm:$0xff]  }
 0x6df   :  { %12832 = vmatpush1.bf16.msra.mxu0 %v20808_v24  ;;  %v11023_v23 = vadd.f32 1.0, %v21654_v9  ;;  %v20823_v24 = vld [vmem:[#allocation8 + $0x1710] ss:$24 sps:$4 sm:$0xff]   ;;  %v20834_v9 = vld [vmem:[#allocation8 + $0x1684] ss:$24 sps:$4 sm:$0xff]  }
 0x6e0   :  { %12833 = vmatprep.subr.bf16.mxu0 %v20813_v1  ;;  %v20775_v1 = vld [vmem:[#allocation8 + $0x1410] ss:$24 sps:$4 sm:$0xff]  }
 0x6e1   :  { %12789 = vmatpush1.bf16.msra.mxu1 %v20760_v3  ;;  %v11035_v45 = vmul.f32 %v11023_v23, %v10987_v16  ;;  %v20826_v3 = vld [vmem:[#allocation8 + $0x16e0] ss:$24 sps:$4 sm:$0xff]   ;;  %v20786_v16 = vld [vmem:[#allocation8 + $0x1384] ss:$24 sps:$4 sm:$0xff]  }
 0x6e2   :  { %12790 = vmatprep.subr.bf16.mxu1 %v20765_v40  ;;  %v20783_v40 = vld [vmem:[#allocation8 + $0x13b4] ss:$24 sps:$4 sm:$0xff]   ;;  %v20832_v23 = vld [vmem:[#allocation8 + $0x1680] ss:$24 sps:$4 sm:$0xff]  }
 0x6e3   :  { %12834 = vmatpush2.bf16.msra.mxu0 %v20811_v52  ;;  %v22266_v62 = vpack.c.bf16 %v11035_v45, %v11029_v7  ;;  %v20829_v52 = vld [vmem:[#allocation8 + $0x16b0] ss:$24 sps:$4 sm:$0xff]   ;;  %v10986_v7 = vmul.f32 0.5, %v22263_v29  ;;  %v20837_v45 = vld [vmem:[#allocation8 + $0x135c] ss:$24 sps:$4 sm:$0xff]  }
 0x6e4   :  { %12835 = vmatprep.subr.bf16.mxu0 %v20816_v55  ;;  %v20844_v29 = vld [vmem:[#allocation8 + $0x1920] ss:$24 sps:$4 sm:$0xff]  }
 0x6e5   :  { %12791 = vmatpush2.bf16.msra.mxu1 %v20763_v4  ;;  %12806 = vmatprep.mubr.bf16.mxu1 %v22266_v62  ;;  %v21656_v63 = vpop.eup %21655 }
 0x6e6   :  { %12792 = vmatprep.subr.bf16.mxu1 %v20768_v60  ;;  %v11022_v48 = vadd.f32 1.0, %v21656_v63  ;;  %v20784_v60 = vld [vmem:[#allocation8 + $0x1380] ss:$24 sps:$4 sm:$0xff]   ;;  %v20900_v63 = vld [vmem:[#allocation8 + $0x1a74] ss:$24 sps:$4 sm:$0xff]  }
 0x6e7   :  { %12836 = vmatpush2.bf16.msra.mxu0 %v20814_v19  ;;  %v10980_v19 = vmul.f32 0.5, %v10714_v10  ;;  %v20850_v10 = vld [vmem:[#allocation8 + $0x18f0] ss:$24 sps:$4 sm:$0xff]  }
 0x6e8   :  { %12837 = vmatprep.subr.bf16.mxu0 %v20819_v61  ;;  %v21658_v55 = vpop.eup %21657  ;;  %v11034_v61 = vmul.f32 %v11022_v48, %v10986_v7  ;;  %v20910_v48 = vld [vmem:[#allocation8 + $0x1a10] ss:$24 sps:$4 sm:$0xff]   ;;  %v20924_v7 = vld [vmem:[#allocation8 + $0x19b4] ss:$24 sps:$4 sm:$0xff]  }
 0x6e9   :  { %12793 = vmatpush2.bf16.msra.mxu1 %v20766_v50  ;;  %v11016_v4 = vadd.f32 1.0, %v21658_v55  ;;  %v20840_v50 = vld [vmem:[#allocation8 + $0x1954] ss:$24 sps:$4 sm:$0xff]   ;;  %v20904_v55 = vld [vmem:[#allocation8 + $0x1a40] ss:$24 sps:$4 sm:$0xff]  }
 0x6ea   :  { %12794 = vmatprep.subr.bf16.mxu1 %v20771_v18  ;;  %v20838_v18 = vld [vmem:[#allocation8 + $0x1950] ss:$24 sps:$4 sm:$0xff]  }
 0x6eb   :  { %12838 = vmatpush2.bf16.msra.mxu0 %v20817_v53  ;;  %v11028_v6 = vmul.f32 %v11016_v4, %v10980_v19  ;;  %v20930_v19 = vld [vmem:[#allocation8 + $0x1984] ss:$24 sps:$4 sm:$0xff]  }
 0x6ec   :  { %12839 = vmatprep.subr.bf16.mxu0 %v20822_v25  ;;  %v20852_v25 = vld [vmem:[#allocation8 + $0x18f4] ss:$24 sps:$4 sm:$0xff]  }
 0x6ed   :  { %12795 = vmatpush2.bf16.msra.mxu1 %v20769_v41  ;;  %v22271_v53 = vpack.c.bf16 %v11034_v61, %v11028_v6  ;;  %v20858_v41 = vld [vmem:[#allocation8 + $0x18c4] ss:$24 sps:$4 sm:$0xff]   ;;  %v9134_v61 = vrot.slane %v22243_v17, %v21973_v28  ;;  %v9138_v6 = vrot.slane %v22243_v17, %v21976_v31 }
 0x6ee   :  { %12796 = vmatprep.subr.bf16.mxu1 %v20774_v56  ;;  %v20856_v56 = vld [vmem:[#allocation8 + $0x18c0] ss:$24 sps:$4 sm:$0xff]  }
 0x6ef   :  { %12840 = vmatpush2.bf16.msra.mxu0 %v20820_v38  ;;  %v20864_v38 = vld [vmem:[#allocation8 + $0x1894] ss:$24 sps:$4 sm:$0xff]  }
 0x6f0   :  { %12841 = vmatprep.subr.bf16.mxu0 %v20825_v57  ;;  %v20862_v57 = vld [vmem:[#allocation8 + $0x1890] ss:$24 sps:$4 sm:$0xff]  }
 0x6f1   :  { %12797 = vmatpush2.bf16.msra.mxu1 %v20772_v34  ;;  %v20870_v34 = vld [vmem:[#allocation8 + $0x1864] ss:$24 sps:$4 sm:$0xff]  }
 0x6f2   :  { %12798 = vmatprep.subr.bf16.mxu1 %v20777_v0  ;;  %v20868_v0 = vld [vmem:[#allocation8 + $0x1860] ss:$24 sps:$4 sm:$0xff]  }
 0x6f3   :  { %12842 = vmatpush2.bf16.msra.mxu0 %v20823_v24  ;;  %v20876_v24 = vld [vmem:[#allocation8 + $0x1834] ss:$24 sps:$4 sm:$0xff]  }
 0x6f4   :  { %12843 = vmatprep.subr.bf16.mxu0 %v20828_v26  ;;  %v20874_v26 = vld [vmem:[#allocation8 + $0x1830] ss:$24 sps:$4 sm:$0xff]  }
 0x6f5   :  { %12799 = vmatpush2.bf16.msra.mxu1 %v20775_v1  ;;  %v20882_v1 = vld [vmem:[#allocation8 + $0x1804] ss:$24 sps:$4 sm:$0xff]  }
 0x6f6   :  { %12800 = vmatprep.subr.bf16.mxu1 %v20780_v2  ;;  %v20880_v2 = vld [vmem:[#allocation8 + $0x1800] ss:$24 sps:$4 sm:$0xff]  }
 0x6f7   :  { %12844 = vmatpush2.bf16.msra.mxu0 %v20826_v3  ;;  %v20888_v3 = vld [vmem:[#allocation8 + $0x1ad4] ss:$24 sps:$4 sm:$0xff]  }
 0x6f8   :  { %12845 = vmatprep.subr.bf16.mxu0 %v20831_v13  ;;  %v20886_v13 = vld [vmem:[#allocation8 + $0x1ad0] ss:$24 sps:$4 sm:$0xff]  }
 0x6f9   :  { %12801 = vmatpush2.bf16.msra.mxu1 %v20778_v5  ;;  %v20894_v5 = vld [vmem:[#allocation8 + $0x1aa4] ss:$24 sps:$4 sm:$0xff]  }
 0x6fa   :  { %12802 = vmatprep.subr.bf16.mxu1 %v20783_v40  ;;  %v20892_v40 = vld [vmem:[#allocation8 + $0x1aa0] ss:$24 sps:$4 sm:$0xff]  }
 0x6fb   :  { %12846 = vmatpush2.bf16.msra.mxu0 %v20829_v52  ;;  %v20898_v52 = vld [vmem:[#allocation8 + $0x1a70] ss:$24 sps:$4 sm:$0xff]  }
 0x6fc   :  { %12847 = vmatprep.subr.bf16.mxu0 %v20834_v9  ;;  %v20906_v9 = vld [vmem:[#allocation8 + $0x1a44] ss:$24 sps:$4 sm:$0xff]  }
 0x6fd   :  { %12803 = vmatpush2.bf16.msra.mxu1 %v20781_v22  ;;  %v20912_v22 = vld [vmem:[#allocation8 + $0x1a14] ss:$24 sps:$4 sm:$0xff]  }
 0x6fe   :  { %12804 = vmatprep.subr.bf16.mxu1 %v20786_v16  ;;  %v20918_v16 = vld [vmem:[#allocation8 + $0x19e4] ss:$24 sps:$4 sm:$0xff]  }
 0x6ff   :  { %12848 = vmatpush2.bf16.msra.mxu0 %v20832_v23  ;;  %v20916_v23 = vld [vmem:[#allocation8 + $0x19e0] ss:$24 sps:$4 sm:$0xff]  }
 0x700   :  { %12903 = vmatprep.subr.bf16.mxu0 %v20837_v45  ;;  %v20922_v45 = vld [vmem:[#allocation8 + $0x19b0] ss:$24 sps:$4 sm:$0xff]  }
 0x701   :  { %12805 = vmatpush2.bf16.msra.mxu1 %v20784_v60 }
 0x702   :  { %12860 = vmatprep.subr.bf16.mxu1 %v20840_v50  ;;  %v10799_v50 = vpop.f32.mrf.mxu0 }
 0x704   :  { %12807 = vmatmul.mubr.bf16.vlgmr.msra.gmra.mxu1 %v22271_v53  ;;  %v10756_v4 = vpop.f32.mrf.mxu1 }
 0x705   :  { %12861 = vmatpush1.bf16.msra.mxu1 %v20838_v18  ;;  %v20928_v18 = vld [vmem:[#allocation8 + $0x1980] ss:$24 sps:$4 sm:$0xff]  }
 0x706   :  { %12862 = vmatprep.subr.bf16.mxu1 %v20846_v33  ;;  %v10758_v60 = vpop.f32.mrf.mxu1 }
 0x708   :  { %v10760_v33 = vpop.f32.mrf.mxu1 }
 0x709   :  { %12863 = vmatpush1.bf16.msra.mxu1 %v20844_v29  ;;  %v20936_v29 = vld [vmem:[#allocation8 + $0x165c] ss:$24 sps:$4 sm:$0xff]  }
 0x70a   :  { %12864 = vmatprep.subr.bf16.mxu1 %v20852_v25  ;;  %v10757_v25 = vadd.f32 %v10756_v4, %v9134_v61 }
 0x70d   :  { %12865 = vmatpush1.bf16.msra.mxu1 %v20850_v10  ;;  %v10801_v10 = vpop.f32.mrf.mxu0 }
 0x70e   :  { %12866 = vmatprep.subr.bf16.mxu1 %v20858_v41  ;;  %v10759_v41 = vadd.f32 %v10758_v60, %v9138_v6 }
 0x711   :  { %12867 = vmatpush1.bf16.msra.mxu1 %v20856_v56  ;;  %v10762_v56 = vpop.f32.mrf.mxu1 }
 0x712   :  { %12868 = vmatprep.subr.bf16.mxu1 %v20864_v38  ;;  %v10761_v38 = vadd.f32 %v10760_v33, %v9134_v61 }
 0x715   :  { %12869 = vmatpush1.bf16.msra.mxu1 %v20862_v57  ;;  %v10800_v57 = vadd.f32 %v10799_v50, %v10757_v25 }
 0x716   :  { %12870 = vmatprep.subr.bf16.mxu1 %v20870_v34  ;;  %v10803_v34 = vpop.f32.mrf.mxu0 }
 0x719   :  { %12871 = vmatpush1.bf16.msra.mxu1 %v20868_v0 }
 0x71a   :  { %12872 = vmatprep.subr.bf16.mxu1 %v20876_v24  ;;  %v10763_v24 = vadd.f32 %v10762_v56, %v9138_v6 }
 0x71d   :  { %12873 = vmatpush1.bf16.msra.mxu1 %v20874_v26 }
 0x71e   :  { %12874 = vmatprep.subr.bf16.mxu1 %v20882_v1  ;;  %v10802_v1 = vadd.f32 %v10801_v10, %v10759_v41 }
 0x721   :  { %12875 = vmatpush1.bf16.msra.mxu1 %v20880_v2 }
 0x722   :  { %12876 = vmatprep.subr.bf16.mxu1 %v20888_v3 }
 0x725   :  { %12877 = vmatpush2.bf16.msra.mxu1 %v20886_v13  ;;  %v10804_v13 = vadd.f32 %v10803_v34, %v10761_v38  ;;  %v20835_v34 = vld [vmem:[#allocation8 + $0x1358] ss:$24 sps:$4 sm:$0xff]  }
 0x726   :  { %12878 = vmatprep.subr.bf16.mxu1 %v20894_v5  ;;  %v10805_v5 = vpop.f32.mrf.mxu0 }
 0x729   :  { %12879 = vmatpush2.bf16.msra.mxu1 %v20892_v40 }
 0x72a   :  { %12880 = vmatprep.subr.bf16.mxu1 %v20900_v63 }
 0x72d   :  { %12881 = vmatpush2.bf16.msra.mxu1 %v20898_v52 }
 0x72e   :  { %12882 = vmatprep.subr.bf16.mxu1 %v20906_v9 }
 0x731   :  { %12883 = vmatpush2.bf16.msra.mxu1 %v20904_v55  ;;  %v10806_v55 = vadd.f32 %v10805_v5, %v10763_v24  ;;  %v20843_v24 = vld [vmem:[#allocation8 + $0x132c] ss:$24 sps:$4 sm:$0xff]   ;;  %v20861_v5 = vld [vmem:[#allocation8 + $0x129c] ss:$24 sps:$4 sm:$0xff]  }
 0x732   :  { %12884 = vmatprep.subr.bf16.mxu1 %v20912_v22 }
 0x735   :  { %12885 = vmatpush2.bf16.msra.mxu1 %v20910_v48 }
 0x736   :  { %12886 = vmatprep.subr.bf16.mxu1 %v20918_v16 }
 0x739   :  { %12887 = vmatpush2.bf16.msra.mxu1 %v20916_v23 }
 0x73a   :  { %12888 = vmatprep.subr.bf16.mxu1 %v20924_v7 }
 0x73d   :  { %12889 = vmatpush2.bf16.msra.mxu1 %v20922_v45 }
 0x73e   :  { %12890 = vmatprep.subr.bf16.mxu1 %v20930_v19 }
 0x741   :  { %12891 = vmatpush2.bf16.msra.mxu1 %v20928_v18 }
 0x742   :  { %12946 = vmatprep.subr.bf16.mxu1 %v20936_v29 }
 0x744   :  { %v10842_v0 = vpop.f32.mrf.mxu1 }
 0x745   :  { %v10843_v26 = vadd.f32 %v10842_v0, %v10800_v57 }
 0x746   :  { %v10844_v2 = vpop.f32.mrf.mxu1 }
 0x747   :  { %v10845_v3 = vadd.f32 %v10844_v2, %v10802_v1  ;;  %v10994_v40 = vmul.f32 0.70710677, %v10843_v26  ;;  %v10982_v25 = vmul.f32 0.5, %v10843_v26  ;;  %v20841_v1 = vld [vmem:[#allocation8 + $0x1328] ss:$24 sps:$4 sm:$0xff]  }
 0x748   :  { %v10846_v63 = vpop.f32.mrf.mxu1  ;;  %v20849_v26 = vld [vmem:[#allocation8 + $0x12fc] ss:$24 sps:$4 sm:$0xff]   ;;  %v20847_v2 = vld [vmem:[#allocation8 + $0x12f8] ss:$24 sps:$4 sm:$0xff]  }
 0x749   :  { %v10995_v52 = vmul.f32 0.70710677, %v10845_v3  ;;  %v10847_v9 = vadd.f32 %v10846_v63, %v10804_v13  ;;  %v10983_v18 = vmul.f32 0.5, %v10845_v3  ;;  %v20855_v3 = vld [vmem:[#allocation8 + $0x12cc] ss:$24 sps:$4 sm:$0xff]  }
 0x74a   :  { %v10848_v22 = vpop.f32.mrf.mxu1  ;;  %v20853_v13 = vld [vmem:[#allocation8 + $0x12c8] ss:$24 sps:$4 sm:$0xff]   ;;  %v20867_v63 = vld [vmem:[#allocation8 + $0x126c] ss:$24 sps:$4 sm:$0xff]  }
 0x74b   :  { %21659 = verf.f32 %v10995_v52  ;;  %v11000_v48 = vmul.f32 0.70710677, %v10847_v9  ;;  %v10849_v16 = vadd.f32 %v10848_v22, %v10806_v55  ;;  %v10988_v6 = vmul.f32 0.5, %v10847_v9  ;;  %v10885_v52 = vpop.f32.mrf.mxu0  ;;  %v20865_v9 = vld [vmem:[#allocation8 + $0x1268] ss:$24 sps:$4 sm:$0xff]  }
 0x74c   :  { %21661 = verf.f32 %v10994_v40  ;;  %v20859_v40 = vld [vmem:[#allocation8 + $0x1298] ss:$24 sps:$4 sm:$0xff]   ;;  %v20873_v55 = vld [vmem:[#allocation8 + $0x123c] ss:$24 sps:$4 sm:$0xff]  }
 0x74d   :  { %21663 = verf.f32 %v11000_v48  ;;  %v11001_v23 = vmul.f32 0.70710677, %v10849_v16  ;;  %v10989_v33 = vmul.f32 0.5, %v10849_v16  ;;  %v10887_v22 = vpop.f32.mrf.mxu0  ;;  %v20871_v48 = vld [vmem:[#allocation8 + $0x1238] ss:$24 sps:$4 sm:$0xff]  }
 0x74e   :  { %v20879_v16 = vld [vmem:[#allocation8 + $0x120c] ss:$24 sps:$4 sm:$0xff]  }
 0x74f   :  { %21665 = verf.f32 %v11001_v23  ;;  %v10889_v23 = vpop.f32.mrf.mxu0 }
 0x758   :  { %v21660_v4 = vpop.eup %21659 }
 0x759   :  { %v21662_v7 = vpop.eup %21661  ;;  %v11019_v60 = vadd.f32 1.0, %v21660_v4  ;;  %v20877_v4 = vld [vmem:[#allocation8 + $0x1208] ss:$24 sps:$4 sm:$0xff]  }
 0x75a   :  { %v21664_v45 = vpop.eup %21663  ;;  %v11018_v50 = vadd.f32 1.0, %v21662_v7  ;;  %v20885_v7 = vld [vmem:[#allocation8 + $0x14dc] ss:$24 sps:$4 sm:$0xff]  }
 0x75b   :  { %v11024_v19 = vadd.f32 1.0, %v21664_v45  ;;  %v11031_v41 = vmul.f32 %v11019_v60, %v10983_v18  ;;  %v9142_v45 = vrot.slane %v22243_v17, %v21991_v30  ;;  %v10891_v60 = vpop.f32.mrf.mxu0 }
 0x75c   :  { %v21666_v61 = vpop.eup %21665  ;;  %v11030_v38 = vmul.f32 %v11018_v50, %v10982_v25  ;;  %v20883_v50 = vld [vmem:[#allocation8 + $0x14d8] ss:$24 sps:$4 sm:$0xff]  }
 0x75d   :  { %v11025_v29 = vadd.f32 1.0, %v21666_v61  ;;  %v11036_v10 = vmul.f32 %v11024_v19, %v10988_v6  ;;  %v9146_v19 = vrot.slane %v22243_v17, %v21994_v32  ;;  %v20891_v6 = vld [vmem:[#allocation8 + $0x14ac] ss:$24 sps:$4 sm:$0xff]   ;;  %v10886_v18 = vadd.f32 %v10885_v52, %v9142_v45 }
 0x75e   :  { %v20903_v52 = vld [vmem:[#allocation8 + $0x144c] ss:$24 sps:$4 sm:$0xff]  }
 0x75f   :  { %v11037_v56 = vmul.f32 %v11025_v29, %v10989_v33  ;;  %v22280_v0 = vpack.c.bf16 %v11036_v10, %v11030_v38  ;;  %v10888_v29 = vadd.f32 %v10887_v22, %v9146_v19  ;;  %v20897_v38 = vld [vmem:[#allocation8 + $0x147c] ss:$24 sps:$4 sm:$0xff]  }
 0x761   :  { %v22278_v57 = vpack.c.bf16 %v11037_v56, %v11031_v41  ;;  %v20889_v41 = vld [vmem:[#allocation8 + $0x14a8] ss:$24 sps:$4 sm:$0xff]  }
 0x763   :  { %12849 = vmatprep.mubr.bf16.mxu0 %v22278_v57 }
 0x764   :  { %12850 = vmatmul.mubr.bf16.vlgmr.msra.gmra.mxu0 %v22280_v0 }
 0x765   :  { %12904 = vmatpush1.bf16.msra.mxu0 %v20835_v34  ;;  %12935 = vmatprep.mubr.bf16.mxu0 %v22266_v62  ;;  %v10890_v34 = vadd.f32 %v10889_v23, %v9142_v45  ;;  %v20901_v23 = vld [vmem:[#allocation8 + $0x1448] ss:$24 sps:$4 sm:$0xff]  }
 0x766   :  { %12905 = vmatprep.subr.bf16.mxu0 %v20843_v24 }
 0x769   :  { %12906 = vmatpush1.bf16.msra.mxu0 %v20841_v1 }
 0x76a   :  { %12907 = vmatprep.subr.bf16.mxu0 %v20849_v26 }
 0x76d   :  { %12908 = vmatpush1.bf16.msra.mxu0 %v20847_v2 }
 0x76e   :  { %12909 = vmatprep.subr.bf16.mxu0 %v20855_v3 }
 0x771   :  { %12910 = vmatpush1.bf16.msra.mxu0 %v20853_v13 }
 0x772   :  { %12911 = vmatprep.subr.bf16.mxu0 %v20861_v5  ;;  %v20895_v5 = vld [vmem:[#allocation8 + $0x1478] ss:$24 sps:$4 sm:$0xff]  }
 0x775   :  { %12912 = vmatpush1.bf16.msra.mxu0 %v20859_v40  ;;  %v10892_v40 = vadd.f32 %v10891_v60, %v9146_v19  ;;  %v20915_v60 = vld [vmem:[#allocation8 + $0x13ec] ss:$24 sps:$4 sm:$0xff]   ;;  %v20913_v19 = vld [vmem:[#allocation8 + $0x13e8] ss:$24 sps:$4 sm:$0xff]  }
 0x776   :  { %12913 = vmatprep.subr.bf16.mxu0 %v20867_v63 }
 0x779   :  { %12914 = vmatpush1.bf16.msra.mxu0 %v20865_v9 }
 0x77a   :  { %12915 = vmatprep.subr.bf16.mxu0 %v20873_v55 }
 0x77d   :  { %12916 = vmatpush1.bf16.msra.mxu0 %v20871_v48 }
 0x77e   :  { %12917 = vmatprep.subr.bf16.mxu0 %v20879_v16 }
 0x781   :  { %12918 = vmatpush1.bf16.msra.mxu0 %v20877_v4 }
 0x782   :  { %v10971_v61 = vpop.f32.mrf.mxu0  ;;  %12919 = vmatprep.subr.bf16.mxu0 %v20885_v7  ;;  %v20909_v7 = vld [vmem:[#allocation8 + $0x141c] ss:$24 sps:$4 sm:$0xff]  }
 0x784   :  { %v10928_v33 = vpop.f32.mrf.mxu1  ;;  %v10973_v10 = vpop.f32.mrf.mxu0 }
 0x785   :  { %v10929_v25 = vadd.f32 %v10928_v33, %v10886_v18  ;;  %12920 = vmatpush2.bf16.msra.mxu0 %v20883_v50  ;;  %v20921_v50 = vld [vmem:[#allocation8 + $0x13bc] ss:$24 sps:$4 sm:$0xff]   ;;  %v20927_v33 = vld [vmem:[#allocation8 + $0x138c] ss:$24 sps:$4 sm:$0xff]  }
 0x786   :  { %v10930_v56 = vpop.f32.mrf.mxu1  ;;  %12921 = vmatprep.subr.bf16.mxu0 %v20891_v6  ;;  %v10975_v3 = vpop.f32.mrf.mxu0  ;;  %v20919_v6 = vld [vmem:[#allocation8 + $0x13b8] ss:$24 sps:$4 sm:$0xff]  }
 0x787   :  { %v10972_v24 = vadd.f32 %v10971_v61, %v10929_v25  ;;  %v10931_v1 = vadd.f32 %v10930_v56, %v10888_v29  ;;  %v20907_v61 = vld [vmem:[#allocation8 + $0x1418] ss:$24 sps:$4 sm:$0xff]   ;;  %v20933_v56 = vld [vmem:[#allocation8 + $0x195c] ss:$24 sps:$4 sm:$0xff]  }
 0x788   :  { %v10932_v26 = vpop.f32.mrf.mxu1  ;;  %v10977_v16 = vpop.f32.mrf.mxu0 }
 0x789   :  { %v10996_v17 = vmul.f32 0.70710677, %v10972_v24  ;;  %v10974_v2 = vadd.f32 %v10973_v10, %v10931_v1  ;;  %v10933_v13 = vadd.f32 %v10932_v26, %v10890_v34  ;;  %12922 = vmatpush2.bf16.msra.mxu0 %v20889_v41  ;;  %v20925_v41 = vld [vmem:[#allocation8 + $0x1388] ss:$24 sps:$4 sm:$0xff]  }
 0x78a   :  { %v10934_v63 = vpop.f32.mrf.mxu1  ;;  %12923 = vmatprep.subr.bf16.mxu0 %v20897_v38 }
 0x78b   :  { %v10997_v9 = vmul.f32 0.70710677, %v10974_v2  ;;  %v10976_v55 = vadd.f32 %v10975_v3, %v10933_v13  ;;  %v10935_v22 = vadd.f32 %v10934_v63, %v10892_v40  ;;  %21667 = verf.f32 %v10996_v17  ;;  %v20931_v63 = vld [vmem:[#allocation8 + $0x1958] ss:$24 sps:$4 sm:$0xff]  }
 0x78c   :  { %v10985_v17 = vmul.f32 0.5, %v10974_v2  ;;  %v20937_v2 = vld [vmem:[#allocation8 + $0x1928] ss:$24 sps:$4 sm:$0xff]  }
 0x78d   :  { %v11002_v48 = vmul.f32 0.70710677, %v10976_v55  ;;  %12924 = vmatpush2.bf16.msra.mxu0 %v20895_v5  ;;  %21669 = verf.f32 %v10997_v9  ;;  %v10978_v4 = vadd.f32 %v10977_v16, %v10935_v22  ;;  %v10990_v26 = vmul.f32 0.5, %v10976_v55  ;;  %v20942_v55 = vld [vmem:[#allocation8 + $0x162c] ss:$24 sps:$4 sm:$0xff]  }
 0x78e   :  { %12925 = vmatprep.subr.bf16.mxu0 %v20903_v52  ;;  %v10984_v5 = vmul.f32 0.5, %v10972_v24  ;;  %v20945_v24 = vld [vmem:[#allocation8 + $0x18fc] ss:$24 sps:$4 sm:$0xff]  }
 0x78f   :  { %21671 = verf.f32 %v11002_v48  ;;  %v11003_v45 = vmul.f32 0.70710677, %v10978_v4  ;;  %v10991_v3 = vmul.f32 0.5, %v10978_v4  ;;  %v20939_v48 = vld [vmem:[#allocation8 + $0x192c] ss:$24 sps:$4 sm:$0xff]  }
 0x790   :  { %v20940_v4 = vld [vmem:[#allocation8 + $0x1628] ss:$24 sps:$4 sm:$0xff]  }
 0x791   :  { %12926 = vmatpush2.bf16.msra.mxu0 %v20901_v23  ;;  %21673 = verf.f32 %v11003_v45  ;;  %v20934_v23 = vld [vmem:[#allocation8 + $0x1658] ss:$24 sps:$4 sm:$0xff]  }
 0x792   :  { %12927 = vmatprep.subr.bf16.mxu0 %v20909_v7  ;;  %v20943_v45 = vld [vmem:[#allocation8 + $0x18f8] ss:$24 sps:$4 sm:$0xff]  }
 0x795   :  { %12928 = vmatpush2.bf16.msra.mxu0 %v20907_v61  ;;  %v20948_v61 = vld [vmem:[#allocation8 + $0x15fc] ss:$24 sps:$4 sm:$0xff]  }
 0x796   :  { %12929 = vmatprep.subr.bf16.mxu0 %v20915_v60  ;;  %v20951_v60 = vld [vmem:[#allocation8 + $0x18cc] ss:$24 sps:$4 sm:$0xff]  }
 0x798   :  { %v21668_v18 = vpop.eup %21667 }
 0x799   :  { %12930 = vmatpush2.bf16.msra.mxu0 %v20913_v19  ;;  %v11020_v1 = vadd.f32 1.0, %v21668_v18  ;;  %v20946_v19 = vld [vmem:[#allocation8 + $0x15f8] ss:$24 sps:$4 sm:$0xff]   ;;  %v20957_v18 = vld [vmem:[#allocation8 + $0x189c] ss:$24 sps:$4 sm:$0xff]  }
 0x79a   :  { %12931 = vmatprep.subr.bf16.mxu0 %v20921_v50  ;;  %v21670_v29 = vpop.eup %21669  ;;  %v20949_v50 = vld [vmem:[#allocation8 + $0x18c8] ss:$24 sps:$4 sm:$0xff]  }
 0x79b   :  { %v11021_v38 = vadd.f32 1.0, %v21670_v29  ;;  %v11032_v22 = vmul.f32 %v11020_v1, %v10984_v5  ;;  %v20955_v29 = vld [vmem:[#allocation8 + $0x1898] ss:$24 sps:$4 sm:$0xff]   ;;  %v20964_v1 = vld [vmem:[#allocation8 + $0x1568] ss:$24 sps:$4 sm:$0xff]  }
 0x79c   :  { %v21672_v25 = vpop.eup %21671  ;;  %v20973_v5 = vld [vmem:[#allocation8 + $0x1808] ss:$24 sps:$4 sm:$0xff]  }
 0x79d   :  { %v11026_v10 = vadd.f32 1.0, %v21672_v25  ;;  %12932 = vmatpush2.bf16.msra.mxu0 %v20919_v6  ;;  %v11033_v52 = vmul.f32 %v11021_v38, %v10985_v17  ;;  %v20954_v6 = vld [vmem:[#allocation8 + $0x15cc] ss:$24 sps:$4 sm:$0xff]   ;;  %v20960_v25 = vld [vmem:[#allocation8 + $0x159c] ss:$24 sps:$4 sm:$0xff]  }
 0x79e   :  { %12933 = vmatprep.subr.bf16.mxu0 %v20927_v33  ;;  %v21674_v34 = vpop.eup %21673  ;;  %v20952_v33 = vld [vmem:[#allocation8 + $0x15c8] ss:$24 sps:$4 sm:$0xff]   ;;  %v20966_v38 = vld [vmem:[#allocation8 + $0x156c] ss:$24 sps:$4 sm:$0xff]   ;;  %v20972_v17 = vld [vmem:[#allocation8 + $0x153c] ss:$24 sps:$4 sm:$0xff]  }
 0x79f   :  { %v11027_v13 = vadd.f32 1.0, %v21674_v34  ;;  %v11038_v40 = vmul.f32 %v11026_v10, %v10990_v26  ;;  %v20963_v10 = vld [vmem:[#allocation8 + $0x186c] ss:$24 sps:$4 sm:$0xff]   ;;  %v20969_v34 = vld [vmem:[#allocation8 + $0x183c] ss:$24 sps:$4 sm:$0xff]  }
 0x7a0   :  { %v20967_v26 = vld [vmem:[#allocation8 + $0x1838] ss:$24 sps:$4 sm:$0xff]  }
 0x7a1   :  { %12934 = vmatpush2.bf16.msra.mxu0 %v20925_v41  ;;  %v11039_v9 = vmul.f32 %v11027_v13, %v10991_v3  ;;  %v22292_v7 = vpack.c.bf16 %v11038_v40, %v11032_v22  ;;  %v20958_v41 = vld [vmem:[#allocation8 + $0x1598] ss:$24 sps:$4 sm:$0xff]   ;;  %v20975_v3 = vld [vmem:[#allocation8 + $0x180c] ss:$24 sps:$4 sm:$0xff]   ;;  %v20984_v22 = vld [vmem:[#allocation8 + $0x17dc] ss:$24 sps:$4 sm:$0xff]  }
 0x7a2   :  { %12989 = vmatprep.subr.bf16.mxu0 %v20933_v56  ;;  %v20961_v56 = vld [vmem:[#allocation8 + $0x1868] ss:$24 sps:$4 sm:$0xff]   ;;  %v20970_v13 = vld [vmem:[#allocation8 + $0x1538] ss:$24 sps:$4 sm:$0xff]   ;;  %v20978_v40 = vld [vmem:[#allocation8 + $0x150c] ss:$24 sps:$4 sm:$0xff]  }
 0x7a3   :  { %v22290_v16 = vpack.c.bf16 %v11039_v9, %v11033_v52  ;;  %v20976_v52 = vld [vmem:[#allocation8 + $0x1508] ss:$24 sps:$4 sm:$0xff]   ;;  %v20979_v9 = vld [vmem:[#allocation8 + $0x1ad8] ss:$24 sps:$4 sm:$0xff]  }
 0x7a4   :  { %12936 = vmatmul.mubr.bf16.vlgmr.msra.gmra.mxu0 %v22271_v53 }
 0x7a5   :  { %12990 = vmatpush1.bf16.msra.mxu0 %v20931_v63  ;;  %12892 = vmatprep.mubr.bf16.mxu1 %v22290_v16  ;;  %v20981_v63 = vld [vmem:[#allocation8 + $0x1adc] ss:$24 sps:$4 sm:$0xff]  }
 0x7a6   :  { %13021 = vmatprep.mubr.bf16.mxu0 %v22290_v16  ;;  %12893 = vmatmul.mubr.bf16.vlgmr.msra.gmra.mxu1 %v22292_v7 }
 0x7a7   :  { %12991 = vmatprep.subr.bf16.mxu0 %v20939_v48  ;;  %12947 = vmatpush1.bf16.msra.mxu1 %v20934_v23  ;;  %v20987_v48 = vld [vmem:[#allocation8 + $0x1aac] ss:$24 sps:$4 sm:$0xff]   ;;  %v20982_v23 = vld [vmem:[#allocation8 + $0x17d8] ss:$24 sps:$4 sm:$0xff]  }
 0x7a8   :  { %12978 = vmatprep.mubr.bf16.mxu1 %v22278_v57  ;;  %12948 = vmatprep.subr.bf16.mxu1 %v20942_v55  ;;  %v20990_v55 = vld [vmem:[#allocation8 + $0x17ac] ss:$24 sps:$4 sm:$0xff]  }
 0x7a9   :  { %12992 = vmatpush1.bf16.msra.mxu0 %v20937_v2  ;;  %v20985_v2 = vld [vmem:[#allocation8 + $0x1aa8] ss:$24 sps:$4 sm:$0xff]  }
 0x7aa   :  { %12993 = vmatprep.subr.bf16.mxu0 %v20945_v24  ;;  %v20993_v24 = vld [vmem:[#allocation8 + $0x1a7c] ss:$24 sps:$4 sm:$0xff]  }
 0x7ab   :  { %12949 = vmatpush1.bf16.msra.mxu1 %v20940_v4  ;;  %v20988_v4 = vld [vmem:[#allocation8 + $0x17a8] ss:$24 sps:$4 sm:$0xff]  }
 0x7ac   :  { %12950 = vmatprep.subr.bf16.mxu1 %v20948_v61  ;;  %v20996_v61 = vld [vmem:[#allocation8 + $0x177c] ss:$24 sps:$4 sm:$0xff]  }
 0x7ad   :  { %12994 = vmatpush1.bf16.msra.mxu0 %v20943_v45  ;;  %v20991_v45 = vld [vmem:[#allocation8 + $0x1a78] ss:$24 sps:$4 sm:$0xff]  }
 0x7ae   :  { %12995 = vmatprep.subr.bf16.mxu0 %v20951_v60  ;;  %v20999_v60 = vld [vmem:[#allocation8 + $0x1a4c] ss:$24 sps:$4 sm:$0xff]  }
 0x7af   :  { %12951 = vmatpush1.bf16.msra.mxu1 %v20946_v19  ;;  %v20994_v19 = vld [vmem:[#allocation8 + $0x1778] ss:$24 sps:$4 sm:$0xff]  }
 0x7b0   :  { %12952 = vmatprep.subr.bf16.mxu1 %v20954_v6  ;;  %v21002_v6 = vld [vmem:[#allocation8 + $0x174c] ss:$24 sps:$4 sm:$0xff]  }
 0x7b1   :  { %12996 = vmatpush1.bf16.msra.mxu0 %v20949_v50  ;;  %v20997_v50 = vld [vmem:[#allocation8 + $0x1a48] ss:$24 sps:$4 sm:$0xff]  }
 0x7b2   :  { %12997 = vmatprep.subr.bf16.mxu0 %v20957_v18  ;;  %v21005_v18 = vld [vmem:[#allocation8 + $0x1a1c] ss:$24 sps:$4 sm:$0xff]  }
 0x7b3   :  { %12953 = vmatpush1.bf16.msra.mxu1 %v20952_v33  ;;  %v21000_v33 = vld [vmem:[#allocation8 + $0x1748] ss:$24 sps:$4 sm:$0xff]  }
 0x7b4   :  { %12954 = vmatprep.subr.bf16.mxu1 %v20960_v25  ;;  %v21008_v25 = vld [vmem:[#allocation8 + $0x171c] ss:$24 sps:$4 sm:$0xff]  }
 0x7b5   :  { %12998 = vmatpush1.bf16.msra.mxu0 %v20955_v29  ;;  %v21003_v29 = vld [vmem:[#allocation8 + $0x1a18] ss:$24 sps:$4 sm:$0xff]  }
 0x7b6   :  { %12999 = vmatprep.subr.bf16.mxu0 %v20963_v10  ;;  %v21011_v10 = vld [vmem:[#allocation8 + $0x19ec] ss:$24 sps:$4 sm:$0xff]  }
 0x7b7   :  { %12955 = vmatpush1.bf16.msra.mxu1 %v20958_v41  ;;  %v21006_v41 = vld [vmem:[#allocation8 + $0x1718] ss:$24 sps:$4 sm:$0xff]  }
 0x7b8   :  { %12956 = vmatprep.subr.bf16.mxu1 %v20966_v38  ;;  %v21014_v38 = vld [vmem:[#allocation8 + $0x16ec] ss:$24 sps:$4 sm:$0xff]  }
 0x7b9   :  { %13000 = vmatpush1.bf16.msra.mxu0 %v20961_v56  ;;  %v21009_v56 = vld [vmem:[#allocation8 + $0x19e8] ss:$24 sps:$4 sm:$0xff]  }
 0x7ba   :  { %13001 = vmatprep.subr.bf16.mxu0 %v20969_v34  ;;  %v21017_v34 = vld [vmem:[#allocation8 + $0x19bc] ss:$24 sps:$4 sm:$0xff]  }
 0x7bb   :  { %12957 = vmatpush1.bf16.msra.mxu1 %v20964_v1  ;;  %v21012_v1 = vld [vmem:[#allocation8 + $0x16e8] ss:$24 sps:$4 sm:$0xff]  }
 0x7bc   :  { %12958 = vmatprep.subr.bf16.mxu1 %v20972_v17  ;;  %v21020_v17 = vld [vmem:[#allocation8 + $0x16bc] ss:$24 sps:$4 sm:$0xff]  }
 0x7bd   :  { %13002 = vmatpush1.bf16.msra.mxu0 %v20967_v26  ;;  %v21015_v26 = vld [vmem:[#allocation8 + $0x19b8] ss:$24 sps:$4 sm:$0xff]  }
 0x7be   :  { %13003 = vmatprep.subr.bf16.mxu0 %v20975_v3  ;;  %v21023_v3 = vld [vmem:[#allocation8 + $0x198c] ss:$24 sps:$4 sm:$0xff]  }
 0x7bf   :  { %12959 = vmatpush1.bf16.msra.mxu1 %v20970_v13  ;;  %v21018_v13 = vld [vmem:[#allocation8 + $0x16b8] ss:$24 sps:$4 sm:$0xff]  }
 0x7c0   :  { %12960 = vmatprep.subr.bf16.mxu1 %v20978_v40  ;;  %v21026_v40 = vld [vmem:[#allocation8 + $0x168c] ss:$24 sps:$4 sm:$0xff]  }
 0x7c1   :  { %13004 = vmatpush1.bf16.msra.mxu0 %v20973_v5  ;;  %v21021_v5 = vld [vmem:[#allocation8 + $0x1988] ss:$24 sps:$4 sm:$0xff]  }
 0x7c2   :  { %13005 = vmatprep.subr.bf16.mxu0 %v20981_v63  ;;  %v21029_v63 = vld [vmem:[#allocation8 + $0x1664] ss:$24 sps:$4 sm:$0xff]  }
 0x7c3   :  { %12961 = vmatpush1.bf16.msra.mxu1 %v20976_v52  ;;  %v21024_v52 = vld [vmem:[#allocation8 + $0x1688] ss:$24 sps:$4 sm:$0xff]  }
 0x7c4   :  { %12962 = vmatprep.subr.bf16.mxu1 %v20984_v22  ;;  %v21032_v22 = vld [vmem:[#allocation8 + $0x1364] ss:$24 sps:$4 sm:$0xff]  }
 0x7c5   :  { %13006 = vmatpush2.bf16.msra.mxu0 %v20979_v9  ;;  %v21027_v9 = vld [vmem:[#allocation8 + $0x1660] ss:$24 sps:$4 sm:$0xff]  }
 0x7c6   :  { %13007 = vmatprep.subr.bf16.mxu0 %v20987_v48  ;;  %v21035_v48 = vld [vmem:[#allocation8 + $0x1634] ss:$24 sps:$4 sm:$0xff]  }
 0x7c7   :  { %12963 = vmatpush2.bf16.msra.mxu1 %v20982_v23  ;;  %v21030_v23 = vld [vmem:[#allocation8 + $0x1360] ss:$24 sps:$4 sm:$0xff]  }
 0x7c8   :  { %12964 = vmatprep.subr.bf16.mxu1 %v20990_v55  ;;  %v21038_v55 = vld [vmem:[#allocation8 + $0x1334] ss:$24 sps:$4 sm:$0xff]  }
 0x7c9   :  { %13008 = vmatpush2.bf16.msra.mxu0 %v20985_v2  ;;  %v21033_v2 = vld [vmem:[#allocation8 + $0x1630] ss:$24 sps:$4 sm:$0xff]  }
 0x7ca   :  { %13009 = vmatprep.subr.bf16.mxu0 %v20993_v24  ;;  %v21041_v24 = vld [vmem:[#allocation8 + $0x1604] ss:$24 sps:$4 sm:$0xff]  }
 0x7cb   :  { %12965 = vmatpush2.bf16.msra.mxu1 %v20988_v4  ;;  %v21036_v4 = vld [vmem:[#allocation8 + $0x1330] ss:$24 sps:$4 sm:$0xff]  }
 0x7cc   :  { %12966 = vmatprep.subr.bf16.mxu1 %v20996_v61  ;;  %v21044_v61 = vld [vmem:[#allocation8 + $0x1304] ss:$24 sps:$4 sm:$0xff]  }
 0x7cd   :  { %13010 = vmatpush2.bf16.msra.mxu0 %v20991_v45  ;;  %v21039_v45 = vld [vmem:[#allocation8 + $0x1600] ss:$24 sps:$4 sm:$0xff]  }
 0x7ce   :  { %13011 = vmatprep.subr.bf16.mxu0 %v20999_v60  ;;  %v21047_v60 = vld [vmem:[#allocation8 + $0x15d4] ss:$24 sps:$4 sm:$0xff]  }
 0x7cf   :  { %12967 = vmatpush2.bf16.msra.mxu1 %v20994_v19  ;;  %v21042_v19 = vld [vmem:[#allocation8 + $0x1300] ss:$24 sps:$4 sm:$0xff]  }
 0x7d0   :  { %12968 = vmatprep.subr.bf16.mxu1 %v21002_v6  ;;  %v21053_v6 = vld [vmem:[#allocation8 + $0x15a4] ss:$24 sps:$4 sm:$0xff]  }
 0x7d1   :  { %13012 = vmatpush2.bf16.msra.mxu0 %v20997_v50  ;;  %v21050_v50 = vld [vmem:[#allocation8 + $0x12d4] ss:$24 sps:$4 sm:$0xff]  }
 0x7d2   :  { %13013 = vmatprep.subr.bf16.mxu0 %v21005_v18  ;;  %v21048_v18 = vld [vmem:[#allocation8 + $0x12d0] ss:$24 sps:$4 sm:$0xff]  }
 0x7d3   :  { %12969 = vmatpush2.bf16.msra.mxu1 %v21000_v33  ;;  %v21056_v33 = vld [vmem:[#allocation8 + $0x12a4] ss:$24 sps:$4 sm:$0xff]  }
 0x7d4   :  { %12970 = vmatprep.subr.bf16.mxu1 %v21008_v25  ;;  %v21054_v25 = vld [vmem:[#allocation8 + $0x12a0] ss:$24 sps:$4 sm:$0xff]  }
 0x7d5   :  { %13014 = vmatpush2.bf16.msra.mxu0 %v21003_v29  ;;  %v21059_v29 = vld [vmem:[#allocation8 + $0x1574] ss:$24 sps:$4 sm:$0xff]  }
 0x7d6   :  { %13015 = vmatprep.subr.bf16.mxu0 %v21011_v10  ;;  %v21057_v10 = vld [vmem:[#allocation8 + $0x1570] ss:$24 sps:$4 sm:$0xff]  }
 0x7d7   :  { %12971 = vmatpush2.bf16.msra.mxu1 %v21006_v41  ;;  %v21062_v41 = vld [vmem:[#allocation8 + $0x1274] ss:$24 sps:$4 sm:$0xff]  }
 0x7d8   :  { %12972 = vmatprep.subr.bf16.mxu1 %v21014_v38  ;;  %v21060_v38 = vld [vmem:[#allocation8 + $0x1270] ss:$24 sps:$4 sm:$0xff]  }
 0x7d9   :  { %13016 = vmatpush2.bf16.msra.mxu0 %v21009_v56  ;;  %v21065_v56 = vld [vmem:[#allocation8 + $0x1544] ss:$24 sps:$4 sm:$0xff]  }
 0x7da   :  { %13017 = vmatprep.subr.bf16.mxu0 %v21017_v34  ;;  %v21063_v34 = vld [vmem:[#allocation8 + $0x1540] ss:$24 sps:$4 sm:$0xff]  }
 0x7db   :  { %12973 = vmatpush2.bf16.msra.mxu1 %v21012_v1  ;;  %v21068_v1 = vld [vmem:[#allocation8 + $0x1244] ss:$24 sps:$4 sm:$0xff]  }
 0x7dc   :  { %12974 = vmatprep.subr.bf16.mxu1 %v21020_v17  ;;  %v21066_v17 = vld [vmem:[#allocation8 + $0x1240] ss:$24 sps:$4 sm:$0xff]  }
 0x7dd   :  { %13018 = vmatpush2.bf16.msra.mxu0 %v21015_v26  ;;  %v21071_v26 = vld [vmem:[#allocation8 + $0x1514] ss:$24 sps:$4 sm:$0xff]  }
 0x7de   :  { %13019 = vmatprep.subr.bf16.mxu0 %v21023_v3  ;;  %v21069_v3 = vld [vmem:[#allocation8 + $0x1510] ss:$24 sps:$4 sm:$0xff]  }
 0x7df   :  { %12975 = vmatpush2.bf16.msra.mxu1 %v21018_v13  ;;  %v21074_v13 = vld [vmem:[#allocation8 + $0x1214] ss:$24 sps:$4 sm:$0xff]  }
 0x7e0   :  { %12976 = vmatprep.subr.bf16.mxu1 %v21026_v40  ;;  %v21072_v40 = vld [vmem:[#allocation8 + $0x1210] ss:$24 sps:$4 sm:$0xff]  }
 0x7e1   :  { %13020 = vmatpush2.bf16.msra.mxu0 %v21021_v5  ;;  %v21077_v5 = vld [vmem:[#allocation8 + $0x17e4] ss:$24 sps:$4 sm:$0xff]  }
 0x7e2   :  { %13075 = vmatprep.subr.bf16.mxu0 %v21029_v63  ;;  %v21075_v63 = vld [vmem:[#allocation8 + $0x17e0] ss:$24 sps:$4 sm:$0xff]  }
 0x7e3   :  { %12977 = vmatpush2.bf16.msra.mxu1 %v21024_v52  ;;  %v21080_v52 = vld [vmem:[#allocation8 + $0x14e4] ss:$24 sps:$4 sm:$0xff]  }
 0x7e4   :  { %13022 = vmatmul.mubr.bf16.vlgmr.msra.gmra.mxu0 %v22292_v7  ;;  %13032 = vmatprep.subr.bf16.mxu1 %v21032_v22  ;;  %v21078_v22 = vld [vmem:[#allocation8 + $0x14e0] ss:$24 sps:$4 sm:$0xff]  }
 0x7e5   :  { %13076 = vmatpush1.bf16.msra.mxu0 %v21027_v9  ;;  %13107 = vmatprep.mubr.bf16.mxu0 %v22278_v57  ;;  %v21045_v57 = vld [vmem:[#allocation8 + $0x15d0] ss:$24 sps:$4 sm:$0xff]   ;;  %v21083_v9 = vld [vmem:[#allocation8 + $0x17b4] ss:$24 sps:$4 sm:$0xff]  }
 0x7e6   :  { %13077 = vmatprep.subr.bf16.mxu0 %v21035_v48  ;;  %12979 = vmatmul.mubr.bf16.vlgmr.msra.gmra.mxu1 %v22280_v0  ;;  %v21081_v48 = vld [vmem:[#allocation8 + $0x17b0] ss:$24 sps:$4 sm:$0xff]  }
 0x7e7   :  { %13033 = vmatpush1.bf16.msra.mxu1 %v21030_v23  ;;  %13064 = vmatprep.mubr.bf16.mxu1 %v22266_v62  ;;  %v21051_v62 = vld [vmem:[#allocation8 + $0x15a0] ss:$24 sps:$4 sm:$0xff]   ;;  %v21086_v23 = vld [vmem:[#allocation8 + $0x14b4] ss:$24 sps:$4 sm:$0xff]  }
 0x7e8   :  { %13034 = vmatprep.subr.bf16.mxu1 %v21038_v55  ;;  %v21084_v55 = vld [vmem:[#allocation8 + $0x14b0] ss:$24 sps:$4 sm:$0xff]  }
 0x7e9   :  { %13078 = vmatpush1.bf16.msra.mxu0 %v21033_v2  ;;  %v21089_v2 = vld [vmem:[#allocation8 + $0x1784] ss:$24 sps:$4 sm:$0xff]  }
 0x7ea   :  { %13079 = vmatprep.subr.bf16.mxu0 %v21041_v24  ;;  %v21087_v24 = vld [vmem:[#allocation8 + $0x1780] ss:$24 sps:$4 sm:$0xff]  }
 0x7eb   :  { %13035 = vmatpush1.bf16.msra.mxu1 %v21036_v4  ;;  %v21092_v4 = vld [vmem:[#allocation8 + $0x1484] ss:$24 sps:$4 sm:$0xff]  }
 0x7ec   :  { %13036 = vmatprep.subr.bf16.mxu1 %v21044_v61  ;;  %v21090_v61 = vld [vmem:[#allocation8 + $0x1480] ss:$24 sps:$4 sm:$0xff]  }
 0x7ed   :  { %13080 = vmatpush1.bf16.msra.mxu0 %v21039_v45  ;;  %v21095_v45 = vld [vmem:[#allocation8 + $0x1754] ss:$24 sps:$4 sm:$0xff]  }
 0x7ee   :  { %13081 = vmatprep.subr.bf16.mxu0 %v21047_v60  ;;  %v21093_v60 = vld [vmem:[#allocation8 + $0x1750] ss:$24 sps:$4 sm:$0xff]  }
 0x7ef   :  { %13037 = vmatpush1.bf16.msra.mxu1 %v21042_v19  ;;  %v21098_v19 = vld [vmem:[#allocation8 + $0x1454] ss:$24 sps:$4 sm:$0xff]  }
 0x7f0   :  { %13038 = vmatprep.subr.bf16.mxu1 %v21050_v50  ;;  %v21096_v50 = vld [vmem:[#allocation8 + $0x1450] ss:$24 sps:$4 sm:$0xff]  }
 0x7f1   :  { %13082 = vmatpush1.bf16.msra.mxu0 %v21045_v57  ;;  %v21101_v57 = vld [vmem:[#allocation8 + $0x1724] ss:$24 sps:$4 sm:$0xff]  }
 0x7f2   :  { %13083 = vmatprep.subr.bf16.mxu0 %v21053_v6  ;;  %v21099_v6 = vld [vmem:[#allocation8 + $0x1720] ss:$24 sps:$4 sm:$0xff]  }
 0x7f3   :  { %13039 = vmatpush1.bf16.msra.mxu1 %v21048_v18  ;;  %v21104_v18 = vld [vmem:[#allocation8 + $0x1424] ss:$24 sps:$4 sm:$0xff]  }
 0x7f4   :  { %13040 = vmatprep.subr.bf16.mxu1 %v21056_v33  ;;  %v21102_v33 = vld [vmem:[#allocation8 + $0x1420] ss:$24 sps:$4 sm:$0xff]  }
 0x7f5   :  { %13084 = vmatpush1.bf16.msra.mxu0 %v21051_v62  ;;  %v21107_v62 = vld [vmem:[#allocation8 + $0x16f4] ss:$24 sps:$4 sm:$0xff]  }
 0x7f6   :  { %13085 = vmatprep.subr.bf16.mxu0 %v21059_v29  ;;  %v21105_v29 = vld [vmem:[#allocation8 + $0x16f0] ss:$24 sps:$4 sm:$0xff]  }
 0x7f7   :  { %13041 = vmatpush1.bf16.msra.mxu1 %v21054_v25  ;;  %v21110_v25 = vld [vmem:[#allocation8 + $0x13f4] ss:$24 sps:$4 sm:$0xff]  }
 0x7f8   :  { %13042 = vmatprep.subr.bf16.mxu1 %v21062_v41  ;;  %v21108_v41 = vld [vmem:[#allocation8 + $0x13f0] ss:$24 sps:$4 sm:$0xff]  }
 0x7f9   :  { %13086 = vmatpush1.bf16.msra.mxu0 %v21057_v10  ;;  %v21113_v10 = vld [vmem:[#allocation8 + $0x16c4] ss:$24 sps:$4 sm:$0xff]  }
 0x7fa   :  { %13087 = vmatprep.subr.bf16.mxu0 %v21065_v56  ;;  %v21111_v56 = vld [vmem:[#allocation8 + $0x16c0] ss:$24 sps:$4 sm:$0xff]  }
 0x7fb   :  { %13043 = vmatpush1.bf16.msra.mxu1 %v21060_v38  ;;  %v21116_v38 = vld [vmem:[#allocation8 + $0x13c4] ss:$24 sps:$4 sm:$0xff]  }
 0x7fc   :  { %13044 = vmatprep.subr.bf16.mxu1 %v21068_v1  ;;  %v13215_v1 = vld [vmem:[#allocation5 + $0x588] sm:$0xff] }
 0x7fd   :  { %13088 = vmatpush1.bf16.msra.mxu0 %v21063_v34  ;;  %v21119_v34 = vld [vmem:[#allocation8 + $0x1694] ss:$24 sps:$4 sm:$0xff]  }
 0x7fe   :  { %13089 = vmatprep.subr.bf16.mxu0 %v21071_v26  ;;  %v13218_v26 = vld [vmem:[#allocation5 + $0x5e8] sm:$0xff] }
 0x7ff   :  { %13045 = vmatpush1.bf16.msra.mxu1 %v21066_v17  ;;  %v21114_v17 = vld [vmem:[#allocation8 + $0x13c0] ss:$24 sps:$4 sm:$0xff]  }
 0x800   :  { %13046 = vmatprep.subr.bf16.mxu1 %v21074_v13  ;;  %v21122_v13 = vld [vmem:[#allocation8 + $0x1394] ss:$24 sps:$4 sm:$0xff]  }
 0x801   :  { %13090 = vmatpush1.bf16.msra.mxu0 %v21069_v3  ;;  %v21117_v3 = vld [vmem:[#allocation8 + $0x1690] ss:$24 sps:$4 sm:$0xff]  }
 0x802   :  { %13091 = vmatprep.subr.bf16.mxu0 %v21077_v5  ;;  %v22302_v5 = vpop.f32.mrf.mxu1 }
 0x803   :  { %13047 = vmatpush1.bf16.msra.mxu1 %v21072_v40  ;;  %v19321_v40 = vcombine.high %v13215_v1, %v13218_v26 }
 0x804   :  { %13048 = vmatprep.subr.bf16.mxu1 %v21080_v52  ;;  %v13212_v52 = vld [vmem:[#allocation5 + $0x528] sm:$0xff] }
 0x805   :  { %13092 = vmatpush2.bf16.msra.mxu0 %v21075_v63  ;;  %v13209_v63 = vld [vmem:[#allocation5 + $0x4c8] sm:$0xff] }
 0x806   :  { %13093 = vmatprep.subr.bf16.mxu0 %v21083_v9  ;;  %v21120_v9 = vld [vmem:[#allocation8 + $0x1390] ss:$24 sps:$4 sm:$0xff]  }
 0x807   :  { %13049 = vmatpush2.bf16.msra.mxu1 %v21078_v22  ;;  %v19320_v22 = vcombine.low %v13215_v1, %v13218_v26  ;;  %v21129_v1 = vld [vmem:[#allocation8 + $0x1900] ss:$24 sps:$4 sm:$0xff]   ;;  %v21134_v26 = vld [vmem:[#allocation8 + $0x18d4] ss:$24 sps:$4 sm:$0xff]  }
 0x808   :  { %13050 = vmatprep.subr.bf16.mxu1 %v21086_v23  ;;  %v22304_v23 = vpop.f32.mrf.mxu1 }
 0x809   :  { %13094 = vmatpush2.bf16.msra.mxu0 %v21081_v48  ;;  %v21125_v48 = vld [vmem:[#allocation8 + $0x1964] ss:$24 sps:$4 sm:$0xff]  }
 0x80a   :  { %13095 = vmatprep.subr.bf16.mxu0 %v21089_v2  ;;  %v19315_v2 = vcombine.high %v13209_v63, %v13212_v52 }
 0x80b   :  { %13051 = vmatpush2.bf16.msra.mxu1 %v21084_v55  ;;  %v13203_v55 = vld [vmem:[#allocation5 + $0x408] sm:$0xff] }
 0x80c   :  { %13052 = vmatprep.subr.bf16.mxu1 %v21092_v4 }
 0x80d   :  { %13096 = vmatpush2.bf16.msra.mxu0 %v21087_v24  ;;  %v13206_v24 = vld [vmem:[#allocation5 + $0x468] sm:$0xff] }
 0x80e   :  { %13097 = vmatprep.subr.bf16.mxu0 %v21095_v45  ;;  %v21123_v45 = vld [vmem:[#allocation8 + $0x1960] ss:$24 sps:$4 sm:$0xff]  }
 0x80f   :  { %13053 = vmatpush2.bf16.msra.mxu1 %v21090_v61  ;;  %v19314_v61 = vcombine.low %v13209_v63, %v13212_v52  ;;  %v21137_v52 = vld [vmem:[#allocation8 + $0x18a4] ss:$24 sps:$4 sm:$0xff]  }
 0x810   :  { %13054 = vmatprep.subr.bf16.mxu1 %v21098_v19  ;;  %v22309_v19 = vpop.f32.mrf.mxu1 }
 0x811   :  { %13098 = vmatpush2.bf16.msra.mxu0 %v21093_v60  ;;  %v21128_v60 = vld [vmem:[#allocation8 + $0x1934] ss:$24 sps:$4 sm:$0xff]  }
 0x812   :  { %13099 = vmatprep.subr.bf16.mxu0 %v21101_v57 }
 0x813   :  { %13055 = vmatpush2.bf16.msra.mxu1 %v21096_v50  ;;  %v19309_v50 = vcombine.high %v13203_v55, %v13206_v24 }
 0x814   :  { %13056 = vmatprep.subr.bf16.mxu1 %v21104_v18  ;;  %v13200_v18 = vld [vmem:[#allocation5 + $0x3a8] sm:$0xff] }
 0x815   :  { %13100 = vmatpush2.bf16.msra.mxu0 %v21099_v6  ;;  %v22313_v6 = vld [vmem:[#allocation2 + $0x4] ss:$24 sps:$4 sm:$0xff]  }
 0x816   :  { %13101 = vmatprep.subr.bf16.mxu0 %v21107_v62 }
 0x817   :  { %13057 = vmatpush2.bf16.msra.mxu1 %v21102_v33  ;;  %v21126_v33 = vld [vmem:[#allocation8 + $0x1930] ss:$24 sps:$4 sm:$0xff]  }
 0x818   :  { %13058 = vmatprep.subr.bf16.mxu1 %v21110_v25  ;;  %v21131_v25 = vld [vmem:[#allocation8 + $0x1904] ss:$24 sps:$4 sm:$0xff]  }
 0x819   :  { %13102 = vmatpush2.bf16.msra.mxu0 %v21105_v29  ;;  %v19308_v29 = vcombine.low %v13203_v55, %v13206_v24  ;;  %v21140_v24 = vld [vmem:[#allocation8 + $0x1874] ss:$24 sps:$4 sm:$0xff]  }
 0x81a   :  { %13103 = vmatprep.subr.bf16.mxu0 %v21113_v10  ;;  %v12814_v10 = vpop.f32.mrf.mxu1 }
 0x81b   :  { %13059 = vmatpush2.bf16.msra.mxu1 %v21108_v41 }
 0x81c   :  { %13060 = vmatprep.subr.bf16.mxu1 %v21116_v38 }
 0x81d   :  { %13104 = vmatpush2.bf16.msra.mxu0 %v21111_v56 }
 0x81e   :  { %13105 = vmatprep.subr.bf16.mxu0 %v21119_v34  ;;  %v13191_v34 = vld [vmem:[#allocation5 + $0x288] sm:$0xff] }
 0x81f   :  { %13061 = vmatpush2.bf16.msra.mxu1 %v21114_v17 }
 0x820   :  { %13062 = vmatprep.subr.bf16.mxu1 %v21122_v13  ;;  %v13188_v13 = vld [vmem:[#allocation5 + $0x228] sm:$0xff] }
 0x821   :  { %13106 = vmatpush2.bf16.msra.mxu0 %v21117_v3  ;;  %v13185_v3 = vld [vmem:[#allocation5 + $0x1c8] sm:$0xff] }
 0x822   :  { %14933 = vmatprep.subr.bf16.mxu0 %v19321_v40  ;;  %v21132_v40 = vld [vmem:[#allocation8 + $0x18d0] ss:$24 sps:$4 sm:$0xff]   ;;  %v19290_v55 = vcombine.low %v13185_v3, %v13188_v13 }
 0x823   :  { %13063 = vmatpush2.bf16.msra.mxu1 %v21120_v9  ;;  %v19291_v9 = vcombine.high %v13185_v3, %v13188_v13  ;;  %v13251_v13 = vld [vmem:[#allocation5 + $0xa08] sm:$0xff] }
 0x824   :  { %13108 = vmatmul.mubr.bf16.vlgmr.msra.gmra.mxu0 %v22280_v0  ;;  %v22307_v4 = vpop.f32.mrf.mxu0  ;;  %13118 = vmatprep.subr.bf16.mxu1 %v21125_v48  ;;  %v13197_v0 = vld [vmem:[#allocation5 + $0x348] sm:$0xff] }
 0x825   :  { %14934 = vmatpush1.bf16.msra.mxu0 %v19320_v22  ;;  %14965 = vmatprep.mubr.bf16.mxu0 %v22313_v6  ;;  %v19303_v56 = vcombine.high %v13197_v0, %v13200_v18  ;;  %v13179_v22 = vld [vmem:[#allocation5 + $0x108] sm:$0xff] }
 0x826   :  { %v22311_v57 = vpop.f32.mrf.mxu0  ;;  %14935 = vmatprep.subr.bf16.mxu0 %v19315_v2  ;;  %13065 = vmatmul.mubr.bf16.vlgmr.msra.gmra.mxu1 %v22271_v53  ;;  %v13194_v53 = vld [vmem:[#allocation5 + $0x2e8] sm:$0xff]  ;;  %v21135_v2 = vld [vmem:[#allocation8 + $0x18a0] ss:$24 sps:$4 sm:$0xff]  }
 0x827   :  { %13119 = vmatpush1.bf16.msra.mxu1 %v21123_v45  ;;  %13150 = vmatprep.mubr.bf16.mxu1 %v22290_v16  ;;  %v19302_v16 = vcombine.low %v13197_v0, %v13200_v18  ;;  %v19297_v17 = vcombine.high %v13191_v34, %v13194_v53  ;;  %v19296_v63 = vcombine.low %v13191_v34, %v13194_v53  ;;  %v13182_v48 = vld [vmem:[#allocation5 + $0x168] sm:$0xff]  ;;  %v21143_v18 = vld [vmem:[#allocation8 + $0x1844] ss:$24 sps:$4 sm:$0xff]  }
 0x828   :  { %v22318_v62 = vpop.f32.mrf.mxu0  ;;  %13120 = vmatprep.subr.bf16.mxu1 %v21128_v60  ;;  %v19285_v45 = vcombine.high %v13179_v22, %v13182_v48  ;;  %v13176_v60 = vld [vmem:[#allocation5 + $0xa8] sm:$0xff]  ;;  %v19284_v0 = vcombine.low %v13179_v22, %v13182_v48 }
 0x829   :  { %14936 = vmatpush1.bf16.msra.mxu0 %v19314_v61  ;;  %v13173_v61 = vld [vmem:[#allocation5 + $0x48] sm:$0xff] }
 0x82a   :  { %v12857_v41 = vpop.f32.mrf.mxu0  ;;  %14937 = vmatprep.subr.bf16.mxu0 %v19309_v50  ;;  %v21138_v50 = vld [vmem:[#allocation8 + $0x1870] ss:$24 sps:$4 sm:$0xff]  }
 0x82b   :  { %v22320_v38 = vadd.f32 %v12857_v41, %v12814_v10  ;;  %13121 = vmatpush1.bf16.msra.mxu1 %v21126_v33  ;;  %v19279_v33 = vcombine.high %v13173_v61, %v13176_v60  ;;  %v21141_v10 = vld [vmem:[#allocation8 + $0x1840] ss:$24 sps:$4 sm:$0xff]   ;;  %v19278_v41 = vcombine.low %v13173_v61, %v13176_v60  ;;  %v13257_v53 = vld [vmem:[#allocation5 + $0xac8] sm:$0xff] }
 0x82c   :  { %13122 = vmatprep.subr.bf16.mxu1 %v21131_v25  ;;  %v13266_v25 = vld [vmem:[#allocation5 + $0xbe8] sm:$0xff] }
 0x82d   :  { %14938 = vmatpush1.bf16.msra.mxu0 %v19308_v29  ;;  %v13263_v29 = vld [vmem:[#allocation5 + $0xb88] sm:$0xff] }
 0x82e   :  { %14939 = vmatprep.subr.bf16.mxu0 %v19303_v56  ;;  %v21146_v56 = vld [vmem:[#allocation8 + $0x1814] ss:$24 sps:$4 sm:$0xff]   ;;  %v19369_v34 = vcombine.high %v13263_v29, %v13266_v25 }
 0x82f   :  { %13123 = vmatpush1.bf16.msra.mxu1 %v21129_v1  ;;  %v13260_v1 = vld [vmem:[#allocation5 + $0xb28] sm:$0xff] }
 0x830   :  { %13124 = vmatprep.subr.bf16.mxu1 %v21134_v26  ;;  %v19368_v26 = vcombine.low %v13263_v29, %v13266_v25  ;;  %v19363_v3 = vcombine.high %v13257_v53, %v13260_v1  ;;  %v13245_v48 = vld [vmem:[#allocation5 + $0x948] sm:$0xff] }
 0x831   :  { %14940 = vmatpush1.bf16.msra.mxu0 %v19302_v16  ;;  %v21144_v16 = vld [vmem:[#allocation8 + $0x1810] ss:$24 sps:$4 sm:$0xff]  }
 0x832   :  { %14941 = vmatprep.subr.bf16.mxu0 %v19297_v17  ;;  %v21149_v17 = vld [vmem:[#allocation8 + $0x1ae4] ss:$24 sps:$4 sm:$0xff]   ;;  %v13239_v60 = vld [vmem:[#allocation5 + $0x888] sm:$0xff] }
 0x833   :  { %13125 = vmatpush1.bf16.msra.mxu1 %v21132_v40  ;;  %v13254_v40 = vld [vmem:[#allocation5 + $0xa68] sm:$0xff] }
 0x834   :  { %13126 = vmatprep.subr.bf16.mxu1 %v21137_v52  ;;  %v19362_v52 = vcombine.low %v13257_v53, %v13260_v1  ;;  %v19357_v22 = vcombine.high %v13251_v13, %v13254_v40  ;;  %v13233_v25 = vld [vmem:[#allocation5 + $0x7c8] sm:$0xff] }
 0x835   :  { %14942 = vmatpush1.bf16.msra.mxu0 %v19296_v63  ;;  %v21147_v63 = vld [vmem:[#allocation8 + $0x1ae0] ss:$24 sps:$4 sm:$0xff]   ;;  %v13227_v1 = vld [vmem:[#allocation5 + $0x708] sm:$0xff] }
 0x836   :  { %14943 = vmatprep.subr.bf16.mxu0 %v19291_v9  ;;  %v21152_v9 = vld [vmem:[#allocation8 + $0x1ab4] ss:$24 sps:$4 sm:$0xff]  }
 0x837   :  { %13127 = vmatpush1.bf16.msra.mxu1 %v21135_v2  ;;  %v13248_v2 = vld [vmem:[#allocation5 + $0x9a8] sm:$0xff] }
 0x838   :  { %13128 = vmatprep.subr.bf16.mxu1 %v21140_v24  ;;  %v19356_v24 = vcombine.low %v13251_v13, %v13254_v40  ;;  %v19351_v61 = vcombine.high %v13245_v48, %v13248_v2  ;;  %v13221_v40 = vld [vmem:[#allocation5 + $0x648] sm:$0xff] }
 0x839   :  { %14944 = vmatpush1.bf16.msra.mxu0 %v19290_v55  ;;  %v21150_v55 = vld [vmem:[#allocation8 + $0x1ab0] ss:$24 sps:$4 sm:$0xff]  }
 0x83a   :  { %14945 = vmatprep.subr.bf16.mxu0 %v19285_v45  ;;  %v21155_v45 = vld [vmem:[#allocation8 + $0x1a84] ss:$24 sps:$4 sm:$0xff]  }
 0x83b   :  { %13129 = vmatpush1.bf16.msra.mxu1 %v21138_v50  ;;  %v13242_v50 = vld [vmem:[#allocation5 + $0x8e8] sm:$0xff] }
 0x83c   :  { %13130 = vmatprep.subr.bf16.mxu1 %v21143_v18  ;;  %v19350_v18 = vcombine.low %v13245_v48, %v13248_v2  ;;  %v19345_v29 = vcombine.high %v13239_v60, %v13242_v50  ;;  %v13407_v2 = vld [vmem:[#allocation5 + $0x1d88] sm:$0xff] }
 0x83d   :  { %14946 = vmatpush1.bf16.msra.mxu0 %v19284_v0  ;;  %v21153_v0 = vld [vmem:[#allocation8 + $0x1a80] ss:$24 sps:$4 sm:$0xff]  }
 0x83e   :  { %14947 = vmatprep.subr.bf16.mxu0 %v19279_v33  ;;  %v21158_v33 = vld [vmem:[#allocation8 + $0x1a54] ss:$24 sps:$4 sm:$0xff]  }
 0x83f   :  { %13131 = vmatpush1.bf16.msra.mxu1 %v21141_v10  ;;  %v13236_v10 = vld [vmem:[#allocation5 + $0x828] sm:$0xff] }
 0x840   :  { %13132 = vmatprep.subr.bf16.mxu1 %v21146_v56  ;;  %v19344_v56 = vcombine.low %v13239_v60, %v13242_v50  ;;  %v19339_v53 = vcombine.high %v13233_v25, %v13236_v10  ;;  %v13311_v50 = vld [vmem:[#allocation5 + $0x1188] sm:$0xff] }
 0x841   :  { %14948 = vmatpush1.bf16.msra.mxu0 %v19278_v41  ;;  %v21156_v41 = vld [vmem:[#allocation8 + $0x1a50] ss:$24 sps:$4 sm:$0xff]  }
 0x842   :  { %14949 = vmatprep.subr.bf16.mxu0 %v19369_v34  ;;  %v21161_v34 = vld [vmem:[#allocation8 + $0x1a24] ss:$24 sps:$4 sm:$0xff]  }
 0x843   :  { %13133 = vmatpush1.bf16.msra.mxu1 %v21144_v16  ;;  %v13230_v16 = vld [vmem:[#allocation5 + $0x768] sm:$0xff] }
 0x844   :  { %13134 = vmatprep.subr.bf16.mxu1 %v21149_v17  ;;  %v19338_v17 = vcombine.low %v13233_v25, %v13236_v10  ;;  %v19333_v13 = vcombine.high %v13227_v1, %v13230_v16 }
 0x845   :  { %14950 = vmatpush2.bf16.msra.mxu0 %v19368_v26  ;;  %v21159_v26 = vld [vmem:[#allocation8 + $0x1a20] ss:$24 sps:$4 sm:$0xff]  }
 0x846   :  { %14951 = vmatprep.subr.bf16.mxu0 %v19363_v3  ;;  %v21164_v3 = vld [vmem:[#allocation8 + $0x19f4] ss:$24 sps:$4 sm:$0xff]  }
 0x847   :  { %13135 = vmatpush2.bf16.msra.mxu1 %v21147_v63  ;;  %v13224_v63 = vld [vmem:[#allocation5 + $0x6a8] sm:$0xff] }
 0x848   :  { %13136 = vmatprep.subr.bf16.mxu1 %v21152_v9  ;;  %v19332_v9 = vcombine.low %v13227_v1, %v13230_v16  ;;  %v19327_v48 = vcombine.high %v13221_v40, %v13224_v63  ;;  %v13398_v1 = vld [vmem:[#allocation5 + $0x1c68] sm:$0xff] }
 0x849   :  { %14952 = vmatpush2.bf16.msra.mxu0 %v19362_v52  ;;  %v21162_v52 = vld [vmem:[#allocation8 + $0x19f0] ss:$24 sps:$4 sm:$0xff]  }
 0x84a   :  { %14953 = vmatprep.subr.bf16.mxu0 %v19357_v22  ;;  %v21167_v22 = vld [vmem:[#allocation8 + $0x19c4] ss:$24 sps:$4 sm:$0xff]   ;;  %v22322_v16 = vld [vmem:[#allocation2] ss:$24 sps:$4 sm:$0xff]  }
 0x84b   :  { %13137 = vmatpush2.bf16.msra.mxu1 %v21150_v55  ;;  %v13410_v55 = vld [vmem:[#allocation5 + $0x1de8] sm:$0xff] }
 0x84c   :  { %13138 = vmatprep.subr.bf16.mxu1 %v21155_v45  ;;  %v19326_v45 = vcombine.low %v13221_v40, %v13224_v63  ;;  %v19513_v60 = vcombine.high %v13407_v2, %v13410_v55  ;;  %v19512_v25 = vcombine.low %v13407_v2, %v13410_v55  ;;  %v12852_v40 = vadd.f32 %v22307_v4, %v22302_v5  ;;  %v13392_v2 = vld [vmem:[#allocation5 + $0x1ba8] sm:$0xff]  ;;  %v22336_v4 = vld [vmem:[#allocation2 + $0xc] ss:$24 sps:$4 sm:$0xff]  }
 0x84d   :  { %14954 = vmatpush2.bf16.msra.mxu0 %v19356_v24  ;;  %v21165_v24 = vld [vmem:[#allocation8 + $0x19c0] ss:$24 sps:$4 sm:$0xff]   ;;  %v12854_v55 = vadd.f32 %v22311_v57, %v22304_v23  ;;  %v13293_v57 = vld [vmem:[#allocation5 + $0xf48] sm:$0xff] }
 0x84e   :  { %14955 = vmatprep.subr.bf16.mxu0 %v19351_v61  ;;  %v21170_v61 = vld [vmem:[#allocation8 + $0x1994] ss:$24 sps:$4 sm:$0xff]  }
 0x84f   :  { %13139 = vmatpush2.bf16.msra.mxu1 %v21153_v0  ;;  %v13314_v0 = vld [vmem:[#allocation5 + $0x11e8] sm:$0xff] }
 0x850   :  { %13140 = vmatprep.subr.bf16.mxu1 %v21158_v33  ;;  %v13404_v33 = vld [vmem:[#allocation5 + $0x1d28] sm:$0xff]  ;;  %v19417_v10 = vcombine.high %v13311_v50, %v13314_v0 }
 0x851   :  { %14956 = vmatpush2.bf16.msra.mxu0 %v19350_v18  ;;  %v13401_v18 = vld [vmem:[#allocation5 + $0x1cc8] sm:$0xff] }
 0x852   :  { %14957 = vmatprep.subr.bf16.mxu0 %v19345_v29  ;;  %v21168_v29 = vld [vmem:[#allocation8 + $0x1990] ss:$24 sps:$4 sm:$0xff]  }
 0x853   :  { %13141 = vmatpush2.bf16.msra.mxu1 %v21156_v41  ;;  %v19507_v41 = vcombine.high %v13401_v18, %v13404_v33 }
 0x854   :  { %13142 = vmatprep.subr.bf16.mxu1 %v21161_v34  ;;  %v13308_v34 = vld [vmem:[#allocation5 + $0x1128] sm:$0xff] }
 0x855   :  { %14958 = vmatpush2.bf16.msra.mxu0 %v19344_v56  ;;  %v13305_v56 = vld [vmem:[#allocation5 + $0x10c8] sm:$0xff] }
 0x856   :  { %14959 = vmatprep.subr.bf16.mxu0 %v19339_v53  ;;  %v13395_v53 = vld [vmem:[#allocation5 + $0x1c08] sm:$0xff]  ;;  %v19410_v5 = vcombine.low %v13305_v56, %v13308_v34 }
 0x857   :  { %13143 = vmatpush2.bf16.msra.mxu1 %v21159_v26  ;;  %v19416_v26 = vcombine.low %v13311_v50, %v13314_v0  ;;  %v19501_v63 = vcombine.high %v13395_v53, %v13398_v1  ;;  %v13296_v0 = vld [vmem:[#allocation5 + $0xfa8] sm:$0xff] }
 0x858   :  { %13144 = vmatprep.subr.bf16.mxu1 %v21164_v3  ;;  %v19506_v3 = vcombine.low %v13401_v18, %v13404_v33  ;;  %v13383_v33 = vld [vmem:[#allocation5 + $0x1a88] sm:$0xff] }
 0x859   :  { %14960 = vmatpush2.bf16.msra.mxu0 %v19338_v17  ;;  %v4178_v17 = vadd.f32 %v22022_v39, %v22013_v43  ;;  %v13389_v39 = vld [vmem:[#allocation5 + $0x1b48] sm:$0xff] }
 0x85a   :  { %14961 = vmatprep.subr.bf16.mxu0 %v19333_v13  ;;  %v19411_v13 = vcombine.high %v13305_v56, %v13308_v34  ;;  %v19495_v23 = vcombine.high %v13389_v39, %v13392_v2 }
 0x85b   :  { %13145 = vmatpush2.bf16.msra.mxu1 %v21162_v52  ;;  %v13299_v52 = vld [vmem:[#allocation5 + $0x1008] sm:$0xff] }
 0x85c   :  { %13146 = vmatprep.subr.bf16.mxu1 %v21167_v22  ;;  %v22329_v22 = vld [vmem:[#allocation2 + $0x14] ss:$24 sps:$4 sm:$0xff]  }
 0x85d   :  { %14962 = vmatpush2.bf16.msra.mxu0 %v19332_v9  ;;  %v13302_v9 = vld [vmem:[#allocation5 + $0x1068] sm:$0xff] }
 0x85e   :  { %14963 = vmatprep.subr.bf16.mxu0 %v19327_v48  ;;  %v4221_v48 = vadd.f32 %v22026_v44, %v4178_v17  ;;  %v19405_v44 = vcombine.high %v13299_v52, %v13302_v9  ;;  %v19404_v56 = vcombine.low %v13299_v52, %v13302_v9  ;;  %v13377_v17 = vld [vmem:[#allocation5 + $0x19c8] sm:$0xff] }
 0x85f   :  { %13147 = vmatpush2.bf16.msra.mxu1 %v21165_v24  ;;  %v13284_v9 = vld [vmem:[#allocation5 + $0xe28] sm:$0xff] }
 0x860   :  { %13148 = vmatprep.subr.bf16.mxu1 %v21170_v61  ;;  %v19500_v61 = vcombine.low %v13395_v53, %v13398_v1 }
 0x861   :  { %14964 = vmatpush2.bf16.msra.mxu0 %v19326_v45 }
 0x862   :  { %15019 = vmatprep.subr.bf16.mxu0 %v19513_v60 }
 0x863   :  { %13149 = vmatpush2.bf16.msra.mxu1 %v21168_v29  ;;  %v13386_v29 = vld [vmem:[#allocation5 + $0x1ae8] sm:$0xff] }
 0x864   :  { %14966 = vmatmul.mubr.bf16.vlgmr.msra.gmra.mxu0 %v22322_v16  ;;  %14976 = vmatprep.subr.bf16.mxu1 %v19417_v10 }
 0x865   :  { %15020 = vmatpush1.bf16.msra.mxu0 %v19512_v25  ;;  %15051 = vmatprep.mubr.bf16.mxu0 %v22329_v22  ;;  %v4488_v25 = vadd.f32 %v4221_v48, %v22143_v12  ;;  %v19489_v12 = vcombine.high %v13383_v33, %v13386_v29  ;;  %v13371_v48 = vld [vmem:[#allocation5 + $0x1908] sm:$0xff] }
 0x866   :  { %15021 = vmatprep.subr.bf16.mxu0 %v19507_v41  ;;  %13151 = vmatmul.mubr.bf16.vlgmr.msra.gmra.mxu1 %v22292_v7  ;;  %v12894_v43 = vpop.f32.mrf.mxu1  ;;  %v12856_v7 = vadd.f32 %v22318_v62, %v22309_v19  ;;  %v19399_v62 = vcombine.high %v13293_v57, %v13296_v0 }
 0x867   :  { %v12895_v24 = vadd.f32 %v12894_v43, %v12852_v40  ;;  %14977 = vmatpush1.bf16.msra.mxu1 %v19416_v26  ;;  %15008 = vmatprep.mubr.bf16.mxu1 %v22336_v4  ;;  %v8828_v34 = vadd.f32 %v22169_v59, %v4488_v25  ;;  %v13287_v26 = vld [vmem:[#allocation5 + $0xe88] sm:$0xff]  ;;  %v19398_v40 = vcombine.low %v13293_v57, %v13296_v0 }
 0x868   :  { %v12896_v45 = vpop.f32.mrf.mxu1  ;;  %14978 = vmatprep.subr.bf16.mxu1 %v19411_v13  ;;  %v13269_v57 = vld [vmem:[#allocation5 + $0xc48] sm:$0xff] }
 0x869   :  { %15022 = vmatpush1.bf16.msra.mxu0 %v19506_v3  ;;  %v22342_v60 = vadd.f32 %v12895_v24, %v22161_v27  ;;  %v12897_v50 = vadd.f32 %v12896_v45, %v12854_v55  ;;  %v19494_v27 = vcombine.low %v13389_v39, %v13392_v2  ;;  %v13380_v3 = vld [vmem:[#allocation5 + $0x1a28] sm:$0xff] }
 0x86a   :  { %15023 = vmatprep.subr.bf16.mxu0 %v19501_v63  ;;  %v12898_v18 = vpop.f32.mrf.mxu1  ;;  %v19488_v63 = vcombine.low %v13383_v33, %v13386_v29  ;;  %v19483_v59 = vcombine.high %v13377_v17, %v13380_v3  ;;  %v19482_v39 = vcombine.low %v13377_v17, %v13380_v3  ;;  %v13275_v24 = vld [vmem:[#allocation5 + $0xd08] sm:$0xff] }
 0x86b   :  { %v22346_v10 = vadd.f32 %v12897_v50, %v22164_v35  ;;  %v12899_v41 = vadd.f32 %v12898_v18, %v12856_v7  ;;  %14979 = vmatpush1.bf16.msra.mxu1 %v19410_v5  ;;  %v13290_v35 = vld [vmem:[#allocation5 + $0xee8] sm:$0xff] }
 0x86c   :  { %v12900_v19 = vpop.f32.mrf.mxu1  ;;  %14980 = vmatprep.subr.bf16.mxu1 %v19405_v44  ;;  %v19393_v52 = vcombine.high %v13287_v26, %v13290_v35  ;;  %v19392_v43 = vcombine.low %v13287_v26, %v13290_v35  ;;  %v13278_v5 = vld [vmem:[#allocation5 + $0xd68] sm:$0xff] }
 0x86d   :  { %15024 = vmatpush1.bf16.msra.mxu0 %v19500_v61  ;;  %v22350_v53 = vadd.f32 %v12899_v41, %v22166_v20  ;;  %v12901_v1 = vadd.f32 %v12900_v19, %v22320_v38  ;;  %v13281_v20 = vld [vmem:[#allocation5 + $0xdc8] sm:$0xff]  ;;  %v19381_v50 = vcombine.high %v13275_v24, %v13278_v5  ;;  %v19380_v29 = vcombine.low %v13275_v24, %v13278_v5 }
 0x86e   :  { %15025 = vmatprep.subr.bf16.mxu0 %v19495_v23  ;;  %v13374_v38 = vld [vmem:[#allocation5 + $0x1968] sm:$0xff]  ;;  %v19387_v2 = vcombine.high %v13281_v20, %v13284_v9  ;;  %v19386_v44 = vcombine.low %v13281_v20, %v13284_v9 }
 0x86f   :  { %v22353_v13 = vadd.f32 %v12901_v1, %v8828_v34  ;;  %14981 = vmatpush1.bf16.msra.mxu1 %v19404_v56  ;;  %v19477_v55 = vcombine.high %v13371_v48, %v13374_v38  ;;  %v13365_v45 = vld [vmem:[#allocation5 + $0x1848] sm:$0xff]  ;;  %v19476_v7 = vcombine.low %v13371_v48, %v13374_v38 }
 0x870   :  { %14982 = vmatprep.subr.bf16.mxu1 %v19399_v62  ;;  %v13368_v61 = vld [vmem:[#allocation5 + $0x18a8] sm:$0xff] }
 0x871   :  { %15026 = vmatpush1.bf16.msra.mxu0 %v19494_v27  ;;  %v19471_v23 = vcombine.high %v13365_v45, %v13368_v61  ;;  %v13272_v0 = vld [vmem:[#allocation5 + $0xca8] sm:$0xff]  ;;  %v19470_v25 = vcombine.low %v13365_v45, %v13368_v61 }
 0x872   :  { %15027 = vmatprep.subr.bf16.mxu0 %v19489_v12  ;;  %v13455_v18 = vld [vmem:[#allocation5 + $0x2388] sm:$0xff]  ;;  %v19375_v41 = vcombine.high %v13269_v57, %v13272_v0  ;;  %v19374_v1 = vcombine.low %v13269_v57, %v13272_v0 }
 0x873   :  { %14983 = vmatpush1.bf16.msra.mxu1 %v19398_v40  ;;  %v13458_v33 = vld [vmem:[#allocation5 + $0x23e8] sm:$0xff] }
 0x874   :  { %14984 = vmatprep.subr.bf16.mxu1 %v19393_v52  ;;  %v19561_v56 = vcombine.high %v13455_v18, %v13458_v33  ;;  %v13359_v19 = vld [vmem:[#allocation5 + $0x1788] sm:$0xff]  ;;  %v19560_v12 = vcombine.low %v13455_v18, %v13458_v33 }
 0x875   :  { %15028 = vmatpush1.bf16.msra.mxu0 %v19488_v63  ;;  %v13362_v27 = vld [vmem:[#allocation5 + $0x17e8] sm:$0xff] }
 0x876   :  { %15029 = vmatprep.subr.bf16.mxu0 %v19483_v59  ;;  %v13449_v62 = vld [vmem:[#allocation5 + $0x22c8] sm:$0xff]  ;;  %v19465_v26 = vcombine.high %v13359_v19, %v13362_v27  ;;  %v19464_v52 = vcombine.low %v13359_v19, %v13362_v27 }
 0x877   :  { %14985 = vmatpush1.bf16.msra.mxu1 %v19392_v43  ;;  %v13452_v34 = vld [vmem:[#allocation5 + $0x2328] sm:$0xff] }
 0x878   :  { %14986 = vmatprep.subr.bf16.mxu1 %v19387_v2  ;;  %v19555_v35 = vcombine.high %v13449_v62, %v13452_v34  ;;  %v13353_v17 = vld [vmem:[#allocation5 + $0x16c8] sm:$0xff]  ;;  %v19554_v59 = vcombine.low %v13449_v62, %v13452_v34 }
 0x879   :  { %15030 = vmatpush1.bf16.msra.mxu0 %v19482_v39  ;;  %v13356_v3 = vld [vmem:[#allocation5 + $0x1728] sm:$0xff] }
 0x87a   :  { %15031 = vmatprep.subr.bf16.mxu0 %v19477_v55  ;;  %v13443_v40 = vld [vmem:[#allocation5 + $0x2208] sm:$0xff]  ;;  %v19459_v20 = vcombine.high %v13353_v17, %v13356_v3  ;;  %v19458_v2 = vcombine.low %v13353_v17, %v13356_v3  ;;  %v22355_v3 = vpop.f32.mrf.mxu0 }
 0x87b   :  { %14987 = vmatpush1.bf16.msra.mxu1 %v19386_v44  ;;  %v13446_v63 = vld [vmem:[#allocation5 + $0x2268] sm:$0xff] }
 0x87c   :  { %14988 = vmatprep.subr.bf16.mxu1 %v19381_v50  ;;  %v19549_v9 = vcombine.high %v13443_v40, %v13446_v63  ;;  %v13347_v48 = vld [vmem:[#allocation5 + $0x1608] sm:$0xff]  ;;  %v19548_v55 = vcombine.low %v13443_v40, %v13446_v63 }
 0x87d   :  { %15032 = vmatpush1.bf16.msra.mxu0 %v19476_v7  ;;  %v13350_v38 = vld [vmem:[#allocation5 + $0x1668] sm:$0xff] }
 0x87e   :  { %15033 = vmatprep.subr.bf16.mxu0 %v19471_v23  ;;  %v13437_v43 = vld [vmem:[#allocation5 + $0x2148] sm:$0xff]  ;;  %v19453_v24 = vcombine.high %v13347_v48, %v13350_v38  ;;  %v19452_v50 = vcombine.low %v13347_v48, %v13350_v38 }
 0x87f   :  { %14989 = vmatpush1.bf16.msra.mxu1 %v19380_v29  ;;  %v13440_v39 = vld [vmem:[#allocation5 + $0x21a8] sm:$0xff] }
 0x880   :  { %14990 = vmatprep.subr.bf16.mxu1 %v19375_v41  ;;  %v19543_v5 = vcombine.high %v13437_v43, %v13440_v39  ;;  %v13341_v45 = vld [vmem:[#allocation5 + $0x1548] sm:$0xff]  ;;  %v19542_v23 = vcombine.low %v13437_v43, %v13440_v39  ;;  %v22357_v43 = vpop.f32.mrf.mxu0 }
 0x881   :  { %15034 = vmatpush1.bf16.msra.mxu0 %v19470_v25  ;;  %v13344_v61 = vld [vmem:[#allocation5 + $0x15a8] sm:$0xff] }
 0x882   :  { %15035 = vmatprep.subr.bf16.mxu0 %v19561_v56  ;;  %v13431_v44 = vld [vmem:[#allocation5 + $0x2088] sm:$0xff]  ;;  %v19447_v57 = vcombine.high %v13341_v45, %v13344_v61  ;;  %v19446_v41 = vcombine.low %v13341_v45, %v13344_v61 }
 0x883   :  { %14991 = vmatpush1.bf16.msra.mxu1 %v19374_v1  ;;  %v13434_v7 = vld [vmem:[#allocation5 + $0x20e8] sm:$0xff] }
 0x884   :  { %14992 = vmatprep.subr.bf16.mxu1 %v19465_v26  ;;  %v19537_v0 = vcombine.high %v13431_v44, %v13434_v7  ;;  %v13335_v18 = vld [vmem:[#allocation5 + $0x1488] sm:$0xff]  ;;  %v19536_v56 = vcombine.low %v13431_v44, %v13434_v7  ;;  %v22359_v7 = vpop.f32.mrf.mxu0 }
 0x885   :  { %15036 = vmatpush2.bf16.msra.mxu0 %v19560_v12  ;;  %v13338_v33 = vld [vmem:[#allocation5 + $0x14e8] sm:$0xff] }
 0x886   :  { %15037 = vmatprep.subr.bf16.mxu0 %v19555_v35  ;;  %v13425_v29 = vld [vmem:[#allocation5 + $0x1fc8] sm:$0xff]  ;;  %v19441_v19 = vcombine.high %v13335_v18, %v13338_v33  ;;  %v19440_v26 = vcombine.low %v13335_v18, %v13338_v33  ;;  %v13309_v18 = vld [vmem:[#allocation5 + $0x1130] sm:$0xff] }
 0x887   :  { %14993 = vmatpush2.bf16.msra.mxu1 %v19464_v52  ;;  %v13428_v25 = vld [vmem:[#allocation5 + $0x2028] sm:$0xff] }
 0x888   :  { %14994 = vmatprep.subr.bf16.mxu1 %v19459_v20  ;;  %v19531_v27 = vcombine.high %v13425_v29, %v13428_v25  ;;  %v13329_v62 = vld [vmem:[#allocation5 + $0x13c8] sm:$0xff]  ;;  %v19530_v35 = vcombine.low %v13425_v29, %v13428_v25 }
 0x889   :  { %15038 = vmatpush2.bf16.msra.mxu0 %v19554_v59  ;;  %v13332_v34 = vld [vmem:[#allocation5 + $0x1428] sm:$0xff] }
 0x88a   :  { %15039 = vmatprep.subr.bf16.mxu0 %v19549_v9  ;;  %v13419_v1 = vld [vmem:[#allocation5 + $0x1f08] sm:$0xff]  ;;  %v19435_v17 = vcombine.high %v13329_v62, %v13332_v34  ;;  %v19434_v9 = vcombine.low %v13329_v62, %v13332_v34  ;;  %v13300_v62 = vld [vmem:[#allocation5 + $0x1010] sm:$0xff] }
 0x88b   :  { %14995 = vmatpush2.bf16.msra.mxu1 %v19458_v2  ;;  %v13422_v12 = vld [vmem:[#allocation5 + $0x1f68] sm:$0xff]  ;;  %v13303_v34 = vld [vmem:[#allocation5 + $0x1070] sm:$0xff] }
 0x88c   :  { %14996 = vmatprep.subr.bf16.mxu1 %v19453_v24  ;;  %v19525_v40 = vcombine.high %v13419_v1, %v13422_v12  ;;  %v13323_v63 = vld [vmem:[#allocation5 + $0x1308] sm:$0xff]  ;;  %v19524_v48 = vcombine.low %v13419_v1, %v13422_v12  ;;  %v13312_v24 = vld [vmem:[#allocation5 + $0x1190] sm:$0xff]  ;;  %v22361_v12 = vld [vmem:[#allocation2 + $0x10] ss:$24 sps:$4 sm:$0xff]  }
 0x88d   :  { %15040 = vmatpush2.bf16.msra.mxu0 %v19548_v55  ;;  %v13326_v52 = vld [vmem:[#allocation5 + $0x1368] sm:$0xff] }
 0x88e   :  { %15041 = vmatprep.subr.bf16.mxu0 %v19543_v5  ;;  %v13413_v59 = vld [vmem:[#allocation5 + $0x1e48] sm:$0xff]  ;;  %v19429_v38 = vcombine.high %v13323_v63, %v13326_v52  ;;  %v13315_v5 = vld [vmem:[#allocation5 + $0x11f0] sm:$0xff]  ;;  %v19428_v45 = vcombine.low %v13323_v63, %v13326_v52  ;;  %v19407_v63 = vcombine.high %v13300_v62, %v13303_v34 }
 0x88f   :  { %14997 = vmatpush2.bf16.msra.mxu1 %v19452_v50  ;;  %v13416_v20 = vld [vmem:[#allocation5 + $0x1ea8] sm:$0xff]  ;;  %v19419_v50 = vcombine.high %v13312_v24, %v13315_v5  ;;  %v19418_v29 = vcombine.low %v13312_v24, %v13315_v5  ;;  %v13204_v52 = vld [vmem:[#allocation5 + $0x410] sm:$0xff] }
 0x890   :  { %14998 = vmatprep.subr.bf16.mxu1 %v19447_v57  ;;  %v19519_v39 = vcombine.high %v13413_v59, %v13416_v20  ;;  %v13317_v2 = vld [vmem:[#allocation5 + $0x1248] sm:$0xff]  ;;  %v19518_v61 = vcombine.low %v13413_v59, %v13416_v20  ;;  %v13219_v57 = vld [vmem:[#allocation5 + $0x5f0] sm:$0xff] }
 0x891   :  { %15042 = vmatpush2.bf16.msra.mxu0 %v19542_v23  ;;  %v13320_v55 = vld [vmem:[#allocation5 + $0x12a8] sm:$0xff]  ;;  %v13216_v23 = vld [vmem:[#allocation5 + $0x590] sm:$0xff] }
 0x892   :  { %15043 = vmatprep.subr.bf16.mxu0 %v19537_v0  ;;  %v19423_v44 = vcombine.high %v13317_v2, %v13320_v55  ;;  %v13306_v0 = vld [vmem:[#allocation5 + $0x10d0] sm:$0xff]  ;;  %v19422_v33 = vcombine.low %v13317_v2, %v13320_v55  ;;  %v19323_v25 = vcombine.high %v13216_v23, %v13219_v57 }
 0x893   :  { %14999 = vmatpush2.bf16.msra.mxu1 %v19446_v41  ;;  %v12943_v41 = vpop.f32.mrf.mxu0  ;;  %v13207_v59 = vld [vmem:[#allocation5 + $0x470] sm:$0xff] }
 0x894   :  { %15000 = vmatprep.subr.bf16.mxu1 %v19441_v19  ;;  %v13210_v19 = vld [vmem:[#allocation5 + $0x4d0] sm:$0xff]  ;;  %v19311_v24 = vcombine.high %v13204_v52, %v13207_v59 }
 0x895   :  { %15044 = vmatpush2.bf16.msra.mxu0 %v19536_v56  ;;  %v19413_v56 = vcombine.high %v13306_v0, %v13309_v18 }
 0x896   :  { %15045 = vmatprep.subr.bf16.mxu0 %v19531_v27  ;;  %v13213_v27 = vld [vmem:[#allocation5 + $0x530] sm:$0xff] }
 0x897   :  { %15001 = vmatpush2.bf16.msra.mxu1 %v19440_v26  ;;  %v19322_v26 = vcombine.low %v13216_v23, %v13219_v57  ;;  %v13288_v57 = vld [vmem:[#allocation5 + $0xe90] sm:$0xff] }
 0x898   :  { %15002 = vmatprep.subr.bf16.mxu1 %v19435_v17  ;;  %v19412_v17 = vcombine.low %v13306_v0, %v13309_v18  ;;  %v13291_v0 = vld [vmem:[#allocation5 + $0xef0] sm:$0xff] }
 0x899   :  { %15046 = vmatpush2.bf16.msra.mxu0 %v19530_v35  ;;  %v4307_v35 = vadd.f32 %v22036_v14, %v22024_v11  ;;  %v19316_v14 = vcombine.low %v13210_v19, %v13213_v27 }
 0x89a   :  { %15047 = vmatprep.subr.bf16.mxu0 %v19525_v40  ;;  %v19317_v40 = vcombine.high %v13210_v19, %v13213_v27 }
 0x89b   :  { %15003 = vmatpush2.bf16.msra.mxu1 %v19434_v9  ;;  %v4350_v2 = vadd.f32 %v22034_v42, %v4307_v35  ;;  %v13285_v35 = vld [vmem:[#allocation5 + $0xe30] sm:$0xff] }
 0x89c   :  { %15004 = vmatprep.subr.bf16.mxu1 %v19429_v38  ;;  %v13294_v38 = vld [vmem:[#allocation5 + $0xf50] sm:$0xff] }
 0x89d   :  { %15048 = vmatpush2.bf16.msra.mxu0 %v19524_v48  ;;  %v22367_v48 = vld [vmem:[#allocation2 + $0x8] ss:$24 sps:$4 sm:$0xff]  }
 0x89e   :  { %15049 = vmatprep.subr.bf16.mxu0 %v19519_v39  ;;  %v13297_v39 = vld [vmem:[#allocation5 + $0xfb0] sm:$0xff] }
 0x89f   :  { %15005 = vmatpush2.bf16.msra.mxu1 %v19428_v45 }
 0x8a0   :  { %15006 = vmatprep.subr.bf16.mxu1 %v19423_v44  ;;  %v13198_v44 = vld [vmem:[#allocation5 + $0x350] sm:$0xff] }
 0x8a1   :  { %15050 = vmatpush2.bf16.msra.mxu0 %v19518_v61  ;;  %v19401_v61 = vcombine.high %v13294_v38, %v13297_v39 }
 0x8a2   :  { %15105 = vmatprep.subr.bf16.mxu0 %v19419_v50  ;;  %v13201_v50 = vld [vmem:[#allocation5 + $0x3b0] sm:$0xff] }
 0x8a3   :  { %15007 = vmatpush2.bf16.msra.mxu1 %v19422_v33  ;;  %v19310_v33 = vcombine.low %v13204_v52, %v13207_v59 }
 0x8a4   :  { %v13023_v1 = vpop.f32.mrf.mxu0  ;;  %15052 = vmatmul.mubr.bf16.vlgmr.msra.gmra.mxu0 %v22361_v12  ;;  %15062 = vmatprep.subr.bf16.mxu1 %v19323_v25 }
 0x8a5   :  { %15106 = vmatpush1.bf16.msra.mxu0 %v19418_v29  ;;  %15137 = vmatprep.mubr.bf16.mxu0 %v22336_v4  ;;  %v19406_v4 = vcombine.low %v13300_v62, %v13303_v34  ;;  %v4490_v29 = vadd.f32 %v4350_v2, %v22187_v54  ;;  %v13192_v34 = vld [vmem:[#allocation5 + $0x290] sm:$0xff] }
 0x8a6   :  { %15107 = vmatprep.subr.bf16.mxu0 %v19413_v56  ;;  %v12980_v20 = vpop.f32.mrf.mxu1  ;;  %v13025_v9 = vpop.f32.mrf.mxu0  ;;  %15009 = vmatmul.mubr.bf16.vlgmr.msra.gmra.mxu1 %v22367_v48  ;;  %v19305_v56 = vcombine.high %v13198_v44, %v13201_v50  ;;  %v13180_v2 = vld [vmem:[#allocation5 + $0x110] sm:$0xff] }
 0x8a7   :  { %v12981_v11 = vadd.f32 %v12980_v20, %v22355_v3  ;;  %15063 = vmatpush1.bf16.msra.mxu1 %v19322_v26  ;;  %15094 = vmatprep.mubr.bf16.mxu1 %v22313_v6  ;;  %v13186_v20 = vld [vmem:[#allocation5 + $0x1d0] sm:$0xff] }
 0x8a8   :  { %v12982_v55 = vpop.f32.mrf.mxu1  ;;  %15064 = vmatprep.subr.bf16.mxu1 %v19317_v40  ;;  %v13027_v23 = vpop.f32.mrf.mxu0 }
 0x8a9   :  { %15108 = vmatpush1.bf16.msra.mxu0 %v19412_v17  ;;  %v13024_v5 = vadd.f32 %v13023_v1, %v12981_v11  ;;  %v12983_v45 = vadd.f32 %v12982_v55, %v22357_v43  ;;  %v19400_v43 = vcombine.low %v13294_v38, %v13297_v39  ;;  %v13195_v1 = vld [vmem:[#allocation5 + $0x2f0] sm:$0xff]  ;;  %v8830_v17 = vadd.f32 %v22207_v58, %v4490_v29 }
 0x8aa   :  { %15109 = vmatprep.subr.bf16.mxu0 %v19407_v63  ;;  %v12984_v3 = vpop.f32.mrf.mxu1  ;;  %v13029_v26 = vpop.f32.mrf.mxu0  ;;  %v19304_v63 = vcombine.low %v13198_v44, %v13201_v50  ;;  %v19299_v52 = vcombine.high %v13192_v34, %v13195_v1  ;;  %v13276_v38 = vld [vmem:[#allocation5 + $0xd10] sm:$0xff]  ;;  %v19298_v58 = vcombine.low %v13192_v34, %v13195_v1 }
 0x8ab   :  { %v22375_v6 = vadd.f32 %v13024_v5, %v22198_v46  ;;  %v13026_v42 = vadd.f32 %v13025_v9, %v12983_v45  ;;  %v12985_v18 = vadd.f32 %v12984_v3, %v22359_v7  ;;  %15065 = vmatpush1.bf16.msra.mxu1 %v19316_v14  ;;  %v19395_v46 = vcombine.high %v13288_v57, %v13291_v0  ;;  %v13282_v7 = vld [vmem:[#allocation5 + $0xdd0] sm:$0xff] }
 0x8ac   :  { %v12986_v25 = vpop.f32.mrf.mxu1  ;;  %15066 = vmatprep.subr.bf16.mxu1 %v19311_v24  ;;  %v19389_v59 = vcombine.high %v13282_v7, %v13285_v35  ;;  %v13189_v9 = vld [vmem:[#allocation5 + $0x230] sm:$0xff] }
 0x8ad   :  { %15110 = vmatpush1.bf16.msra.mxu0 %v19406_v4  ;;  %v22380_v19 = vadd.f32 %v13026_v42, %v22202_v37  ;;  %v13028_v27 = vadd.f32 %v13027_v23, %v12985_v18  ;;  %v12987_v62 = vadd.f32 %v12986_v25, %v12943_v41  ;;  %v19394_v37 = vcombine.low %v13288_v57, %v13291_v0  ;;  %v13279_v39 = vld [vmem:[#allocation5 + $0xd70] sm:$0xff] }
 0x8ae   :  { %15111 = vmatprep.subr.bf16.mxu0 %v19401_v61  ;;  %v19293_v11 = vcombine.high %v13186_v20, %v13189_v9  ;;  %v19383_v14 = vcombine.high %v13276_v38, %v13279_v39  ;;  %v13183_v55 = vld [vmem:[#allocation5 + $0x170] sm:$0xff]  ;;  %v19292_v5 = vcombine.low %v13186_v20, %v13189_v9  ;;  %v19382_v45 = vcombine.low %v13276_v38, %v13279_v39 }
 0x8af   :  { %v22384_v54 = vadd.f32 %v13028_v27, %v22205_v15  ;;  %v13030_v40 = vadd.f32 %v13029_v26, %v12987_v62  ;;  %15067 = vmatpush1.bf16.msra.mxu1 %v19310_v33  ;;  %v19388_v15 = vcombine.low %v13282_v7, %v13285_v35  ;;  %v13270_v4 = vld [vmem:[#allocation5 + $0xc50] sm:$0xff]  ;;  %v19287_v61 = vcombine.high %v13180_v2, %v13183_v55 }
 0x8b0   :  { %15068 = vmatprep.subr.bf16.mxu1 %v19305_v56  ;;  %v13273_v24 = vld [vmem:[#allocation5 + $0xcb0] sm:$0xff]  ;;  %v19286_v0 = vcombine.low %v13180_v2, %v13183_v55 }
 0x8b1   :  { %15112 = vmatpush1.bf16.msra.mxu0 %v19400_v43  ;;  %v22386_v41 = vadd.f32 %v13030_v40, %v8830_v17  ;;  %v19377_v44 = vcombine.high %v13270_v4, %v13273_v24  ;;  %v13174_v50 = vld [vmem:[#allocation5 + $0x50] sm:$0xff]  ;;  %v19376_v42 = vcombine.low %v13270_v4, %v13273_v24 }
 0x8b2   :  { %15113 = vmatprep.subr.bf16.mxu0 %v19395_v46  ;;  %v13177_v23 = vld [vmem:[#allocation5 + $0xb0] sm:$0xff] }
 0x8b3   :  { %15069 = vmatpush1.bf16.msra.mxu1 %v19304_v63  ;;  %v13360_v3 = vld [vmem:[#allocation5 + $0x1790] sm:$0xff]  ;;  %v19281_v18 = vcombine.high %v13174_v50, %v13177_v23  ;;  %v19280_v27 = vcombine.low %v13174_v50, %v13177_v23 }
 0x8b4   :  { %15070 = vmatprep.subr.bf16.mxu1 %v19299_v52  ;;  %v13363_v57 = vld [vmem:[#allocation5 + $0x17f0] sm:$0xff] }
 0x8b5   :  { %15114 = vmatpush1.bf16.msra.mxu0 %v19394_v37  ;;  %v19467_v33 = vcombine.high %v13360_v3, %v13363_v57  ;;  %v13264_v29 = vld [vmem:[#allocation5 + $0xb90] sm:$0xff]  ;;  %v19466_v62 = vcombine.low %v13360_v3, %v13363_v57 }
 0x8b6   :  { %15115 = vmatprep.subr.bf16.mxu0 %v19389_v59  ;;  %v13267_v25 = vld [vmem:[#allocation5 + $0xbf0] sm:$0xff] }
 0x8b7   :  { %15071 = vmatpush1.bf16.msra.mxu1 %v19298_v58  ;;  %v13354_v43 = vld [vmem:[#allocation5 + $0x16d0] sm:$0xff]  ;;  %v19371_v46 = vcombine.high %v13264_v29, %v13267_v25  ;;  %v19370_v17 = vcombine.low %v13264_v29, %v13267_v25 }
 0x8b8   :  { %15072 = vmatprep.subr.bf16.mxu1 %v19293_v11  ;;  %v13357_v56 = vld [vmem:[#allocation5 + $0x1730] sm:$0xff] }
 0x8b9   :  { %15116 = vmatpush1.bf16.msra.mxu0 %v19388_v15  ;;  %v19461_v34 = vcombine.high %v13354_v43, %v13357_v56  ;;  %v13258_v1 = vld [vmem:[#allocation5 + $0xad0] sm:$0xff]  ;;  %v19460_v40 = vcombine.low %v13354_v43, %v13357_v56 }
 0x8ba   :  { %15117 = vmatprep.subr.bf16.mxu0 %v19383_v14  ;;  %v13261_v26 = vld [vmem:[#allocation5 + $0xb30] sm:$0xff] }
 0x8bb   :  { %15073 = vmatpush1.bf16.msra.mxu1 %v19292_v5  ;;  %v13348_v7 = vld [vmem:[#allocation5 + $0x1610] sm:$0xff]  ;;  %v19365_v63 = vcombine.high %v13258_v1, %v13261_v26  ;;  %v19364_v38 = vcombine.low %v13258_v1, %v13261_v26 }
 0x8bc   :  { %15074 = vmatprep.subr.bf16.mxu1 %v19287_v61  ;;  %v13351_v35 = vld [vmem:[#allocation5 + $0x1670] sm:$0xff] }
 0x8bd   :  { %15118 = vmatpush1.bf16.msra.mxu0 %v19382_v45  ;;  %v19455_v37 = vcombine.high %v13348_v7, %v13351_v35  ;;  %v13252_v52 = vld [vmem:[#allocation5 + $0xa10] sm:$0xff]  ;;  %v19454_v39 = vcombine.low %v13348_v7, %v13351_v35 }
 0x8be   :  { %15119 = vmatprep.subr.bf16.mxu0 %v19377_v44  ;;  %v13255_v59 = vld [vmem:[#allocation5 + $0xa70] sm:$0xff] }
 0x8bf   :  { %15075 = vmatpush1.bf16.msra.mxu1 %v19286_v0  ;;  %v13342_v20 = vld [vmem:[#allocation5 + $0x1550] sm:$0xff]  ;;  %v19359_v58 = vcombine.high %v13252_v52, %v13255_v59  ;;  %v19358_v4 = vcombine.low %v13252_v52, %v13255_v59  ;;  %v13217_v52 = vld [vmem:[#allocation5 + $0x598] sm:$0xff] }
 0x8c0   :  { %15076 = vmatprep.subr.bf16.mxu1 %v19281_v18  ;;  %v13345_v9 = vld [vmem:[#allocation5 + $0x15b0] sm:$0xff]  ;;  %v13220_v59 = vld [vmem:[#allocation5 + $0x5f8] sm:$0xff] }
 0x8c1   :  { %15120 = vmatpush1.bf16.msra.mxu0 %v19376_v42  ;;  %v19449_v15 = vcombine.high %v13342_v20, %v13345_v9  ;;  %v13246_v11 = vld [vmem:[#allocation5 + $0x950] sm:$0xff]  ;;  %v19448_v24 = vcombine.low %v13342_v20, %v13345_v9 }
 0x8c2   :  { %15121 = vmatprep.subr.bf16.mxu0 %v19467_v33  ;;  %v13249_v14 = vld [vmem:[#allocation5 + $0x9b0] sm:$0xff] }
 0x8c3   :  { %15077 = vmatpush1.bf16.msra.mxu1 %v19280_v27  ;;  %v13336_v2 = vld [vmem:[#allocation5 + $0x1490] sm:$0xff]  ;;  %v19353_v5 = vcombine.high %v13246_v11, %v13249_v14  ;;  %v19352_v3 = vcombine.low %v13246_v11, %v13249_v14  ;;  %v13211_v11 = vld [vmem:[#allocation5 + $0x4d8] sm:$0xff] }
 0x8c4   :  { %15078 = vmatprep.subr.bf16.mxu1 %v19371_v46  ;;  %v13339_v55 = vld [vmem:[#allocation5 + $0x14f0] sm:$0xff]  ;;  %v13214_v14 = vld [vmem:[#allocation5 + $0x538] sm:$0xff] }
 0x8c5   :  { %15122 = vmatpush2.bf16.msra.mxu0 %v19466_v62  ;;  %v19443_v45 = vcombine.high %v13336_v2, %v13339_v55  ;;  %v13240_v61 = vld [vmem:[#allocation5 + $0x890] sm:$0xff]  ;;  %v19442_v57 = vcombine.low %v13336_v2, %v13339_v55  ;;  %v19324_v55 = vcombine.low %v13217_v52, %v13220_v59 }
 0x8c6   :  { %15123 = vmatprep.subr.bf16.mxu0 %v19461_v34  ;;  %v13243_v44 = vld [vmem:[#allocation5 + $0x8f0] sm:$0xff] }
 0x8c7   :  { %15079 = vmatpush2.bf16.msra.mxu1 %v19370_v17  ;;  %v13330_v50 = vld [vmem:[#allocation5 + $0x13d0] sm:$0xff]  ;;  %v19347_v0 = vcombine.high %v13240_v61, %v13243_v44  ;;  %v19346_v43 = vcombine.low %v13240_v61, %v13243_v44  ;;  %v13205_v61 = vld [vmem:[#allocation5 + $0x418] sm:$0xff] }
 0x8c8   :  { %15080 = vmatprep.subr.bf16.mxu1 %v19365_v63  ;;  %v13333_v23 = vld [vmem:[#allocation5 + $0x1430] sm:$0xff]  ;;  %v13208_v44 = vld [vmem:[#allocation5 + $0x478] sm:$0xff] }
 0x8c9   :  { %15124 = vmatpush2.bf16.msra.mxu0 %v19460_v40  ;;  %v19437_v42 = vcombine.high %v13330_v50, %v13333_v23  ;;  %v13234_v18 = vld [vmem:[#allocation5 + $0x7d0] sm:$0xff]  ;;  %v19436_v56 = vcombine.low %v13330_v50, %v13333_v23 }
 0x8ca   :  { %15125 = vmatprep.subr.bf16.mxu0 %v19455_v37  ;;  %v13237_v33 = vld [vmem:[#allocation5 + $0x830] sm:$0xff] }
 0x8cb   :  { %15081 = vmatpush2.bf16.msra.mxu1 %v19364_v38  ;;  %v13324_v29 = vld [vmem:[#allocation5 + $0x1310] sm:$0xff]  ;;  %v19341_v27 = vcombine.high %v13234_v18, %v13237_v33  ;;  %v19340_v7 = vcombine.low %v13234_v18, %v13237_v33 }
 0x8cc   :  { %15082 = vmatprep.subr.bf16.mxu1 %v19359_v58  ;;  %v13327_v25 = vld [vmem:[#allocation5 + $0x1370] sm:$0xff] }
 0x8cd   :  { %15126 = vmatpush2.bf16.msra.mxu0 %v19454_v39  ;;  %v19431_v62 = vcombine.high %v13324_v29, %v13327_v25  ;;  %v13228_v46 = vld [vmem:[#allocation5 + $0x710] sm:$0xff]  ;;  %v19430_v35 = vcombine.low %v13324_v29, %v13327_v25  ;;  %v19325_v39 = vcombine.high %v13217_v52, %v13220_v59 }
 0x8ce   :  { %15127 = vmatprep.subr.bf16.mxu0 %v19449_v15  ;;  %v13231_v34 = vld [vmem:[#allocation5 + $0x770] sm:$0xff] }
 0x8cf   :  { %15083 = vmatpush2.bf16.msra.mxu1 %v19358_v4  ;;  %v13318_v1 = vld [vmem:[#allocation5 + $0x1250] sm:$0xff]  ;;  %v19335_v17 = vcombine.high %v13228_v46, %v13231_v34  ;;  %v19334_v20 = vcombine.low %v13228_v46, %v13231_v34  ;;  %v19312_v34 = vcombine.low %v13205_v61, %v13208_v44 }
 0x8d0   :  { %15084 = vmatprep.subr.bf16.mxu1 %v19353_v5  ;;  %v13321_v26 = vld [vmem:[#allocation5 + $0x12b0] sm:$0xff] }
 0x8d1   :  { %15128 = vmatpush2.bf16.msra.mxu0 %v19448_v24  ;;  %v19425_v40 = vcombine.high %v13318_v1, %v13321_v26  ;;  %v13222_v63 = vld [vmem:[#allocation5 + $0x650] sm:$0xff]  ;;  %v19424_v9 = vcombine.low %v13318_v1, %v13321_v26  ;;  %v19319_v24 = vcombine.high %v13211_v11, %v13214_v14 }
 0x8d2   :  { %15129 = vmatprep.subr.bf16.mxu0 %v19443_v45  ;;  %v13225_v37 = vld [vmem:[#allocation5 + $0x6b0] sm:$0xff] }
 0x8d3   :  { %15085 = vmatpush2.bf16.msra.mxu1 %v19352_v3  ;;  %v19329_v38 = vcombine.high %v13222_v63, %v13225_v37  ;;  %v13408_v58 = vld [vmem:[#allocation5 + $0x1d90] sm:$0xff]  ;;  %v19328_v2 = vcombine.low %v13222_v63, %v13225_v37  ;;  %v19318_v3 = vcombine.low %v13211_v11, %v13214_v14  ;;  %v13196_v63 = vld [vmem:[#allocation5 + $0x2f8] sm:$0xff] }
 0x8d4   :  { %15086 = vmatprep.subr.bf16.mxu1 %v19347_v0  ;;  %v13411_v15 = vld [vmem:[#allocation5 + $0x1df0] sm:$0xff]  ;;  %v13187_v11 = vld [vmem:[#allocation5 + $0x1d8] sm:$0xff] }
 0x8d5   :  { %15130 = vmatpush2.bf16.msra.mxu0 %v19442_v57  ;;  %v19515_v4 = vcombine.high %v13408_v58, %v13411_v15  ;;  %v13402_v5 = vld [vmem:[#allocation5 + $0x1cd0] sm:$0xff]  ;;  %v19514_v23 = vcombine.low %v13408_v58, %v13411_v15  ;;  %v13190_v14 = vld [vmem:[#allocation5 + $0x238] sm:$0xff] }
 0x8d6   :  { %15131 = vmatprep.subr.bf16.mxu0 %v19437_v42  ;;  %v13405_v45 = vld [vmem:[#allocation5 + $0x1d30] sm:$0xff]  ;;  %v19313_v42 = vcombine.high %v13205_v61, %v13208_v44  ;;  %v13181_v61 = vld [vmem:[#allocation5 + $0x118] sm:$0xff] }
 0x8d7   :  { %15087 = vmatpush2.bf16.msra.mxu1 %v19346_v43  ;;  %v19509_v57 = vcombine.high %v13402_v5, %v13405_v45  ;;  %v13396_v18 = vld [vmem:[#allocation5 + $0x1c10] sm:$0xff]  ;;  %v13199_v43 = vld [vmem:[#allocation5 + $0x358] sm:$0xff] }
 0x8d8   :  { %15088 = vmatprep.subr.bf16.mxu1 %v19341_v27  ;;  %v13399_v33 = vld [vmem:[#allocation5 + $0x1c70] sm:$0xff]  ;;  %v13184_v44 = vld [vmem:[#allocation5 + $0x178] sm:$0xff] }
 0x8d9   :  { %15132 = vmatpush2.bf16.msra.mxu0 %v19436_v56  ;;  %v21737_v29 = vld [vmem:[#allocation2 + $0x4] ss:$24 sps:$4 sm:$0xff]   ;;  %v13202_v56 = vld [vmem:[#allocation5 + $0x3b8] sm:$0xff]  ;;  %v19503_v1 = vcombine.high %v13396_v18, %v13399_v33  ;;  %v19502_v52 = vcombine.low %v13396_v18, %v13399_v33 }
 0x8da   :  { %15133 = vmatprep.subr.bf16.mxu0 %v19431_v62  ;;  %v13384_v58 = vld [vmem:[#allocation5 + $0x1a90] sm:$0xff]  ;;  %v13175_v18 = vld [vmem:[#allocation5 + $0x58] sm:$0xff] }
 0x8db   :  { %15089 = vmatpush2.bf16.msra.mxu1 %v19340_v7  ;;  %v19307_v7 = vcombine.high %v13199_v43, %v13202_v56  ;;  %v13387_v15 = vld [vmem:[#allocation5 + $0x1af0] sm:$0xff]  ;;  %v13178_v33 = vld [vmem:[#allocation5 + $0xb8] sm:$0xff] }
 0x8dc   :  { %15090 = vmatprep.subr.bf16.mxu1 %v19335_v17 }
 0x8dd   :  { %15134 = vmatpush2.bf16.msra.mxu0 %v19430_v35  ;;  %v13390_v35 = vld [vmem:[#allocation5 + $0x1b50] sm:$0xff] }
 0x8de   :  { %15135 = vmatprep.subr.bf16.mxu0 %v19425_v40  ;;  %v13193_v40 = vld [vmem:[#allocation5 + $0x298] sm:$0xff] }
 0x8df   :  { %15091 = vmatpush2.bf16.msra.mxu1 %v19334_v20  ;;  %v19306_v20 = vcombine.low %v13199_v43, %v13202_v56  ;;  %v19283_v56 = vcombine.high %v13175_v18, %v13178_v33 }
 0x8e0   :  { %15092 = vmatprep.subr.bf16.mxu1 %v19329_v38 }
 0x8e1   :  { %15136 = vmatpush2.bf16.msra.mxu0 %v19424_v9 }
 0x8e2   :  { %15191 = vmatprep.subr.bf16.mxu0 %v19325_v39  ;;  %v19301_v39 = vcombine.high %v13193_v40, %v13196_v63 }
 0x8e3   :  { %15093 = vmatpush2.bf16.msra.mxu1 %v19328_v2 }
 0x8e4   :  { %v13109_v50 = vpop.f32.mrf.mxu0  ;;  %15138 = vmatmul.mubr.bf16.vlgmr.msra.gmra.mxu0 %v22367_v48  ;;  %15148 = vmatprep.subr.bf16.mxu1 %v19515_v4  ;;  %v19508_v48 = vcombine.low %v13402_v5, %v13405_v45  ;;  %v19491_v4 = vcombine.high %v13384_v58, %v13387_v15  ;;  %v13378_v5 = vld [vmem:[#allocation5 + $0x19d0] sm:$0xff] }
 0x8e5   :  { %15192 = vmatpush1.bf16.msra.mxu0 %v19324_v55  ;;  %15223 = vmatprep.mubr.bf16.mxu0 %v21737_v29  ;;  %v19300_v55 = vcombine.low %v13193_v40, %v13196_v63  ;;  %v13381_v45 = vld [vmem:[#allocation5 + $0x1a30] sm:$0xff]  ;;  %v13259_v63 = vld [vmem:[#allocation5 + $0xad8] sm:$0xff] }
 0x8e6   :  { %v13111_v0 = vpop.f32.mrf.mxu0  ;;  %15193 = vmatprep.subr.bf16.mxu0 %v19319_v24  ;;  %v13066_v25 = vpop.f32.mrf.mxu1  ;;  %15095 = vmatmul.mubr.bf16.vlgmr.msra.gmra.mxu1 %v22322_v16  ;;  %v13393_v16 = vld [vmem:[#allocation5 + $0x1bb0] sm:$0xff]  ;;  %v19295_v24 = vcombine.high %v13187_v11, %v13190_v14  ;;  %v19484_v29 = vcombine.low %v13378_v5, %v13381_v45 }
 0x8e7   :  { %v22390_v27 = vadd.f32 %v13109_v50, %v13066_v25  ;;  %15149 = vmatpush1.bf16.msra.mxu1 %v19514_v23  ;;  %15180 = vmatprep.mubr.bf16.mxu1 %v22329_v22  ;;  %v19497_v9 = vcombine.high %v13390_v35, %v13393_v16  ;;  %v19496_v2 = vcombine.low %v13390_v35, %v13393_v16  ;;  %v13459_v40 = vld [vmem:[#allocation5 + $0x23f0] sm:$0xff] }
 0x8e8   :  { %v13068_v62 = vpop.f32.mrf.mxu1  ;;  %v13113_v46 = vpop.f32.mrf.mxu0  ;;  %15150 = vmatprep.subr.bf16.mxu1 %v19509_v57  ;;  %v19490_v50 = vcombine.low %v13384_v58, %v13387_v15  ;;  %v19294_v23 = vcombine.low %v13187_v11, %v13190_v14  ;;  %v19289_v57 = vcombine.high %v13181_v61, %v13184_v44  ;;  %v19288_v25 = vcombine.low %v13181_v61, %v13184_v44  ;;  %v13453_v58 = vld [vmem:[#allocation5 + $0x2330] sm:$0xff]  ;;  %v13253_v15 = vld [vmem:[#allocation5 + $0xa18] sm:$0xff] }
 0x8e9   :  { %15194 = vmatpush1.bf16.msra.mxu0 %v19318_v3  ;;  %v22393_v26 = vadd.f32 %v13111_v0, %v13068_v62  ;;  %v19485_v3 = vcombine.high %v13378_v5, %v13381_v45  ;;  %v13372_v0 = vld [vmem:[#allocation5 + $0x1910] sm:$0xff]  ;;  %v13256_v11 = vld [vmem:[#allocation5 + $0xa78] sm:$0xff] }
 0x8ea   :  { %15195 = vmatprep.subr.bf16.mxu0 %v19313_v42  ;;  %v13070_v17 = vpop.f32.mrf.mxu1  ;;  %v13115_v22 = vpop.f32.mrf.mxu0  ;;  %v13375_v42 = vld [vmem:[#allocation5 + $0x1970] sm:$0xff]  ;;  %v13247_v45 = vld [vmem:[#allocation5 + $0x958] sm:$0xff] }
 0x8eb   :  { %v22395_v37 = vadd.f32 %v13113_v46, %v13070_v17  ;;  %15151 = vmatpush1.bf16.msra.mxu1 %v19508_v48  ;;  %v19479_v43 = vcombine.high %v13372_v0, %v13375_v42  ;;  %v13366_v48 = vld [vmem:[#allocation5 + $0x1850] sm:$0xff]  ;;  %v13265_v46 = vld [vmem:[#allocation5 + $0xb98] sm:$0xff] }
 0x8ec   :  { %v13072_v59 = vpop.f32.mrf.mxu1  ;;  %15152 = vmatprep.subr.bf16.mxu1 %v19503_v1  ;;  %v13369_v62 = vld [vmem:[#allocation5 + $0x18b0] sm:$0xff]  ;;  %v19478_v1 = vcombine.low %v13372_v0, %v13375_v42  ;;  %v13250_v61 = vld [vmem:[#allocation5 + $0x9b8] sm:$0xff] }
 0x8ed   :  { %15196 = vmatpush1.bf16.msra.mxu0 %v19312_v34  ;;  %v22397_v38 = vadd.f32 %v13115_v22, %v13072_v59  ;;  %v13268_v34 = vld [vmem:[#allocation5 + $0xbf8] sm:$0xff]  ;;  %v19473_v35 = vcombine.high %v13366_v48, %v13369_v62  ;;  %v13456_v17 = vld [vmem:[#allocation5 + $0x2390] sm:$0xff]  ;;  %v19472_v22 = vcombine.low %v13366_v48, %v13369_v62 }
 0x8ee   :  { %15197 = vmatprep.subr.bf16.mxu0 %v19307_v7  ;;  %v19282_v7 = vcombine.low %v13175_v18, %v13178_v33  ;;  %v19373_v16 = vcombine.high %v13265_v46, %v13268_v34  ;;  %v19372_v59 = vcombine.low %v13265_v46, %v13268_v34  ;;  %v19562_v14 = vcombine.low %v13456_v17, %v13459_v40  ;;  %v13447_v5 = vld [vmem:[#allocation5 + $0x2270] sm:$0xff]  ;;  %v13241_v42 = vld [vmem:[#allocation5 + $0x898] sm:$0xff] }
 0x8ef   :  { %15153 = vmatpush1.bf16.msra.mxu1 %v19502_v52  ;;  %v13262_v52 = vld [vmem:[#allocation5 + $0xb38] sm:$0xff]  ;;  %v13441_v0 = vld [vmem:[#allocation5 + $0x21b0] sm:$0xff] }
 0x8f0   :  { %15154 = vmatprep.subr.bf16.mxu1 %v19497_v9  ;;  %v19367_v9 = vcombine.high %v13259_v63, %v13262_v52  ;;  %v13244_v18 = vld [vmem:[#allocation5 + $0x8f8] sm:$0xff]  ;;  %v13435_v48 = vld [vmem:[#allocation5 + $0x20f0] sm:$0xff] }
 0x8f1   :  { %15198 = vmatpush1.bf16.msra.mxu0 %v19306_v20  ;;  %v19563_v20 = vcombine.high %v13456_v17, %v13459_v40  ;;  %v13235_v62 = vld [vmem:[#allocation5 + $0x7d8] sm:$0xff]  ;;  %v13429_v17 = vld [vmem:[#allocation5 + $0x2030] sm:$0xff] }
 0x8f2   :  { %15199 = vmatprep.subr.bf16.mxu0 %v19301_v39  ;;  %v13450_v39 = vld [vmem:[#allocation5 + $0x22d0] sm:$0xff]  ;;  %v13238_v46 = vld [vmem:[#allocation5 + $0x838] sm:$0xff] }
 0x8f3   :  { %15155 = vmatpush1.bf16.msra.mxu1 %v19496_v2  ;;  %v19366_v2 = vcombine.low %v13259_v63, %v13262_v52  ;;  %v19556_v44 = vcombine.low %v13450_v39, %v13453_v58  ;;  %v13229_v40 = vld [vmem:[#allocation5 + $0x718] sm:$0xff] }
 0x8f4   :  { %15156 = vmatprep.subr.bf16.mxu1 %v19491_v4  ;;  %v19361_v4 = vcombine.high %v13253_v15, %v13256_v11  ;;  %v13232_v63 = vld [vmem:[#allocation5 + $0x778] sm:$0xff] }
 0x8f5   :  { %15200 = vmatpush1.bf16.msra.mxu0 %v19300_v55  ;;  %v19557_v55 = vcombine.high %v13450_v39, %v13453_v58  ;;  %v13423_v39 = vld [vmem:[#allocation5 + $0x1f70] sm:$0xff]  ;;  %v13223_v58 = vld [vmem:[#allocation5 + $0x658] sm:$0xff] }
 0x8f6   :  { %15201 = vmatprep.subr.bf16.mxu0 %v19295_v24  ;;  %v13444_v24 = vld [vmem:[#allocation5 + $0x2210] sm:$0xff] }
 0x8f7   :  { %15157 = vmatpush1.bf16.msra.mxu1 %v19490_v50  ;;  %v19360_v50 = vcombine.low %v13253_v15, %v13256_v11  ;;  %v19550_v33 = vcombine.low %v13444_v24, %v13447_v5  ;;  %v13226_v15 = vld [vmem:[#allocation5 + $0x6b8] sm:$0xff] }
 0x8f8   :  { %15158 = vmatprep.subr.bf16.mxu1 %v19485_v3  ;;  %v19355_v3 = vcombine.high %v13247_v45, %v13250_v61 }
 0x8f9   :  { %15202 = vmatpush1.bf16.msra.mxu0 %v19294_v23  ;;  %v19551_v23 = vcombine.high %v13444_v24, %v13447_v5  ;;  %v13417_v24 = vld [vmem:[#allocation5 + $0x1eb0] sm:$0xff]  ;;  %v13409_v5 = vld [vmem:[#allocation5 + $0x1d98] sm:$0xff] }
 0x8fa   :  { %15203 = vmatprep.subr.bf16.mxu0 %v19289_v57  ;;  %v13438_v57 = vld [vmem:[#allocation5 + $0x2150] sm:$0xff] }
 0x8fb   :  { %15159 = vmatpush1.bf16.msra.mxu1 %v19484_v29  ;;  %v19354_v29 = vcombine.low %v13247_v45, %v13250_v61  ;;  %v19544_v34 = vcombine.low %v13438_v57, %v13441_v0  ;;  %v13412_v45 = vld [vmem:[#allocation5 + $0x1df8] sm:$0xff] }
 0x8fc   :  { %15160 = vmatprep.subr.bf16.mxu1 %v19479_v43  ;;  %v19349_v43 = vcombine.high %v13241_v42, %v13244_v18 }
 0x8fd   :  { %15204 = vmatpush1.bf16.msra.mxu0 %v19288_v25  ;;  %v19545_v25 = vcombine.high %v13438_v57, %v13441_v0  ;;  %v13316_v57 = vld [vmem:[#allocation5 + $0x11f8] sm:$0xff] }
 0x8fe   :  { %15205 = vmatprep.subr.bf16.mxu0 %v19283_v56  ;;  %v13432_v56 = vld [vmem:[#allocation5 + $0x2090] sm:$0xff]  ;;  %v13403_v0 = vld [vmem:[#allocation5 + $0x1cd8] sm:$0xff] }
 0x8ff   :  { %15161 = vmatpush1.bf16.msra.mxu1 %v19478_v1  ;;  %v19348_v1 = vcombine.low %v13241_v42, %v13244_v18  ;;  %v19538_v52 = vcombine.low %v13432_v56, %v13435_v48  ;;  %v13406_v42 = vld [vmem:[#allocation5 + $0x1d38] sm:$0xff] }
 0x900   :  { %15162 = vmatprep.subr.bf16.mxu1 %v19473_v35  ;;  %v19343_v35 = vcombine.high %v13235_v62, %v13238_v46 }
 0x901   :  { %15206 = vmatpush1.bf16.msra.mxu0 %v19282_v7  ;;  %v19539_v7 = vcombine.high %v13432_v56, %v13435_v48  ;;  %v13310_v56 = vld [vmem:[#allocation5 + $0x1138] sm:$0xff] }
 0x902   :  { %15207 = vmatprep.subr.bf16.mxu0 %v19373_v16  ;;  %v13426_v16 = vld [vmem:[#allocation5 + $0x1fd0] sm:$0xff]  ;;  %v13397_v48 = vld [vmem:[#allocation5 + $0x1c18] sm:$0xff] }
 0x903   :  { %15163 = vmatpush1.bf16.msra.mxu1 %v19472_v22  ;;  %v19342_v22 = vcombine.low %v13235_v62, %v13238_v46  ;;  %v19532_v11 = vcombine.low %v13426_v16, %v13429_v17  ;;  %v13400_v62 = vld [vmem:[#allocation5 + $0x1c78] sm:$0xff]  ;;  %v21738_v46 = vld [vmem:[#allocation2] ss:$24 sps:$4 sm:$0xff]  }
 0x904   :  { %15164 = vmatprep.subr.bf16.mxu1 %v19563_v20  ;;  %v19337_v20 = vcombine.high %v13229_v40, %v13232_v63 }
 0x905   :  { %15208 = vmatpush2.bf16.msra.mxu0 %v19372_v59  ;;  %v19533_v59 = vcombine.high %v13426_v16, %v13429_v17  ;;  %v13301_v16 = vld [vmem:[#allocation5 + $0x1018] sm:$0xff] }
 0x906   :  { %15209 = vmatprep.subr.bf16.mxu0 %v19367_v9  ;;  %v13420_v9 = vld [vmem:[#allocation5 + $0x1f10] sm:$0xff]  ;;  %v13304_v17 = vld [vmem:[#allocation5 + $0x1078] sm:$0xff] }
 0x907   :  { %15165 = vmatpush2.bf16.msra.mxu1 %v19562_v14  ;;  %v19336_v14 = vcombine.low %v13229_v40, %v13232_v63  ;;  %v19526_v61 = vcombine.low %v13420_v9, %v13423_v39  ;;  %v21739_v40 = vld [vmem:[#allocation2 + $0x14] ss:$24 sps:$4 sm:$0xff]  }
 0x908   :  { %15166 = vmatprep.subr.bf16.mxu1 %v19557_v55  ;;  %v19331_v55 = vcombine.high %v13223_v58, %v13226_v15 }
 0x909   :  { %15210 = vmatpush2.bf16.msra.mxu0 %v19366_v2  ;;  %v19527_v2 = vcombine.high %v13420_v9, %v13423_v39  ;;  %v21740_v9 = vld [vmem:[#allocation2 + $0xc] ss:$24 sps:$4 sm:$0xff]  }
 0x90a   :  { %15211 = vmatprep.subr.bf16.mxu0 %v19361_v4  ;;  %v13414_v4 = vld [vmem:[#allocation5 + $0x1e50] sm:$0xff] }
 0x90b   :  { %15167 = vmatpush2.bf16.msra.mxu1 %v19556_v44  ;;  %v19330_v44 = vcombine.low %v13223_v58, %v13226_v15  ;;  %v19520_v18 = vcombine.low %v13414_v4, %v13417_v24  ;;  %v19504_v58 = vcombine.low %v13397_v48, %v13400_v62  ;;  %v19409_v15 = vcombine.high %v13301_v16, %v13304_v17 }
 0x90c   :  { %15168 = vmatprep.subr.bf16.mxu1 %v19551_v23  ;;  %v19517_v23 = vcombine.high %v13409_v5, %v13412_v45 }
 0x90d   :  { %15212 = vmatpush2.bf16.msra.mxu0 %v19360_v50  ;;  %v19521_v50 = vcombine.high %v13414_v4, %v13417_v24  ;;  %v13388_v24 = vld [vmem:[#allocation5 + $0x1af8] sm:$0xff] }
 0x90e   :  { %15213 = vmatprep.subr.bf16.mxu0 %v19355_v3  ;;  %v13313_v3 = vld [vmem:[#allocation5 + $0x1198] sm:$0xff] }
 0x90f   :  { %15169 = vmatpush2.bf16.msra.mxu1 %v19550_v33  ;;  %v19516_v33 = vcombine.low %v13409_v5, %v13412_v45 }
 0x910   :  { %15170 = vmatprep.subr.bf16.mxu1 %v19545_v25  ;;  %v19511_v25 = vcombine.high %v13403_v0, %v13406_v42 }
 0x911   :  { %15214 = vmatpush2.bf16.msra.mxu0 %v19354_v29  ;;  %v19421_v29 = vcombine.high %v13313_v3, %v13316_v57 }
 0x912   :  { %15215 = vmatprep.subr.bf16.mxu0 %v19349_v43  ;;  %v13307_v43 = vld [vmem:[#allocation5 + $0x10d8] sm:$0xff] }
 0x913   :  { %15171 = vmatpush2.bf16.msra.mxu1 %v19544_v34  ;;  %v19420_v34 = vcombine.low %v13313_v3, %v13316_v57  ;;  %v13289_v57 = vld [vmem:[#allocation5 + $0xe98] sm:$0xff] }
 0x914   :  { %15172 = vmatprep.subr.bf16.mxu1 %v19539_v7  ;;  %v19415_v7 = vcombine.high %v13307_v43, %v13310_v56 }
 0x915   :  { %15216 = vmatpush2.bf16.msra.mxu0 %v19348_v1  ;;  %v19510_v1 = vcombine.low %v13403_v0, %v13406_v42  ;;  %v13292_v0 = vld [vmem:[#allocation5 + $0xef8] sm:$0xff] }
 0x916   :  { %15217 = vmatprep.subr.bf16.mxu0 %v19343_v35  ;;  %v19505_v35 = vcombine.high %v13397_v48, %v13400_v62  ;;  %v13382_v42 = vld [vmem:[#allocation5 + $0x1a38] sm:$0xff]  ;;  %v19396_v48 = vcombine.low %v13289_v57, %v13292_v0 }
 0x917   :  { %15173 = vmatpush2.bf16.msra.mxu1 %v19538_v52  ;;  %v13391_v52 = vld [vmem:[#allocation5 + $0x1b58] sm:$0xff] }
 0x918   :  { %15174 = vmatprep.subr.bf16.mxu1 %v19533_v59 }
 0x919   :  { %15218 = vmatpush2.bf16.msra.mxu0 %v19342_v22  ;;  %v13394_v22 = vld [vmem:[#allocation5 + $0x1bb8] sm:$0xff] }
 0x91a   :  { %15219 = vmatprep.subr.bf16.mxu0 %v19337_v20  ;;  %v19414_v20 = vcombine.low %v13307_v43, %v13310_v56  ;;  %v13286_v43 = vld [vmem:[#allocation5 + $0xe38] sm:$0xff] }
 0x91b   :  { %15175 = vmatpush2.bf16.msra.mxu1 %v19532_v11  ;;  %v13376_v56 = vld [vmem:[#allocation5 + $0x1978] sm:$0xff] }
 0x91c   :  { %15176 = vmatprep.subr.bf16.mxu1 %v19527_v2  ;;  %v13295_v2 = vld [vmem:[#allocation5 + $0xf58] sm:$0xff] }
 0x91d   :  { %15220 = vmatpush2.bf16.msra.mxu0 %v19336_v14 }
 0x91e   :  { %15221 = vmatprep.subr.bf16.mxu0 %v19331_v55  ;;  %v13298_v55 = vld [vmem:[#allocation5 + $0xfb8] sm:$0xff] }
 0x91f   :  { %15177 = vmatpush2.bf16.msra.mxu1 %v19526_v61  ;;  %v19408_v61 = vcombine.low %v13301_v16, %v13304_v17 }
 0x920   :  { %15178 = vmatprep.subr.bf16.mxu1 %v19521_v50  ;;  %v19403_v50 = vcombine.high %v13295_v2, %v13298_v55 }
 0x921   :  { %15222 = vmatpush2.bf16.msra.mxu0 %v19330_v44 }
 0x922   :  { %15277 = vmatprep.subr.bf16.mxu0 %v19517_v23 }
 0x923   :  { %15179 = vmatpush2.bf16.msra.mxu1 %v19520_v18  ;;  %v19402_v18 = vcombine.low %v13295_v2, %v13298_v55  ;;  %v13451_v2 = vld [vmem:[#allocation5 + $0x22d8] sm:$0xff] }
 0x924   :  { %15224 = vmatmul.mubr.bf16.vlgmr.msra.gmra.mxu0 %v21738_v46  ;;  %15234 = vmatprep.subr.bf16.mxu1 %v19421_v29  ;;  %v19397_v29 = vcombine.high %v13289_v57, %v13292_v0  ;;  %v13454_v55 = vld [vmem:[#allocation5 + $0x2338] sm:$0xff] }
 0x925   :  { %15278 = vmatpush1.bf16.msra.mxu0 %v19516_v33  ;;  %15309 = vmatprep.mubr.bf16.mxu0 %v21739_v40 }
 0x926   :  { %15279 = vmatprep.subr.bf16.mxu0 %v19511_v25  ;;  %v13152_v63 = vpop.f32.mrf.mxu1  ;;  %15181 = vmatmul.mubr.bf16.vlgmr.msra.gmra.mxu1 %v22361_v12  ;;  %v19499_v12 = vcombine.high %v13391_v52, %v13394_v22  ;;  %v13283_v25 = vld [vmem:[#allocation5 + $0xdd8] sm:$0xff] }
 0x927   :  { %v13153_v59 = vadd.f32 %v13152_v63, %v22390_v27  ;;  %15235 = vmatpush1.bf16.msra.mxu1 %v19420_v34  ;;  %15266 = vmatprep.mubr.bf16.mxu1 %v21740_v9  ;;  %v13385_v27 = vld [vmem:[#allocation5 + $0x1a98] sm:$0xff]  ;;  %v19391_v46 = vcombine.high %v13283_v25, %v13286_v43  ;;  %v19390_v16 = vcombine.low %v13283_v25, %v13286_v43 }
 0x928   :  { %v13154_v39 = vpop.f32.mrf.mxu1  ;;  %15236 = vmatprep.subr.bf16.mxu1 %v19415_v7  ;;  %v19493_v3 = vcombine.high %v13385_v27, %v13388_v24  ;;  %v19492_v33 = vcombine.low %v13385_v27, %v13388_v24  ;;  %v13277_v34 = vld [vmem:[#allocation5 + $0xd18] sm:$0xff] }
 0x929   :  { %15280 = vmatpush1.bf16.msra.mxu0 %v19510_v1  ;;  %v22402_v11 = vadd.f32 %v13153_v59, %v22226_v36  ;;  %v13155_v14 = vadd.f32 %v13154_v39, %v22393_v26  ;;  %v19498_v36 = vcombine.low %v13391_v52, %v13394_v22  ;;  %v13280_v1 = vld [vmem:[#allocation5 + $0xd78] sm:$0xff] }
 0x92a   :  { %15281 = vmatprep.subr.bf16.mxu0 %v19505_v35  ;;  %v13156_v4 = vpop.f32.mrf.mxu1  ;;  %v13367_v7 = vld [vmem:[#allocation5 + $0x1858] sm:$0xff]  ;;  %v19385_v40 = vcombine.high %v13277_v34, %v13280_v1  ;;  %v19384_v9 = vcombine.low %v13277_v34, %v13280_v1 }
 0x92b   :  { %v22406_v5 = vadd.f32 %v13155_v14, %v22230_v51  ;;  %v13157_v45 = vadd.f32 %v13156_v4, %v22395_v37  ;;  %15237 = vmatpush1.bf16.msra.mxu1 %v19414_v20  ;;  %v13379_v51 = vld [vmem:[#allocation5 + $0x19d8] sm:$0xff] }
 0x92c   :  { %v13158_v44 = vpop.f32.mrf.mxu1  ;;  %15238 = vmatprep.subr.bf16.mxu1 %v19409_v15  ;;  %v19486_v62 = vcombine.low %v13379_v51, %v13382_v42  ;;  %v13370_v35 = vld [vmem:[#allocation5 + $0x18b8] sm:$0xff] }
 0x92d   :  { %15282 = vmatpush1.bf16.msra.mxu0 %v19504_v58  ;;  %v22410_v26 = vadd.f32 %v13157_v45, %v22234_v21  ;;  %v13159_v23 = vadd.f32 %v13158_v44, %v22397_v38  ;;  %v19487_v21 = vcombine.high %v13379_v51, %v13382_v42  ;;  %v13373_v38 = vld [vmem:[#allocation5 + $0x1918] sm:$0xff]  ;;  %v19475_v63 = vcombine.high %v13367_v7, %v13370_v35 }
 0x92e   :  { %15283 = vmatprep.subr.bf16.mxu0 %v19499_v12  ;;  %v19480_v17 = vcombine.low %v13373_v38, %v13376_v56  ;;  %v13271_v52 = vld [vmem:[#allocation5 + $0xc58] sm:$0xff]  ;;  %v19474_v39 = vcombine.low %v13367_v7, %v13370_v35  ;;  %v19559_v45 = vcombine.high %v13451_v2, %v13454_v55 }
 0x92f   :  { %v22414_v37 = vadd.f32 %v13159_v23, %v22237_v8  ;;  %15239 = vmatpush1.bf16.msra.mxu1 %v19408_v61  ;;  %v19481_v8 = vcombine.high %v13373_v38, %v13376_v56  ;;  %v13274_v22 = vld [vmem:[#allocation5 + $0xcb8] sm:$0xff] }
 0x930   :  { %15240 = vmatprep.subr.bf16.mxu1 %v19403_v50  ;;  %v13457_v59 = vld [vmem:[#allocation5 + $0x2398] sm:$0xff]  ;;  %v19379_v58 = vcombine.high %v13271_v52, %v13274_v22  ;;  %v19378_v4 = vcombine.low %v13271_v52, %v13274_v22 }
 0x931   :  { %15284 = vmatpush1.bf16.msra.mxu0 %v19498_v36  ;;  %v13460_v20 = vld [vmem:[#allocation5 + $0x23f8] sm:$0xff] }
 0x932   :  { %15285 = vmatprep.subr.bf16.mxu0 %v19493_v3  ;;  %v19565_v15 = vcombine.high %v13457_v59, %v13460_v20  ;;  %v13361_v14 = vld [vmem:[#allocation5 + $0x1798] sm:$0xff]  ;;  %v19564_v27 = vcombine.low %v13457_v59, %v13460_v20  ;;  %v19558_v3 = vcombine.low %v13451_v2, %v13454_v55 }
 0x933   :  { %15241 = vmatpush1.bf16.msra.mxu1 %v19402_v18  ;;  %v13364_v12 = vld [vmem:[#allocation5 + $0x17f8] sm:$0xff] }
 0x934   :  { %15242 = vmatprep.subr.bf16.mxu1 %v19397_v29  ;;  %v19469_v24 = vcombine.high %v13361_v14, %v13364_v12  ;;  %v13355_v61 = vld [vmem:[#allocation5 + $0x16d8] sm:$0xff]  ;;  %v19468_v23 = vcombine.low %v13361_v14, %v13364_v12  ;;  %v22416_v12 = vpop.f32.mrf.mxu0 }
 0x935   :  { %15286 = vmatpush1.bf16.msra.mxu0 %v19492_v33  ;;  %v13358_v44 = vld [vmem:[#allocation5 + $0x1738] sm:$0xff] }
 0x936   :  { %15287 = vmatprep.subr.bf16.mxu0 %v19487_v21  ;;  %v13445_v36 = vld [vmem:[#allocation5 + $0x2218] sm:$0xff]  ;;  %v19463_v57 = vcombine.high %v13355_v61, %v13358_v44  ;;  %v19462_v29 = vcombine.low %v13355_v61, %v13358_v44 }
 0x937   :  { %15243 = vmatpush1.bf16.msra.mxu1 %v19396_v48  ;;  %v13448_v50 = vld [vmem:[#allocation5 + $0x2278] sm:$0xff] }
 0x938   :  { %15244 = vmatprep.subr.bf16.mxu1 %v19391_v46  ;;  %v19553_v0 = vcombine.high %v13445_v36, %v13448_v50  ;;  %v13349_v51 = vld [vmem:[#allocation5 + $0x1618] sm:$0xff]  ;;  %v19552_v21 = vcombine.low %v13445_v36, %v13448_v50  ;;  %v14969_v36 = vpop.f32.mrf.mxu0 }
 0x939   :  { %15288 = vmatpush1.bf16.msra.mxu0 %v19486_v62  ;;  %v13352_v42 = vld [vmem:[#allocation5 + $0x1678] sm:$0xff] }
 0x93a   :  { %15289 = vmatprep.subr.bf16.mxu0 %v19481_v8  ;;  %v13439_v18 = vld [vmem:[#allocation5 + $0x2158] sm:$0xff]  ;;  %v19457_v25 = vcombine.high %v13349_v51, %v13352_v42  ;;  %v19456_v46 = vcombine.low %v13349_v51, %v13352_v42  ;;  %v22418_v42 = vpop.f32.mrf.mxu0 }
 0x93b   :  { %15245 = vmatpush1.bf16.msra.mxu1 %v19390_v16  ;;  %v13442_v33 = vld [vmem:[#allocation5 + $0x21b8] sm:$0xff] }
 0x93c   :  { %15246 = vmatprep.subr.bf16.mxu1 %v19385_v40  ;;  %v19547_v43 = vcombine.high %v13439_v18, %v13442_v33  ;;  %v13343_v38 = vld [vmem:[#allocation5 + $0x1558] sm:$0xff]  ;;  %v19546_v8 = vcombine.low %v13439_v18, %v13442_v33  ;;  %v21221_v18 = vld [vmem:[#allocation8 + $0x1f54] ss:$24 sps:$4 sm:$0xff]  }
 0x93d   :  { %15290 = vmatpush1.bf16.msra.mxu0 %v19480_v17  ;;  %v13346_v56 = vld [vmem:[#allocation5 + $0x15b8] sm:$0xff] }
 0x93e   :  { %15291 = vmatprep.subr.bf16.mxu0 %v19475_v63  ;;  %v13433_v48 = vld [vmem:[#allocation5 + $0x2098] sm:$0xff]  ;;  %v19451_v34 = vcombine.high %v13343_v38, %v13346_v56  ;;  %v19450_v40 = vcombine.low %v13343_v38, %v13346_v56 }
 0x93f   :  { %15247 = vmatpush1.bf16.msra.mxu1 %v19384_v9  ;;  %v13436_v62 = vld [vmem:[#allocation5 + $0x20f8] sm:$0xff] }
 0x940   :  { %15248 = vmatprep.subr.bf16.mxu1 %v19379_v58  ;;  %v19541_v1 = vcombine.high %v13433_v48, %v13436_v62  ;;  %v13337_v7 = vld [vmem:[#allocation5 + $0x1498] sm:$0xff]  ;;  %v19540_v63 = vcombine.low %v13433_v48, %v13436_v62 }
 0x941   :  { %15292 = vmatpush1.bf16.msra.mxu0 %v19474_v39  ;;  %v13340_v35 = vld [vmem:[#allocation5 + $0x14f8] sm:$0xff] }
 0x942   :  { %15293 = vmatprep.subr.bf16.mxu0 %v19565_v15  ;;  %v13427_v16 = vld [vmem:[#allocation5 + $0x1fd8] sm:$0xff]  ;;  %v19445_v52 = vcombine.high %v13337_v7, %v13340_v35  ;;  %v19444_v58 = vcombine.low %v13337_v7, %v13340_v35 }
 0x943   :  { %15249 = vmatpush1.bf16.msra.mxu1 %v19378_v4  ;;  %v13430_v17 = vld [vmem:[#allocation5 + $0x2038] sm:$0xff] }
 0x944   :  { %15250 = vmatprep.subr.bf16.mxu1 %v19469_v24  ;;  %v19535_v22 = vcombine.high %v13427_v16, %v13430_v17  ;;  %v13331_v59 = vld [vmem:[#allocation5 + $0x13d8] sm:$0xff]  ;;  %v19534_v15 = vcombine.low %v13427_v16, %v13430_v17 }
 0x945   :  { %15294 = vmatpush2.bf16.msra.mxu0 %v19564_v27  ;;  %v13334_v20 = vld [vmem:[#allocation5 + $0x1438] sm:$0xff] }
 0x946   :  { %15295 = vmatprep.subr.bf16.mxu0 %v19559_v45  ;;  %v13421_v9 = vld [vmem:[#allocation5 + $0x1f18] sm:$0xff]  ;;  %v19439_v14 = vcombine.high %v13331_v59, %v13334_v20  ;;  %v19438_v45 = vcombine.low %v13331_v59, %v13334_v20 }
 0x947   :  { %15251 = vmatpush2.bf16.msra.mxu1 %v19468_v23  ;;  %v13424_v39 = vld [vmem:[#allocation5 + $0x1f78] sm:$0xff] }
 0x948   :  { %15252 = vmatprep.subr.bf16.mxu1 %v19463_v57  ;;  %v19529_v2 = vcombine.high %v13421_v9, %v13424_v39  ;;  %v13325_v55 = vld [vmem:[#allocation5 + $0x1318] sm:$0xff]  ;;  %v19528_v61 = vcombine.low %v13421_v9, %v13424_v39 }
 0x949   :  { %15296 = vmatpush2.bf16.msra.mxu0 %v19558_v3  ;;  %v13328_v4 = vld [vmem:[#allocation5 + $0x1378] sm:$0xff] }
 0x94a   :  { %15297 = vmatprep.subr.bf16.mxu0 %v19553_v0  ;;  %v13415_v27 = vld [vmem:[#allocation5 + $0x1e58] sm:$0xff]  ;;  %v19433_v44 = vcombine.high %v13325_v55, %v13328_v4  ;;  %v19432_v57 = vcombine.low %v13325_v55, %v13328_v4 }
 0x94b   :  { %15253 = vmatpush2.bf16.msra.mxu1 %v19462_v29  ;;  %v13418_v24 = vld [vmem:[#allocation5 + $0x1eb8] sm:$0xff]  ;;  %v22420_v29 = vld [vmem:[#allocation7 + $0x12] sm:$0x3f] }
 0x94c   :  { %15254 = vmatprep.subr.bf16.mxu1 %v19457_v25  ;;  %v19523_v50 = vcombine.high %v13415_v27, %v13418_v24  ;;  %v13319_v23 = vld [vmem:[#allocation5 + $0x1258] sm:$0xff]  ;;  %v19522_v0 = vcombine.low %v13415_v27, %v13418_v24  ;;  %v21219_v25 = vld [vmem:[#allocation8 + $0x1f50] ss:$24 sps:$4 sm:$0xff]   ;;  %v13470_v56 = vrot.slane %v22420_v29, %v21960_v49  ;;  %v21233_v27 = vld [vmem:[#allocation8 + $0x1e94] ss:$24 sps:$4 sm:$0xff]  }
 0x94d   :  { %15298 = vmatpush2.bf16.msra.mxu0 %v19552_v21  ;;  %v13322_v3 = vld [vmem:[#allocation5 + $0x12b8] sm:$0xff]  ;;  %v21173_v21 = vld [vmem:[#allocation8 + $0x1c54] ss:$24 sps:$4 sm:$0xff]  }
 0x94e   :  { %15299 = vmatprep.subr.bf16.mxu0 %v19547_v43  ;;  %v19427_v51 = vcombine.high %v13319_v23, %v13322_v3  ;;  %v19426_v33 = vcombine.low %v13319_v23, %v13322_v3  ;;  %v14973_v43 = vpop.f32.mrf.mxu0  ;;  %v21224_v38 = vld [vmem:[#allocation8 + $0x1f24] ss:$24 sps:$4 sm:$0xff]   ;;  %v21741_v62 = vld [vmem:[#allocation2 + $0x10] ss:$24 sps:$4 sm:$0xff]   ;;  %v14970_v16 = vadd.f32 %v14969_v36, %v13470_v56  ;;  %v21185_v36 = vld [vmem:[#allocation8 + $0x1b94] ss:$24 sps:$4 sm:$0xff]  }
 0x94f   :  { %15255 = vmatpush2.bf16.msra.mxu1 %v19456_v46  ;;  %v21171_v46 = vld [vmem:[#allocation8 + $0x1c50] ss:$24 sps:$4 sm:$0xff]   ;;  %v21742_v35 = vld [vmem:[#allocation2 + $0x8] ss:$24 sps:$4 sm:$0xff]   ;;  %v21230_v59 = vld [vmem:[#allocation8 + $0x1ec4] ss:$24 sps:$4 sm:$0xff]  }
 0x950   :  { %15256 = vmatprep.subr.bf16.mxu1 %v19451_v34  ;;  %v21222_v34 = vld [vmem:[#allocation8 + $0x1f20] ss:$24 sps:$4 sm:$0xff]   ;;  %v21236_v23 = vld [vmem:[#allocation8 + $0x1e64] ss:$24 sps:$4 sm:$0xff]  }
 0x951   :  { %15300 = vmatpush2.bf16.msra.mxu0 %v19546_v8  ;;  %v21176_v8 = vld [vmem:[#allocation8 + $0x1c24] ss:$24 sps:$4 sm:$0xff]   ;;  %v21174_v49 = vld [vmem:[#allocation8 + $0x1c20] ss:$24 sps:$4 sm:$0xff]  }
 0x952   :  { %15301 = vmatprep.subr.bf16.mxu0 %v19541_v1  ;;  %v21227_v1 = vld [vmem:[#allocation8 + $0x1ef4] ss:$24 sps:$4 sm:$0xff]   ;;  %v21228_v55 = vld [vmem:[#allocation8 + $0x1ec0] ss:$24 sps:$4 sm:$0xff]  }
 0x953   :  { %15257 = vmatpush2.bf16.msra.mxu1 %v19450_v40 }
 0x954   :  { %15258 = vmatprep.subr.bf16.mxu1 %v19445_v52  ;;  %v21225_v52 = vld [vmem:[#allocation8 + $0x1ef0] ss:$24 sps:$4 sm:$0xff]  }
 0x955   :  { %15302 = vmatpush2.bf16.msra.mxu0 %v19540_v63  ;;  %v21179_v63 = vld [vmem:[#allocation8 + $0x1bf4] ss:$24 sps:$4 sm:$0xff]  }
 0x956   :  { %15303 = vmatprep.subr.bf16.mxu0 %v19535_v22 }
 0x957   :  { %15259 = vmatpush2.bf16.msra.mxu1 %v19444_v58  ;;  %v21177_v58 = vld [vmem:[#allocation8 + $0x1bf0] ss:$24 sps:$4 sm:$0xff]  }
 0x958   :  { %15260 = vmatprep.subr.bf16.mxu1 %v19439_v14 }
 0x959   :  { %15304 = vmatpush2.bf16.msra.mxu0 %v19534_v15  ;;  %v14974_v15 = vadd.f32 %v14973_v43, %v13470_v56  ;;  %v21242_v43 = vld [vmem:[#allocation8 + $0x1e04] ss:$24 sps:$4 sm:$0xff]   ;;  %v21189_v56 = vld [vmem:[#allocation8 + $0x1b30] ss:$24 sps:$4 sm:$0xff]  }
 0x95a   :  { %15305 = vmatprep.subr.bf16.mxu0 %v19529_v2  ;;  %v21182_v2 = vld [vmem:[#allocation8 + $0x1bc4] ss:$24 sps:$4 sm:$0xff]  }
 0x95b   :  { %15261 = vmatpush2.bf16.msra.mxu1 %v19438_v45 }
 0x95c   :  { %15262 = vmatprep.subr.bf16.mxu1 %v19433_v44 }
 0x95d   :  { %15306 = vmatpush2.bf16.msra.mxu0 %v19528_v61  ;;  %v21180_v61 = vld [vmem:[#allocation8 + $0x1bc0] ss:$24 sps:$4 sm:$0xff]  }
 0x95e   :  { %15307 = vmatprep.subr.bf16.mxu0 %v19523_v50  ;;  %v21231_v50 = vld [vmem:[#allocation8 + $0x1e90] ss:$24 sps:$4 sm:$0xff]  }
 0x95f   :  { %15263 = vmatpush2.bf16.msra.mxu1 %v19432_v57  ;;  %v21183_v57 = vld [vmem:[#allocation8 + $0x1b90] ss:$24 sps:$4 sm:$0xff]  }
 0x960   :  { %15264 = vmatprep.subr.bf16.mxu1 %v19427_v51  ;;  %v21234_v51 = vld [vmem:[#allocation8 + $0x1e60] ss:$24 sps:$4 sm:$0xff]  }
 0x961   :  { %15308 = vmatpush2.bf16.msra.mxu0 %v19522_v0  ;;  %v21188_v0 = vld [vmem:[#allocation8 + $0x1b64] ss:$24 sps:$4 sm:$0xff]  }
 0x962   :  { %17157 = vmatprep.subr.bf16.mxu0 %v21221_v18  ;;  %v21239_v18 = vld [vmem:[#allocation8 + $0x1e34] ss:$24 sps:$4 sm:$0xff]  }
 0x963   :  { %15265 = vmatpush2.bf16.msra.mxu1 %v19426_v33  ;;  %v21186_v33 = vld [vmem:[#allocation8 + $0x1b60] ss:$24 sps:$4 sm:$0xff]  }
 0x964   :  { %v22424_v48 = vpop.f32.mrf.mxu0  ;;  %15310 = vmatmul.mubr.bf16.vlgmr.msra.gmra.mxu0 %v21741_v62  ;;  %17114 = vmatprep.subr.bf16.mxu1 %v21173_v21  ;;  %v21191_v21 = vld [vmem:[#allocation8 + $0x1b34] ss:$24 sps:$4 sm:$0xff]   ;;  %v21194_v62 = vld [vmem:[#allocation8 + $0x1b04] ss:$24 sps:$4 sm:$0xff]  }
 0x965   :  { %17158 = vmatpush1.bf16.msra.mxu0 %v21219_v25  ;;  %v21237_v25 = vld [vmem:[#allocation8 + $0x1e30] ss:$24 sps:$4 sm:$0xff]  }
 0x966   :  { %17159 = vmatprep.subr.bf16.mxu0 %v21224_v38  ;;  %v22426_v7 = vpop.f32.mrf.mxu1  ;;  %15267 = vmatmul.mubr.bf16.vlgmr.msra.gmra.mxu1 %v21742_v35  ;;  %v15055_v17 = vpop.f32.mrf.mxu0  ;;  %v13466_v38 = vrot.slane %v22420_v29, %v21957_v47  ;;  %v21192_v35 = vld [vmem:[#allocation8 + $0x1b00] ss:$24 sps:$4 sm:$0xff]   ;;  %v21243_v47 = vld [vmem:[#allocation8 + $0x20d0] ss:$24 sps:$4 sm:$0xff]  }
 0x967   :  { %17115 = vmatpush1.bf16.msra.mxu1 %v21171_v46  ;;  %v21240_v46 = vld [vmem:[#allocation8 + $0x1e00] ss:$24 sps:$4 sm:$0xff]  }
 0x968   :  { %v15012_v40 = vpop.f32.mrf.mxu1  ;;  %17116 = vmatprep.subr.bf16.mxu1 %v21176_v8  ;;  %v22430_v39 = vpop.f32.mrf.mxu0 }
 0x969   :  { %17160 = vmatpush1.bf16.msra.mxu0 %v21222_v34  ;;  %v15013_v22 = vadd.f32 %v15012_v40, %v14970_v16  ;;  %v21245_v34 = vld [vmem:[#allocation8 + $0x20d4] ss:$24 sps:$4 sm:$0xff]   ;;  %v14968_v16 = vadd.f32 %v22416_v12, %v13466_v38 }
 0x96a   :  { %17161 = vmatprep.subr.bf16.mxu0 %v21227_v1  ;;  %v15014_v20 = vpop.f32.mrf.mxu1  ;;  %v15059_v45 = vpop.f32.mrf.mxu0  ;;  %v14972_v1 = vadd.f32 %v22418_v42, %v13466_v38  ;;  %v21195_v42 = vld [vmem:[#allocation8 + $0x1dd0] ss:$24 sps:$4 sm:$0xff]   ;;  %v21215_v38 = vld [vmem:[#allocation8 + $0x1cb4] ss:$24 sps:$4 sm:$0xff]  }
 0x96b   :  { %v22428_v9 = vadd.f32 %v15055_v17, %v15013_v22  ;;  %17117 = vmatpush1.bf16.msra.mxu1 %v21174_v49  ;;  %v21197_v49 = vld [vmem:[#allocation8 + $0x1dd4] ss:$24 sps:$4 sm:$0xff]   ;;  %v15011_v22 = vadd.f32 %v22426_v7, %v14968_v16  ;;  %v21264_v16 = vld [vmem:[#allocation8 + $0x1f80] ss:$24 sps:$4 sm:$0xff]  }
 0x96c   :  { %v15016_v14 = vpop.f32.mrf.mxu1  ;;  %17118 = vmatprep.subr.bf16.mxu1 %v21179_v63  ;;  %v15015_v17 = vadd.f32 %v15014_v20, %v14972_v1  ;;  %v21251_v7 = vld [vmem:[#allocation8 + $0x2074] ss:$24 sps:$4 sm:$0xff]  }
 0x96d   :  { %17162 = vmatpush1.bf16.msra.mxu0 %v21225_v52  ;;  %v15333_v4 = vmul.f32 0.70710677, %v22428_v9  ;;  %v15017_v24 = vadd.f32 %v15016_v14, %v14974_v15  ;;  %v21248_v52 = vld [vmem:[#allocation8 + $0x20a4] ss:$24 sps:$4 sm:$0xff]  }
 0x96e   :  { %17163 = vmatprep.subr.bf16.mxu0 %v21230_v59  ;;  %v15321_v59 = vmul.f32 0.5, %v22428_v9  ;;  %v22440_v14 = vadd.f32 %v22430_v39, %v15015_v17  ;;  %v21198_v9 = vld [vmem:[#allocation8 + $0x1da0] ss:$24 sps:$4 sm:$0xff]   ;;  %v21203_v39 = vld [vmem:[#allocation8 + $0x1d74] ss:$24 sps:$4 sm:$0xff]  }
 0x96f   :  { %17119 = vmatpush1.bf16.msra.mxu1 %v21177_v58  ;;  %21675 = verf.f32 %v15333_v4  ;;  %v15060_v44 = vadd.f32 %v15059_v45, %v15017_v24  ;;  %v15054_v4 = vadd.f32 %v22424_v48, %v15011_v22  ;;  %v21249_v45 = vld [vmem:[#allocation8 + $0x2070] ss:$24 sps:$4 sm:$0xff]   ;;  %v21206_v48 = vld [vmem:[#allocation8 + $0x1d44] ss:$24 sps:$4 sm:$0xff]   ;;  %v21272_v22 = vld [vmem:[#allocation8 + $0x2254] ss:$24 sps:$4 sm:$0xff]  }
 0x970   :  { %17120 = vmatprep.subr.bf16.mxu1 %v21182_v2  ;;  %v21200_v2 = vld [vmem:[#allocation8 + $0x1da4] ss:$24 sps:$4 sm:$0xff]   ;;  %v15338_v24 = vmul.f32 0.70710677, %v22440_v14 }
 0x971   :  { %17164 = vmatpush1.bf16.msra.mxu0 %v21228_v55  ;;  %v15339_v3 = vmul.f32 0.70710677, %v15060_v44  ;;  %v15327_v58 = vmul.f32 0.5, %v15060_v44  ;;  %v21246_v55 = vld [vmem:[#allocation8 + $0x20a0] ss:$24 sps:$4 sm:$0xff]  }
 0x972   :  { %17165 = vmatprep.subr.bf16.mxu0 %v21233_v27  ;;  %v21254_v44 = vld [vmem:[#allocation8 + $0x2044] ss:$24 sps:$4 sm:$0xff]  }
 0x973   :  { %17121 = vmatpush1.bf16.msra.mxu1 %v21180_v61  ;;  %21677 = verf.f32 %v15339_v3  ;;  %v15332_v61 = vmul.f32 0.70710677, %v15054_v4  ;;  %v21204_v3 = vld [vmem:[#allocation8 + $0x1d40] ss:$24 sps:$4 sm:$0xff]  }
 0x974   :  { %17122 = vmatprep.subr.bf16.mxu1 %v21185_v36  ;;  %v21201_v36 = vld [vmem:[#allocation8 + $0x1d70] ss:$24 sps:$4 sm:$0xff]   ;;  %21679 = verf.f32 %v15338_v24  ;;  %v21300_v24 = vld [vmem:[#allocation8 + $0x2160] ss:$24 sps:$4 sm:$0xff]  }
 0x975   :  { %17166 = vmatpush1.bf16.msra.mxu0 %v21231_v50  ;;  %v21252_v50 = vld [vmem:[#allocation8 + $0x2040] ss:$24 sps:$4 sm:$0xff]   ;;  %21681 = verf.f32 %v15332_v61  ;;  %v21314_v61 = vld [vmem:[#allocation8 + $0x2104] ss:$24 sps:$4 sm:$0xff]  }
 0x976   :  { %17167 = vmatprep.subr.bf16.mxu0 %v21236_v23  ;;  %v21257_v23 = vld [vmem:[#allocation8 + $0x2014] ss:$24 sps:$4 sm:$0xff]  }
 0x977   :  { %17123 = vmatpush1.bf16.msra.mxu1 %v21183_v57  ;;  %v21209_v57 = vld [vmem:[#allocation8 + $0x1d14] ss:$24 sps:$4 sm:$0xff]  }
 0x978   :  { %17124 = vmatprep.subr.bf16.mxu1 %v21188_v0  ;;  %v21255_v0 = vld [vmem:[#allocation8 + $0x2010] ss:$24 sps:$4 sm:$0xff]  }
 0x979   :  { %17168 = vmatpush1.bf16.msra.mxu0 %v21234_v51  ;;  %v21260_v51 = vld [vmem:[#allocation8 + $0x1fe4] ss:$24 sps:$4 sm:$0xff]  }
 0x97a   :  { %17169 = vmatprep.subr.bf16.mxu0 %v21239_v18  ;;  %v21207_v18 = vld [vmem:[#allocation8 + $0x1d10] ss:$24 sps:$4 sm:$0xff]  }
 0x97b   :  { %17125 = vmatpush1.bf16.msra.mxu1 %v21186_v33  ;;  %v21212_v33 = vld [vmem:[#allocation8 + $0x1ce4] ss:$24 sps:$4 sm:$0xff]  }
 0x97c   :  { %17126 = vmatprep.subr.bf16.mxu1 %v21191_v21  ;;  %v21676_v8 = vpop.eup %21675  ;;  %v21258_v21 = vld [vmem:[#allocation8 + $0x1fe0] ss:$24 sps:$4 sm:$0xff]  }
 0x97d   :  { %17170 = vmatpush1.bf16.msra.mxu0 %v21237_v25  ;;  %v15357_v40 = vadd.f32 1.0, %v21676_v8  ;;  %v21263_v25 = vld [vmem:[#allocation8 + $0x1fb4] ss:$24 sps:$4 sm:$0xff]  }
 0x97e   :  { %17171 = vmatprep.subr.bf16.mxu0 %v21242_v43  ;;  %v21210_v43 = vld [vmem:[#allocation8 + $0x1ce0] ss:$24 sps:$4 sm:$0xff]  }
 0x97f   :  { %17127 = vmatpush1.bf16.msra.mxu1 %v21189_v56  ;;  %v15369_v12 = vmul.f32 %v15357_v40, %v15321_v59  ;;  %v21269_v40 = vld [vmem:[#allocation8 + $0x1c5c] ss:$24 sps:$4 sm:$0xff]  }
 0x980   :  { %17128 = vmatprep.subr.bf16.mxu1 %v21194_v62  ;;  %v21678_v63 = vpop.eup %21677  ;;  %v21261_v62 = vld [vmem:[#allocation8 + $0x1fb0] ss:$24 sps:$4 sm:$0xff]  }
 0x981   :  { %17172 = vmatpush1.bf16.msra.mxu0 %v21240_v46  ;;  %v15363_v15 = vadd.f32 1.0, %v21678_v63  ;;  %v21680_v56 = vpop.eup %21679  ;;  %v21266_v46 = vld [vmem:[#allocation8 + $0x1f84] ss:$24 sps:$4 sm:$0xff]   ;;  %v15320_v63 = vmul.f32 0.5, %v15054_v4  ;;  %v21296_v4 = vld [vmem:[#allocation8 + $0x2194] ss:$24 sps:$4 sm:$0xff]  }
 0x982   :  { %17173 = vmatprep.subr.bf16.mxu0 %v21245_v34  ;;  %v21682_v8 = vpop.eup %21681  ;;  %v21213_v34 = vld [vmem:[#allocation8 + $0x1cb0] ss:$24 sps:$4 sm:$0xff]   ;;  %v15362_v1 = vadd.f32 1.0, %v21680_v56 }
 0x983   :  { %17129 = vmatpush1.bf16.msra.mxu1 %v21192_v35  ;;  %v15375_v20 = vmul.f32 %v15363_v15, %v15327_v58  ;;  %v21218_v35 = vld [vmem:[#allocation8 + $0x1c84] ss:$24 sps:$4 sm:$0xff]   ;;  %v15356_v17 = vadd.f32 1.0, %v21682_v8  ;;  %v21270_v58 = vld [vmem:[#allocation8 + $0x2250] ss:$24 sps:$4 sm:$0xff]   ;;  %v13474_v8 = vrot.slane %v22420_v29, %v21973_v28 }
 0x984   :  { %17130 = vmatprep.subr.bf16.mxu1 %v21197_v49  ;;  %v15326_v49 = vmul.f32 0.5, %v22440_v14  ;;  %v21276_v14 = vld [vmem:[#allocation8 + $0x2220] ss:$24 sps:$4 sm:$0xff]   ;;  %v21354_v56 = vld [vmem:[#allocation8 + $0x22b0] ss:$24 sps:$4 sm:$0xff]  }
 0x985   :  { %17174 = vmatpush2.bf16.msra.mxu0 %v21243_v47  ;;  %v22443_v27 = vpack.c.bf16 %v15375_v20, %v15369_v12  ;;  %v21216_v47 = vld [vmem:[#allocation8 + $0x1c80] ss:$24 sps:$4 sm:$0xff]   ;;  %v15368_v59 = vmul.f32 %v15356_v17, %v15320_v63  ;;  %v21284_v12 = vld [vmem:[#allocation8 + $0x21f4] ss:$24 sps:$4 sm:$0xff]   ;;  %v21282_v20 = vld [vmem:[#allocation8 + $0x21f0] ss:$24 sps:$4 sm:$0xff]  }
 0x986   :  { %17175 = vmatprep.subr.bf16.mxu0 %v21248_v52  ;;  %v15374_v52 = vmul.f32 %v15362_v1, %v15326_v49  ;;  %v13478_v1 = vrot.slane %v22420_v29, %v21976_v31  ;;  %v21368_v17 = vld [vmem:[#allocation8 + $0x1f5c] ss:$24 sps:$4 sm:$0xff]  }
 0x987   :  { %17131 = vmatpush2.bf16.msra.mxu1 %v21195_v42  ;;  %17146 = vmatprep.mubr.bf16.mxu1 %v22443_v27  ;;  %v21278_v42 = vld [vmem:[#allocation8 + $0x2224] ss:$24 sps:$4 sm:$0xff]  }
 0x988   :  { %17132 = vmatprep.subr.bf16.mxu1 %v21200_v2  ;;  %v22448_v15 = vpack.c.bf16 %v15374_v52, %v15368_v59  ;;  %v21290_v2 = vld [vmem:[#allocation8 + $0x21c4] ss:$24 sps:$4 sm:$0xff]  }
 0x989   :  { %17176 = vmatpush2.bf16.msra.mxu0 %v21246_v55  ;;  %v21288_v55 = vld [vmem:[#allocation8 + $0x21c0] ss:$24 sps:$4 sm:$0xff]  }
 0x98a   :  { %17177 = vmatprep.subr.bf16.mxu0 %v21251_v7  ;;  %v21294_v7 = vld [vmem:[#allocation8 + $0x2190] ss:$24 sps:$4 sm:$0xff]  }
 0x98b   :  { %17133 = vmatpush2.bf16.msra.mxu1 %v21198_v9  ;;  %v21302_v9 = vld [vmem:[#allocation8 + $0x2164] ss:$24 sps:$4 sm:$0xff]  }
 0x98c   :  { %17134 = vmatprep.subr.bf16.mxu1 %v21203_v39  ;;  %v21308_v39 = vld [vmem:[#allocation8 + $0x2134] ss:$24 sps:$4 sm:$0xff]  }
 0x98d   :  { %17178 = vmatpush2.bf16.msra.mxu0 %v21249_v45  ;;  %v21306_v45 = vld [vmem:[#allocation8 + $0x2130] ss:$24 sps:$4 sm:$0xff]  }
 0x98e   :  { %17179 = vmatprep.subr.bf16.mxu0 %v21254_v44  ;;  %v21312_v44 = vld [vmem:[#allocation8 + $0x2100] ss:$24 sps:$4 sm:$0xff]  }
 0x98f   :  { %17135 = vmatpush2.bf16.msra.mxu1 %v21201_v36  ;;  %v21320_v36 = vld [vmem:[#allocation8 + $0x23d4] ss:$24 sps:$4 sm:$0xff]  }
 0x990   :  { %17136 = vmatprep.subr.bf16.mxu1 %v21206_v48  ;;  %v21318_v48 = vld [vmem:[#allocation8 + $0x23d0] ss:$24 sps:$4 sm:$0xff]  }
 0x991   :  { %17180 = vmatpush2.bf16.msra.mxu0 %v21252_v50  ;;  %v21326_v50 = vld [vmem:[#allocation8 + $0x23a4] ss:$24 sps:$4 sm:$0xff]  }
 0x992   :  { %17181 = vmatprep.subr.bf16.mxu0 %v21257_v23  ;;  %v21324_v23 = vld [vmem:[#allocation8 + $0x23a0] ss:$24 sps:$4 sm:$0xff]  }
 0x993   :  { %17137 = vmatpush2.bf16.msra.mxu1 %v21204_v3  ;;  %v21332_v3 = vld [vmem:[#allocation8 + $0x2374] ss:$24 sps:$4 sm:$0xff]  }
 0x994   :  { %17138 = vmatprep.subr.bf16.mxu1 %v21209_v57  ;;  %v21330_v57 = vld [vmem:[#allocation8 + $0x2370] ss:$24 sps:$4 sm:$0xff]  }
 0x995   :  { %17182 = vmatpush2.bf16.msra.mxu0 %v21255_v0  ;;  %v21338_v0 = vld [vmem:[#allocation8 + $0x2344] ss:$24 sps:$4 sm:$0xff]  }
 0x996   :  { %17183 = vmatprep.subr.bf16.mxu0 %v21260_v51  ;;  %v21336_v51 = vld [vmem:[#allocation8 + $0x2340] ss:$24 sps:$4 sm:$0xff]  }
 0x997   :  { %17139 = vmatpush2.bf16.msra.mxu1 %v21207_v18  ;;  %v21344_v18 = vld [vmem:[#allocation8 + $0x2314] ss:$24 sps:$4 sm:$0xff]  }
 0x998   :  { %17140 = vmatprep.subr.bf16.mxu1 %v21212_v33  ;;  %v21342_v33 = vld [vmem:[#allocation8 + $0x2310] ss:$24 sps:$4 sm:$0xff]  }
 0x999   :  { %17184 = vmatpush2.bf16.msra.mxu0 %v21258_v21  ;;  %v21350_v21 = vld [vmem:[#allocation8 + $0x22e4] ss:$24 sps:$4 sm:$0xff]  }
 0x99a   :  { %17185 = vmatprep.subr.bf16.mxu0 %v21263_v25  ;;  %v21348_v25 = vld [vmem:[#allocation8 + $0x22e0] ss:$24 sps:$4 sm:$0xff]  }
 0x99b   :  { %17141 = vmatpush2.bf16.msra.mxu1 %v21210_v43 }
 0x99c   :  { %17142 = vmatprep.subr.bf16.mxu1 %v21215_v38  ;;  %v21356_v38 = vld [vmem:[#allocation8 + $0x22b4] ss:$24 sps:$4 sm:$0xff]  }
 0x99d   :  { %17186 = vmatpush2.bf16.msra.mxu0 %v21261_v62 }
 0x99e   :  { %17187 = vmatprep.subr.bf16.mxu0 %v21266_v46  ;;  %v21362_v46 = vld [vmem:[#allocation8 + $0x2284] ss:$24 sps:$4 sm:$0xff]  }
 0x99f   :  { %17143 = vmatpush2.bf16.msra.mxu1 %v21213_v34 }
 0x9a0   :  { %17144 = vmatprep.subr.bf16.mxu1 %v21218_v35  ;;  %v21360_v35 = vld [vmem:[#allocation8 + $0x2280] ss:$24 sps:$4 sm:$0xff]  }
 0x9a1   :  { %17188 = vmatpush2.bf16.msra.mxu0 %v21264_v16 }
 0x9a2   :  { %17243 = vmatprep.subr.bf16.mxu0 %v21269_v40 }
 0x9a3   :  { %17145 = vmatpush2.bf16.msra.mxu1 %v21216_v47 }
 0x9a4   :  { %17200 = vmatprep.subr.bf16.mxu1 %v21272_v22  ;;  %v15139_v34 = vpop.f32.mrf.mxu0 }
 0x9a6   :  { %17147 = vmatmul.mubr.bf16.vlgmr.msra.gmra.mxu1 %v22448_v15  ;;  %v15096_v43 = vpop.f32.mrf.mxu1  ;;  %v15141_v40 = vpop.f32.mrf.mxu0 }
 0x9a7   :  { %17201 = vmatpush1.bf16.msra.mxu1 %v21270_v58  ;;  %v15097_v49 = vadd.f32 %v15096_v43, %v13474_v8 }
 0x9a8   :  { %17202 = vmatprep.subr.bf16.mxu1 %v21278_v42  ;;  %v15098_v62 = vpop.f32.mrf.mxu1  ;;  %v15143_v59 = vpop.f32.mrf.mxu0 }
 0x9a9   :  { %v15099_v47 = vadd.f32 %v15098_v62, %v13478_v1  ;;  %v15140_v22 = vadd.f32 %v15139_v34, %v15097_v49  ;;  %v21287_v49 = vld [vmem:[#allocation8 + $0x1bcc] ss:$24 sps:$4 sm:$0xff]  }
 0x9aa   :  { %v15100_v16 = vpop.f32.mrf.mxu1 }
 0x9ab   :  { %17203 = vmatpush1.bf16.msra.mxu1 %v21276_v14  ;;  %v15101_v52 = vadd.f32 %v15100_v16, %v13474_v8  ;;  %v15142_v14 = vadd.f32 %v15141_v40, %v15099_v47  ;;  %v21267_v8 = vld [vmem:[#allocation8 + $0x1c58] ss:$24 sps:$4 sm:$0xff]   ;;  %v21281_v16 = vld [vmem:[#allocation8 + $0x1bfc] ss:$24 sps:$4 sm:$0xff]   ;;  %v21285_v40 = vld [vmem:[#allocation8 + $0x1bc8] ss:$24 sps:$4 sm:$0xff]  }
 0x9ac   :  { %17204 = vmatprep.subr.bf16.mxu1 %v21284_v12  ;;  %v15102_v63 = vpop.f32.mrf.mxu1  ;;  %v21293_v47 = vld [vmem:[#allocation8 + $0x1b9c] ss:$24 sps:$4 sm:$0xff]  }
 0x9ad   :  { %v15103_v28 = vadd.f32 %v15102_v63, %v13478_v1  ;;  %v21275_v1 = vld [vmem:[#allocation8 + $0x1c2c] ss:$24 sps:$4 sm:$0xff]   ;;  %v21291_v63 = vld [vmem:[#allocation8 + $0x1b98] ss:$24 sps:$4 sm:$0xff]  }
 0x9af   :  { %17205 = vmatpush1.bf16.msra.mxu1 %v21282_v20  ;;  %v15144_v20 = vadd.f32 %v15143_v59, %v15101_v52  ;;  %v21299_v52 = vld [vmem:[#allocation8 + $0x1b6c] ss:$24 sps:$4 sm:$0xff]   ;;  %v21297_v59 = vld [vmem:[#allocation8 + $0x1b68] ss:$24 sps:$4 sm:$0xff]  }
 0x9b0   :  { %17206 = vmatprep.subr.bf16.mxu1 %v21290_v2  ;;  %v15145_v2 = vpop.f32.mrf.mxu0 }
 0x9b3   :  { %17207 = vmatpush1.bf16.msra.mxu1 %v21288_v55 }
 0x9b4   :  { %17208 = vmatprep.subr.bf16.mxu1 %v21296_v4 }
 0x9b7   :  { %17209 = vmatpush1.bf16.msra.mxu1 %v21294_v7 }
 0x9b8   :  { %17210 = vmatprep.subr.bf16.mxu1 %v21302_v9 }
 0x9bb   :  { %17211 = vmatpush1.bf16.msra.mxu1 %v21300_v24  ;;  %v15146_v24 = vadd.f32 %v15145_v2, %v15103_v28  ;;  %v13482_v2 = vrot.slane %v22420_v29, %v21991_v30 }
 0x9bc   :  { %17212 = vmatprep.subr.bf16.mxu1 %v21308_v39 }
 0x9bf   :  { %17213 = vmatpush1.bf16.msra.mxu1 %v21306_v45 }
 0x9c0   :  { %17214 = vmatprep.subr.bf16.mxu1 %v21314_v61 }
 0x9c3   :  { %17215 = vmatpush1.bf16.msra.mxu1 %v21312_v44 }
 0x9c4   :  { %17216 = vmatprep.subr.bf16.mxu1 %v21320_v36 }
 0x9c7   :  { %17217 = vmatpush2.bf16.msra.mxu1 %v21318_v48 }
 0x9c8   :  { %17218 = vmatprep.subr.bf16.mxu1 %v21326_v50 }
 0x9cb   :  { %17219 = vmatpush2.bf16.msra.mxu1 %v21324_v23 }
 0x9cc   :  { %17220 = vmatprep.subr.bf16.mxu1 %v21332_v3 }
 0x9cf   :  { %17221 = vmatpush2.bf16.msra.mxu1 %v21330_v57 }
 0x9d0   :  { %17222 = vmatprep.subr.bf16.mxu1 %v21338_v0 }
 0x9d3   :  { %17223 = vmatpush2.bf16.msra.mxu1 %v21336_v51 }
 0x9d4   :  { %17224 = vmatprep.subr.bf16.mxu1 %v21344_v18 }
 0x9d7   :  { %17225 = vmatpush2.bf16.msra.mxu1 %v21342_v33 }
 0x9d8   :  { %17226 = vmatprep.subr.bf16.mxu1 %v21350_v21 }
 0x9db   :  { %17227 = vmatpush2.bf16.msra.mxu1 %v21348_v25 }
 0x9dc   :  { %17228 = vmatprep.subr.bf16.mxu1 %v21356_v38 }
 0x9df   :  { %17229 = vmatpush2.bf16.msra.mxu1 %v21354_v56 }
 0x9e0   :  { %17230 = vmatprep.subr.bf16.mxu1 %v21362_v46 }
 0x9e3   :  { %17231 = vmatpush2.bf16.msra.mxu1 %v21360_v35  ;;  %v21273_v35 = vld [vmem:[#allocation8 + $0x1c28] ss:$24 sps:$4 sm:$0xff]  }
 0x9e4   :  { %17286 = vmatprep.subr.bf16.mxu1 %v21368_v17  ;;  %v21279_v17 = vld [vmem:[#allocation8 + $0x1bf8] ss:$24 sps:$4 sm:$0xff]  }
 0x9e6   :  { %v15182_v58 = vpop.f32.mrf.mxu1 }
 0x9e7   :  { %v15183_v42 = vadd.f32 %v15182_v58, %v15140_v22  ;;  %v15225_v22 = vpop.f32.mrf.mxu0  ;;  %v21305_v58 = vld [vmem:[#allocation8 + $0x1b3c] ss:$24 sps:$4 sm:$0xff]  }
 0x9e8   :  { %v15184_v12 = vpop.f32.mrf.mxu1 }
 0x9e9   :  { %v15185_v31 = vadd.f32 %v15184_v12, %v15142_v14  ;;  %v15334_v55 = vmul.f32 0.70710677, %v15183_v42  ;;  %v15322_v25 = vmul.f32 0.5, %v15183_v42  ;;  %v15227_v28 = vpop.f32.mrf.mxu0  ;;  %v21303_v42 = vld [vmem:[#allocation8 + $0x1b38] ss:$24 sps:$4 sm:$0xff]  }
 0x9ea   :  { %v15186_v4 = vpop.f32.mrf.mxu1  ;;  %v21311_v14 = vld [vmem:[#allocation8 + $0x1b0c] ss:$24 sps:$4 sm:$0xff]  }
 0x9eb   :  { %v15335_v7 = vmul.f32 0.70710677, %v15185_v31  ;;  %v15187_v9 = vadd.f32 %v15186_v4, %v15144_v20  ;;  %v15323_v18 = vmul.f32 0.5, %v15185_v31  ;;  %v15229_v12 = vpop.f32.mrf.mxu0  ;;  %v21309_v31 = vld [vmem:[#allocation8 + $0x1b08] ss:$24 sps:$4 sm:$0xff]   ;;  %v13486_v4 = vrot.slane %v22420_v29, %v21994_v32 }
 0x9ec   :  { %v15188_v39 = vpop.f32.mrf.mxu1  ;;  %v21317_v20 = vld [vmem:[#allocation8 + $0x1ddc] ss:$24 sps:$4 sm:$0xff]   ;;  %v15230_v30 = vadd.f32 %v15229_v12, %v13482_v2  ;;  %v21357_v12 = vld [vmem:[#allocation8 + $0x1c88] ss:$24 sps:$4 sm:$0xff]  }
 0x9ed   :  { %21683 = verf.f32 %v15335_v7  ;;  %v15340_v45 = vmul.f32 0.70710677, %v15187_v9  ;;  %v15189_v61 = vadd.f32 %v15188_v39, %v15146_v24  ;;  %v15328_v51 = vmul.f32 0.5, %v15187_v9  ;;  %v21315_v9 = vld [vmem:[#allocation8 + $0x1dd8] ss:$24 sps:$4 sm:$0xff]  }
 0x9ee   :  { %21685 = verf.f32 %v15334_v55  ;;  %v15231_v55 = vpop.f32.mrf.mxu0  ;;  %v21323_v24 = vld [vmem:[#allocation8 + $0x1dac] ss:$24 sps:$4 sm:$0xff]   ;;  %v15226_v39 = vadd.f32 %v15225_v22, %v13482_v2  ;;  %v21351_v22 = vld [vmem:[#allocation8 + $0x1cb8] ss:$24 sps:$4 sm:$0xff]  }
 0x9ef   :  { %21687 = verf.f32 %v15340_v45  ;;  %v15341_v44 = vmul.f32 0.70710677, %v15189_v61  ;;  %v15329_v33 = vmul.f32 0.5, %v15189_v61  ;;  %v15228_v61 = vadd.f32 %v15227_v28, %v13486_v4 }
 0x9f1   :  { %21689 = verf.f32 %v15341_v44 }
 0x9fa   :  { %v21684_v36 = vpop.eup %21683 }
 0x9fb   :  { %v21686_v48 = vpop.eup %21685  ;;  %v15359_v23 = vadd.f32 1.0, %v21684_v36 }
 0x9fc   :  { %v21688_v50 = vpop.eup %21687  ;;  %v15358_v0 = vadd.f32 1.0, %v21686_v48  ;;  %v21321_v48 = vld [vmem:[#allocation8 + $0x1da8] ss:$24 sps:$4 sm:$0xff]  }
 0x9fd   :  { %v15364_v3 = vadd.f32 1.0, %v21688_v50  ;;  %v15371_v38 = vmul.f32 %v15359_v23, %v15323_v18  ;;  %v21329_v23 = vld [vmem:[#allocation8 + $0x1d7c] ss:$24 sps:$4 sm:$0xff]  }
 0x9fe   :  { %v21690_v57 = vpop.eup %21689  ;;  %v15370_v62 = vmul.f32 %v15358_v0, %v15322_v25 }
 0x9ff   :  { %v15365_v21 = vadd.f32 1.0, %v21690_v57  ;;  %v15376_v43 = vmul.f32 %v15364_v3, %v15328_v51 }
 0xa01   :  { %v15377_v56 = vmul.f32 %v15365_v21, %v15329_v33  ;;  %v22457_v34 = vpack.c.bf16 %v15376_v43, %v15370_v62  ;;  %v21327_v33 = vld [vmem:[#allocation8 + $0x1d78] ss:$24 sps:$4 sm:$0xff]   ;;  %v15232_v21 = vadd.f32 %v15231_v55, %v13486_v4  ;;  %v21335_v43 = vld [vmem:[#allocation8 + $0x1d4c] ss:$24 sps:$4 sm:$0xff]  }
 0xa03   :  { %v22455_v46 = vpack.c.bf16 %v15377_v56, %v15371_v38 }
 0xa05   :  { %17189 = vmatprep.mubr.bf16.mxu0 %v22455_v46 }
 0xa06   :  { %17190 = vmatmul.mubr.bf16.vlgmr.msra.gmra.mxu0 %v22457_v34 }
 0xa07   :  { %17244 = vmatpush1.bf16.msra.mxu0 %v21267_v8  ;;  %17275 = vmatprep.mubr.bf16.mxu0 %v22443_v27 }
 0xa08   :  { %17245 = vmatprep.subr.bf16.mxu0 %v21275_v1 }
 0xa0b   :  { %17246 = vmatpush1.bf16.msra.mxu0 %v21273_v35  ;;  %v21333_v35 = vld [vmem:[#allocation8 + $0x1d48] ss:$24 sps:$4 sm:$0xff]  }
 0xa0c   :  { %17247 = vmatprep.subr.bf16.mxu0 %v21281_v16 }
 0xa0f   :  { %17248 = vmatpush1.bf16.msra.mxu0 %v21279_v17  ;;  %v21341_v17 = vld [vmem:[#allocation8 + $0x1d1c] ss:$24 sps:$4 sm:$0xff]  }
 0xa10   :  { %17249 = vmatprep.subr.bf16.mxu0 %v21287_v49 }
 0xa13   :  { %17250 = vmatpush1.bf16.msra.mxu0 %v21285_v40  ;;  %v21339_v40 = vld [vmem:[#allocation8 + $0x1d18] ss:$24 sps:$4 sm:$0xff]  }
 0xa14   :  { %17251 = vmatprep.subr.bf16.mxu0 %v21293_v47  ;;  %v21347_v47 = vld [vmem:[#allocation8 + $0x1cec] ss:$24 sps:$4 sm:$0xff]  }
 0xa17   :  { %17252 = vmatpush1.bf16.msra.mxu0 %v21291_v63  ;;  %v21345_v63 = vld [vmem:[#allocation8 + $0x1ce8] ss:$24 sps:$4 sm:$0xff]  }
 0xa18   :  { %17253 = vmatprep.subr.bf16.mxu0 %v21299_v52  ;;  %v21353_v52 = vld [vmem:[#allocation8 + $0x1cbc] ss:$24 sps:$4 sm:$0xff]  }
 0xa1b   :  { %17254 = vmatpush1.bf16.msra.mxu0 %v21297_v59 }
 0xa1c   :  { %17255 = vmatprep.subr.bf16.mxu0 %v21305_v58  ;;  %v21359_v58 = vld [vmem:[#allocation8 + $0x1c8c] ss:$24 sps:$4 sm:$0xff]  }
 0xa1f   :  { %17256 = vmatpush1.bf16.msra.mxu0 %v21303_v42 }
 0xa20   :  { %17257 = vmatprep.subr.bf16.mxu0 %v21311_v14 }
 0xa23   :  { %17258 = vmatpush1.bf16.msra.mxu0 %v21309_v31  ;;  %v21365_v31 = vld [vmem:[#allocation8 + $0x225c] ss:$24 sps:$4 sm:$0xff]  }
 0xa24   :  { %v15311_v7 = vpop.f32.mrf.mxu0  ;;  %17259 = vmatprep.subr.bf16.mxu0 %v21317_v20 }
 0xa26   :  { %v15268_v45 = vpop.f32.mrf.mxu1  ;;  %v15313_v36 = vpop.f32.mrf.mxu0 }
 0xa27   :  { %v15269_v44 = vadd.f32 %v15268_v45, %v15226_v39  ;;  %17260 = vmatpush2.bf16.msra.mxu0 %v21315_v9 }
 0xa28   :  { %v15270_v50 = vpop.f32.mrf.mxu1  ;;  %17261 = vmatprep.subr.bf16.mxu0 %v21323_v24  ;;  %v15315_v51 = vpop.f32.mrf.mxu0 }
 0xa29   :  { %v15312_v3 = vadd.f32 %v15311_v7, %v15269_v44  ;;  %v15271_v57 = vadd.f32 %v15270_v50, %v15228_v61  ;;  %v21363_v61 = vld [vmem:[#allocation8 + $0x2258] ss:$24 sps:$4 sm:$0xff]   ;;  %v21371_v50 = vld [vmem:[#allocation8 + $0x222c] ss:$24 sps:$4 sm:$0xff]  }
 0xa2a   :  { %v15272_v0 = vpop.f32.mrf.mxu1  ;;  %v15317_v1 = vpop.f32.mrf.mxu0 }
 0xa2b   :  { %v15336_v32 = vmul.f32 0.70710677, %v15312_v3  ;;  %v15314_v29 = vadd.f32 %v15313_v36, %v15271_v57  ;;  %v15273_v18 = vadd.f32 %v15272_v0, %v15230_v30  ;;  %17262 = vmatpush2.bf16.msra.mxu0 %v21321_v48  ;;  %v15324_v39 = vmul.f32 0.5, %v15312_v3  ;;  %v21366_v30 = vld [vmem:[#allocation8 + $0x1f58] ss:$24 sps:$4 sm:$0xff]  }
 0xa2c   :  { %v15274_v25 = vpop.f32.mrf.mxu1  ;;  %17263 = vmatprep.subr.bf16.mxu0 %v21329_v23  ;;  %v21369_v0 = vld [vmem:[#allocation8 + $0x2228] ss:$24 sps:$4 sm:$0xff]   ;;  %v21377_v3 = vld [vmem:[#allocation8 + $0x21fc] ss:$24 sps:$4 sm:$0xff]  }
 0xa2d   :  { %v15337_v38 = vmul.f32 0.70710677, %v15314_v29  ;;  %v15316_v56 = vadd.f32 %v15315_v51, %v15273_v18  ;;  %v15275_v62 = vadd.f32 %v15274_v25, %v15232_v21  ;;  %21691 = verf.f32 %v15336_v32  ;;  %v21374_v32 = vld [vmem:[#allocation8 + $0x1f2c] ss:$24 sps:$4 sm:$0xff]   ;;  %v21375_v51 = vld [vmem:[#allocation8 + $0x21f8] ss:$24 sps:$4 sm:$0xff]  }
 0xa2e   :  { %v15325_v7 = vmul.f32 0.5, %v15314_v29  ;;  %v21372_v29 = vld [vmem:[#allocation8 + $0x1f28] ss:$24 sps:$4 sm:$0xff]   ;;  %v21380_v18 = vld [vmem:[#allocation8 + $0x1efc] ss:$24 sps:$4 sm:$0xff]  }
 0xa2f   :  { %v15342_v8 = vmul.f32 0.70710677, %v15316_v56  ;;  %17264 = vmatpush2.bf16.msra.mxu0 %v21327_v33  ;;  %21693 = verf.f32 %v15337_v38  ;;  %v15318_v16 = vadd.f32 %v15317_v1, %v15275_v62  ;;  %v15330_v4 = vmul.f32 0.5, %v15316_v56  ;;  %v21383_v33 = vld [vmem:[#allocation8 + $0x21cc] ss:$24 sps:$4 sm:$0xff]  }
 0xa30   :  { %17265 = vmatprep.subr.bf16.mxu0 %v21335_v43  ;;  %v21378_v21 = vld [vmem:[#allocation8 + $0x1ef8] ss:$24 sps:$4 sm:$0xff]   ;;  %v21381_v25 = vld [vmem:[#allocation8 + $0x21c8] ss:$24 sps:$4 sm:$0xff]   ;;  %v21386_v43 = vld [vmem:[#allocation8 + $0x1ecc] ss:$24 sps:$4 sm:$0xff]  }
 0xa31   :  { %21695 = verf.f32 %v15342_v8  ;;  %v15343_v49 = vmul.f32 0.70710677, %v15318_v16  ;;  %v15331_v9 = vmul.f32 0.5, %v15318_v16  ;;  %v21389_v38 = vld [vmem:[#allocation8 + $0x219c] ss:$24 sps:$4 sm:$0xff]  }
 0xa32   :  { %v21384_v56 = vld [vmem:[#allocation8 + $0x1ec8] ss:$24 sps:$4 sm:$0xff]   ;;  %v21387_v62 = vld [vmem:[#allocation8 + $0x2198] ss:$24 sps:$4 sm:$0xff]   ;;  %v21392_v8 = vld [vmem:[#allocation8 + $0x1e9c] ss:$24 sps:$4 sm:$0xff]  }
 0xa33   :  { %17266 = vmatpush2.bf16.msra.mxu0 %v21333_v35  ;;  %21697 = verf.f32 %v15343_v49  ;;  %v21395_v1 = vld [vmem:[#allocation8 + $0x216c] ss:$24 sps:$4 sm:$0xff]   ;;  %v21390_v35 = vld [vmem:[#allocation8 + $0x1e98] ss:$24 sps:$4 sm:$0xff]   ;;  %v21393_v16 = vld [vmem:[#allocation8 + $0x2168] ss:$24 sps:$4 sm:$0xff]  }
 0xa34   :  { %17267 = vmatprep.subr.bf16.mxu0 %v21341_v17  ;;  %v21398_v17 = vld [vmem:[#allocation8 + $0x1e6c] ss:$24 sps:$4 sm:$0xff]   ;;  %v21401_v49 = vld [vmem:[#allocation8 + $0x213c] ss:$24 sps:$4 sm:$0xff]  }
 0xa37   :  { %17268 = vmatpush2.bf16.msra.mxu0 %v21339_v40  ;;  %v21396_v40 = vld [vmem:[#allocation8 + $0x1e68] ss:$24 sps:$4 sm:$0xff]  }
 0xa38   :  { %17269 = vmatprep.subr.bf16.mxu0 %v21347_v47  ;;  %v21399_v47 = vld [vmem:[#allocation8 + $0x2138] ss:$24 sps:$4 sm:$0xff]  }
 0xa3a   :  { %v21692_v59 = vpop.eup %21691 }
 0xa3b   :  { %17270 = vmatpush2.bf16.msra.mxu0 %v21345_v63  ;;  %v15360_v55 = vadd.f32 1.0, %v21692_v59  ;;  %v21404_v63 = vld [vmem:[#allocation8 + $0x1e3c] ss:$24 sps:$4 sm:$0xff]   ;;  %v21405_v59 = vld [vmem:[#allocation8 + $0x2108] ss:$24 sps:$4 sm:$0xff]  }
 0xa3c   :  { %17271 = vmatprep.subr.bf16.mxu0 %v21353_v52  ;;  %v21694_v28 = vpop.eup %21693  ;;  %v21407_v52 = vld [vmem:[#allocation8 + $0x210c] ss:$24 sps:$4 sm:$0xff]  }
 0xa3d   :  { %v15361_v20 = vadd.f32 1.0, %v21694_v28  ;;  %v15372_v48 = vmul.f32 %v15360_v55, %v15324_v39  ;;  %v21413_v28 = vld [vmem:[#allocation8 + $0x23dc] ss:$24 sps:$4 sm:$0xff]   ;;  %v21422_v55 = vld [vmem:[#allocation8 + $0x20ac] ss:$24 sps:$4 sm:$0xff]  }
 0xa3e   :  { %v21696_v42 = vpop.eup %21695  ;;  %v21431_v39 = vld [vmem:[#allocation8 + $0x234c] ss:$24 sps:$4 sm:$0xff]  }
 0xa3f   :  { %v15366_v14 = vadd.f32 1.0, %v21696_v42  ;;  %17272 = vmatpush2.bf16.msra.mxu0 %v21351_v22  ;;  %v15373_v44 = vmul.f32 %v15361_v20, %v15325_v7  ;;  %v21402_v22 = vld [vmem:[#allocation8 + $0x1e38] ss:$24 sps:$4 sm:$0xff]   ;;  %v21408_v42 = vld [vmem:[#allocation8 + $0x1e08] ss:$24 sps:$4 sm:$0xff]  }
 0xa40   :  { %17273 = vmatprep.subr.bf16.mxu0 %v21359_v58  ;;  %v21698_v2 = vpop.eup %21697  ;;  %v21410_v58 = vld [vmem:[#allocation8 + $0x1e0c] ss:$24 sps:$4 sm:$0xff]   ;;  %v21414_v20 = vld [vmem:[#allocation8 + $0x20d8] ss:$24 sps:$4 sm:$0xff]   ;;  %v21420_v7 = vld [vmem:[#allocation8 + $0x20a8] ss:$24 sps:$4 sm:$0xff]  }
 0xa41   :  { %v15367_v24 = vadd.f32 1.0, %v21698_v2  ;;  %v15378_v45 = vmul.f32 %v15366_v14, %v15330_v4  ;;  %v21411_v14 = vld [vmem:[#allocation8 + $0x23d8] ss:$24 sps:$4 sm:$0xff]   ;;  %v21417_v2 = vld [vmem:[#allocation8 + $0x23a8] ss:$24 sps:$4 sm:$0xff]  }
 0xa42   :  { %v21425_v4 = vld [vmem:[#allocation8 + $0x237c] ss:$24 sps:$4 sm:$0xff]  }
 0xa43   :  { %17274 = vmatpush2.bf16.msra.mxu0 %v21357_v12  ;;  %v15379_v36 = vmul.f32 %v15367_v24, %v15331_v9  ;;  %v22469_v57 = vpack.c.bf16 %v15378_v45, %v15372_v48  ;;  %v21416_v12 = vld [vmem:[#allocation8 + $0x20dc] ss:$24 sps:$4 sm:$0xff]   ;;  %v21423_v9 = vld [vmem:[#allocation8 + $0x2378] ss:$24 sps:$4 sm:$0xff]   ;;  %v21432_v48 = vld [vmem:[#allocation8 + $0x2048] ss:$24 sps:$4 sm:$0xff]  }
 0xa44   :  { %17329 = vmatprep.subr.bf16.mxu0 %v21365_v31  ;;  %v21419_v31 = vld [vmem:[#allocation8 + $0x23ac] ss:$24 sps:$4 sm:$0xff]   ;;  %v21428_v24 = vld [vmem:[#allocation8 + $0x207c] ss:$24 sps:$4 sm:$0xff]   ;;  %v21426_v45 = vld [vmem:[#allocation8 + $0x2078] ss:$24 sps:$4 sm:$0xff]  }
 0xa45   :  { %v22467_v23 = vpack.c.bf16 %v15379_v36, %v15373_v44  ;;  %v21434_v44 = vld [vmem:[#allocation8 + $0x204c] ss:$24 sps:$4 sm:$0xff]   ;;  %v21437_v36 = vld [vmem:[#allocation8 + $0x231c] ss:$24 sps:$4 sm:$0xff]  }
 0xa46   :  { %17276 = vmatmul.mubr.bf16.vlgmr.msra.gmra.mxu0 %v22448_v15 }
 0xa47   :  { %17330 = vmatpush1.bf16.msra.mxu0 %v21363_v61  ;;  %17232 = vmatprep.mubr.bf16.mxu1 %v22467_v23  ;;  %v21429_v61 = vld [vmem:[#allocation8 + $0x2348] ss:$24 sps:$4 sm:$0xff]  }
 0xa48   :  { %17361 = vmatprep.mubr.bf16.mxu0 %v22467_v23  ;;  %17233 = vmatmul.mubr.bf16.vlgmr.msra.gmra.mxu1 %v22469_v57 }
 0xa49   :  { %17331 = vmatprep.subr.bf16.mxu0 %v21371_v50  ;;  %17287 = vmatpush1.bf16.msra.mxu1 %v21366_v30  ;;  %v21435_v50 = vld [vmem:[#allocation8 + $0x2318] ss:$24 sps:$4 sm:$0xff]   ;;  %v21440_v30 = vld [vmem:[#allocation8 + $0x201c] ss:$24 sps:$4 sm:$0xff]  }
 0xa4a   :  { %17318 = vmatprep.mubr.bf16.mxu1 %v22455_v46  ;;  %17288 = vmatprep.subr.bf16.mxu1 %v21374_v32  ;;  %v21438_v32 = vld [vmem:[#allocation8 + $0x2018] ss:$24 sps:$4 sm:$0xff]  }
 0xa4b   :  { %17332 = vmatpush1.bf16.msra.mxu0 %v21369_v0  ;;  %v21443_v0 = vld [vmem:[#allocation8 + $0x22ec] ss:$24 sps:$4 sm:$0xff]  }
 0xa4c   :  { %17333 = vmatprep.subr.bf16.mxu0 %v21377_v3  ;;  %v21441_v3 = vld [vmem:[#allocation8 + $0x22e8] ss:$24 sps:$4 sm:$0xff]  }
 0xa4d   :  { %17289 = vmatpush1.bf16.msra.mxu1 %v21372_v29  ;;  %v21446_v29 = vld [vmem:[#allocation8 + $0x1fec] ss:$24 sps:$4 sm:$0xff]  }
 0xa4e   :  { %17290 = vmatprep.subr.bf16.mxu1 %v21380_v18  ;;  %v21444_v18 = vld [vmem:[#allocation8 + $0x1fe8] ss:$24 sps:$4 sm:$0xff]  }
 0xa4f   :  { %17334 = vmatpush1.bf16.msra.mxu0 %v21375_v51  ;;  %v21449_v51 = vld [vmem:[#allocation8 + $0x22bc] ss:$24 sps:$4 sm:$0xff]  }
 0xa50   :  { %17335 = vmatprep.subr.bf16.mxu0 %v21383_v33  ;;  %v21447_v33 = vld [vmem:[#allocation8 + $0x22b8] ss:$24 sps:$4 sm:$0xff]  }
 0xa51   :  { %17291 = vmatpush1.bf16.msra.mxu1 %v21378_v21  ;;  %v21452_v21 = vld [vmem:[#allocation8 + $0x1fbc] ss:$24 sps:$4 sm:$0xff]  }
 0xa52   :  { %17292 = vmatprep.subr.bf16.mxu1 %v21386_v43  ;;  %v21450_v43 = vld [vmem:[#allocation8 + $0x1fb8] ss:$24 sps:$4 sm:$0xff]  }
 0xa53   :  { %17336 = vmatpush1.bf16.msra.mxu0 %v21381_v25  ;;  %v21455_v25 = vld [vmem:[#allocation8 + $0x228c] ss:$24 sps:$4 sm:$0xff]  }
 0xa54   :  { %17337 = vmatprep.subr.bf16.mxu0 %v21389_v38  ;;  %v21453_v38 = vld [vmem:[#allocation8 + $0x2288] ss:$24 sps:$4 sm:$0xff]  }
 0xa55   :  { %17293 = vmatpush1.bf16.msra.mxu1 %v21384_v56  ;;  %v21458_v56 = vld [vmem:[#allocation8 + $0x1f8c] ss:$24 sps:$4 sm:$0xff]  }
 0xa56   :  { %17294 = vmatprep.subr.bf16.mxu1 %v21392_v8  ;;  %v21456_v8 = vld [vmem:[#allocation8 + $0x1f88] ss:$24 sps:$4 sm:$0xff]  }
 0xa57   :  { %17338 = vmatpush1.bf16.msra.mxu0 %v21387_v62  ;;  %v21461_v62 = vld [vmem:[#allocation8 + $0x1f64] ss:$24 sps:$4 sm:$0xff]  }
 0xa58   :  { %17339 = vmatprep.subr.bf16.mxu0 %v21395_v1  ;;  %v21459_v1 = vld [vmem:[#allocation8 + $0x1f60] ss:$24 sps:$4 sm:$0xff]  }
 0xa59   :  { %17295 = vmatpush1.bf16.msra.mxu1 %v21390_v35  ;;  %v21464_v35 = vld [vmem:[#allocation8 + $0x1c64] ss:$24 sps:$4 sm:$0xff]  }
 0xa5a   :  { %17296 = vmatprep.subr.bf16.mxu1 %v21398_v17  ;;  %v21462_v17 = vld [vmem:[#allocation8 + $0x1c60] ss:$24 sps:$4 sm:$0xff]  }
 0xa5b   :  { %17340 = vmatpush1.bf16.msra.mxu0 %v21393_v16  ;;  %v21467_v16 = vld [vmem:[#allocation8 + $0x1f34] ss:$24 sps:$4 sm:$0xff]  }
 0xa5c   :  { %17341 = vmatprep.subr.bf16.mxu0 %v21401_v49  ;;  %v21465_v49 = vld [vmem:[#allocation8 + $0x1f30] ss:$24 sps:$4 sm:$0xff]  }
 0xa5d   :  { %17297 = vmatpush1.bf16.msra.mxu1 %v21396_v40  ;;  %v21470_v40 = vld [vmem:[#allocation8 + $0x1c34] ss:$24 sps:$4 sm:$0xff]  }
 0xa5e   :  { %17298 = vmatprep.subr.bf16.mxu1 %v21404_v63  ;;  %v21468_v63 = vld [vmem:[#allocation8 + $0x1c30] ss:$24 sps:$4 sm:$0xff]  }
 0xa5f   :  { %17342 = vmatpush1.bf16.msra.mxu0 %v21399_v47  ;;  %v21473_v47 = vld [vmem:[#allocation8 + $0x1f04] ss:$24 sps:$4 sm:$0xff]  }
 0xa60   :  { %17343 = vmatprep.subr.bf16.mxu0 %v21407_v52  ;;  %v21471_v52 = vld [vmem:[#allocation8 + $0x1f00] ss:$24 sps:$4 sm:$0xff]  }
 0xa61   :  { %17299 = vmatpush1.bf16.msra.mxu1 %v21402_v22  ;;  %v21476_v22 = vld [vmem:[#allocation8 + $0x1c04] ss:$24 sps:$4 sm:$0xff]  }
 0xa62   :  { %17300 = vmatprep.subr.bf16.mxu1 %v21410_v58  ;;  %v21474_v58 = vld [vmem:[#allocation8 + $0x1c00] ss:$24 sps:$4 sm:$0xff]  }
 0xa63   :  { %17344 = vmatpush1.bf16.msra.mxu0 %v21405_v59  ;;  %v21479_v59 = vld [vmem:[#allocation8 + $0x1ed4] ss:$24 sps:$4 sm:$0xff]  }
 0xa64   :  { %17345 = vmatprep.subr.bf16.mxu0 %v21413_v28  ;;  %v21482_v28 = vld [vmem:[#allocation8 + $0x1bd4] ss:$24 sps:$4 sm:$0xff]  }
 0xa65   :  { %17301 = vmatpush1.bf16.msra.mxu1 %v21408_v42  ;;  %v21485_v42 = vld [vmem:[#allocation8 + $0x1ea4] ss:$24 sps:$4 sm:$0xff]  }
 0xa66   :  { %17302 = vmatprep.subr.bf16.mxu1 %v21416_v12  ;;  %v21488_v12 = vld [vmem:[#allocation8 + $0x1ba4] ss:$24 sps:$4 sm:$0xff]  }
 0xa67   :  { %17346 = vmatpush2.bf16.msra.mxu0 %v21411_v14  ;;  %v21480_v14 = vld [vmem:[#allocation8 + $0x1bd0] ss:$24 sps:$4 sm:$0xff]  }
 0xa68   :  { %17347 = vmatprep.subr.bf16.mxu0 %v21419_v31  ;;  %v21491_v31 = vld [vmem:[#allocation8 + $0x1e74] ss:$24 sps:$4 sm:$0xff]  }
 0xa69   :  { %17303 = vmatpush2.bf16.msra.mxu1 %v21414_v20  ;;  %v21486_v20 = vld [vmem:[#allocation8 + $0x1ba0] ss:$24 sps:$4 sm:$0xff]  }
 0xa6a   :  { %17304 = vmatprep.subr.bf16.mxu1 %v21422_v55  ;;  %v21494_v55 = vld [vmem:[#allocation8 + $0x1b74] ss:$24 sps:$4 sm:$0xff]  }
 0xa6b   :  { %17348 = vmatpush2.bf16.msra.mxu0 %v21417_v2  ;;  %v21489_v2 = vld [vmem:[#allocation8 + $0x1e70] ss:$24 sps:$4 sm:$0xff]  }
 0xa6c   :  { %17349 = vmatprep.subr.bf16.mxu0 %v21425_v4  ;;  %v21497_v4 = vld [vmem:[#allocation8 + $0x1e44] ss:$24 sps:$4 sm:$0xff]  }
 0xa6d   :  { %17305 = vmatpush2.bf16.msra.mxu1 %v21420_v7  ;;  %v21492_v7 = vld [vmem:[#allocation8 + $0x1b70] ss:$24 sps:$4 sm:$0xff]  }
 0xa6e   :  { %17306 = vmatprep.subr.bf16.mxu1 %v21428_v24  ;;  %v21500_v24 = vld [vmem:[#allocation8 + $0x1b44] ss:$24 sps:$4 sm:$0xff]  }
 0xa6f   :  { %17350 = vmatpush2.bf16.msra.mxu0 %v21423_v9  ;;  %v21495_v9 = vld [vmem:[#allocation8 + $0x1e40] ss:$24 sps:$4 sm:$0xff]  }
 0xa70   :  { %17351 = vmatprep.subr.bf16.mxu0 %v21431_v39  ;;  %v21503_v39 = vld [vmem:[#allocation8 + $0x1e14] ss:$24 sps:$4 sm:$0xff]  }
 0xa71   :  { %17307 = vmatpush2.bf16.msra.mxu1 %v21426_v45  ;;  %v21498_v45 = vld [vmem:[#allocation8 + $0x1b40] ss:$24 sps:$4 sm:$0xff]  }
 0xa72   :  { %17308 = vmatprep.subr.bf16.mxu1 %v21434_v44  ;;  %v21506_v44 = vld [vmem:[#allocation8 + $0x1b14] ss:$24 sps:$4 sm:$0xff]  }
 0xa73   :  { %17352 = vmatpush2.bf16.msra.mxu0 %v21429_v61  ;;  %v21501_v61 = vld [vmem:[#allocation8 + $0x1e10] ss:$24 sps:$4 sm:$0xff]  }
 0xa74   :  { %17353 = vmatprep.subr.bf16.mxu0 %v21437_v36  ;;  %v21509_v36 = vld [vmem:[#allocation8 + $0x20e4] ss:$24 sps:$4 sm:$0xff]  }
 0xa75   :  { %17309 = vmatpush2.bf16.msra.mxu1 %v21432_v48  ;;  %v21504_v48 = vld [vmem:[#allocation8 + $0x1b10] ss:$24 sps:$4 sm:$0xff]  }
 0xa76   :  { %17310 = vmatprep.subr.bf16.mxu1 %v21440_v30  ;;  %v21512_v30 = vld [vmem:[#allocation8 + $0x1de4] ss:$24 sps:$4 sm:$0xff]  }
 0xa77   :  { %17354 = vmatpush2.bf16.msra.mxu0 %v21435_v50  ;;  %v21507_v50 = vld [vmem:[#allocation8 + $0x20e0] ss:$24 sps:$4 sm:$0xff]  }
 0xa78   :  { %17355 = vmatprep.subr.bf16.mxu0 %v21443_v0  ;;  %v21515_v0 = vld [vmem:[#allocation8 + $0x20b4] ss:$24 sps:$4 sm:$0xff]  }
 0xa79   :  { %17311 = vmatpush2.bf16.msra.mxu1 %v21438_v32  ;;  %v21510_v32 = vld [vmem:[#allocation8 + $0x1de0] ss:$24 sps:$4 sm:$0xff]  }
 0xa7a   :  { %17312 = vmatprep.subr.bf16.mxu1 %v21446_v29  ;;  %v21518_v29 = vld [vmem:[#allocation8 + $0x1db4] ss:$24 sps:$4 sm:$0xff]  }
 0xa7b   :  { %17356 = vmatpush2.bf16.msra.mxu0 %v21441_v3  ;;  %v21513_v3 = vld [vmem:[#allocation8 + $0x20b0] ss:$24 sps:$4 sm:$0xff]  }
 0xa7c   :  { %17357 = vmatprep.subr.bf16.mxu0 %v21449_v51  ;;  %v21521_v51 = vld [vmem:[#allocation8 + $0x2084] ss:$24 sps:$4 sm:$0xff]  }
 0xa7d   :  { %17313 = vmatpush2.bf16.msra.mxu1 %v21444_v18  ;;  %v21516_v18 = vld [vmem:[#allocation8 + $0x1db0] ss:$24 sps:$4 sm:$0xff]  }
 0xa7e   :  { %17314 = vmatprep.subr.bf16.mxu1 %v21452_v21  ;;  %v21524_v21 = vld [vmem:[#allocation8 + $0x1d84] ss:$24 sps:$4 sm:$0xff]  }
 0xa7f   :  { %17358 = vmatpush2.bf16.msra.mxu0 %v21447_v33  ;;  %v21519_v33 = vld [vmem:[#allocation8 + $0x2080] ss:$24 sps:$4 sm:$0xff]  }
 0xa80   :  { %17359 = vmatprep.subr.bf16.mxu0 %v21455_v25  ;;  %v21527_v25 = vld [vmem:[#allocation8 + $0x2054] ss:$24 sps:$4 sm:$0xff]  }
 0xa81   :  { %17315 = vmatpush2.bf16.msra.mxu1 %v21450_v43  ;;  %v21522_v43 = vld [vmem:[#allocation8 + $0x1d80] ss:$24 sps:$4 sm:$0xff]  }
 0xa82   :  { %17316 = vmatprep.subr.bf16.mxu1 %v21458_v56  ;;  %v21530_v56 = vld [vmem:[#allocation8 + $0x1d54] ss:$24 sps:$4 sm:$0xff]  }
 0xa83   :  { %17360 = vmatpush2.bf16.msra.mxu0 %v21453_v38  ;;  %v21525_v38 = vld [vmem:[#allocation8 + $0x2050] ss:$24 sps:$4 sm:$0xff]  }
 0xa84   :  { %17415 = vmatprep.subr.bf16.mxu0 %v21461_v62  ;;  %v21533_v62 = vld [vmem:[#allocation8 + $0x2024] ss:$24 sps:$4 sm:$0xff]  }
 0xa85   :  { %17317 = vmatpush2.bf16.msra.mxu1 %v21456_v8  ;;  %v21528_v8 = vld [vmem:[#allocation8 + $0x1d50] ss:$24 sps:$4 sm:$0xff]  }
 0xa86   :  { %17362 = vmatmul.mubr.bf16.vlgmr.msra.gmra.mxu0 %v22469_v57  ;;  %17372 = vmatprep.subr.bf16.mxu1 %v21464_v35  ;;  %v21536_v35 = vld [vmem:[#allocation8 + $0x1d24] ss:$24 sps:$4 sm:$0xff]  }
 0xa87   :  { %17416 = vmatpush1.bf16.msra.mxu0 %v21459_v1  ;;  %17447 = vmatprep.mubr.bf16.mxu0 %v22455_v46  ;;  %v21477_v46 = vld [vmem:[#allocation8 + $0x1ed0] ss:$24 sps:$4 sm:$0xff]   ;;  %v21531_v1 = vld [vmem:[#allocation8 + $0x2020] ss:$24 sps:$4 sm:$0xff]  }
 0xa88   :  { %17417 = vmatprep.subr.bf16.mxu0 %v21467_v16  ;;  %17319 = vmatmul.mubr.bf16.vlgmr.msra.gmra.mxu1 %v22457_v34  ;;  %v21539_v16 = vld [vmem:[#allocation8 + $0x1ff4] ss:$24 sps:$4 sm:$0xff]  }
 0xa89   :  { %17373 = vmatpush1.bf16.msra.mxu1 %v21462_v17  ;;  %17404 = vmatprep.mubr.bf16.mxu1 %v22443_v27  ;;  %v21483_v27 = vld [vmem:[#allocation8 + $0x1ea0] ss:$24 sps:$4 sm:$0xff]  }
 0xa8a   :  { %17374 = vmatprep.subr.bf16.mxu1 %v21470_v40  ;;  %v21534_v17 = vld [vmem:[#allocation8 + $0x1d20] ss:$24 sps:$4 sm:$0xff]   ;;  %v21542_v40 = vld [vmem:[#allocation8 + $0x1cf4] ss:$24 sps:$4 sm:$0xff]  }
 0xa8b   :  { %17418 = vmatpush1.bf16.msra.mxu0 %v21465_v49  ;;  %v21537_v49 = vld [vmem:[#allocation8 + $0x1ff0] ss:$24 sps:$4 sm:$0xff]  }
 0xa8c   :  { %17419 = vmatprep.subr.bf16.mxu0 %v21473_v47  ;;  %v21545_v47 = vld [vmem:[#allocation8 + $0x1fc4] ss:$24 sps:$4 sm:$0xff]  }
 0xa8d   :  { %17375 = vmatpush1.bf16.msra.mxu1 %v21468_v63  ;;  %v21540_v63 = vld [vmem:[#allocation8 + $0x1cf0] ss:$24 sps:$4 sm:$0xff]  }
 0xa8e   :  { %17376 = vmatprep.subr.bf16.mxu1 %v21476_v22  ;;  %v21548_v22 = vld [vmem:[#allocation8 + $0x1cc4] ss:$24 sps:$4 sm:$0xff]  }
 0xa8f   :  { %17420 = vmatpush1.bf16.msra.mxu0 %v21471_v52  ;;  %v21543_v52 = vld [vmem:[#allocation8 + $0x1fc0] ss:$24 sps:$4 sm:$0xff]  }
 0xa90   :  { %17421 = vmatprep.subr.bf16.mxu0 %v21479_v59  ;;  %v21551_v59 = vld [vmem:[#allocation8 + $0x1f94] ss:$24 sps:$4 sm:$0xff]  }
 0xa91   :  { %17377 = vmatpush1.bf16.msra.mxu1 %v21474_v58  ;;  %v21546_v58 = vld [vmem:[#allocation8 + $0x1cc0] ss:$24 sps:$4 sm:$0xff]  }
 0xa92   :  { %17378 = vmatprep.subr.bf16.mxu1 %v21482_v28  ;;  %v21554_v28 = vld [vmem:[#allocation8 + $0x1c94] ss:$24 sps:$4 sm:$0xff]  }
 0xa93   :  { %17422 = vmatpush1.bf16.msra.mxu0 %v21477_v46  ;;  %v21549_v46 = vld [vmem:[#allocation8 + $0x1f90] ss:$24 sps:$4 sm:$0xff]  }
 0xa94   :  { %17423 = vmatprep.subr.bf16.mxu0 %v21485_v42  ;;  %v21552_v42 = vld [vmem:[#allocation8 + $0x1c90] ss:$24 sps:$4 sm:$0xff]  }
 0xa95   :  { %17379 = vmatpush1.bf16.msra.mxu1 %v21480_v14  ;;  %v21557_v14 = vld [vmem:[#allocation8 + $0x2264] ss:$24 sps:$4 sm:$0xff]  }
 0xa96   :  { %17380 = vmatprep.subr.bf16.mxu1 %v21488_v12  ;;  %v21560_v12 = vld [vmem:[#allocation8 + $0x2234] ss:$24 sps:$4 sm:$0xff]  }
 0xa97   :  { %17424 = vmatpush1.bf16.msra.mxu0 %v21483_v27  ;;  %v21555_v27 = vld [vmem:[#allocation8 + $0x2260] ss:$24 sps:$4 sm:$0xff]  }
 0xa98   :  { %17425 = vmatprep.subr.bf16.mxu0 %v21491_v31  ;;  %v21558_v31 = vld [vmem:[#allocation8 + $0x2230] ss:$24 sps:$4 sm:$0xff]  }
 0xa99   :  { %17381 = vmatpush1.bf16.msra.mxu1 %v21486_v20  ;;  %v21563_v20 = vld [vmem:[#allocation8 + $0x2204] ss:$24 sps:$4 sm:$0xff]  }
 0xa9a   :  { %17382 = vmatprep.subr.bf16.mxu1 %v21494_v55  ;;  %v21566_v55 = vld [vmem:[#allocation8 + $0x21d4] ss:$24 sps:$4 sm:$0xff]  }
 0xa9b   :  { %17426 = vmatpush1.bf16.msra.mxu0 %v21489_v2  ;;  %v21561_v2 = vld [vmem:[#allocation8 + $0x2200] ss:$24 sps:$4 sm:$0xff]  }
 0xa9c   :  { %17427 = vmatprep.subr.bf16.mxu0 %v21497_v4  ;;  %v21564_v4 = vld [vmem:[#allocation8 + $0x21d0] ss:$24 sps:$4 sm:$0xff]  }
 0xa9d   :  { %17383 = vmatpush1.bf16.msra.mxu1 %v21492_v7  ;;  %v21569_v7 = vld [vmem:[#allocation8 + $0x21a4] ss:$24 sps:$4 sm:$0xff]  }
 0xa9e   :  { %17384 = vmatprep.subr.bf16.mxu1 %v21500_v24  ;;  %v21575_v24 = vld [vmem:[#allocation8 + $0x2144] ss:$24 sps:$4 sm:$0xff]  }
 0xa9f   :  { %17428 = vmatpush1.bf16.msra.mxu0 %v21495_v9  ;;  %v21572_v9 = vld [vmem:[#allocation8 + $0x2174] ss:$24 sps:$4 sm:$0xff]  }
 0xaa0   :  { %17429 = vmatprep.subr.bf16.mxu0 %v21503_v39  ;;  %v21578_v39 = vld [vmem:[#allocation8 + $0x2114] ss:$24 sps:$4 sm:$0xff]  }
 0xaa1   :  { %17385 = vmatpush1.bf16.msra.mxu1 %v21498_v45  ;;  %v21576_v45 = vld [vmem:[#allocation8 + $0x2110] ss:$24 sps:$4 sm:$0xff]  }
 0xaa2   :  { %17386 = vmatprep.subr.bf16.mxu1 %v21506_v44  ;;  %v21579_v44 = vld [vmem:[#allocation8 + $0x23e0] ss:$24 sps:$4 sm:$0xff]  }
 0xaa3   :  { %17430 = vmatpush1.bf16.msra.mxu0 %v21501_v61  ;;  %v21581_v61 = vld [vmem:[#allocation8 + $0x23e4] ss:$24 sps:$4 sm:$0xff]  }
 0xaa4   :  { %17431 = vmatprep.subr.bf16.mxu0 %v21509_v36  ;;  %v21584_v36 = vld [vmem:[#allocation8 + $0x23b4] ss:$24 sps:$4 sm:$0xff]  }
 0xaa5   :  { %17387 = vmatpush1.bf16.msra.mxu1 %v21504_v48  ;;  %v21582_v48 = vld [vmem:[#allocation8 + $0x23b0] ss:$24 sps:$4 sm:$0xff]  }
 0xaa6   :  { %17388 = vmatprep.subr.bf16.mxu1 %v21512_v30  ;;  %v21585_v30 = vld [vmem:[#allocation8 + $0x2380] ss:$24 sps:$4 sm:$0xff]  }
 0xaa7   :  { %17432 = vmatpush2.bf16.msra.mxu0 %v21507_v50  ;;  %v21587_v50 = vld [vmem:[#allocation8 + $0x2384] ss:$24 sps:$4 sm:$0xff]  }
 0xaa8   :  { %17433 = vmatprep.subr.bf16.mxu0 %v21515_v0  ;;  %v21590_v0 = vld [vmem:[#allocation8 + $0x2354] ss:$24 sps:$4 sm:$0xff]  }
 0xaa9   :  { %17389 = vmatpush2.bf16.msra.mxu1 %v21510_v32  ;;  %v21588_v32 = vld [vmem:[#allocation8 + $0x2350] ss:$24 sps:$4 sm:$0xff]  }
 0xaaa   :  { %17390 = vmatprep.subr.bf16.mxu1 %v21518_v29  ;;  %v21591_v29 = vld [vmem:[#allocation8 + $0x2320] ss:$24 sps:$4 sm:$0xff]  }
 0xaab   :  { %17434 = vmatpush2.bf16.msra.mxu0 %v21513_v3  ;;  %v21593_v3 = vld [vmem:[#allocation8 + $0x2324] ss:$24 sps:$4 sm:$0xff]  }
 0xaac   :  { %17435 = vmatprep.subr.bf16.mxu0 %v21521_v51  ;;  %v21596_v51 = vld [vmem:[#allocation8 + $0x22f4] ss:$24 sps:$4 sm:$0xff]  }
 0xaad   :  { %17391 = vmatpush2.bf16.msra.mxu1 %v21516_v18  ;;  %v21594_v18 = vld [vmem:[#allocation8 + $0x22f0] ss:$24 sps:$4 sm:$0xff]  }
 0xaae   :  { %17392 = vmatprep.subr.bf16.mxu1 %v21524_v21  ;;  %v21599_v21 = vld [vmem:[#allocation8 + $0x22c4] ss:$24 sps:$4 sm:$0xff]  }
 0xaaf   :  { %17436 = vmatpush2.bf16.msra.mxu0 %v21519_v33  ;;  %v17148_v33 = vpop.f32.mrf.mxu1 }
 0xab0   :  { %17437 = vmatprep.subr.bf16.mxu0 %v21527_v25  ;;  %v21597_v25 = vld [vmem:[#allocation8 + $0x22c0] ss:$24 sps:$4 sm:$0xff]  }
 0xab1   :  { %17393 = vmatpush2.bf16.msra.mxu1 %v21522_v43  ;;  %v17150_v43 = vpop.f32.mrf.mxu1 }
 0xab2   :  { %17394 = vmatprep.subr.bf16.mxu1 %v21530_v56  ;;  %v21602_v56 = vld [vmem:[#allocation8 + $0x2294] ss:$24 sps:$4 sm:$0xff]  }
 0xab3   :  { %17438 = vmatpush2.bf16.msra.mxu0 %v21525_v38 }
 0xab4   :  { %17439 = vmatprep.subr.bf16.mxu0 %v21533_v62  ;;  %v21600_v62 = vld [vmem:[#allocation8 + $0x2290] ss:$24 sps:$4 sm:$0xff]  }
 0xab5   :  { %17395 = vmatpush2.bf16.msra.mxu1 %v21528_v8  ;;  %v17152_v8 = vpop.f32.mrf.mxu1 }
 0xab6   :  { %17396 = vmatprep.subr.bf16.mxu1 %v21536_v35 }
 0xab7   :  { %17440 = vmatpush2.bf16.msra.mxu0 %v21531_v1  ;;  %v17154_v35 = vpop.f32.mrf.mxu1 }
 0xab8   :  { %17441 = vmatprep.subr.bf16.mxu0 %v21539_v16 }
 0xab9   :  { %17397 = vmatpush2.bf16.msra.mxu1 %v21534_v17 }
 0xaba   :  { %17398 = vmatprep.subr.bf16.mxu1 %v21542_v40 }
 0xabb   :  { %17442 = vmatpush2.bf16.msra.mxu0 %v21537_v49 }
 0xabc   :  { %17443 = vmatprep.subr.bf16.mxu0 %v21545_v47 }
 0xabd   :  { %17399 = vmatpush2.bf16.msra.mxu1 %v21540_v63 }
 0xabe   :  { %17400 = vmatprep.subr.bf16.mxu1 %v21548_v22 }
 0xabf   :  { %17444 = vmatpush2.bf16.msra.mxu0 %v21543_v52 }
 0xac0   :  { %17445 = vmatprep.subr.bf16.mxu0 %v21551_v59 }
 0xac1   :  { %17401 = vmatpush2.bf16.msra.mxu1 %v21546_v58 }
 0xac2   :  { %17402 = vmatprep.subr.bf16.mxu1 %v21554_v28 }
 0xac3   :  { %17446 = vmatpush2.bf16.msra.mxu0 %v21549_v46 }
 0xac5   :  { %17403 = vmatpush2.bf16.msra.mxu1 %v21552_v42 }
 0xac6   :  { %17448 = vmatmul.mubr.bf16.vlgmr.msra.gmra.mxu0 %v22457_v34  ;;  %17458 = vmatprep.subr.bf16.mxu1 %v21557_v14  ;;  %v21567_v34 = vld [vmem:[#allocation8 + $0x21a0] ss:$24 sps:$4 sm:$0xff]   ;;  %v17191_v38 = vpop.f32.mrf.mxu0 }
 0xac7   :  { %v17192_v17 = vadd.f32 %v17191_v38, %v17148_v33 }
 0xac8   :  { %17405 = vmatmul.mubr.bf16.vlgmr.msra.gmra.mxu1 %v22448_v15  ;;  %v21570_v15 = vld [vmem:[#allocation8 + $0x2170] ss:$24 sps:$4 sm:$0xff]   ;;  %v17193_v1 = vpop.f32.mrf.mxu0 }
 0xac9   :  { %17459 = vmatpush1.bf16.msra.mxu1 %v21555_v27  ;;  %17490 = vmatprep.mubr.bf16.mxu1 %v22467_v23  ;;  %v21573_v23 = vld [vmem:[#allocation8 + $0x2140] ss:$24 sps:$4 sm:$0xff]   ;;  %v17194_v40 = vadd.f32 %v17193_v1, %v17150_v43 }
 0xaca   :  { %17460 = vmatprep.subr.bf16.mxu1 %v21560_v12  ;;  %v17195_v16 = vpop.f32.mrf.mxu0 }
 0xacb   :  { %v17196_v22 = vadd.f32 %v17195_v16, %v17152_v8 }
 0xacc   :  { %v17197_v63 = vpop.f32.mrf.mxu0 }
 0xacd   :  { %17461 = vmatpush1.bf16.msra.mxu1 %v21558_v31  ;;  %v17198_v28 = vadd.f32 %v17197_v63, %v17154_v35 }
 0xace   :  { %17462 = vmatprep.subr.bf16.mxu1 %v21563_v20 }
 0xad1   :  { %17463 = vmatpush1.bf16.msra.mxu1 %v21561_v2 }
 0xad2   :  { %17464 = vmatprep.subr.bf16.mxu1 %v21566_v55 }
 0xad5   :  { %17465 = vmatpush1.bf16.msra.mxu1 %v21564_v4 }
 0xad6   :  { %17466 = vmatprep.subr.bf16.mxu1 %v21569_v7 }
 0xad9   :  { %17467 = vmatpush1.bf16.msra.mxu1 %v21567_v34 }
 0xada   :  { %17468 = vmatprep.subr.bf16.mxu1 %v21572_v9 }
 0xadd   :  { %17469 = vmatpush1.bf16.msra.mxu1 %v21570_v15 }
 0xade   :  { %17470 = vmatprep.subr.bf16.mxu1 %v21575_v24 }
 0xae1   :  { %17471 = vmatpush1.bf16.msra.mxu1 %v21573_v23 }
 0xae2   :  { %17472 = vmatprep.subr.bf16.mxu1 %v21578_v39 }
 0xae5   :  { %17473 = vmatpush1.bf16.msra.mxu1 %v21576_v45 }
 0xae6   :  { %17474 = vmatprep.subr.bf16.mxu1 %v21581_v61 }
 0xae9   :  { %17475 = vmatpush2.bf16.msra.mxu1 %v21579_v44 }
 0xaea   :  { %17476 = vmatprep.subr.bf16.mxu1 %v21584_v36 }
 0xaed   :  { %17477 = vmatpush2.bf16.msra.mxu1 %v21582_v48 }
 0xaee   :  { %17478 = vmatprep.subr.bf16.mxu1 %v21587_v50 }
 0xaf1   :  { %17479 = vmatpush2.bf16.msra.mxu1 %v21585_v30 }
 0xaf2   :  { %17480 = vmatprep.subr.bf16.mxu1 %v21590_v0 }
 0xaf5   :  { %17481 = vmatpush2.bf16.msra.mxu1 %v21588_v32 }
 0xaf6   :  { %17482 = vmatprep.subr.bf16.mxu1 %v21593_v3 }
 0xaf9   :  { %17483 = vmatpush2.bf16.msra.mxu1 %v21591_v29 }
 0xafa   :  { %17484 = vmatprep.subr.bf16.mxu1 %v21596_v51 }
 0xafd   :  { %17485 = vmatpush2.bf16.msra.mxu1 %v21594_v18 }
 0xafe   :  { %17486 = vmatprep.subr.bf16.mxu1 %v21599_v21 }
 0xb01   :  { %17487 = vmatpush2.bf16.msra.mxu1 %v21597_v25 }
 0xb02   :  { %17488 = vmatprep.subr.bf16.mxu1 %v21602_v56 }
 0xb05   :  { %17489 = vmatpush2.bf16.msra.mxu1 %v21600_v62 }
 0xb06   :  { %v17277_v20 = vpop.f32.mrf.mxu0 }
 0xb08   :  { %17491 = vmatmul.mubr.bf16.vlgmr.msra.gmra.mxu1 %v22469_v57  ;;  %v17234_v49 = vpop.f32.mrf.mxu1  ;;  %v17279_v2 = vpop.f32.mrf.mxu0 }
 0xb09   :  { %v17235_v47 = vadd.f32 %v17234_v49, %v17192_v17 }
 0xb0a   :  { %v17236_v52 = vpop.f32.mrf.mxu1  ;;  %v17281_v55 = vpop.f32.mrf.mxu0 }
 0xb0b   :  { %v17501_v59 = vadd.f32 %v17235_v47, %v22342_v60  ;;  %v17237_v58 = vadd.f32 %v17236_v52, %v17194_v40 }
 0xb0c   :  { %v17238_v46 = vpop.f32.mrf.mxu1  ;;  %v17283_v60 = vpop.f32.mrf.mxu0 }
 0xb0d   :  { %17513 = vst [vmem:[#allocation11] sm:$0xff] %v17501_v59  ;;  %v17502_v42 = vadd.f32 %v17237_v58, %v22346_v10  ;;  %v17239_v14 = vadd.f32 %v17238_v46, %v17196_v22 }
 0xb0e   :  { %v17240_v27 = vpop.f32.mrf.mxu1 }
 0xb0f   :  { %17514 = vst [vmem:[#allocation11 + $0x8] sm:$0xff] %v17502_v42  ;;  %v17507_v12 = vadd.f32 %v17239_v14, %v22350_v53  ;;  %v17241_v57 = vadd.f32 %v17240_v27, %v17198_v28 }
 0xb11   :  { %17519 = vst [vmem:[#allocation11 + $0x30] sm:$0xff] %v17507_v12  ;;  %v17508_v31 = vadd.f32 %v17241_v57, %v22353_v13 }
 0xb13   :  { %17520 = vst [vmem:[#allocation11 + $0x38] sm:$0xff] %v17508_v31 }
 0xb46   :  { %v17363_v4 = vpop.f32.mrf.mxu0 }
 0xb48   :  { %v17320_v7 = vpop.f32.mrf.mxu1  ;;  %v17365_v34 = vpop.f32.mrf.mxu0 }
 0xb49   :  { %v17321_v9 = vadd.f32 %v17320_v7, %v17277_v20 }
 0xb4a   :  { %v17322_v15 = vpop.f32.mrf.mxu1  ;;  %v17367_v23 = vpop.f32.mrf.mxu0 }
 0xb4b   :  { %v17364_v10 = vadd.f32 %v17363_v4, %v17321_v9  ;;  %v17323_v24 = vadd.f32 %v17322_v15, %v17279_v2 }
 0xb4c   :  { %v17324_v39 = vpop.f32.mrf.mxu1  ;;  %v17369_v50 = vpop.f32.mrf.mxu0 }
 0xb4d   :  { %v17503_v53 = vadd.f32 %v17364_v10, %v22375_v6  ;;  %v17366_v45 = vadd.f32 %v17365_v34, %v17323_v24  ;;  %v17325_v61 = vadd.f32 %v17324_v39, %v17281_v55 }
 0xb4e   :  { %v17326_v44 = vpop.f32.mrf.mxu1 }
 0xb4f   :  { %17515 = vst [vmem:[#allocation11 + $0x10] sm:$0xff] %v17503_v53  ;;  %v17504_v13 = vadd.f32 %v17366_v45, %v22380_v19  ;;  %v17368_v36 = vadd.f32 %v17367_v23, %v17325_v61  ;;  %v17327_v48 = vadd.f32 %v17326_v44, %v17283_v60 }
 0xb51   :  { %17516 = vst [vmem:[#allocation11 + $0x18] sm:$0xff] %v17504_v13  ;;  %v17509_v30 = vadd.f32 %v17368_v36, %v22384_v54  ;;  %v17370_v0 = vadd.f32 %v17369_v50, %v17327_v48 }
 0xb53   :  { %17521 = vst [vmem:[#allocation11 + $0x40] sm:$0xff] %v17509_v30  ;;  %v17510_v32 = vadd.f32 %v17370_v0, %v22386_v41 }
 0xb55   :  { %17522 = vst [vmem:[#allocation11 + $0x48] sm:$0xff] %v17510_v32 }
 0xb86   :  { %v17449_v6 = vpop.f32.mrf.mxu0 }
 0xb88   :  { %v17406_v3 = vpop.f32.mrf.mxu1  ;;  %v17451_v18 = vpop.f32.mrf.mxu0 }
 0xb89   :  { %v17450_v21 = vadd.f32 %v17449_v6, %v17406_v3 }
 0xb8a   :  { %v17408_v29 = vpop.f32.mrf.mxu1  ;;  %v17453_v25 = vpop.f32.mrf.mxu0 }
 0xb8b   :  { %v17452_v43 = vadd.f32 %v17451_v18, %v17408_v29 }
 0xb8c   :  { %v17410_v51 = vpop.f32.mrf.mxu1  ;;  %v17455_v1 = vpop.f32.mrf.mxu0 }
 0xb8d   :  { %v17454_v62 = vadd.f32 %v17453_v25, %v17410_v51 }
 0xb8e   :  { %v17412_v33 = vpop.f32.mrf.mxu1 }
 0xb8f   :  { %v17456_v41 = vadd.f32 %v17455_v1, %v17412_v33 }
 0xbc8   :  { %v17492_v19 = vpop.f32.mrf.mxu1 }
 0xbc9   :  { %v17493_v38 = vadd.f32 %v17492_v19, %v17450_v21 }
 0xbca   :  { %v17494_v56 = vpop.f32.mrf.mxu1 }
 0xbcb   :  { %v17505_v54 = vadd.f32 %v17493_v38, %v22402_v11  ;;  %v17495_v8 = vadd.f32 %v17494_v56, %v17452_v43 }
 0xbcc   :  { %v17496_v35 = vpop.f32.mrf.mxu1 }
 0xbcd   :  { %17517 = vst [vmem:[#allocation11 + $0x20] sm:$0xff] %v17505_v54  ;;  %v17506_v16 = vadd.f32 %v17495_v8, %v22406_v5  ;;  %v17497_v17 = vadd.f32 %v17496_v35, %v17454_v62 }
 0xbce   :  { %v17498_v49 = vpop.f32.mrf.mxu1 }
 0xbcf   :  { %17518 = vst [vmem:[#allocation11 + $0x28] sm:$0xff] %v17506_v16  ;;  %v17511_v40 = vadd.f32 %v17497_v17, %v22410_v26  ;;  %v17499_v47 = vadd.f32 %v17498_v49, %v17456_v41 }
 0xbd1   :  { %17523 = vst [vmem:[#allocation11 + $0x50] sm:$0xff] %v17511_v40  ;;  %v17512_v63 = vadd.f32 %v17499_v47, %v22414_v37 }
 0xbd3   :  { %17524 = vst [vmem:[#allocation11 + $0x58] sm:$0xff] %v17512_v63 }
 0xbd4   :  { %21854 = shalt.err (!%p21851_p1)
}
 0xbd5   :  { %s21881_s20 = smov 768   ;;  %s21882_s21 = smov 48  }
 0xbd6   :  { %17536 = dma.vmem_to_hbm [thread:$0]  %s17531_s4, 1536, %s22503_s5, [#allocation4], %s21881_s20, %s21881_s20, %s21882_s21  }
 0xbd7   :  { %21869 = dma.done.wait [#allocation4], 1536  }
 0xbd8   :  { %21870 = vsyncadd [#allocation4], 4294965760 }
 0xbd9   :  { %17540 = vsyncpa [#allocation3], 1 }
 0xbda   :  { %17541 = vsyncpa [#allocation6], 1 }
 0xbdb   :  { %17542 = vsyncpa [#allocation9], 1 }
 0xbdc   :  { %17543 = vsyncpa [#allocation4], 1 }

</bundles_post_ra>
